<compile_context>
chip_gen: v6e
topology: v6e:2x2x1
jax: 0.10.0
libtpu: 0.0.40
codegen_flags: <defaults>
</compile_context>

<pallas_src>
import functools
import math

import jax
import jax.numpy as jnp
import numpy as np
from jax import lax
from jax.experimental import pallas as pl
from jax.experimental.pallas import tpu as pltpu


# --------------------------- static (numpy) tables ---------------------------

def _conv_gather_mats(hin, win, oh, ow, k, stride, pad):
    """(k*k, hin*win, oh*ow) 0/1 matrices: act @ G[ij] == shifted/strided window
    (zero where the window falls into the padding)."""
    g = np.zeros((k * k, hin * win, oh * ow), np.float32)
    for i in range(k):
        for j in range(k):
            for a in range(oh):
                for b in range(ow):
                    hi = stride * a + i - pad
                    wi = stride * b + j - pad
                    if 0 <= hi < hin and 0 <= wi < win:
                        g[i * k + j, hi * win + wi, a * ow + b] = 1.0
    return g


def _maxpool_gather_mats(h, w):
    """(4, h*w, (h//2)*(w//2)) 0/1 matrices; max over the 4 gathered corners == 2x2 maxpool."""
    oh, ow = h // 2, w // 2
    g = np.zeros((4, h * w, oh * ow), np.float32)
    for dh in range(2):
        for dw in range(2):
            for a in range(oh):
                for b in range(ow):
                    g[dh * 2 + dw, (2 * a + dh) * w + (2 * b + dw), a * ow + b] = 1.0
    return g


def build_constants(H, W, ksize):
    """Parameter-independent 0/1 tables used by the fused kernel (bf16: exact)."""
    pad = ksize // 2

    def osz(n, p):
        return (n + 2 * p - ksize) // 2 + 1

    H1, W1 = osz(H, pad), osz(W, pad)          # gabor1 output (16,16)
    H2, W2 = osz(H1, pad), osz(W1, pad)        # gabor2 output (8,8)
    Q1h, Q1w = osz(H1, 0), osz(W1, 0)          # conv1_1 output (6,6)
    Q2h, Q2w = osz(H2, 0), osz(W2, 0)          # conv2_1 output (2,2)

    def red_bcast(h, w):
        # low-rank 0/1 factors of kron(ones(h,h), eye(w)) (softmax over H) and
        # kron(eye(h), ones(w,w)) (softmax over W); columns are h-major, w-minor.
        rh = np.kron(np.ones((h, 1), np.float32), np.eye(w, dtype=np.float32))   # (h*w, w)
        bh = np.kron(np.ones((1, h), np.float32), np.eye(w, dtype=np.float32))   # (w, h*w)
        rw = np.kron(np.eye(h, dtype=np.float32), np.ones((w, 1), np.float32))   # (h*w, h)
        bw = np.kron(np.eye(h, dtype=np.float32), np.ones((1, w), np.float32))   # (h, h*w)
        return rh, bh, rw, bw

    rh1, bh1, rw1, bw1 = red_bcast(H1, W1)
    rh2, bh2, rw2, bw2 = red_bcast(H2, W2)

    c = {
        "g2": _conv_gather_mats(H1, W1, H2, W2, ksize, 2, pad),
        "gc1": _conv_gather_mats(H1, W1, Q1h, Q1w, ksize, 2, 0),
        "gc2": _conv_gather_mats(H2, W2, Q2h, Q2w, ksize, 2, 0),
        "rh1": rh1, "bh1": bh1, "rw1": rw1, "bw1": bw1,
        "rh2": rh2, "bh2": bh2, "rw2": rw2, "bw2": bw2,
        "gp1": _maxpool_gather_mats(Q1h, Q1w),
        "gp2": _maxpool_gather_mats(Q2h, Q2w),
    }
    return {k: jnp.asarray(v, jnp.bfloat16) for k, v in c.items()}


# ------------------------------ Gabor bank (JAX) ------------------------------

def gabor_bank(ksize, channel_in, channel_out, sigma, gamma, f, psi):
    """Reproduces GaborConv2d.genGaborBank."""
    half = ksize // 2
    coords = jnp.arange(-half, half + 1, dtype=jnp.float32)
    xg = coords[:, None]          # varies along kernel rows (dim 2)
    yg = coords[None, :]          # varies along kernel cols (dim 3)
    theta = jnp.arange(channel_out, dtype=jnp.float32) * math.pi / channel_out
    th = theta[:, None, None, None]
    x_theta = xg * jnp.cos(th) + yg * jnp.sin(th)
    y_theta = -xg * jnp.sin(th) + yg * jnp.cos(th)
    gb = -jnp.exp(-0.5 * ((gamma * x_theta) ** 2 + y_theta ** 2) / (8.0 * sigma ** 2)) \
         * jnp.cos(2.0 * math.pi * f * x_theta + psi)
    gb = gb - jnp.mean(gb, axis=(2, 3), keepdims=True)
    return jnp.broadcast_to(gb, (channel_out, channel_in, ksize, ksize))


# ------------------------------- fused kernel --------------------------------

def _ccnet_kernel(xp1_ref, w1_ref,
                  g2_ref, w2_ref,
                  gc1_ref, wc1_ref, bc1_ref,
                  gc2_ref, wc2_ref, bc2_ref,
                  csum_ref,
                  rh1_ref, bh1_ref, rw1_ref, bw1_ref,
                  rh2_ref, bh2_ref, rw2_ref, bw2_ref,
                  se1a_ref, se1b_ref, se2a_ref, se2b_ref,
                  gp1_ref, gp2_ref,
                  o_ref,
                  *, w_chan, w_spa, n_acc):
    """One grid step == one sublane-batched tile of images, activations (bt*C, H*W)."""
    f32 = jnp.float32
    bf16 = jnp.bfloat16

    def mm(a, b):
        # all MXU operands bf16, f32 accumulation
        return jnp.dot(a.astype(bf16), b.astype(bf16), preferred_element_type=f32)

    # ---- Gabor conv 1: ONE lane-dense MXU matmul over pre-gathered windows ----
    g1 = mm(w1_ref[...], xp1_ref[...])                      # (bt*C, M1) f32

    # ---- strided conv: hoisted channel mix + per-tap 0/1 MXU gathers ----------
    def conv_gather(act, g_ref, w_ref, bias_ref=None):
        n_taps = g_ref.shape[0]
        rows = w_ref.shape[0] // n_taps                     # bt*Cout
        q = mm(w_ref[...], act).astype(bf16)                # (kk*rows, M_in), one matmul
        accs = [None] * n_acc                               # break MXU-pop -> add -> push chain
        for t in range(n_taps):
            part = mm(q[t * rows:(t + 1) * rows, :], g_ref[t])
            a = t % n_acc
            accs[a] = part if accs[a] is None else accs[a] + part
        acc = accs[0]
        for a in range(1, n_acc):
            if accs[a] is not None:
                acc = acc + accs[a]
        if bias_ref is not None:
            acc = acc + bias_ref[...]
        return acc                                          # (bt*Cout, M_out) f32

    # ---- 3 softmaxes (one shared exp pass) + SE; elementwise stays f32 -------
    def competitive_se(act, rh_ref, bh_ref, rw_ref, bw_ref, sea_ref, seb_ref):
        inv_hw = 1.0 / act.shape[1]
        gmax = jnp.max(act)                                 # single shift, exact for all 3
        e = jnp.exp(act - gmax)                             # one EUP pass, f32
        eb = e.astype(bf16)
        den_c = mm(csum_ref[...], eb)                       # per-image channel sums (block-diag 1s)
        den_h = mm(mm(eb, rh_ref[...]), bh_ref[...])        # low-rank 0/1 factors (softmax dim 2)
        den_w = mm(mm(eb, rw_ref[...]), bw_ref[...])        # low-rank 0/1 factors (softmax dim 3)
        mixed = e * (w_chan * pl.reciprocal(den_c, approx=True)
                     + w_spa * (pl.reciprocal(den_h, approx=True)
                                + pl.reciprocal(den_w, approx=True)))
        # SE (reduction=1): global avg pool -> FC -> ReLU -> FC -> sigmoid -> scale
        y = jnp.sum(mixed, axis=1, keepdims=True) * inv_hw  # (bt*C, 1)
        h = jnp.maximum(mm(sea_ref[...], y), 0.0)
        z = mm(seb_ref[...], h)
        s = pl.reciprocal(1.0 + jnp.exp(-z), approx=True)   # sigmoid
        return mixed * s

    def maxpool(act, gp_ref):                               # 2x2 maxpool via 4 MXU gathers + max
        p = mm(act, gp_ref[0])
        for d in range(1, gp_ref.shape[0]):
            p = jnp.maximum(p, mm(act, gp_ref[d]))
        return p

    # ---------------- branch 1 ----------------
    y1 = competitive_se(g1, rh1_ref, bh1_ref, rw1_ref, bw1_ref, se1a_ref, se1b_ref)
    c1 = conv_gather(y1, gc1_ref, wc1_ref, bc1_ref)         # (bt*Co, 36)
    p1 = maxpool(c1, gp1_ref)                               # (bt*Co, 9)

    # ---------------- branch 2 (fed by the raw Gabor-1 output) ----------------
    g2 = conv_gather(g1, g2_ref, w2_ref)                    # (bt*C, 64)
    y2 = competitive_se(g2, rh2_ref, bh2_ref, rw2_ref, bw2_ref, se2a_ref, se2b_ref)
    c2 = conv_gather(y2, gc2_ref, wc2_ref, bc2_ref)         # (bt*Co, 4)
    p2 = maxpool(c2, gp2_ref)                               # (bt*Co, 1)

    # single merged lane-major output block, written once
    np1 = p1.shape[1]
    o_ref[:, :np1] = p1
    o_ref[:, np1:] = p2


# ------------------------------- JAX wrapper ----------------------------------

def _blockdiag(w, bt):
    """kron(I_bt, w): (m, n) -> (bt*m, bt*n)."""
    m, n = w.shape
    eye = jnp.eye(bt, dtype=w.dtype)
    return jnp.einsum("ab,ij->aibj", eye, w).reshape(bt * m, bt * n)


def _hoisted_taps(w, bt):
    """(Cout, Cin, k, k) -> (k*k*bt*Cout, bt*Cin): vstack over taps of kron(I_bt, W_tap)."""
    cout, cin, k, _ = w.shape
    taps = jnp.transpose(w, (2, 3, 0, 1)).reshape(k * k, cout, cin)   # tap = i*k + j
    eye = jnp.eye(bt, dtype=w.dtype)
    big = jnp.einsum("ab,tij->taibj", eye, taps)
    return big.reshape(k * k * bt * cout, bt * cin)


def _first_conv_patches(x, ksize, pad, stride=2):
    """Pre-gather the strided windows of the external input: (B, k*k*Cin, OH*OW)."""
    B, Cin, H, W = x.shape
    OH = (H + 2 * pad - ksize) // stride + 1
    OW = (W + 2 * pad - ksize) // stride + 1
    xp = jnp.pad(x, ((0, 0), (0, 0), (pad, pad), (pad, pad)))
    slabs = []
    for i in range(ksize):
        for j in range(ksize):
            s = xp[:, :, i:i + stride * OH:stride, j:j + stride * OW:stride]
            slabs.append(s.reshape(B, Cin, OH * OW))
    patches = jnp.stack(slabs, axis=1).reshape(B, ksize * ksize * Cin, OH * OW)
    return patches, OH, OW


def _pick_batch_tile(B, requested=None):
    """Images stacked along sublanes per grid step; keep >= 2 grid steps when
    possible so both v7x TensorCores stay fed (grid is a serial loop on v5e/v6e)."""
    if requested is not None:
        if B % requested:
            raise ValueError("batch_tile must divide batch")
        return requested
    bt = min(8, B)
    while bt > 1 and (B % bt != 0 or B // bt < 2):
        bt -= 1
    return bt


def competitive_block_forward(x, params, consts, *, ksize, weight, n_competitor,
                              batch_tile=None):
    B, Cin, H, W = x.shape
    C = n_competitor
    Co = params["conv1_w"].shape[0]
    pad = ksize // 2
    kk = ksize * ksize
    w_chan = float(weight)
    w_spa = float((1.0 - weight) / 2.0)
    bf16 = jnp.bfloat16

    bt = _pick_batch_tile(B, batch_tile)
    nb = B // bt

    # Gabor banks (deterministic functions of the scalar parameters)
    k1 = gabor_bank(ksize, Cin, C, params["sigma"], params["gamma"], params["f"], params["psi"])
    k2 = gabor_bank(ksize, C, C, params["sigma"], params["gamma"], params["f"], params["psi"])

    xp1, OH1, OW1 = _first_conv_patches(x, ksize, pad)
    M1 = OH1 * OW1
    xp1 = xp1.reshape(nb, bt * kk * Cin, M1).astype(bf16)

    # weights: flattened first-conv taps + hoisted (vstack) per-tap channel mixes,
    # block-diagonal over the sublane-batched images.
    w1flat = jnp.transpose(k1, (0, 2, 3, 1)).reshape(C, kk * Cin)
    w1big = _blockdiag(w1flat, bt).astype(bf16)                      # (bt*C, bt*kk*Cin)
    w2big = _hoisted_taps(k2, bt).astype(bf16)                       # (kk*bt*C, bt*C)
    wc1big = _hoisted_taps(params["conv1_w"], bt).astype(bf16)       # (kk*bt*Co, bt*C)
    wc2big = _hoisted_taps(params["conv2_w"], bt).astype(bf16)
    bc1 = jnp.tile(params["conv1_b"].reshape(Co, 1), (bt, 1)).astype(jnp.float32)
    bc2 = jnp.tile(params["conv2_b"].reshape(Co, 1), (bt, 1)).astype(jnp.float32)
    csum = _blockdiag(jnp.ones((C, C), jnp.float32), bt).astype(bf16)
    se1a = _blockdiag(params["se1_w1"], bt).astype(bf16)
    se1b = _blockdiag(params["se1_w2"], bt).astype(bf16)
    se2a = _blockdiag(params["se2_w1"], bt).astype(bf16)
    se2b = _blockdiag(params["se2_w2"], bt).astype(bf16)

    P1 = consts["gp1"].shape[-1]       # 9 (3x3 after maxpool, branch 1)
    P2 = consts["gp2"].shape[-1]       # 1 (1x1 after maxpool, branch 2)

    def _rep(a):                        # replicated (batch-independent) operand
        return pl.BlockSpec(a.shape, lambda b, _n=a.ndim: (0,) * _n)

    operands_and_specs = [
        (xp1, pl.BlockSpec((None, bt * kk * Cin, M1), lambda b: (b, 0, 0))),
        (w1big, _rep(w1big)),
        (consts["g2"], _rep(consts["g2"])),
        (w2big, _rep(w2big)),
        (consts["gc1"], _rep(consts["gc1"])),
        (wc1big, _rep(wc1big)),
        (bc1, _rep(bc1)),
        (consts["gc2"], _rep(consts["gc2"])),
        (wc2big, _rep(wc2big)),
        (bc2, _rep(bc2)),
        (csum, _rep(csum)),
        (consts["rh1"], _rep(consts["rh1"])),
        (consts["bh1"], _rep(consts["bh1"])),
        (consts["rw1"], _rep(consts["rw1"])),
        (consts["bw1"], _rep(consts["bw1"])),
        (consts["rh2"], _rep(consts["rh2"])),
        (consts["bh2"], _rep(consts["bh2"])),
        (consts["rw2"], _rep(consts["rw2"])),
        (consts["bw2"], _rep(consts["bw2"])),
        (se1a, _rep(se1a)),
        (se1b, _rep(se1b)),
        (se2a, _rep(se2a)),
        (se2b, _rep(se2b)),
        (consts["gp1"], _rep(consts["gp1"])),
        (consts["gp2"], _rep(consts["gp2"])),
    ]
    operands = [o for o, _ in operands_and_specs]
    in_specs = [sp for _, sp in operands_and_specs]

    kern = functools.partial(_ccnet_kernel, w_chan=w_chan, w_spa=w_spa, n_acc=4)

    # bf16 constants ~3-4 MB (bt=1) .. ~6 MB (bt=8) after lane padding, double
    # buffered, plus in-kernel temporaries; keep the scoped request modest
    # (v7x has only 64 MiB of VMEM per TensorCore).
    vmem_mb = 24 if bt <= 2 else 40

    o = pl.pallas_call(
        kern,
        grid=(nb,),
        out_shape=jax.ShapeDtypeStruct((nb, bt * Co, P1 + P2), jnp.float32),
        in_specs=in_specs,
        out_specs=pl.BlockSpec((None, bt * Co, P1 + P2), lambda b: (b, 0, 0)),
        compiler_params=pltpu.CompilerParams(
            dimension_semantics=("parallel",),
            vmem_limit_bytes=vmem_mb * 1024 * 1024),
    )(*operands)

    # TODO(synk): final flatten/concat is trivial layout plumbing kept in JAX.
    o = o.reshape(B, Co, P1 + P2)
    return jnp.concatenate([o[:, :, :P1].reshape(B, Co * P1),
                            o[:, :, P1:].reshape(B, Co * P2)], axis=1)


# ------------------------------ parameters ------------------------------------

def make_params(key, channel_in, n_competitor, ksize, o1, init_ratio=1.0):
    ks = jax.random.split(key, 6)
    C = n_competitor
    return {
        "sigma": 9.2 * init_ratio,
        "gamma": 2.0,
        "f": 0.057 / init_ratio,
        "psi": 0.0,
        "se1_w1": jax.random.normal(ks[0], (C, C), jnp.float32) * 0.1,
        "se1_w2": jax.random.normal(ks[1], (C, C), jnp.float32) * 0.1,
        "se2_w1": jax.random.normal(ks[2], (C, C), jnp.float32) * 0.1,
        "se2_w2": jax.random.normal(ks[3], (C, C), jnp.float32) * 0.1,
        "conv1_w": jax.random.normal(ks[4], (o1 // 2, C, ksize, ksize), jnp.float32) * 0.05,
        "conv1_b": jnp.zeros((o1 // 2,), jnp.float32),
        "conv2_w": jax.random.normal(ks[5], (o1 // 2, C, ksize, ksize), jnp.float32) * 0.05,
        "conv2_b": jnp.zeros((o1 // 2,), jnp.float32),
    }


# --------------------------- pure-JAX reference --------------------------------

def _reference_forward(x, params, *, ksize, weight, n_competitor):
    w_chan = weight
    w_spa = (1.0 - weight) / 2.0
    B, Cin, H, W = x.shape
    C = n_competitor
    pad = ksize // 2
    k1 = gabor_bank(ksize, Cin, C, params["sigma"], params["gamma"], params["f"], params["psi"])
    k2 = gabor_bank(ksize, C, C, params["sigma"], params["gamma"], params["f"], params["psi"])

    def conv(v, w, stride, p, bias=None):
        out = lax.conv_general_dilated(v, w, (stride, stride), [(p, p), (p, p)],
                                       dimension_numbers=("NCHW", "OIHW", "NCHW"),
                                       precision=lax.Precision.HIGHEST)
        if bias is not None:
            out = out + bias[None, :, None, None]
        return out

    def comp_se(v, w1, w2):
        m = (w_chan * jax.nn.softmax(v, axis=1)
             + w_spa * (jax.nn.softmax(v, axis=2) + jax.nn.softmax(v, axis=3)))
        y = jnp.mean(m, axis=(2, 3))
        h = jnp.maximum(y @ w1.T, 0.0)
        s = jax.nn.sigmoid(h @ w2.T)
        return m * s[:, :, None, None]

    def maxpool(v):
        b, c, hh, ww = v.shape
        return jnp.max(v.reshape(b, c, hh // 2, 2, ww // 2, 2), axis=(3, 5))

    g1 = conv(x, k1, 2, pad)
    x1 = maxpool(conv(comp_se(g1, params["se1_w1"], params["se1_w2"]),
                      params["conv1_w"], 2, 0, params["conv1_b"]))
    g2 = conv(g1, k2, 2, pad)
    x2 = maxpool(conv(comp_se(g2, params["se2_w1"], params["se2_w2"]),
                      params["conv2_w"], 2, 0, params["conv2_b"]))
    return jnp.concatenate([x1.reshape(B, -1), x2.reshape(B, -1)], axis=1)


# ----------------------------------- main --------------------------------------

if __name__ == "__main__":
    channel_in = 1
    n_competitor = 16
    ksize = 5
    weight = 0.8          # weight_chan = 0.8, weight_spa = 0.1
    o1 = 32
    B, H, W = 2, 32, 32

    key = jax.random.PRNGKey(0)
    kx, kp = jax.random.split(key)
    x = jax.random.normal(kx, (B, channel_in, H, W), jnp.float32)
    params = make_params(kp, channel_in, n_competitor, ksize, o1)
    consts = build_constants(H, W, ksize)

    fwd = jax.jit(functools.partial(
        competitive_block_forward, ksize=ksize, weight=weight,
        n_competitor=n_competitor))

    out = fwd(x, params, consts)
    jax.block_until_ready(out)
    assert out.shape == (B, (o1 // 2) * 3 * 3 + (o1 // 2)), out.shape

    # sanity check against a plain-JAX (f32, HIGHEST-precision) reference of the
    # PyTorch module.  bf16 MXU operands + approx reciprocals put the fused
    # kernel ~1e-2 relative from that reference, so gate with margin.
    ref = _reference_forward(x, params, ksize=ksize, weight=weight,
                             n_competitor=n_competitor)
    err = float(jnp.max(jnp.abs(out - ref)) / (jnp.max(jnp.abs(ref)) + 1e-6))
    assert err < 4e-2, f"mismatch vs reference: {err}"

    print("KERNEL_OK")
</pallas_src>

<mosaic_0001>
module attributes {stable_mosaic.version = 11 : i64} {
  func.func @_ccnet_kernel(%arg0: i32, %arg1: memref<1x25x256xbf16, #tpu.memory_space<vmem>>, %arg2: memref<16x25xbf16, #tpu.memory_space<vmem>>, %arg3: memref<25x256x64xbf16, #tpu.memory_space<vmem>>, %arg4: memref<400x16xbf16, #tpu.memory_space<vmem>>, %arg5: memref<25x256x36xbf16, #tpu.memory_space<vmem>>, %arg6: memref<400x16xbf16, #tpu.memory_space<vmem>>, %arg7: memref<16x1xf32, #tpu.memory_space<vmem>>, %arg8: memref<25x64x4xbf16, #tpu.memory_space<vmem>>, %arg9: memref<400x16xbf16, #tpu.memory_space<vmem>>, %arg10: memref<16x1xf32, #tpu.memory_space<vmem>>, %arg11: memref<16x16xbf16, #tpu.memory_space<vmem>>, %arg12: memref<256x16xbf16, #tpu.memory_space<vmem>>, %arg13: memref<16x256xbf16, #tpu.memory_space<vmem>>, %arg14: memref<256x16xbf16, #tpu.memory_space<vmem>>, %arg15: memref<16x256xbf16, #tpu.memory_space<vmem>>, %arg16: memref<64x8xbf16, #tpu.memory_space<vmem>>, %arg17: memref<8x64xbf16, #tpu.memory_space<vmem>>, %arg18: memref<64x8xbf16, #tpu.memory_space<vmem>>, %arg19: memref<8x64xbf16, #tpu.memory_space<vmem>>, %arg20: memref<16x16xbf16, #tpu.memory_space<vmem>>, %arg21: memref<16x16xbf16, #tpu.memory_space<vmem>>, %arg22: memref<16x16xbf16, #tpu.memory_space<vmem>>, %arg23: memref<16x16xbf16, #tpu.memory_space<vmem>>, %arg24: memref<4x36x9xbf16, #tpu.memory_space<vmem>>, %arg25: memref<4x4x1xbf16, #tpu.memory_space<vmem>>, %arg26: memref<1x16x10xf32, #tpu.memory_space<vmem>>) attributes {dimension_semantics = [#tpu.dimension_semantics<parallel>], iteration_bounds = array<i64: 2>, scalar_prefetch = 0 : i64, scratch_operands = 0 : i64, tpu.core_type = #tpu.core_type<tc>, window_params = [{transform_indices = @transform_0, window_bounds = array<i64: 1, 25, 256>}, {pipeline_mode = #tpu.pipeline_mode<synchronous>, transform_indices = @transform_1, window_bounds = array<i64: 16, 25>}, {pipeline_mode = #tpu.pipeline_mode<synchronous>, transform_indices = @transform_2, window_bounds = array<i64: 25, 256, 64>}, {pipeline_mode = #tpu.pipeline_mode<synchronous>, transform_indices = @transform_3, window_bounds = array<i64: 400, 16>}, {pipeline_mode = #tpu.pipeline_mode<synchronous>, transform_indices = @transform_4, window_bounds = array<i64: 25, 256, 36>}, {pipeline_mode = #tpu.pipeline_mode<synchronous>, transform_indices = @transform_5, window_bounds = array<i64: 400, 16>}, {pipeline_mode = #tpu.pipeline_mode<synchronous>, transform_indices = @transform_6, window_bounds = array<i64: 16, 1>}, {pipeline_mode = #tpu.pipeline_mode<synchronous>, transform_indices = @transform_7, window_bounds = array<i64: 25, 64, 4>}, {pipeline_mode = #tpu.pipeline_mode<synchronous>, transform_indices = @transform_8, window_bounds = array<i64: 400, 16>}, {pipeline_mode = #tpu.pipeline_mode<synchronous>, transform_indices = @transform_9, window_bounds = array<i64: 16, 1>}, {pipeline_mode = #tpu.pipeline_mode<synchronous>, transform_indices = @transform_10, window_bounds = array<i64: 16, 16>}, {pipeline_mode = #tpu.pipeline_mode<synchronous>, transform_indices = @transform_11, window_bounds = array<i64: 256, 16>}, {pipeline_mode = #tpu.pipeline_mode<synchronous>, transform_indices = @transform_12, window_bounds = array<i64: 16, 256>}, {pipeline_mode = #tpu.pipeline_mode<synchronous>, transform_indices = @transform_13, window_bounds = array<i64: 256, 16>}, {pipeline_mode = #tpu.pipeline_mode<synchronous>, transform_indices = @transform_14, window_bounds = array<i64: 16, 256>}, {pipeline_mode = #tpu.pipeline_mode<synchronous>, transform_indices = @transform_15, window_bounds = array<i64: 64, 8>}, {pipeline_mode = #tpu.pipeline_mode<synchronous>, transform_indices = @transform_16, window_bounds = array<i64: 8, 64>}, {pipeline_mode = #tpu.pipeline_mode<synchronous>, transform_indices = @transform_17, window_bounds = array<i64: 64, 8>}, {pipeline_mode = #tpu.pipeline_mode<synchronous>, transform_indices = @transform_18, window_bounds = array<i64: 8, 64>}, {pipeline_mode = #tpu.pipeline_mode<synchronous>, transform_indices = @transform_19, window_bounds = array<i64: 16, 16>}, {pipeline_mode = #tpu.pipeline_mode<synchronous>, transform_indices = @transform_20, window_bounds = array<i64: 16, 16>}, {pipeline_mode = #tpu.pipeline_mode<synchronous>, transform_indices = @transform_21, window_bounds = array<i64: 16, 16>}, {pipeline_mode = #tpu.pipeline_mode<synchronous>, transform_indices = @transform_22, window_bounds = array<i64: 16, 16>}, {pipeline_mode = #tpu.pipeline_mode<synchronous>, transform_indices = @transform_23, window_bounds = array<i64: 4, 36, 9>}, {pipeline_mode = #tpu.pipeline_mode<synchronous>, transform_indices = @transform_24, window_bounds = array<i64: 4, 4, 1>}, {transform_indices = @transform_25, window_bounds = array<i64: 1, 16, 10>}]} {
    %c0 = arith.constant 0 : index
    %c0_0 = arith.constant 0 : index
    %0 = vector.load %arg2[%c0, %c0_0] : memref<16x25xbf16, #tpu.memory_space<vmem>>, vector<16x25xbf16>
    %c0_1 = arith.constant 0 : index
    %c0_2 = arith.constant 0 : index
    %c0_3 = arith.constant 0 : index
    %1 = vector.load %arg1[%c0_1, %c0_2, %c0_3] : memref<1x25x256xbf16, #tpu.memory_space<vmem>>, vector<1x25x256xbf16>
    %2 = vector.shape_cast %1 : vector<1x25x256xbf16> to vector<25x256xbf16>
    %cst = arith.constant dense<0.000000e+00> : vector<16x256xf32>
    %3 = tpu.matmul %0, %2, %cst {dimension_numbers = #tpu.dot_dimension_numbers<[1], [0], [0], [1], [0, 0, 1, 1], [], []>} : vector<16x25xbf16>, vector<25x256xbf16>, vector<16x256xf32> -> vector<16x256xf32>
    %4 = vector.shape_cast %3 : vector<16x256xf32> to vector<1x16x256xf32>
    %cst_4 = arith.constant dense<0xFF800000> : vector<1xf32>
    %5 = vector.multi_reduction <maximumf>, %4, %cst_4 [1, 2] : vector<1x16x256xf32> to vector<1xf32>
    %6 = vector.shape_cast %5 : vector<1xf32> to vector<1x1x1xf32>
    %7 = vector.extract %6[0, 0, 0] : f32 from vector<1x1x1xf32>
    %8 = vector.broadcast %7 : f32 to vector<16x256xf32>
    %9 = arith.subf %3, %8 : vector<16x256xf32>
    %10 = math.exp %9 : vector<16x256xf32>
    %11 = arith.truncf %10 : vector<16x256xf32> to vector<16x256xbf16>
    %c0_5 = arith.constant 0 : index
    %c0_6 = arith.constant 0 : index
    %12 = vector.load %arg11[%c0_5, %c0_6] : memref<16x16xbf16, #tpu.memory_space<vmem>>, vector<16x16xbf16>
    %cst_7 = arith.constant dense<0.000000e+00> : vector<16x256xf32>
    %13 = tpu.matmul %12, %11, %cst_7 {dimension_numbers = #tpu.dot_dimension_numbers<[1], [0], [0], [1], [0, 0, 1, 1], [], []>} : vector<16x16xbf16>, vector<16x256xbf16>, vector<16x256xf32> -> vector<16x256xf32>
    %c0_8 = arith.constant 0 : index
    %c0_9 = arith.constant 0 : index
    %14 = vector.load %arg12[%c0_8, %c0_9] : memref<256x16xbf16, #tpu.memory_space<vmem>>, vector<256x16xbf16>
    %cst_10 = arith.constant dense<0.000000e+00> : vector<16x16xf32>
    %15 = tpu.matmul %11, %14, %cst_10 {dimension_numbers = #tpu.dot_dimension_numbers<[1], [0], [0], [1], [0, 0, 1, 1], [], []>} : vector<16x256xbf16>, vector<256x16xbf16>, vector<16x16xf32> -> vector<16x16xf32>
    %c0_11 = arith.constant 0 : index
    %c0_12 = arith.constant 0 : index
    %16 = vector.load %arg13[%c0_11, %c0_12] : memref<16x256xbf16, #tpu.memory_space<vmem>>, vector<16x256xbf16>
    %17 = arith.truncf %15 : vector<16x16xf32> to vector<16x16xbf16>
    %cst_13 = arith.constant dense<0.000000e+00> : vector<16x256xf32>
    %18 = tpu.matmul %17, %16, %cst_13 {dimension_numbers = #tpu.dot_dimension_numbers<[1], [0], [0], [1], [0, 0, 1, 1], [], []>} : vector<16x16xbf16>, vector<16x256xbf16>, vector<16x256xf32> -> vector<16x256xf32>
    %c0_14 = arith.constant 0 : index
    %c0_15 = arith.constant 0 : index
    %19 = vector.load %arg14[%c0_14, %c0_15] : memref<256x16xbf16, #tpu.memory_space<vmem>>, vector<256x16xbf16>
    %cst_16 = arith.constant dense<0.000000e+00> : vector<16x16xf32>
    %20 = tpu.matmul %11, %19, %cst_16 {dimension_numbers = #tpu.dot_dimension_numbers<[1], [0], [0], [1], [0, 0, 1, 1], [], []>} : vector<16x256xbf16>, vector<256x16xbf16>, vector<16x16xf32> -> vector<16x16xf32>
    %c0_17 = arith.constant 0 : index
    %c0_18 = arith.constant 0 : index
    %21 = vector.load %arg15[%c0_17, %c0_18] : memref<16x256xbf16, #tpu.memory_space<vmem>>, vector<16x256xbf16>
    %22 = arith.truncf %20 : vector<16x16xf32> to vector<16x16xbf16>
    %cst_19 = arith.constant dense<0.000000e+00> : vector<16x256xf32>
    %23 = tpu.matmul %22, %21, %cst_19 {dimension_numbers = #tpu.dot_dimension_numbers<[1], [0], [0], [1], [0, 0, 1, 1], [], []>} : vector<16x16xbf16>, vector<16x256xbf16>, vector<16x256xf32> -> vector<16x256xf32>
    %24 = tpu.reciprocal %13 {approx = true} : vector<16x256xf32> -> vector<16x256xf32>
    %cst_20 = arith.constant 8.000000e-01 : f32
    %25 = vector.broadcast %cst_20 : f32 to vector<16x256xf32>
    %26 = arith.mulf %25, %24 : vector<16x256xf32>
    %27 = tpu.reciprocal %18 {approx = true} : vector<16x256xf32> -> vector<16x256xf32>
    %28 = tpu.reciprocal %23 {approx = true} : vector<16x256xf32> -> vector<16x256xf32>
    %29 = arith.addf %27, %28 : vector<16x256xf32>
    %cst_21 = arith.constant 1.000000e-01 : f32
    %30 = vector.broadcast %cst_21 : f32 to vector<16x256xf32>
    %31 = arith.mulf %30, %29 : vector<16x256xf32>
    %32 = arith.addf %26, %31 : vector<16x256xf32>
    %33 = arith.mulf %10, %32 : vector<16x256xf32>
    %cst_22 = arith.constant dense<0.000000e+00> : vector<16xf32>
    %34 = vector.multi_reduction <add>, %33, %cst_22 [1] : vector<16x256xf32> to vector<16xf32>
    %35 = vector.shape_cast %34 : vector<16xf32> to vector<16x1xf32>
    %cst_23 = arith.constant 3.906250e-03 : f32
    %36 = vector.broadcast %cst_23 : f32 to vector<16x1xf32>
    %37 = arith.mulf %35, %36 : vector<16x1xf32>
    %c0_24 = arith.constant 0 : index
    %c0_25 = arith.constant 0 : index
    %38 = vector.load %arg20[%c0_24, %c0_25] : memref<16x16xbf16, #tpu.memory_space<vmem>>, vector<16x16xbf16>
    %39 = arith.truncf %37 : vector<16x1xf32> to vector<16x1xbf16>
    %cst_26 = arith.constant dense<0.000000e+00> : vector<16x1xf32>
    %40 = tpu.matmul %38, %39, %cst_26 {dimension_numbers = #tpu.dot_dimension_numbers<[1], [0], [0], [1], [0, 0, 1, 1], [], []>} : vector<16x16xbf16>, vector<16x1xbf16>, vector<16x1xf32> -> vector<16x1xf32>
    %cst_27 = arith.constant 0.000000e+00 : f32
    %41 = vector.broadcast %cst_27 : f32 to vector<16x1xf32>
    %42 = arith.maximumf %40, %41 : vector<16x1xf32>
    %c0_28 = arith.constant 0 : index
    %c0_29 = arith.constant 0 : index
    %43 = vector.load %arg21[%c0_28, %c0_29] : memref<16x16xbf16, #tpu.memory_space<vmem>>, vector<16x16xbf16>
    %44 = arith.truncf %42 : vector<16x1xf32> to vector<16x1xbf16>
    %cst_30 = arith.constant dense<0.000000e+00> : vector<16x1xf32>
    %45 = tpu.matmul %43, %44, %cst_30 {dimension_numbers = #tpu.dot_dimension_numbers<[1], [0], [0], [1], [0, 0, 1, 1], [], []>} : vector<16x16xbf16>, vector<16x1xbf16>, vector<16x1xf32> -> vector<16x1xf32>
    %cst_31 = arith.constant 0.000000e+00 : f32
    %46 = vector.broadcast %cst_31 : f32 to vector<16x1xf32>
    %47 = arith.subf %46, %45 : vector<16x1xf32>
    %48 = math.exp %47 : vector<16x1xf32>
    %cst_32 = arith.constant 1.000000e+00 : f32
    %49 = vector.broadcast %cst_32 : f32 to vector<16x1xf32>
    %50 = arith.addf %49, %48 : vector<16x1xf32>
    %51 = tpu.reciprocal %50 {approx = true} : vector<16x1xf32> -> vector<16x1xf32>
    %52 = vector.broadcast %51 : vector<16x1xf32> to vector<16x256xf32>
    %53 = arith.mulf %33, %52 : vector<16x256xf32>
    %c0_33 = arith.constant 0 : index
    %c0_34 = arith.constant 0 : index
    %54 = vector.load %arg6[%c0_33, %c0_34] : memref<400x16xbf16, #tpu.memory_space<vmem>>, vector<400x16xbf16>
    %55 = arith.truncf %53 : vector<16x256xf32> to vector<16x256xbf16>
    %cst_35 = arith.constant dense<0.000000e+00> : vector<400x256xf32>
    %56 = tpu.matmul %54, %55, %cst_35 {dimension_numbers = #tpu.dot_dimension_numbers<[1], [0], [0], [1], [0, 0, 1, 1], [], []>} : vector<400x16xbf16>, vector<16x256xbf16>, vector<400x256xf32> -> vector<400x256xf32>
    %57 = arith.truncf %56 : vector<400x256xf32> to vector<400x256xbf16>
    %58 = vector.extract_strided_slice %57 {offsets = [0, 0], sizes = [16, 256], strides = [1, 1]} : vector<400x256xbf16> to vector<16x256xbf16>
    %c0_36 = arith.constant 0 : index
    %c0_37 = arith.constant 0 : index
    %c0_38 = arith.constant 0 : index
    %59 = vector.load %arg5[%c0_36, %c0_37, %c0_38] : memref<25x256x36xbf16, #tpu.memory_space<vmem>>, vector<1x256x36xbf16>
    %60 = vector.shape_cast %59 : vector<1x256x36xbf16> to vector<256x36xbf16>
    %cst_39 = arith.constant dense<0.000000e+00> : vector<16x36xf32>
    %61 = tpu.matmul %58, %60, %cst_39 {dimension_numbers = #tpu.dot_dimension_numbers<[1], [0], [0], [1], [0, 0, 1, 1], [], []>} : vector<16x256xbf16>, vector<256x36xbf16>, vector<16x36xf32> -> vector<16x36xf32>
    %62 = vector.extract_strided_slice %57 {offsets = [16, 0], sizes = [16, 256], strides = [1, 1]} : vector<400x256xbf16> to vector<16x256xbf16>
    %c1 = arith.constant 1 : index
    %c0_40 = arith.constant 0 : index
    %c0_41 = arith.constant 0 : index
    %63 = vector.load %arg5[%c1, %c0_40, %c0_41] : memref<25x256x36xbf16, #tpu.memory_space<vmem>>, vector<1x256x36xbf16>
    %64 = vector.shape_cast %63 : vector<1x256x36xbf16> to vector<256x36xbf16>
    %cst_42 = arith.constant dense<0.000000e+00> : vector<16x36xf32>
    %65 = tpu.matmul %62, %64, %cst_42 {dimension_numbers = #tpu.dot_dimension_numbers<[1], [0], [0], [1], [0, 0, 1, 1], [], []>} : vector<16x256xbf16>, vector<256x36xbf16>, vector<16x36xf32> -> vector<16x36xf32>
    %66 = vector.extract_strided_slice %57 {offsets = [32, 0], sizes = [16, 256], strides = [1, 1]} : vector<400x256xbf16> to vector<16x256xbf16>
    %c2 = arith.constant 2 : index
    %c0_43 = arith.constant 0 : index
    %c0_44 = arith.constant 0 : index
    %67 = vector.load %arg5[%c2, %c0_43, %c0_44] : memref<25x256x36xbf16, #tpu.memory_space<vmem>>, vector<1x256x36xbf16>
    %68 = vector.shape_cast %67 : vector<1x256x36xbf16> to vector<256x36xbf16>
    %cst_45 = arith.constant dense<0.000000e+00> : vector<16x36xf32>
    %69 = tpu.matmul %66, %68, %cst_45 {dimension_numbers = #tpu.dot_dimension_numbers<[1], [0], [0], [1], [0, 0, 1, 1], [], []>} : vector<16x256xbf16>, vector<256x36xbf16>, vector<16x36xf32> -> vector<16x36xf32>
    %70 = vector.extract_strided_slice %57 {offsets = [48, 0], sizes = [16, 256], strides = [1, 1]} : vector<400x256xbf16> to vector<16x256xbf16>
    %c3 = arith.constant 3 : index
    %c0_46 = arith.constant 0 : index
    %c0_47 = arith.constant 0 : index
    %71 = vector.load %arg5[%c3, %c0_46, %c0_47] : memref<25x256x36xbf16, #tpu.memory_space<vmem>>, vector<1x256x36xbf16>
    %72 = vector.shape_cast %71 : vector<1x256x36xbf16> to vector<256x36xbf16>
    %cst_48 = arith.constant dense<0.000000e+00> : vector<16x36xf32>
    %73 = tpu.matmul %70, %72, %cst_48 {dimension_numbers = #tpu.dot_dimension_numbers<[1], [0], [0], [1], [0, 0, 1, 1], [], []>} : vector<16x256xbf16>, vector<256x36xbf16>, vector<16x36xf32> -> vector<16x36xf32>
    %74 = vector.extract_strided_slice %57 {offsets = [64, 0], sizes = [16, 256], strides = [1, 1]} : vector<400x256xbf16> to vector<16x256xbf16>
    %c4 = arith.constant 4 : index
    %c0_49 = arith.constant 0 : index
    %c0_50 = arith.constant 0 : index
    %75 = vector.load %arg5[%c4, %c0_49, %c0_50] : memref<25x256x36xbf16, #tpu.memory_space<vmem>>, vector<1x256x36xbf16>
    %76 = vector.shape_cast %75 : vector<1x256x36xbf16> to vector<256x36xbf16>
    %cst_51 = arith.constant dense<0.000000e+00> : vector<16x36xf32>
    %77 = tpu.matmul %74, %76, %cst_51 {dimension_numbers = #tpu.dot_dimension_numbers<[1], [0], [0], [1], [0, 0, 1, 1], [], []>} : vector<16x256xbf16>, vector<256x36xbf16>, vector<16x36xf32> -> vector<16x36xf32>
    %78 = arith.addf %61, %77 : vector<16x36xf32>
    %79 = vector.extract_strided_slice %57 {offsets = [80, 0], sizes = [16, 256], strides = [1, 1]} : vector<400x256xbf16> to vector<16x256xbf16>
    %c5 = arith.constant 5 : index
    %c0_52 = arith.constant 0 : index
    %c0_53 = arith.constant 0 : index
    %80 = vector.load %arg5[%c5, %c0_52, %c0_53] : memref<25x256x36xbf16, #tpu.memory_space<vmem>>, vector<1x256x36xbf16>
    %81 = vector.shape_cast %80 : vector<1x256x36xbf16> to vector<256x36xbf16>
    %cst_54 = arith.constant dense<0.000000e+00> : vector<16x36xf32>
    %82 = tpu.matmul %79, %81, %cst_54 {dimension_numbers = #tpu.dot_dimension_numbers<[1], [0], [0], [1], [0, 0, 1, 1], [], []>} : vector<16x256xbf16>, vector<256x36xbf16>, vector<16x36xf32> -> vector<16x36xf32>
    %83 = arith.addf %65, %82 : vector<16x36xf32>
    %84 = vector.extract_strided_slice %57 {offsets = [96, 0], sizes = [16, 256], strides = [1, 1]} : vector<400x256xbf16> to vector<16x256xbf16>
    %c6 = arith.constant 6 : index
    %c0_55 = arith.constant 0 : index
    %c0_56 = arith.constant 0 : index
    %85 = vector.load %arg5[%c6, %c0_55, %c0_56] : memref<25x256x36xbf16, #tpu.memory_space<vmem>>, vector<1x256x36xbf16>
    %86 = vector.shape_cast %85 : vector<1x256x36xbf16> to vector<256x36xbf16>
    %cst_57 = arith.constant dense<0.000000e+00> : vector<16x36xf32>
    %87 = tpu.matmul %84, %86, %cst_57 {dimension_numbers = #tpu.dot_dimension_numbers<[1], [0], [0], [1], [0, 0, 1, 1], [], []>} : vector<16x256xbf16>, vector<256x36xbf16>, vector<16x36xf32> -> vector<16x36xf32>
    %88 = arith.addf %69, %87 : vector<16x36xf32>
    %89 = vector.extract_strided_slice %57 {offsets = [112, 0], sizes = [16, 256], strides = [1, 1]} : vector<400x256xbf16> to vector<16x256xbf16>
    %c7 = arith.constant 7 : index
    %c0_58 = arith.constant 0 : index
    %c0_59 = arith.constant 0 : index
    %90 = vector.load %arg5[%c7, %c0_58, %c0_59] : memref<25x256x36xbf16, #tpu.memory_space<vmem>>, vector<1x256x36xbf16>
    %91 = vector.shape_cast %90 : vector<1x256x36xbf16> to vector<256x36xbf16>
    %cst_60 = arith.constant dense<0.000000e+00> : vector<16x36xf32>
    %92 = tpu.matmul %89, %91, %cst_60 {dimension_numbers = #tpu.dot_dimension_numbers<[1], [0], [0], [1], [0, 0, 1, 1], [], []>} : vector<16x256xbf16>, vector<256x36xbf16>, vector<16x36xf32> -> vector<16x36xf32>
    %93 = arith.addf %73, %92 : vector<16x36xf32>
    %94 = vector.extract_strided_slice %57 {offsets = [128, 0], sizes = [16, 256], strides = [1, 1]} : vector<400x256xbf16> to vector<16x256xbf16>
    %c8 = arith.constant 8 : index
    %c0_61 = arith.constant 0 : index
    %c0_62 = arith.constant 0 : index
    %95 = vector.load %arg5[%c8, %c0_61, %c0_62] : memref<25x256x36xbf16, #tpu.memory_space<vmem>>, vector<1x256x36xbf16>
    %96 = vector.shape_cast %95 : vector<1x256x36xbf16> to vector<256x36xbf16>
    %cst_63 = arith.constant dense<0.000000e+00> : vector<16x36xf32>
    %97 = tpu.matmul %94, %96, %cst_63 {dimension_numbers = #tpu.dot_dimension_numbers<[1], [0], [0], [1], [0, 0, 1, 1], [], []>} : vector<16x256xbf16>, vector<256x36xbf16>, vector<16x36xf32> -> vector<16x36xf32>
    %98 = arith.addf %78, %97 : vector<16x36xf32>
    %99 = vector.extract_strided_slice %57 {offsets = [144, 0], sizes = [16, 256], strides = [1, 1]} : vector<400x256xbf16> to vector<16x256xbf16>
    %c9 = arith.constant 9 : index
    %c0_64 = arith.constant 0 : index
    %c0_65 = arith.constant 0 : index
    %100 = vector.load %arg5[%c9, %c0_64, %c0_65] : memref<25x256x36xbf16, #tpu.memory_space<vmem>>, vector<1x256x36xbf16>
    %101 = vector.shape_cast %100 : vector<1x256x36xbf16> to vector<256x36xbf16>
    %cst_66 = arith.constant dense<0.000000e+00> : vector<16x36xf32>
    %102 = tpu.matmul %99, %101, %cst_66 {dimension_numbers = #tpu.dot_dimension_numbers<[1], [0], [0], [1], [0, 0, 1, 1], [], []>} : vector<16x256xbf16>, vector<256x36xbf16>, vector<16x36xf32> -> vector<16x36xf32>
    %103 = arith.addf %83, %102 : vector<16x36xf32>
    %104 = vector.extract_strided_slice %57 {offsets = [160, 0], sizes = [16, 256], strides = [1, 1]} : vector<400x256xbf16> to vector<16x256xbf16>
    %c10 = arith.constant 10 : index
    %c0_67 = arith.constant 0 : index
    %c0_68 = arith.constant 0 : index
    %105 = vector.load %arg5[%c10, %c0_67, %c0_68] : memref<25x256x36xbf16, #tpu.memory_space<vmem>>, vector<1x256x36xbf16>
    %106 = vector.shape_cast %105 : vector<1x256x36xbf16> to vector<256x36xbf16>
    %cst_69 = arith.constant dense<0.000000e+00> : vector<16x36xf32>
    %107 = tpu.matmul %104, %106, %cst_69 {dimension_numbers = #tpu.dot_dimension_numbers<[1], [0], [0], [1], [0, 0, 1, 1], [], []>} : vector<16x256xbf16>, vector<256x36xbf16>, vector<16x36xf32> -> vector<16x36xf32>
    %108 = arith.addf %88, %107 : vector<16x36xf32>
    %109 = vector.extract_strided_slice %57 {offsets = [176, 0], sizes = [16, 256], strides = [1, 1]} : vector<400x256xbf16> to vector<16x256xbf16>
    %c11 = arith.constant 11 : index
    %c0_70 = arith.constant 0 : index
    %c0_71 = arith.constant 0 : index
    %110 = vector.load %arg5[%c11, %c0_70, %c0_71] : memref<25x256x36xbf16, #tpu.memory_space<vmem>>, vector<1x256x36xbf16>
    %111 = vector.shape_cast %110 : vector<1x256x36xbf16> to vector<256x36xbf16>
    %cst_72 = arith.constant dense<0.000000e+00> : vector<16x36xf32>
    %112 = tpu.matmul %109, %111, %cst_72 {dimension_numbers = #tpu.dot_dimension_numbers<[1], [0], [0], [1], [0, 0, 1, 1], [], []>} : vector<16x256xbf16>, vector<256x36xbf16>, vector<16x36xf32> -> vector<16x36xf32>
    %113 = arith.addf %93, %112 : vector<16x36xf32>
    %114 = vector.extract_strided_slice %57 {offsets = [192, 0], sizes = [16, 256], strides = [1, 1]} : vector<400x256xbf16> to vector<16x256xbf16>
    %c12 = arith.constant 12 : index
    %c0_73 = arith.constant 0 : index
    %c0_74 = arith.constant 0 : index
    %115 = vector.load %arg5[%c12, %c0_73, %c0_74] : memref<25x256x36xbf16, #tpu.memory_space<vmem>>, vector<1x256x36xbf16>
    %116 = vector.shape_cast %115 : vector<1x256x36xbf16> to vector<256x36xbf16>
    %cst_75 = arith.constant dense<0.000000e+00> : vector<16x36xf32>
    %117 = tpu.matmul %114, %116, %cst_75 {dimension_numbers = #tpu.dot_dimension_numbers<[1], [0], [0], [1], [0, 0, 1, 1], [], []>} : vector<16x256xbf16>, vector<256x36xbf16>, vector<16x36xf32> -> vector<16x36xf32>
    %118 = arith.addf %98, %117 : vector<16x36xf32>
    %119 = vector.extract_strided_slice %57 {offsets = [208, 0], sizes = [16, 256], strides = [1, 1]} : vector<400x256xbf16> to vector<16x256xbf16>
    %c13 = arith.constant 13 : index
    %c0_76 = arith.constant 0 : index
    %c0_77 = arith.constant 0 : index
    %120 = vector.load %arg5[%c13, %c0_76, %c0_77] : memref<25x256x36xbf16, #tpu.memory_space<vmem>>, vector<1x256x36xbf16>
    %121 = vector.shape_cast %120 : vector<1x256x36xbf16> to vector<256x36xbf16>
    %cst_78 = arith.constant dense<0.000000e+00> : vector<16x36xf32>
    %122 = tpu.matmul %119, %121, %cst_78 {dimension_numbers = #tpu.dot_dimension_numbers<[1], [0], [0], [1], [0, 0, 1, 1], [], []>} : vector<16x256xbf16>, vector<256x36xbf16>, vector<16x36xf32> -> vector<16x36xf32>
    %123 = arith.addf %103, %122 : vector<16x36xf32>
    %124 = vector.extract_strided_slice %57 {offsets = [224, 0], sizes = [16, 256], strides = [1, 1]} : vector<400x256xbf16> to vector<16x256xbf16>
    %c14 = arith.constant 14 : index
    %c0_79 = arith.constant 0 : index
    %c0_80 = arith.constant 0 : index
    %125 = vector.load %arg5[%c14, %c0_79, %c0_80] : memref<25x256x36xbf16, #tpu.memory_space<vmem>>, vector<1x256x36xbf16>
    %126 = vector.shape_cast %125 : vector<1x256x36xbf16> to vector<256x36xbf16>
    %cst_81 = arith.constant dense<0.000000e+00> : vector<16x36xf32>
    %127 = tpu.matmul %124, %126, %cst_81 {dimension_numbers = #tpu.dot_dimension_numbers<[1], [0], [0], [1], [0, 0, 1, 1], [], []>} : vector<16x256xbf16>, vector<256x36xbf16>, vector<16x36xf32> -> vector<16x36xf32>
    %128 = arith.addf %108, %127 : vector<16x36xf32>
    %129 = vector.extract_strided_slice %57 {offsets = [240, 0], sizes = [16, 256], strides = [1, 1]} : vector<400x256xbf16> to vector<16x256xbf16>
    %c15 = arith.constant 15 : index
    %c0_82 = arith.constant 0 : index
    %c0_83 = arith.constant 0 : index
    %130 = vector.load %arg5[%c15, %c0_82, %c0_83] : memref<25x256x36xbf16, #tpu.memory_space<vmem>>, vector<1x256x36xbf16>
    %131 = vector.shape_cast %130 : vector<1x256x36xbf16> to vector<256x36xbf16>
    %cst_84 = arith.constant dense<0.000000e+00> : vector<16x36xf32>
    %132 = tpu.matmul %129, %131, %cst_84 {dimension_numbers = #tpu.dot_dimension_numbers<[1], [0], [0], [1], [0, 0, 1, 1], [], []>} : vector<16x256xbf16>, vector<256x36xbf16>, vector<16x36xf32> -> vector<16x36xf32>
    %133 = arith.addf %113, %132 : vector<16x36xf32>
    %134 = vector.extract_strided_slice %57 {offsets = [256, 0], sizes = [16, 256], strides = [1, 1]} : vector<400x256xbf16> to vector<16x256xbf16>
    %c16 = arith.constant 16 : index
    %c0_85 = arith.constant 0 : index
    %c0_86 = arith.constant 0 : index
    %135 = vector.load %arg5[%c16, %c0_85, %c0_86] : memref<25x256x36xbf16, #tpu.memory_space<vmem>>, vector<1x256x36xbf16>
    %136 = vector.shape_cast %135 : vector<1x256x36xbf16> to vector<256x36xbf16>
    %cst_87 = arith.constant dense<0.000000e+00> : vector<16x36xf32>
    %137 = tpu.matmul %134, %136, %cst_87 {dimension_numbers = #tpu.dot_dimension_numbers<[1], [0], [0], [1], [0, 0, 1, 1], [], []>} : vector<16x256xbf16>, vector<256x36xbf16>, vector<16x36xf32> -> vector<16x36xf32>
    %138 = arith.addf %118, %137 : vector<16x36xf32>
    %139 = vector.extract_strided_slice %57 {offsets = [272, 0], sizes = [16, 256], strides = [1, 1]} : vector<400x256xbf16> to vector<16x256xbf16>
    %c17 = arith.constant 17 : index
    %c0_88 = arith.constant 0 : index
    %c0_89 = arith.constant 0 : index
    %140 = vector.load %arg5[%c17, %c0_88, %c0_89] : memref<25x256x36xbf16, #tpu.memory_space<vmem>>, vector<1x256x36xbf16>
    %141 = vector.shape_cast %140 : vector<1x256x36xbf16> to vector<256x36xbf16>
    %cst_90 = arith.constant dense<0.000000e+00> : vector<16x36xf32>
    %142 = tpu.matmul %139, %141, %cst_90 {dimension_numbers = #tpu.dot_dimension_numbers<[1], [0], [0], [1], [0, 0, 1, 1], [], []>} : vector<16x256xbf16>, vector<256x36xbf16>, vector<16x36xf32> -> vector<16x36xf32>
    %143 = arith.addf %123, %142 : vector<16x36xf32>
    %144 = vector.extract_strided_slice %57 {offsets = [288, 0], sizes = [16, 256], strides = [1, 1]} : vector<400x256xbf16> to vector<16x256xbf16>
    %c18 = arith.constant 18 : index
    %c0_91 = arith.constant 0 : index
    %c0_92 = arith.constant 0 : index
    %145 = vector.load %arg5[%c18, %c0_91, %c0_92] : memref<25x256x36xbf16, #tpu.memory_space<vmem>>, vector<1x256x36xbf16>
    %146 = vector.shape_cast %145 : vector<1x256x36xbf16> to vector<256x36xbf16>
    %cst_93 = arith.constant dense<0.000000e+00> : vector<16x36xf32>
    %147 = tpu.matmul %144, %146, %cst_93 {dimension_numbers = #tpu.dot_dimension_numbers<[1], [0], [0], [1], [0, 0, 1, 1], [], []>} : vector<16x256xbf16>, vector<256x36xbf16>, vector<16x36xf32> -> vector<16x36xf32>
    %148 = arith.addf %128, %147 : vector<16x36xf32>
    %149 = vector.extract_strided_slice %57 {offsets = [304, 0], sizes = [16, 256], strides = [1, 1]} : vector<400x256xbf16> to vector<16x256xbf16>
    %c19 = arith.constant 19 : index
    %c0_94 = arith.constant 0 : index
    %c0_95 = arith.constant 0 : index
    %150 = vector.load %arg5[%c19, %c0_94, %c0_95] : memref<25x256x36xbf16, #tpu.memory_space<vmem>>, vector<1x256x36xbf16>
    %151 = vector.shape_cast %150 : vector<1x256x36xbf16> to vector<256x36xbf16>
    %cst_96 = arith.constant dense<0.000000e+00> : vector<16x36xf32>
    %152 = tpu.matmul %149, %151, %cst_96 {dimension_numbers = #tpu.dot_dimension_numbers<[1], [0], [0], [1], [0, 0, 1, 1], [], []>} : vector<16x256xbf16>, vector<256x36xbf16>, vector<16x36xf32> -> vector<16x36xf32>
    %153 = arith.addf %133, %152 : vector<16x36xf32>
    %154 = vector.extract_strided_slice %57 {offsets = [320, 0], sizes = [16, 256], strides = [1, 1]} : vector<400x256xbf16> to vector<16x256xbf16>
    %c20 = arith.constant 20 : index
    %c0_97 = arith.constant 0 : index
    %c0_98 = arith.constant 0 : index
    %155 = vector.load %arg5[%c20, %c0_97, %c0_98] : memref<25x256x36xbf16, #tpu.memory_space<vmem>>, vector<1x256x36xbf16>
    %156 = vector.shape_cast %155 : vector<1x256x36xbf16> to vector<256x36xbf16>
    %cst_99 = arith.constant dense<0.000000e+00> : vector<16x36xf32>
    %157 = tpu.matmul %154, %156, %cst_99 {dimension_numbers = #tpu.dot_dimension_numbers<[1], [0], [0], [1], [0, 0, 1, 1], [], []>} : vector<16x256xbf16>, vector<256x36xbf16>, vector<16x36xf32> -> vector<16x36xf32>
    %158 = arith.addf %138, %157 : vector<16x36xf32>
    %159 = vector.extract_strided_slice %57 {offsets = [336, 0], sizes = [16, 256], strides = [1, 1]} : vector<400x256xbf16> to vector<16x256xbf16>
    %c21 = arith.constant 21 : index
    %c0_100 = arith.constant 0 : index
    %c0_101 = arith.constant 0 : index
    %160 = vector.load %arg5[%c21, %c0_100, %c0_101] : memref<25x256x36xbf16, #tpu.memory_space<vmem>>, vector<1x256x36xbf16>
    %161 = vector.shape_cast %160 : vector<1x256x36xbf16> to vector<256x36xbf16>
    %cst_102 = arith.constant dense<0.000000e+00> : vector<16x36xf32>
    %162 = tpu.matmul %159, %161, %cst_102 {dimension_numbers = #tpu.dot_dimension_numbers<[1], [0], [0], [1], [0, 0, 1, 1], [], []>} : vector<16x256xbf16>, vector<256x36xbf16>, vector<16x36xf32> -> vector<16x36xf32>
    %163 = arith.addf %143, %162 : vector<16x36xf32>
    %164 = vector.extract_strided_slice %57 {offsets = [352, 0], sizes = [16, 256], strides = [1, 1]} : vector<400x256xbf16> to vector<16x256xbf16>
    %c22 = arith.constant 22 : index
    %c0_103 = arith.constant 0 : index
    %c0_104 = arith.constant 0 : index
    %165 = vector.load %arg5[%c22, %c0_103, %c0_104] : memref<25x256x36xbf16, #tpu.memory_space<vmem>>, vector<1x256x36xbf16>
    %166 = vector.shape_cast %165 : vector<1x256x36xbf16> to vector<256x36xbf16>
    %cst_105 = arith.constant dense<0.000000e+00> : vector<16x36xf32>
    %167 = tpu.matmul %164, %166, %cst_105 {dimension_numbers = #tpu.dot_dimension_numbers<[1], [0], [0], [1], [0, 0, 1, 1], [], []>} : vector<16x256xbf16>, vector<256x36xbf16>, vector<16x36xf32> -> vector<16x36xf32>
    %168 = arith.addf %148, %167 : vector<16x36xf32>
    %169 = vector.extract_strided_slice %57 {offsets = [368, 0], sizes = [16, 256], strides = [1, 1]} : vector<400x256xbf16> to vector<16x256xbf16>
    %c23 = arith.constant 23 : index
    %c0_106 = arith.constant 0 : index
    %c0_107 = arith.constant 0 : index
    %170 = vector.load %arg5[%c23, %c0_106, %c0_107] : memref<25x256x36xbf16, #tpu.memory_space<vmem>>, vector<1x256x36xbf16>
    %171 = vector.shape_cast %170 : vector<1x256x36xbf16> to vector<256x36xbf16>
    %cst_108 = arith.constant dense<0.000000e+00> : vector<16x36xf32>
    %172 = tpu.matmul %169, %171, %cst_108 {dimension_numbers = #tpu.dot_dimension_numbers<[1], [0], [0], [1], [0, 0, 1, 1], [], []>} : vector<16x256xbf16>, vector<256x36xbf16>, vector<16x36xf32> -> vector<16x36xf32>
    %173 = arith.addf %153, %172 : vector<16x36xf32>
    %174 = vector.extract_strided_slice %57 {offsets = [384, 0], sizes = [16, 256], strides = [1, 1]} : vector<400x256xbf16> to vector<16x256xbf16>
    %c24 = arith.constant 24 : index
    %c0_109 = arith.constant 0 : index
    %c0_110 = arith.constant 0 : index
    %175 = vector.load %arg5[%c24, %c0_109, %c0_110] : memref<25x256x36xbf16, #tpu.memory_space<vmem>>, vector<1x256x36xbf16>
    %176 = vector.shape_cast %175 : vector<1x256x36xbf16> to vector<256x36xbf16>
    %cst_111 = arith.constant dense<0.000000e+00> : vector<16x36xf32>
    %177 = tpu.matmul %174, %176, %cst_111 {dimension_numbers = #tpu.dot_dimension_numbers<[1], [0], [0], [1], [0, 0, 1, 1], [], []>} : vector<16x256xbf16>, vector<256x36xbf16>, vector<16x36xf32> -> vector<16x36xf32>
    %178 = arith.addf %158, %177 : vector<16x36xf32>
    %179 = arith.addf %178, %163 : vector<16x36xf32>
    %180 = arith.addf %179, %168 : vector<16x36xf32>
    %181 = arith.addf %180, %173 : vector<16x36xf32>
    %c0_112 = arith.constant 0 : index
    %c0_113 = arith.constant 0 : index
    %182 = vector.load %arg7[%c0_112, %c0_113] : memref<16x1xf32, #tpu.memory_space<vmem>>, vector<16x1xf32>
    %183 = vector.broadcast %182 : vector<16x1xf32> to vector<16x36xf32>
    %184 = arith.addf %181, %183 : vector<16x36xf32>
    %c0_114 = arith.constant 0 : index
    %c0_115 = arith.constant 0 : index
    %c0_116 = arith.constant 0 : index
    %185 = vector.load %arg24[%c0_114, %c0_115, %c0_116] : memref<4x36x9xbf16, #tpu.memory_space<vmem>>, vector<1x36x9xbf16>
    %186 = vector.shape_cast %185 : vector<1x36x9xbf16> to vector<36x9xbf16>
    %187 = arith.truncf %184 : vector<16x36xf32> to vector<16x36xbf16>
    %cst_117 = arith.constant dense<0.000000e+00> : vector<16x9xf32>
    %188 = tpu.matmul %187, %186, %cst_117 {dimension_numbers = #tpu.dot_dimension_numbers<[1], [0], [0], [1], [0, 0, 1, 1], [], []>} : vector<16x36xbf16>, vector<36x9xbf16>, vector<16x9xf32> -> vector<16x9xf32>
    %c1_118 = arith.constant 1 : index
    %c0_119 = arith.constant 0 : index
    %c0_120 = arith.constant 0 : index
    %189 = vector.load %arg24[%c1_118, %c0_119, %c0_120] : memref<4x36x9xbf16, #tpu.memory_space<vmem>>, vector<1x36x9xbf16>
    %190 = vector.shape_cast %189 : vector<1x36x9xbf16> to vector<36x9xbf16>
    %191 = arith.truncf %184 : vector<16x36xf32> to vector<16x36xbf16>
    %cst_121 = arith.constant dense<0.000000e+00> : vector<16x9xf32>
    %192 = tpu.matmul %191, %190, %cst_121 {dimension_numbers = #tpu.dot_dimension_numbers<[1], [0], [0], [1], [0, 0, 1, 1], [], []>} : vector<16x36xbf16>, vector<36x9xbf16>, vector<16x9xf32> -> vector<16x9xf32>
    %193 = arith.maximumf %188, %192 : vector<16x9xf32>
    %c2_122 = arith.constant 2 : index
    %c0_123 = arith.constant 0 : index
    %c0_124 = arith.constant 0 : index
    %194 = vector.load %arg24[%c2_122, %c0_123, %c0_124] : memref<4x36x9xbf16, #tpu.memory_space<vmem>>, vector<1x36x9xbf16>
    %195 = vector.shape_cast %194 : vector<1x36x9xbf16> to vector<36x9xbf16>
    %196 = arith.truncf %184 : vector<16x36xf32> to vector<16x36xbf16>
    %cst_125 = arith.constant dense<0.000000e+00> : vector<16x9xf32>
    %197 = tpu.matmul %196, %195, %cst_125 {dimension_numbers = #tpu.dot_dimension_numbers<[1], [0], [0], [1], [0, 0, 1, 1], [], []>} : vector<16x36xbf16>, vector<36x9xbf16>, vector<16x9xf32> -> vector<16x9xf32>
    %198 = arith.maximumf %193, %197 : vector<16x9xf32>
    %c3_126 = arith.constant 3 : index
    %c0_127 = arith.constant 0 : index
    %c0_128 = arith.constant 0 : index
    %199 = vector.load %arg24[%c3_126, %c0_127, %c0_128] : memref<4x36x9xbf16, #tpu.memory_space<vmem>>, vector<1x36x9xbf16>
    %200 = vector.shape_cast %199 : vector<1x36x9xbf16> to vector<36x9xbf16>
    %201 = arith.truncf %184 : vector<16x36xf32> to vector<16x36xbf16>
    %cst_129 = arith.constant dense<0.000000e+00> : vector<16x9xf32>
    %202 = tpu.matmul %201, %200, %cst_129 {dimension_numbers = #tpu.dot_dimension_numbers<[1], [0], [0], [1], [0, 0, 1, 1], [], []>} : vector<16x36xbf16>, vector<36x9xbf16>, vector<16x9xf32> -> vector<16x9xf32>
    %203 = arith.maximumf %198, %202 : vector<16x9xf32>
    %c0_130 = arith.constant 0 : index
    %c0_131 = arith.constant 0 : index
    %204 = vector.load %arg4[%c0_130, %c0_131] : memref<400x16xbf16, #tpu.memory_space<vmem>>, vector<400x16xbf16>
    %205 = arith.truncf %3 : vector<16x256xf32> to vector<16x256xbf16>
    %cst_132 = arith.constant dense<0.000000e+00> : vector<400x256xf32>
    %206 = tpu.matmul %204, %205, %cst_132 {dimension_numbers = #tpu.dot_dimension_numbers<[1], [0], [0], [1], [0, 0, 1, 1], [], []>} : vector<400x16xbf16>, vector<16x256xbf16>, vector<400x256xf32> -> vector<400x256xf32>
    %207 = arith.truncf %206 : vector<400x256xf32> to vector<400x256xbf16>
    %208 = vector.extract_strided_slice %207 {offsets = [0, 0], sizes = [16, 256], strides = [1, 1]} : vector<400x256xbf16> to vector<16x256xbf16>
    %c0_133 = arith.constant 0 : index
    %c0_134 = arith.constant 0 : index
    %c0_135 = arith.constant 0 : index
    %209 = vector.load %arg3[%c0_133, %c0_134, %c0_135] : memref<25x256x64xbf16, #tpu.memory_space<vmem>>, vector<1x256x64xbf16>
    %210 = vector.shape_cast %209 : vector<1x256x64xbf16> to vector<256x64xbf16>
    %cst_136 = arith.constant dense<0.000000e+00> : vector<16x64xf32>
    %211 = tpu.matmul %208, %210, %cst_136 {dimension_numbers = #tpu.dot_dimension_numbers<[1], [0], [0], [1], [0, 0, 1, 1], [], []>} : vector<16x256xbf16>, vector<256x64xbf16>, vector<16x64xf32> -> vector<16x64xf32>
    %212 = vector.extract_strided_slice %207 {offsets = [16, 0], sizes = [16, 256], strides = [1, 1]} : vector<400x256xbf16> to vector<16x256xbf16>
    %c1_137 = arith.constant 1 : index
    %c0_138 = arith.constant 0 : index
    %c0_139 = arith.constant 0 : index
    %213 = vector.load %arg3[%c1_137, %c0_138, %c0_139] : memref<25x256x64xbf16, #tpu.memory_space<vmem>>, vector<1x256x64xbf16>
    %214 = vector.shape_cast %213 : vector<1x256x64xbf16> to vector<256x64xbf16>
    %cst_140 = arith.constant dense<0.000000e+00> : vector<16x64xf32>
    %215 = tpu.matmul %212, %214, %cst_140 {dimension_numbers = #tpu.dot_dimension_numbers<[1], [0], [0], [1], [0, 0, 1, 1], [], []>} : vector<16x256xbf16>, vector<256x64xbf16>, vector<16x64xf32> -> vector<16x64xf32>
    %216 = vector.extract_strided_slice %207 {offsets = [32, 0], sizes = [16, 256], strides = [1, 1]} : vector<400x256xbf16> to vector<16x256xbf16>
    %c2_141 = arith.constant 2 : index
    %c0_142 = arith.constant 0 : index
    %c0_143 = arith.constant 0 : index
    %217 = vector.load %arg3[%c2_141, %c0_142, %c0_143] : memref<25x256x64xbf16, #tpu.memory_space<vmem>>, vector<1x256x64xbf16>
    %218 = vector.shape_cast %217 : vector<1x256x64xbf16> to vector<256x64xbf16>
    %cst_144 = arith.constant dense<0.000000e+00> : vector<16x64xf32>
    %219 = tpu.matmul %216, %218, %cst_144 {dimension_numbers = #tpu.dot_dimension_numbers<[1], [0], [0], [1], [0, 0, 1, 1], [], []>} : vector<16x256xbf16>, vector<256x64xbf16>, vector<16x64xf32> -> vector<16x64xf32>
    %220 = vector.extract_strided_slice %207 {offsets = [48, 0], sizes = [16, 256], strides = [1, 1]} : vector<400x256xbf16> to vector<16x256xbf16>
    %c3_145 = arith.constant 3 : index
    %c0_146 = arith.constant 0 : index
    %c0_147 = arith.constant 0 : index
    %221 = vector.load %arg3[%c3_145, %c0_146, %c0_147] : memref<25x256x64xbf16, #tpu.memory_space<vmem>>, vector<1x256x64xbf16>
    %222 = vector.shape_cast %221 : vector<1x256x64xbf16> to vector<256x64xbf16>
    %cst_148 = arith.constant dense<0.000000e+00> : vector<16x64xf32>
    %223 = tpu.matmul %220, %222, %cst_148 {dimension_numbers = #tpu.dot_dimension_numbers<[1], [0], [0], [1], [0, 0, 1, 1], [], []>} : vector<16x256xbf16>, vector<256x64xbf16>, vector<16x64xf32> -> vector<16x64xf32>
    %224 = vector.extract_strided_slice %207 {offsets = [64, 0], sizes = [16, 256], strides = [1, 1]} : vector<400x256xbf16> to vector<16x256xbf16>
    %c4_149 = arith.constant 4 : index
    %c0_150 = arith.constant 0 : index
    %c0_151 = arith.constant 0 : index
    %225 = vector.load %arg3[%c4_149, %c0_150, %c0_151] : memref<25x256x64xbf16, #tpu.memory_space<vmem>>, vector<1x256x64xbf16>
    %226 = vector.shape_cast %225 : vector<1x256x64xbf16> to vector<256x64xbf16>
    %cst_152 = arith.constant dense<0.000000e+00> : vector<16x64xf32>
    %227 = tpu.matmul %224, %226, %cst_152 {dimension_numbers = #tpu.dot_dimension_numbers<[1], [0], [0], [1], [0, 0, 1, 1], [], []>} : vector<16x256xbf16>, vector<256x64xbf16>, vector<16x64xf32> -> vector<16x64xf32>
    %228 = arith.addf %211, %227 : vector<16x64xf32>
    %229 = vector.extract_strided_slice %207 {offsets = [80, 0], sizes = [16, 256], strides = [1, 1]} : vector<400x256xbf16> to vector<16x256xbf16>
    %c5_153 = arith.constant 5 : index
    %c0_154 = arith.constant 0 : index
    %c0_155 = arith.constant 0 : index
    %230 = vector.load %arg3[%c5_153, %c0_154, %c0_155] : memref<25x256x64xbf16, #tpu.memory_space<vmem>>, vector<1x256x64xbf16>
    %231 = vector.shape_cast %230 : vector<1x256x64xbf16> to vector<256x64xbf16>
    %cst_156 = arith.constant dense<0.000000e+00> : vector<16x64xf32>
    %232 = tpu.matmul %229, %231, %cst_156 {dimension_numbers = #tpu.dot_dimension_numbers<[1], [0], [0], [1], [0, 0, 1, 1], [], []>} : vector<16x256xbf16>, vector<256x64xbf16>, vector<16x64xf32> -> vector<16x64xf32>
    %233 = arith.addf %215, %232 : vector<16x64xf32>
    %234 = vector.extract_strided_slice %207 {offsets = [96, 0], sizes = [16, 256], strides = [1, 1]} : vector<400x256xbf16> to vector<16x256xbf16>
    %c6_157 = arith.constant 6 : index
    %c0_158 = arith.constant 0 : index
    %c0_159 = arith.constant 0 : index
    %235 = vector.load %arg3[%c6_157, %c0_158, %c0_159] : memref<25x256x64xbf16, #tpu.memory_space<vmem>>, vector<1x256x64xbf16>
    %236 = vector.shape_cast %235 : vector<1x256x64xbf16> to vector<256x64xbf16>
    %cst_160 = arith.constant dense<0.000000e+00> : vector<16x64xf32>
    %237 = tpu.matmul %234, %236, %cst_160 {dimension_numbers = #tpu.dot_dimension_numbers<[1], [0], [0], [1], [0, 0, 1, 1], [], []>} : vector<16x256xbf16>, vector<256x64xbf16>, vector<16x64xf32> -> vector<16x64xf32>
    %238 = arith.addf %219, %237 : vector<16x64xf32>
    %239 = vector.extract_strided_slice %207 {offsets = [112, 0], sizes = [16, 256], strides = [1, 1]} : vector<400x256xbf16> to vector<16x256xbf16>
    %c7_161 = arith.constant 7 : index
    %c0_162 = arith.constant 0 : index
    %c0_163 = arith.constant 0 : index
    %240 = vector.load %arg3[%c7_161, %c0_162, %c0_163] : memref<25x256x64xbf16, #tpu.memory_space<vmem>>, vector<1x256x64xbf16>
    %241 = vector.shape_cast %240 : vector<1x256x64xbf16> to vector<256x64xbf16>
    %cst_164 = arith.constant dense<0.000000e+00> : vector<16x64xf32>
    %242 = tpu.matmul %239, %241, %cst_164 {dimension_numbers = #tpu.dot_dimension_numbers<[1], [0], [0], [1], [0, 0, 1, 1], [], []>} : vector<16x256xbf16>, vector<256x64xbf16>, vector<16x64xf32> -> vector<16x64xf32>
    %243 = arith.addf %223, %242 : vector<16x64xf32>
    %244 = vector.extract_strided_slice %207 {offsets = [128, 0], sizes = [16, 256], strides = [1, 1]} : vector<400x256xbf16> to vector<16x256xbf16>
    %c8_165 = arith.constant 8 : index
    %c0_166 = arith.constant 0 : index
    %c0_167 = arith.constant 0 : index
    %245 = vector.load %arg3[%c8_165, %c0_166, %c0_167] : memref<25x256x64xbf16, #tpu.memory_space<vmem>>, vector<1x256x64xbf16>
    %246 = vector.shape_cast %245 : vector<1x256x64xbf16> to vector<256x64xbf16>
    %cst_168 = arith.constant dense<0.000000e+00> : vector<16x64xf32>
    %247 = tpu.matmul %244, %246, %cst_168 {dimension_numbers = #tpu.dot_dimension_numbers<[1], [0], [0], [1], [0, 0, 1, 1], [], []>} : vector<16x256xbf16>, vector<256x64xbf16>, vector<16x64xf32> -> vector<16x64xf32>
    %248 = arith.addf %228, %247 : vector<16x64xf32>
    %249 = vector.extract_strided_slice %207 {offsets = [144, 0], sizes = [16, 256], strides = [1, 1]} : vector<400x256xbf16> to vector<16x256xbf16>
    %c9_169 = arith.constant 9 : index
    %c0_170 = arith.constant 0 : index
    %c0_171 = arith.constant 0 : index
    %250 = vector.load %arg3[%c9_169, %c0_170, %c0_171] : memref<25x256x64xbf16, #tpu.memory_space<vmem>>, vector<1x256x64xbf16>
    %251 = vector.shape_cast %250 : vector<1x256x64xbf16> to vector<256x64xbf16>
    %cst_172 = arith.constant dense<0.000000e+00> : vector<16x64xf32>
    %252 = tpu.matmul %249, %251, %cst_172 {dimension_numbers = #tpu.dot_dimension_numbers<[1], [0], [0], [1], [0, 0, 1, 1], [], []>} : vector<16x256xbf16>, vector<256x64xbf16>, vector<16x64xf32> -> vector<16x64xf32>
    %253 = arith.addf %233, %252 : vector<16x64xf32>
    %254 = vector.extract_strided_slice %207 {offsets = [160, 0], sizes = [16, 256], strides = [1, 1]} : vector<400x256xbf16> to vector<16x256xbf16>
    %c10_173 = arith.constant 10 : index
    %c0_174 = arith.constant 0 : index
    %c0_175 = arith.constant 0 : index
    %255 = vector.load %arg3[%c10_173, %c0_174, %c0_175] : memref<25x256x64xbf16, #tpu.memory_space<vmem>>, vector<1x256x64xbf16>
    %256 = vector.shape_cast %255 : vector<1x256x64xbf16> to vector<256x64xbf16>
    %cst_176 = arith.constant dense<0.000000e+00> : vector<16x64xf32>
    %257 = tpu.matmul %254, %256, %cst_176 {dimension_numbers = #tpu.dot_dimension_numbers<[1], [0], [0], [1], [0, 0, 1, 1], [], []>} : vector<16x256xbf16>, vector<256x64xbf16>, vector<16x64xf32> -> vector<16x64xf32>
    %258 = arith.addf %238, %257 : vector<16x64xf32>
    %259 = vector.extract_strided_slice %207 {offsets = [176, 0], sizes = [16, 256], strides = [1, 1]} : vector<400x256xbf16> to vector<16x256xbf16>
    %c11_177 = arith.constant 11 : index
    %c0_178 = arith.constant 0 : index
    %c0_179 = arith.constant 0 : index
    %260 = vector.load %arg3[%c11_177, %c0_178, %c0_179] : memref<25x256x64xbf16, #tpu.memory_space<vmem>>, vector<1x256x64xbf16>
    %261 = vector.shape_cast %260 : vector<1x256x64xbf16> to vector<256x64xbf16>
    %cst_180 = arith.constant dense<0.000000e+00> : vector<16x64xf32>
    %262 = tpu.matmul %259, %261, %cst_180 {dimension_numbers = #tpu.dot_dimension_numbers<[1], [0], [0], [1], [0, 0, 1, 1], [], []>} : vector<16x256xbf16>, vector<256x64xbf16>, vector<16x64xf32> -> vector<16x64xf32>
    %263 = arith.addf %243, %262 : vector<16x64xf32>
    %264 = vector.extract_strided_slice %207 {offsets = [192, 0], sizes = [16, 256], strides = [1, 1]} : vector<400x256xbf16> to vector<16x256xbf16>
    %c12_181 = arith.constant 12 : index
    %c0_182 = arith.constant 0 : index
    %c0_183 = arith.constant 0 : index
    %265 = vector.load %arg3[%c12_181, %c0_182, %c0_183] : memref<25x256x64xbf16, #tpu.memory_space<vmem>>, vector<1x256x64xbf16>
    %266 = vector.shape_cast %265 : vector<1x256x64xbf16> to vector<256x64xbf16>
    %cst_184 = arith.constant dense<0.000000e+00> : vector<16x64xf32>
    %267 = tpu.matmul %264, %266, %cst_184 {dimension_numbers = #tpu.dot_dimension_numbers<[1], [0], [0], [1], [0, 0, 1, 1], [], []>} : vector<16x256xbf16>, vector<256x64xbf16>, vector<16x64xf32> -> vector<16x64xf32>
    %268 = arith.addf %248, %267 : vector<16x64xf32>
    %269 = vector.extract_strided_slice %207 {offsets = [208, 0], sizes = [16, 256], strides = [1, 1]} : vector<400x256xbf16> to vector<16x256xbf16>
    %c13_185 = arith.constant 13 : index
    %c0_186 = arith.constant 0 : index
    %c0_187 = arith.constant 0 : index
    %270 = vector.load %arg3[%c13_185, %c0_186, %c0_187] : memref<25x256x64xbf16, #tpu.memory_space<vmem>>, vector<1x256x64xbf16>
    %271 = vector.shape_cast %270 : vector<1x256x64xbf16> to vector<256x64xbf16>
    %cst_188 = arith.constant dense<0.000000e+00> : vector<16x64xf32>
    %272 = tpu.matmul %269, %271, %cst_188 {dimension_numbers = #tpu.dot_dimension_numbers<[1], [0], [0], [1], [0, 0, 1, 1], [], []>} : vector<16x256xbf16>, vector<256x64xbf16>, vector<16x64xf32> -> vector<16x64xf32>
    %273 = arith.addf %253, %272 : vector<16x64xf32>
    %274 = vector.extract_strided_slice %207 {offsets = [224, 0], sizes = [16, 256], strides = [1, 1]} : vector<400x256xbf16> to vector<16x256xbf16>
    %c14_189 = arith.constant 14 : index
    %c0_190 = arith.constant 0 : index
    %c0_191 = arith.constant 0 : index
    %275 = vector.load %arg3[%c14_189, %c0_190, %c0_191] : memref<25x256x64xbf16, #tpu.memory_space<vmem>>, vector<1x256x64xbf16>
    %276 = vector.shape_cast %275 : vector<1x256x64xbf16> to vector<256x64xbf16>
    %cst_192 = arith.constant dense<0.000000e+00> : vector<16x64xf32>
    %277 = tpu.matmul %274, %276, %cst_192 {dimension_numbers = #tpu.dot_dimension_numbers<[1], [0], [0], [1], [0, 0, 1, 1], [], []>} : vector<16x256xbf16>, vector<256x64xbf16>, vector<16x64xf32> -> vector<16x64xf32>
    %278 = arith.addf %258, %277 : vector<16x64xf32>
    %279 = vector.extract_strided_slice %207 {offsets = [240, 0], sizes = [16, 256], strides = [1, 1]} : vector<400x256xbf16> to vector<16x256xbf16>
    %c15_193 = arith.constant 15 : index
    %c0_194 = arith.constant 0 : index
    %c0_195 = arith.constant 0 : index
    %280 = vector.load %arg3[%c15_193, %c0_194, %c0_195] : memref<25x256x64xbf16, #tpu.memory_space<vmem>>, vector<1x256x64xbf16>
    %281 = vector.shape_cast %280 : vector<1x256x64xbf16> to vector<256x64xbf16>
    %cst_196 = arith.constant dense<0.000000e+00> : vector<16x64xf32>
    %282 = tpu.matmul %279, %281, %cst_196 {dimension_numbers = #tpu.dot_dimension_numbers<[1], [0], [0], [1], [0, 0, 1, 1], [], []>} : vector<16x256xbf16>, vector<256x64xbf16>, vector<16x64xf32> -> vector<16x64xf32>
    %283 = arith.addf %263, %282 : vector<16x64xf32>
    %284 = vector.extract_strided_slice %207 {offsets = [256, 0], sizes = [16, 256], strides = [1, 1]} : vector<400x256xbf16> to vector<16x256xbf16>
    %c16_197 = arith.constant 16 : index
    %c0_198 = arith.constant 0 : index
    %c0_199 = arith.constant 0 : index
    %285 = vector.load %arg3[%c16_197, %c0_198, %c0_199] : memref<25x256x64xbf16, #tpu.memory_space<vmem>>, vector<1x256x64xbf16>
    %286 = vector.shape_cast %285 : vector<1x256x64xbf16> to vector<256x64xbf16>
    %cst_200 = arith.constant dense<0.000000e+00> : vector<16x64xf32>
    %287 = tpu.matmul %284, %286, %cst_200 {dimension_numbers = #tpu.dot_dimension_numbers<[1], [0], [0], [1], [0, 0, 1, 1], [], []>} : vector<16x256xbf16>, vector<256x64xbf16>, vector<16x64xf32> -> vector<16x64xf32>
    %288 = arith.addf %268, %287 : vector<16x64xf32>
    %289 = vector.extract_strided_slice %207 {offsets = [272, 0], sizes = [16, 256], strides = [1, 1]} : vector<400x256xbf16> to vector<16x256xbf16>
    %c17_201 = arith.constant 17 : index
    %c0_202 = arith.constant 0 : index
    %c0_203 = arith.constant 0 : index
    %290 = vector.load %arg3[%c17_201, %c0_202, %c0_203] : memref<25x256x64xbf16, #tpu.memory_space<vmem>>, vector<1x256x64xbf16>
    %291 = vector.shape_cast %290 : vector<1x256x64xbf16> to vector<256x64xbf16>
    %cst_204 = arith.constant dense<0.000000e+00> : vector<16x64xf32>
    %292 = tpu.matmul %289, %291, %cst_204 {dimension_numbers = #tpu.dot_dimension_numbers<[1], [0], [0], [1], [0, 0, 1, 1], [], []>} : vector<16x256xbf16>, vector<256x64xbf16>, vector<16x64xf32> -> vector<16x64xf32>
    %293 = arith.addf %273, %292 : vector<16x64xf32>
    %294 = vector.extract_strided_slice %207 {offsets = [288, 0], sizes = [16, 256], strides = [1, 1]} : vector<400x256xbf16> to vector<16x256xbf16>
    %c18_205 = arith.constant 18 : index
    %c0_206 = arith.constant 0 : index
    %c0_207 = arith.constant 0 : index
    %295 = vector.load %arg3[%c18_205, %c0_206, %c0_207] : memref<25x256x64xbf16, #tpu.memory_space<vmem>>, vector<1x256x64xbf16>
    %296 = vector.shape_cast %295 : vector<1x256x64xbf16> to vector<256x64xbf16>
    %cst_208 = arith.constant dense<0.000000e+00> : vector<16x64xf32>
    %297 = tpu.matmul %294, %296, %cst_208 {dimension_numbers = #tpu.dot_dimension_numbers<[1], [0], [0], [1], [0, 0, 1, 1], [], []>} : vector<16x256xbf16>, vector<256x64xbf16>, vector<16x64xf32> -> vector<16x64xf32>
    %298 = arith.addf %278, %297 : vector<16x64xf32>
    %299 = vector.extract_strided_slice %207 {offsets = [304, 0], sizes = [16, 256], strides = [1, 1]} : vector<400x256xbf16> to vector<16x256xbf16>
    %c19_209 = arith.constant 19 : index
    %c0_210 = arith.constant 0 : index
    %c0_211 = arith.constant 0 : index
    %300 = vector.load %arg3[%c19_209, %c0_210, %c0_211] : memref<25x256x64xbf16, #tpu.memory_space<vmem>>, vector<1x256x64xbf16>
    %301 = vector.shape_cast %300 : vector<1x256x64xbf16> to vector<256x64xbf16>
    %cst_212 = arith.constant dense<0.000000e+00> : vector<16x64xf32>
    %302 = tpu.matmul %299, %301, %cst_212 {dimension_numbers = #tpu.dot_dimension_numbers<[1], [0], [0], [1], [0, 0, 1, 1], [], []>} : vector<16x256xbf16>, vector<256x64xbf16>, vector<16x64xf32> -> vector<16x64xf32>
    %303 = arith.addf %283, %302 : vector<16x64xf32>
    %304 = vector.extract_strided_slice %207 {offsets = [320, 0], sizes = [16, 256], strides = [1, 1]} : vector<400x256xbf16> to vector<16x256xbf16>
    %c20_213 = arith.constant 20 : index
    %c0_214 = arith.constant 0 : index
    %c0_215 = arith.constant 0 : index
    %305 = vector.load %arg3[%c20_213, %c0_214, %c0_215] : memref<25x256x64xbf16, #tpu.memory_space<vmem>>, vector<1x256x64xbf16>
    %306 = vector.shape_cast %305 : vector<1x256x64xbf16> to vector<256x64xbf16>
    %cst_216 = arith.constant dense<0.000000e+00> : vector<16x64xf32>
    %307 = tpu.matmul %304, %306, %cst_216 {dimension_numbers = #tpu.dot_dimension_numbers<[1], [0], [0], [1], [0, 0, 1, 1], [], []>} : vector<16x256xbf16>, vector<256x64xbf16>, vector<16x64xf32> -> vector<16x64xf32>
    %308 = arith.addf %288, %307 : vector<16x64xf32>
    %309 = vector.extract_strided_slice %207 {offsets = [336, 0], sizes = [16, 256], strides = [1, 1]} : vector<400x256xbf16> to vector<16x256xbf16>
    %c21_217 = arith.constant 21 : index
    %c0_218 = arith.constant 0 : index
    %c0_219 = arith.constant 0 : index
    %310 = vector.load %arg3[%c21_217, %c0_218, %c0_219] : memref<25x256x64xbf16, #tpu.memory_space<vmem>>, vector<1x256x64xbf16>
    %311 = vector.shape_cast %310 : vector<1x256x64xbf16> to vector<256x64xbf16>
    %cst_220 = arith.constant dense<0.000000e+00> : vector<16x64xf32>
    %312 = tpu.matmul %309, %311, %cst_220 {dimension_numbers = #tpu.dot_dimension_numbers<[1], [0], [0], [1], [0, 0, 1, 1], [], []>} : vector<16x256xbf16>, vector<256x64xbf16>, vector<16x64xf32> -> vector<16x64xf32>
    %313 = arith.addf %293, %312 : vector<16x64xf32>
    %314 = vector.extract_strided_slice %207 {offsets = [352, 0], sizes = [16, 256], strides = [1, 1]} : vector<400x256xbf16> to vector<16x256xbf16>
    %c22_221 = arith.constant 22 : index
    %c0_222 = arith.constant 0 : index
    %c0_223 = arith.constant 0 : index
    %315 = vector.load %arg3[%c22_221, %c0_222, %c0_223] : memref<25x256x64xbf16, #tpu.memory_space<vmem>>, vector<1x256x64xbf16>
    %316 = vector.shape_cast %315 : vector<1x256x64xbf16> to vector<256x64xbf16>
    %cst_224 = arith.constant dense<0.000000e+00> : vector<16x64xf32>
    %317 = tpu.matmul %314, %316, %cst_224 {dimension_numbers = #tpu.dot_dimension_numbers<[1], [0], [0], [1], [0, 0, 1, 1], [], []>} : vector<16x256xbf16>, vector<256x64xbf16>, vector<16x64xf32> -> vector<16x64xf32>
    %318 = arith.addf %298, %317 : vector<16x64xf32>
    %319 = vector.extract_strided_slice %207 {offsets = [368, 0], sizes = [16, 256], strides = [1, 1]} : vector<400x256xbf16> to vector<16x256xbf16>
    %c23_225 = arith.constant 23 : index
    %c0_226 = arith.constant 0 : index
    %c0_227 = arith.constant 0 : index
    %320 = vector.load %arg3[%c23_225, %c0_226, %c0_227] : memref<25x256x64xbf16, #tpu.memory_space<vmem>>, vector<1x256x64xbf16>
    %321 = vector.shape_cast %320 : vector<1x256x64xbf16> to vector<256x64xbf16>
    %cst_228 = arith.constant dense<0.000000e+00> : vector<16x64xf32>
    %322 = tpu.matmul %319, %321, %cst_228 {dimension_numbers = #tpu.dot_dimension_numbers<[1], [0], [0], [1], [0, 0, 1, 1], [], []>} : vector<16x256xbf16>, vector<256x64xbf16>, vector<16x64xf32> -> vector<16x64xf32>
    %323 = arith.addf %303, %322 : vector<16x64xf32>
    %324 = vector.extract_strided_slice %207 {offsets = [384, 0], sizes = [16, 256], strides = [1, 1]} : vector<400x256xbf16> to vector<16x256xbf16>
    %c24_229 = arith.constant 24 : index
    %c0_230 = arith.constant 0 : index
    %c0_231 = arith.constant 0 : index
    %325 = vector.load %arg3[%c24_229, %c0_230, %c0_231] : memref<25x256x64xbf16, #tpu.memory_space<vmem>>, vector<1x256x64xbf16>
    %326 = vector.shape_cast %325 : vector<1x256x64xbf16> to vector<256x64xbf16>
    %cst_232 = arith.constant dense<0.000000e+00> : vector<16x64xf32>
    %327 = tpu.matmul %324, %326, %cst_232 {dimension_numbers = #tpu.dot_dimension_numbers<[1], [0], [0], [1], [0, 0, 1, 1], [], []>} : vector<16x256xbf16>, vector<256x64xbf16>, vector<16x64xf32> -> vector<16x64xf32>
    %328 = arith.addf %308, %327 : vector<16x64xf32>
    %329 = arith.addf %328, %313 : vector<16x64xf32>
    %330 = arith.addf %329, %318 : vector<16x64xf32>
    %331 = arith.addf %330, %323 : vector<16x64xf32>
    %332 = vector.shape_cast %331 : vector<16x64xf32> to vector<1x16x64xf32>
    %cst_233 = arith.constant dense<0xFF800000> : vector<1xf32>
    %333 = vector.multi_reduction <maximumf>, %332, %cst_233 [1, 2] : vector<1x16x64xf32> to vector<1xf32>
    %334 = vector.shape_cast %333 : vector<1xf32> to vector<1x1x1xf32>
    %335 = vector.extract %334[0, 0, 0] : f32 from vector<1x1x1xf32>
    %336 = vector.broadcast %335 : f32 to vector<16x64xf32>
    %337 = arith.subf %331, %336 : vector<16x64xf32>
    %338 = math.exp %337 : vector<16x64xf32>
    %339 = arith.truncf %338 : vector<16x64xf32> to vector<16x64xbf16>
    %c0_234 = arith.constant 0 : index
    %c0_235 = arith.constant 0 : index
    %340 = vector.load %arg11[%c0_234, %c0_235] : memref<16x16xbf16, #tpu.memory_space<vmem>>, vector<16x16xbf16>
    %cst_236 = arith.constant dense<0.000000e+00> : vector<16x64xf32>
    %341 = tpu.matmul %340, %339, %cst_236 {dimension_numbers = #tpu.dot_dimension_numbers<[1], [0], [0], [1], [0, 0, 1, 1], [], []>} : vector<16x16xbf16>, vector<16x64xbf16>, vector<16x64xf32> -> vector<16x64xf32>
    %c0_237 = arith.constant 0 : index
    %c0_238 = arith.constant 0 : index
    %342 = vector.load %arg16[%c0_237, %c0_238] : memref<64x8xbf16, #tpu.memory_space<vmem>>, vector<64x8xbf16>
    %cst_239 = arith.constant dense<0.000000e+00> : vector<16x8xf32>
    %343 = tpu.matmul %339, %342, %cst_239 {dimension_numbers = #tpu.dot_dimension_numbers<[1], [0], [0], [1], [0, 0, 1, 1], [], []>} : vector<16x64xbf16>, vector<64x8xbf16>, vector<16x8xf32> -> vector<16x8xf32>
    %c0_240 = arith.constant 0 : index
    %c0_241 = arith.constant 0 : index
    %344 = vector.load %arg17[%c0_240, %c0_241] : memref<8x64xbf16, #tpu.memory_space<vmem>>, vector<8x64xbf16>
    %345 = arith.truncf %343 : vector<16x8xf32> to vector<16x8xbf16>
    %cst_242 = arith.constant dense<0.000000e+00> : vector<16x64xf32>
    %346 = tpu.matmul %345, %344, %cst_242 {dimension_numbers = #tpu.dot_dimension_numbers<[1], [0], [0], [1], [0, 0, 1, 1], [], []>} : vector<16x8xbf16>, vector<8x64xbf16>, vector<16x64xf32> -> vector<16x64xf32>
    %c0_243 = arith.constant 0 : index
    %c0_244 = arith.constant 0 : index
    %347 = vector.load %arg18[%c0_243, %c0_244] : memref<64x8xbf16, #tpu.memory_space<vmem>>, vector<64x8xbf16>
    %cst_245 = arith.constant dense<0.000000e+00> : vector<16x8xf32>
    %348 = tpu.matmul %339, %347, %cst_245 {dimension_numbers = #tpu.dot_dimension_numbers<[1], [0], [0], [1], [0, 0, 1, 1], [], []>} : vector<16x64xbf16>, vector<64x8xbf16>, vector<16x8xf32> -> vector<16x8xf32>
    %c0_246 = arith.constant 0 : index
    %c0_247 = arith.constant 0 : index
    %349 = vector.load %arg19[%c0_246, %c0_247] : memref<8x64xbf16, #tpu.memory_space<vmem>>, vector<8x64xbf16>
    %350 = arith.truncf %348 : vector<16x8xf32> to vector<16x8xbf16>
    %cst_248 = arith.constant dense<0.000000e+00> : vector<16x64xf32>
    %351 = tpu.matmul %350, %349, %cst_248 {dimension_numbers = #tpu.dot_dimension_numbers<[1], [0], [0], [1], [0, 0, 1, 1], [], []>} : vector<16x8xbf16>, vector<8x64xbf16>, vector<16x64xf32> -> vector<16x64xf32>
    %352 = tpu.reciprocal %341 {approx = true} : vector<16x64xf32> -> vector<16x64xf32>
    %cst_249 = arith.constant 8.000000e-01 : f32
    %353 = vector.broadcast %cst_249 : f32 to vector<16x64xf32>
    %354 = arith.mulf %353, %352 : vector<16x64xf32>
    %355 = tpu.reciprocal %346 {approx = true} : vector<16x64xf32> -> vector<16x64xf32>
    %356 = tpu.reciprocal %351 {approx = true} : vector<16x64xf32> -> vector<16x64xf32>
    %357 = arith.addf %355, %356 : vector<16x64xf32>
    %cst_250 = arith.constant 1.000000e-01 : f32
    %358 = vector.broadcast %cst_250 : f32 to vector<16x64xf32>
    %359 = arith.mulf %358, %357 : vector<16x64xf32>
    %360 = arith.addf %354, %359 : vector<16x64xf32>
    %361 = arith.mulf %338, %360 : vector<16x64xf32>
    %cst_251 = arith.constant dense<0.000000e+00> : vector<16xf32>
    %362 = vector.multi_reduction <add>, %361, %cst_251 [1] : vector<16x64xf32> to vector<16xf32>
    %363 = vector.shape_cast %362 : vector<16xf32> to vector<16x1xf32>
    %cst_252 = arith.constant 1.562500e-02 : f32
    %364 = vector.broadcast %cst_252 : f32 to vector<16x1xf32>
    %365 = arith.mulf %363, %364 : vector<16x1xf32>
    %c0_253 = arith.constant 0 : index
    %c0_254 = arith.constant 0 : index
    %366 = vector.load %arg22[%c0_253, %c0_254] : memref<16x16xbf16, #tpu.memory_space<vmem>>, vector<16x16xbf16>
    %367 = arith.truncf %365 : vector<16x1xf32> to vector<16x1xbf16>
    %cst_255 = arith.constant dense<0.000000e+00> : vector<16x1xf32>
    %368 = tpu.matmul %366, %367, %cst_255 {dimension_numbers = #tpu.dot_dimension_numbers<[1], [0], [0], [1], [0, 0, 1, 1], [], []>} : vector<16x16xbf16>, vector<16x1xbf16>, vector<16x1xf32> -> vector<16x1xf32>
    %cst_256 = arith.constant 0.000000e+00 : f32
    %369 = vector.broadcast %cst_256 : f32 to vector<16x1xf32>
    %370 = arith.maximumf %368, %369 : vector<16x1xf32>
    %c0_257 = arith.constant 0 : index
    %c0_258 = arith.constant 0 : index
    %371 = vector.load %arg23[%c0_257, %c0_258] : memref<16x16xbf16, #tpu.memory_space<vmem>>, vector<16x16xbf16>
    %372 = arith.truncf %370 : vector<16x1xf32> to vector<16x1xbf16>
    %cst_259 = arith.constant dense<0.000000e+00> : vector<16x1xf32>
    %373 = tpu.matmul %371, %372, %cst_259 {dimension_numbers = #tpu.dot_dimension_numbers<[1], [0], [0], [1], [0, 0, 1, 1], [], []>} : vector<16x16xbf16>, vector<16x1xbf16>, vector<16x1xf32> -> vector<16x1xf32>
    %cst_260 = arith.constant 0.000000e+00 : f32
    %374 = vector.broadcast %cst_260 : f32 to vector<16x1xf32>
    %375 = arith.subf %374, %373 : vector<16x1xf32>
    %376 = math.exp %375 : vector<16x1xf32>
    %cst_261 = arith.constant 1.000000e+00 : f32
    %377 = vector.broadcast %cst_261 : f32 to vector<16x1xf32>
    %378 = arith.addf %377, %376 : vector<16x1xf32>
    %379 = tpu.reciprocal %378 {approx = true} : vector<16x1xf32> -> vector<16x1xf32>
    %380 = vector.broadcast %379 : vector<16x1xf32> to vector<16x64xf32>
    %381 = arith.mulf %361, %380 : vector<16x64xf32>
    %c0_262 = arith.constant 0 : index
    %c0_263 = arith.constant 0 : index
    %382 = vector.load %arg9[%c0_262, %c0_263] : memref<400x16xbf16, #tpu.memory_space<vmem>>, vector<400x16xbf16>
    %383 = arith.truncf %381 : vector<16x64xf32> to vector<16x64xbf16>
    %cst_264 = arith.constant dense<0.000000e+00> : vector<400x64xf32>
    %384 = tpu.matmul %382, %383, %cst_264 {dimension_numbers = #tpu.dot_dimension_numbers<[1], [0], [0], [1], [0, 0, 1, 1], [], []>} : vector<400x16xbf16>, vector<16x64xbf16>, vector<400x64xf32> -> vector<400x64xf32>
    %385 = arith.truncf %384 : vector<400x64xf32> to vector<400x64xbf16>
    %386 = vector.extract_strided_slice %385 {offsets = [0, 0], sizes = [16, 64], strides = [1, 1]} : vector<400x64xbf16> to vector<16x64xbf16>
    %c0_265 = arith.constant 0 : index
    %c0_266 = arith.constant 0 : index
    %c0_267 = arith.constant 0 : index
    %387 = vector.load %arg8[%c0_265, %c0_266, %c0_267] : memref<25x64x4xbf16, #tpu.memory_space<vmem>>, vector<1x64x4xbf16>
    %388 = vector.shape_cast %387 : vector<1x64x4xbf16> to vector<64x4xbf16>
    %cst_268 = arith.constant dense<0.000000e+00> : vector<16x4xf32>
    %389 = tpu.matmul %386, %388, %cst_268 {dimension_numbers = #tpu.dot_dimension_numbers<[1], [0], [0], [1], [0, 0, 1, 1], [], []>} : vector<16x64xbf16>, vector<64x4xbf16>, vector<16x4xf32> -> vector<16x4xf32>
    %390 = vector.extract_strided_slice %385 {offsets = [16, 0], sizes = [16, 64], strides = [1, 1]} : vector<400x64xbf16> to vector<16x64xbf16>
    %c1_269 = arith.constant 1 : index
    %c0_270 = arith.constant 0 : index
    %c0_271 = arith.constant 0 : index
    %391 = vector.load %arg8[%c1_269, %c0_270, %c0_271] : memref<25x64x4xbf16, #tpu.memory_space<vmem>>, vector<1x64x4xbf16>
    %392 = vector.shape_cast %391 : vector<1x64x4xbf16> to vector<64x4xbf16>
    %cst_272 = arith.constant dense<0.000000e+00> : vector<16x4xf32>
    %393 = tpu.matmul %390, %392, %cst_272 {dimension_numbers = #tpu.dot_dimension_numbers<[1], [0], [0], [1], [0, 0, 1, 1], [], []>} : vector<16x64xbf16>, vector<64x4xbf16>, vector<16x4xf32> -> vector<16x4xf32>
    %394 = vector.extract_strided_slice %385 {offsets = [32, 0], sizes = [16, 64], strides = [1, 1]} : vector<400x64xbf16> to vector<16x64xbf16>
    %c2_273 = arith.constant 2 : index
    %c0_274 = arith.constant 0 : index
    %c0_275 = arith.constant 0 : index
    %395 = vector.load %arg8[%c2_273, %c0_274, %c0_275] : memref<25x64x4xbf16, #tpu.memory_space<vmem>>, vector<1x64x4xbf16>
    %396 = vector.shape_cast %395 : vector<1x64x4xbf16> to vector<64x4xbf16>
    %cst_276 = arith.constant dense<0.000000e+00> : vector<16x4xf32>
    %397 = tpu.matmul %394, %396, %cst_276 {dimension_numbers = #tpu.dot_dimension_numbers<[1], [0], [0], [1], [0, 0, 1, 1], [], []>} : vector<16x64xbf16>, vector<64x4xbf16>, vector<16x4xf32> -> vector<16x4xf32>
    %398 = vector.extract_strided_slice %385 {offsets = [48, 0], sizes = [16, 64], strides = [1, 1]} : vector<400x64xbf16> to vector<16x64xbf16>
    %c3_277 = arith.constant 3 : index
    %c0_278 = arith.constant 0 : index
    %c0_279 = arith.constant 0 : index
    %399 = vector.load %arg8[%c3_277, %c0_278, %c0_279] : memref<25x64x4xbf16, #tpu.memory_space<vmem>>, vector<1x64x4xbf16>
    %400 = vector.shape_cast %399 : vector<1x64x4xbf16> to vector<64x4xbf16>
    %cst_280 = arith.constant dense<0.000000e+00> : vector<16x4xf32>
    %401 = tpu.matmul %398, %400, %cst_280 {dimension_numbers = #tpu.dot_dimension_numbers<[1], [0], [0], [1], [0, 0, 1, 1], [], []>} : vector<16x64xbf16>, vector<64x4xbf16>, vector<16x4xf32> -> vector<16x4xf32>
    %402 = vector.extract_strided_slice %385 {offsets = [64, 0], sizes = [16, 64], strides = [1, 1]} : vector<400x64xbf16> to vector<16x64xbf16>
    %c4_281 = arith.constant 4 : index
    %c0_282 = arith.constant 0 : index
    %c0_283 = arith.constant 0 : index
    %403 = vector.load %arg8[%c4_281, %c0_282, %c0_283] : memref<25x64x4xbf16, #tpu.memory_space<vmem>>, vector<1x64x4xbf16>
    %404 = vector.shape_cast %403 : vector<1x64x4xbf16> to vector<64x4xbf16>
    %cst_284 = arith.constant dense<0.000000e+00> : vector<16x4xf32>
    %405 = tpu.matmul %402, %404, %cst_284 {dimension_numbers = #tpu.dot_dimension_numbers<[1], [0], [0], [1], [0, 0, 1, 1], [], []>} : vector<16x64xbf16>, vector<64x4xbf16>, vector<16x4xf32> -> vector<16x4xf32>
    %406 = arith.addf %389, %405 : vector<16x4xf32>
    %407 = vector.extract_strided_slice %385 {offsets = [80, 0], sizes = [16, 64], strides = [1, 1]} : vector<400x64xbf16> to vector<16x64xbf16>
    %c5_285 = arith.constant 5 : index
    %c0_286 = arith.constant 0 : index
    %c0_287 = arith.constant 0 : index
    %408 = vector.load %arg8[%c5_285, %c0_286, %c0_287] : memref<25x64x4xbf16, #tpu.memory_space<vmem>>, vector<1x64x4xbf16>
    %409 = vector.shape_cast %408 : vector<1x64x4xbf16> to vector<64x4xbf16>
    %cst_288 = arith.constant dense<0.000000e+00> : vector<16x4xf32>
    %410 = tpu.matmul %407, %409, %cst_288 {dimension_numbers = #tpu.dot_dimension_numbers<[1], [0], [0], [1], [0, 0, 1, 1], [], []>} : vector<16x64xbf16>, vector<64x4xbf16>, vector<16x4xf32> -> vector<16x4xf32>
    %411 = arith.addf %393, %410 : vector<16x4xf32>
    %412 = vector.extract_strided_slice %385 {offsets = [96, 0], sizes = [16, 64], strides = [1, 1]} : vector<400x64xbf16> to vector<16x64xbf16>
    %c6_289 = arith.constant 6 : index
    %c0_290 = arith.constant 0 : index
    %c0_291 = arith.constant 0 : index
    %413 = vector.load %arg8[%c6_289, %c0_290, %c0_291] : memref<25x64x4xbf16, #tpu.memory_space<vmem>>, vector<1x64x4xbf16>
    %414 = vector.shape_cast %413 : vector<1x64x4xbf16> to vector<64x4xbf16>
    %cst_292 = arith.constant dense<0.000000e+00> : vector<16x4xf32>
    %415 = tpu.matmul %412, %414, %cst_292 {dimension_numbers = #tpu.dot_dimension_numbers<[1], [0], [0], [1], [0, 0, 1, 1], [], []>} : vector<16x64xbf16>, vector<64x4xbf16>, vector<16x4xf32> -> vector<16x4xf32>
    %416 = arith.addf %397, %415 : vector<16x4xf32>
    %417 = vector.extract_strided_slice %385 {offsets = [112, 0], sizes = [16, 64], strides = [1, 1]} : vector<400x64xbf16> to vector<16x64xbf16>
    %c7_293 = arith.constant 7 : index
    %c0_294 = arith.constant 0 : index
    %c0_295 = arith.constant 0 : index
    %418 = vector.load %arg8[%c7_293, %c0_294, %c0_295] : memref<25x64x4xbf16, #tpu.memory_space<vmem>>, vector<1x64x4xbf16>
    %419 = vector.shape_cast %418 : vector<1x64x4xbf16> to vector<64x4xbf16>
    %cst_296 = arith.constant dense<0.000000e+00> : vector<16x4xf32>
    %420 = tpu.matmul %417, %419, %cst_296 {dimension_numbers = #tpu.dot_dimension_numbers<[1], [0], [0], [1], [0, 0, 1, 1], [], []>} : vector<16x64xbf16>, vector<64x4xbf16>, vector<16x4xf32> -> vector<16x4xf32>
    %421 = arith.addf %401, %420 : vector<16x4xf32>
    %422 = vector.extract_strided_slice %385 {offsets = [128, 0], sizes = [16, 64], strides = [1, 1]} : vector<400x64xbf16> to vector<16x64xbf16>
    %c8_297 = arith.constant 8 : index
    %c0_298 = arith.constant 0 : index
    %c0_299 = arith.constant 0 : index
    %423 = vector.load %arg8[%c8_297, %c0_298, %c0_299] : memref<25x64x4xbf16, #tpu.memory_space<vmem>>, vector<1x64x4xbf16>
    %424 = vector.shape_cast %423 : vector<1x64x4xbf16> to vector<64x4xbf16>
    %cst_300 = arith.constant dense<0.000000e+00> : vector<16x4xf32>
    %425 = tpu.matmul %422, %424, %cst_300 {dimension_numbers = #tpu.dot_dimension_numbers<[1], [0], [0], [1], [0, 0, 1, 1], [], []>} : vector<16x64xbf16>, vector<64x4xbf16>, vector<16x4xf32> -> vector<16x4xf32>
    %426 = arith.addf %406, %425 : vector<16x4xf32>
    %427 = vector.extract_strided_slice %385 {offsets = [144, 0], sizes = [16, 64], strides = [1, 1]} : vector<400x64xbf16> to vector<16x64xbf16>
    %c9_301 = arith.constant 9 : index
    %c0_302 = arith.constant 0 : index
    %c0_303 = arith.constant 0 : index
    %428 = vector.load %arg8[%c9_301, %c0_302, %c0_303] : memref<25x64x4xbf16, #tpu.memory_space<vmem>>, vector<1x64x4xbf16>
    %429 = vector.shape_cast %428 : vector<1x64x4xbf16> to vector<64x4xbf16>
    %cst_304 = arith.constant dense<0.000000e+00> : vector<16x4xf32>
    %430 = tpu.matmul %427, %429, %cst_304 {dimension_numbers = #tpu.dot_dimension_numbers<[1], [0], [0], [1], [0, 0, 1, 1], [], []>} : vector<16x64xbf16>, vector<64x4xbf16>, vector<16x4xf32> -> vector<16x4xf32>
    %431 = arith.addf %411, %430 : vector<16x4xf32>
    %432 = vector.extract_strided_slice %385 {offsets = [160, 0], sizes = [16, 64], strides = [1, 1]} : vector<400x64xbf16> to vector<16x64xbf16>
    %c10_305 = arith.constant 10 : index
    %c0_306 = arith.constant 0 : index
    %c0_307 = arith.constant 0 : index
    %433 = vector.load %arg8[%c10_305, %c0_306, %c0_307] : memref<25x64x4xbf16, #tpu.memory_space<vmem>>, vector<1x64x4xbf16>
    %434 = vector.shape_cast %433 : vector<1x64x4xbf16> to vector<64x4xbf16>
    %cst_308 = arith.constant dense<0.000000e+00> : vector<16x4xf32>
    %435 = tpu.matmul %432, %434, %cst_308 {dimension_numbers = #tpu.dot_dimension_numbers<[1], [0], [0], [1], [0, 0, 1, 1], [], []>} : vector<16x64xbf16>, vector<64x4xbf16>, vector<16x4xf32> -> vector<16x4xf32>
    %436 = arith.addf %416, %435 : vector<16x4xf32>
    %437 = vector.extract_strided_slice %385 {offsets = [176, 0], sizes = [16, 64], strides = [1, 1]} : vector<400x64xbf16> to vector<16x64xbf16>
    %c11_309 = arith.constant 11 : index
    %c0_310 = arith.constant 0 : index
    %c0_311 = arith.constant 0 : index
    %438 = vector.load %arg8[%c11_309, %c0_310, %c0_311] : memref<25x64x4xbf16, #tpu.memory_space<vmem>>, vector<1x64x4xbf16>
    %439 = vector.shape_cast %438 : vector<1x64x4xbf16> to vector<64x4xbf16>
    %cst_312 = arith.constant dense<0.000000e+00> : vector<16x4xf32>
    %440 = tpu.matmul %437, %439, %cst_312 {dimension_numbers = #tpu.dot_dimension_numbers<[1], [0], [0], [1], [0, 0, 1, 1], [], []>} : vector<16x64xbf16>, vector<64x4xbf16>, vector<16x4xf32> -> vector<16x4xf32>
    %441 = arith.addf %421, %440 : vector<16x4xf32>
    %442 = vector.extract_strided_slice %385 {offsets = [192, 0], sizes = [16, 64], strides = [1, 1]} : vector<400x64xbf16> to vector<16x64xbf16>
    %c12_313 = arith.constant 12 : index
    %c0_314 = arith.constant 0 : index
    %c0_315 = arith.constant 0 : index
    %443 = vector.load %arg8[%c12_313, %c0_314, %c0_315] : memref<25x64x4xbf16, #tpu.memory_space<vmem>>, vector<1x64x4xbf16>
    %444 = vector.shape_cast %443 : vector<1x64x4xbf16> to vector<64x4xbf16>
    %cst_316 = arith.constant dense<0.000000e+00> : vector<16x4xf32>
    %445 = tpu.matmul %442, %444, %cst_316 {dimension_numbers = #tpu.dot_dimension_numbers<[1], [0], [0], [1], [0, 0, 1, 1], [], []>} : vector<16x64xbf16>, vector<64x4xbf16>, vector<16x4xf32> -> vector<16x4xf32>
    %446 = arith.addf %426, %445 : vector<16x4xf32>
    %447 = vector.extract_strided_slice %385 {offsets = [208, 0], sizes = [16, 64], strides = [1, 1]} : vector<400x64xbf16> to vector<16x64xbf16>
    %c13_317 = arith.constant 13 : index
    %c0_318 = arith.constant 0 : index
    %c0_319 = arith.constant 0 : index
    %448 = vector.load %arg8[%c13_317, %c0_318, %c0_319] : memref<25x64x4xbf16, #tpu.memory_space<vmem>>, vector<1x64x4xbf16>
    %449 = vector.shape_cast %448 : vector<1x64x4xbf16> to vector<64x4xbf16>
    %cst_320 = arith.constant dense<0.000000e+00> : vector<16x4xf32>
    %450 = tpu.matmul %447, %449, %cst_320 {dimension_numbers = #tpu.dot_dimension_numbers<[1], [0], [0], [1], [0, 0, 1, 1], [], []>} : vector<16x64xbf16>, vector<64x4xbf16>, vector<16x4xf32> -> vector<16x4xf32>
    %451 = arith.addf %431, %450 : vector<16x4xf32>
    %452 = vector.extract_strided_slice %385 {offsets = [224, 0], sizes = [16, 64], strides = [1, 1]} : vector<400x64xbf16> to vector<16x64xbf16>
    %c14_321 = arith.constant 14 : index
    %c0_322 = arith.constant 0 : index
    %c0_323 = arith.constant 0 : index
    %453 = vector.load %arg8[%c14_321, %c0_322, %c0_323] : memref<25x64x4xbf16, #tpu.memory_space<vmem>>, vector<1x64x4xbf16>
    %454 = vector.shape_cast %453 : vector<1x64x4xbf16> to vector<64x4xbf16>
    %cst_324 = arith.constant dense<0.000000e+00> : vector<16x4xf32>
    %455 = tpu.matmul %452, %454, %cst_324 {dimension_numbers = #tpu.dot_dimension_numbers<[1], [0], [0], [1], [0, 0, 1, 1], [], []>} : vector<16x64xbf16>, vector<64x4xbf16>, vector<16x4xf32> -> vector<16x4xf32>
    %456 = arith.addf %436, %455 : vector<16x4xf32>
    %457 = vector.extract_strided_slice %385 {offsets = [240, 0], sizes = [16, 64], strides = [1, 1]} : vector<400x64xbf16> to vector<16x64xbf16>
    %c15_325 = arith.constant 15 : index
    %c0_326 = arith.constant 0 : index
    %c0_327 = arith.constant 0 : index
    %458 = vector.load %arg8[%c15_325, %c0_326, %c0_327] : memref<25x64x4xbf16, #tpu.memory_space<vmem>>, vector<1x64x4xbf16>
    %459 = vector.shape_cast %458 : vector<1x64x4xbf16> to vector<64x4xbf16>
    %cst_328 = arith.constant dense<0.000000e+00> : vector<16x4xf32>
    %460 = tpu.matmul %457, %459, %cst_328 {dimension_numbers = #tpu.dot_dimension_numbers<[1], [0], [0], [1], [0, 0, 1, 1], [], []>} : vector<16x64xbf16>, vector<64x4xbf16>, vector<16x4xf32> -> vector<16x4xf32>
    %461 = arith.addf %441, %460 : vector<16x4xf32>
    %462 = vector.extract_strided_slice %385 {offsets = [256, 0], sizes = [16, 64], strides = [1, 1]} : vector<400x64xbf16> to vector<16x64xbf16>
    %c16_329 = arith.constant 16 : index
    %c0_330 = arith.constant 0 : index
    %c0_331 = arith.constant 0 : index
    %463 = vector.load %arg8[%c16_329, %c0_330, %c0_331] : memref<25x64x4xbf16, #tpu.memory_space<vmem>>, vector<1x64x4xbf16>
    %464 = vector.shape_cast %463 : vector<1x64x4xbf16> to vector<64x4xbf16>
    %cst_332 = arith.constant dense<0.000000e+00> : vector<16x4xf32>
    %465 = tpu.matmul %462, %464, %cst_332 {dimension_numbers = #tpu.dot_dimension_numbers<[1], [0], [0], [1], [0, 0, 1, 1], [], []>} : vector<16x64xbf16>, vector<64x4xbf16>, vector<16x4xf32> -> vector<16x4xf32>
    %466 = arith.addf %446, %465 : vector<16x4xf32>
    %467 = vector.extract_strided_slice %385 {offsets = [272, 0], sizes = [16, 64], strides = [1, 1]} : vector<400x64xbf16> to vector<16x64xbf16>
    %c17_333 = arith.constant 17 : index
    %c0_334 = arith.constant 0 : index
    %c0_335 = arith.constant 0 : index
    %468 = vector.load %arg8[%c17_333, %c0_334, %c0_335] : memref<25x64x4xbf16, #tpu.memory_space<vmem>>, vector<1x64x4xbf16>
    %469 = vector.shape_cast %468 : vector<1x64x4xbf16> to vector<64x4xbf16>
    %cst_336 = arith.constant dense<0.000000e+00> : vector<16x4xf32>
    %470 = tpu.matmul %467, %469, %cst_336 {dimension_numbers = #tpu.dot_dimension_numbers<[1], [0], [0], [1], [0, 0, 1, 1], [], []>} : vector<16x64xbf16>, vector<64x4xbf16>, vector<16x4xf32> -> vector<16x4xf32>
    %471 = arith.addf %451, %470 : vector<16x4xf32>
    %472 = vector.extract_strided_slice %385 {offsets = [288, 0], sizes = [16, 64], strides = [1, 1]} : vector<400x64xbf16> to vector<16x64xbf16>
    %c18_337 = arith.constant 18 : index
    %c0_338 = arith.constant 0 : index
    %c0_339 = arith.constant 0 : index
    %473 = vector.load %arg8[%c18_337, %c0_338, %c0_339] : memref<25x64x4xbf16, #tpu.memory_space<vmem>>, vector<1x64x4xbf16>
    %474 = vector.shape_cast %473 : vector<1x64x4xbf16> to vector<64x4xbf16>
    %cst_340 = arith.constant dense<0.000000e+00> : vector<16x4xf32>
    %475 = tpu.matmul %472, %474, %cst_340 {dimension_numbers = #tpu.dot_dimension_numbers<[1], [0], [0], [1], [0, 0, 1, 1], [], []>} : vector<16x64xbf16>, vector<64x4xbf16>, vector<16x4xf32> -> vector<16x4xf32>
    %476 = arith.addf %456, %475 : vector<16x4xf32>
    %477 = vector.extract_strided_slice %385 {offsets = [304, 0], sizes = [16, 64], strides = [1, 1]} : vector<400x64xbf16> to vector<16x64xbf16>
    %c19_341 = arith.constant 19 : index
    %c0_342 = arith.constant 0 : index
    %c0_343 = arith.constant 0 : index
    %478 = vector.load %arg8[%c19_341, %c0_342, %c0_343] : memref<25x64x4xbf16, #tpu.memory_space<vmem>>, vector<1x64x4xbf16>
    %479 = vector.shape_cast %478 : vector<1x64x4xbf16> to vector<64x4xbf16>
    %cst_344 = arith.constant dense<0.000000e+00> : vector<16x4xf32>
    %480 = tpu.matmul %477, %479, %cst_344 {dimension_numbers = #tpu.dot_dimension_numbers<[1], [0], [0], [1], [0, 0, 1, 1], [], []>} : vector<16x64xbf16>, vector<64x4xbf16>, vector<16x4xf32> -> vector<16x4xf32>
    %481 = arith.addf %461, %480 : vector<16x4xf32>
    %482 = vector.extract_strided_slice %385 {offsets = [320, 0], sizes = [16, 64], strides = [1, 1]} : vector<400x64xbf16> to vector<16x64xbf16>
    %c20_345 = arith.constant 20 : index
    %c0_346 = arith.constant 0 : index
    %c0_347 = arith.constant 0 : index
    %483 = vector.load %arg8[%c20_345, %c0_346, %c0_347] : memref<25x64x4xbf16, #tpu.memory_space<vmem>>, vector<1x64x4xbf16>
    %484 = vector.shape_cast %483 : vector<1x64x4xbf16> to vector<64x4xbf16>
    %cst_348 = arith.constant dense<0.000000e+00> : vector<16x4xf32>
    %485 = tpu.matmul %482, %484, %cst_348 {dimension_numbers = #tpu.dot_dimension_numbers<[1], [0], [0], [1], [0, 0, 1, 1], [], []>} : vector<16x64xbf16>, vector<64x4xbf16>, vector<16x4xf32> -> vector<16x4xf32>
    %486 = arith.addf %466, %485 : vector<16x4xf32>
    %487 = vector.extract_strided_slice %385 {offsets = [336, 0], sizes = [16, 64], strides = [1, 1]} : vector<400x64xbf16> to vector<16x64xbf16>
    %c21_349 = arith.constant 21 : index
    %c0_350 = arith.constant 0 : index
    %c0_351 = arith.constant 0 : index
    %488 = vector.load %arg8[%c21_349, %c0_350, %c0_351] : memref<25x64x4xbf16, #tpu.memory_space<vmem>>, vector<1x64x4xbf16>
    %489 = vector.shape_cast %488 : vector<1x64x4xbf16> to vector<64x4xbf16>
    %cst_352 = arith.constant dense<0.000000e+00> : vector<16x4xf32>
    %490 = tpu.matmul %487, %489, %cst_352 {dimension_numbers = #tpu.dot_dimension_numbers<[1], [0], [0], [1], [0, 0, 1, 1], [], []>} : vector<16x64xbf16>, vector<64x4xbf16>, vector<16x4xf32> -> vector<16x4xf32>
    %491 = arith.addf %471, %490 : vector<16x4xf32>
    %492 = vector.extract_strided_slice %385 {offsets = [352, 0], sizes = [16, 64], strides = [1, 1]} : vector<400x64xbf16> to vector<16x64xbf16>
    %c22_353 = arith.constant 22 : index
    %c0_354 = arith.constant 0 : index
    %c0_355 = arith.constant 0 : index
    %493 = vector.load %arg8[%c22_353, %c0_354, %c0_355] : memref<25x64x4xbf16, #tpu.memory_space<vmem>>, vector<1x64x4xbf16>
    %494 = vector.shape_cast %493 : vector<1x64x4xbf16> to vector<64x4xbf16>
    %cst_356 = arith.constant dense<0.000000e+00> : vector<16x4xf32>
    %495 = tpu.matmul %492, %494, %cst_356 {dimension_numbers = #tpu.dot_dimension_numbers<[1], [0], [0], [1], [0, 0, 1, 1], [], []>} : vector<16x64xbf16>, vector<64x4xbf16>, vector<16x4xf32> -> vector<16x4xf32>
    %496 = arith.addf %476, %495 : vector<16x4xf32>
    %497 = vector.extract_strided_slice %385 {offsets = [368, 0], sizes = [16, 64], strides = [1, 1]} : vector<400x64xbf16> to vector<16x64xbf16>
    %c23_357 = arith.constant 23 : index
    %c0_358 = arith.constant 0 : index
    %c0_359 = arith.constant 0 : index
    %498 = vector.load %arg8[%c23_357, %c0_358, %c0_359] : memref<25x64x4xbf16, #tpu.memory_space<vmem>>, vector<1x64x4xbf16>
    %499 = vector.shape_cast %498 : vector<1x64x4xbf16> to vector<64x4xbf16>
    %cst_360 = arith.constant dense<0.000000e+00> : vector<16x4xf32>
    %500 = tpu.matmul %497, %499, %cst_360 {dimension_numbers = #tpu.dot_dimension_numbers<[1], [0], [0], [1], [0, 0, 1, 1], [], []>} : vector<16x64xbf16>, vector<64x4xbf16>, vector<16x4xf32> -> vector<16x4xf32>
    %501 = arith.addf %481, %500 : vector<16x4xf32>
    %502 = vector.extract_strided_slice %385 {offsets = [384, 0], sizes = [16, 64], strides = [1, 1]} : vector<400x64xbf16> to vector<16x64xbf16>
    %c24_361 = arith.constant 24 : index
    %c0_362 = arith.constant 0 : index
    %c0_363 = arith.constant 0 : index
    %503 = vector.load %arg8[%c24_361, %c0_362, %c0_363] : memref<25x64x4xbf16, #tpu.memory_space<vmem>>, vector<1x64x4xbf16>
    %504 = vector.shape_cast %503 : vector<1x64x4xbf16> to vector<64x4xbf16>
    %cst_364 = arith.constant dense<0.000000e+00> : vector<16x4xf32>
    %505 = tpu.matmul %502, %504, %cst_364 {dimension_numbers = #tpu.dot_dimension_numbers<[1], [0], [0], [1], [0, 0, 1, 1], [], []>} : vector<16x64xbf16>, vector<64x4xbf16>, vector<16x4xf32> -> vector<16x4xf32>
    %506 = arith.addf %486, %505 : vector<16x4xf32>
    %507 = arith.addf %506, %491 : vector<16x4xf32>
    %508 = arith.addf %507, %496 : vector<16x4xf32>
    %509 = arith.addf %508, %501 : vector<16x4xf32>
    %c0_365 = arith.constant 0 : index
    %c0_366 = arith.constant 0 : index
    %510 = vector.load %arg10[%c0_365, %c0_366] : memref<16x1xf32, #tpu.memory_space<vmem>>, vector<16x1xf32>
    %511 = vector.broadcast %510 : vector<16x1xf32> to vector<16x4xf32>
    %512 = arith.addf %509, %511 : vector<16x4xf32>
    %c0_367 = arith.constant 0 : index
    %c0_368 = arith.constant 0 : index
    %c0_369 = arith.constant 0 : index
    %513 = vector.load %arg25[%c0_367, %c0_368, %c0_369] : memref<4x4x1xbf16, #tpu.memory_space<vmem>>, vector<1x4x1xbf16>
    %514 = vector.shape_cast %513 : vector<1x4x1xbf16> to vector<4x1xbf16>
    %515 = arith.truncf %512 : vector<16x4xf32> to vector<16x4xbf16>
    %cst_370 = arith.constant dense<0.000000e+00> : vector<16x1xf32>
    %516 = tpu.matmul %515, %514, %cst_370 {dimension_numbers = #tpu.dot_dimension_numbers<[1], [0], [0], [1], [0, 0, 1, 1], [], []>} : vector<16x4xbf16>, vector<4x1xbf16>, vector<16x1xf32> -> vector<16x1xf32>
    %c1_371 = arith.constant 1 : index
    %c0_372 = arith.constant 0 : index
    %c0_373 = arith.constant 0 : index
    %517 = vector.load %arg25[%c1_371, %c0_372, %c0_373] : memref<4x4x1xbf16, #tpu.memory_space<vmem>>, vector<1x4x1xbf16>
    %518 = vector.shape_cast %517 : vector<1x4x1xbf16> to vector<4x1xbf16>
    %519 = arith.truncf %512 : vector<16x4xf32> to vector<16x4xbf16>
    %cst_374 = arith.constant dense<0.000000e+00> : vector<16x1xf32>
    %520 = tpu.matmul %519, %518, %cst_374 {dimension_numbers = #tpu.dot_dimension_numbers<[1], [0], [0], [1], [0, 0, 1, 1], [], []>} : vector<16x4xbf16>, vector<4x1xbf16>, vector<16x1xf32> -> vector<16x1xf32>
    %521 = arith.maximumf %516, %520 : vector<16x1xf32>
    %c2_375 = arith.constant 2 : index
    %c0_376 = arith.constant 0 : index
    %c0_377 = arith.constant 0 : index
    %522 = vector.load %arg25[%c2_375, %c0_376, %c0_377] : memref<4x4x1xbf16, #tpu.memory_space<vmem>>, vector<1x4x1xbf16>
    %523 = vector.shape_cast %522 : vector<1x4x1xbf16> to vector<4x1xbf16>
    %524 = arith.truncf %512 : vector<16x4xf32> to vector<16x4xbf16>
    %cst_378 = arith.constant dense<0.000000e+00> : vector<16x1xf32>
    %525 = tpu.matmul %524, %523, %cst_378 {dimension_numbers = #tpu.dot_dimension_numbers<[1], [0], [0], [1], [0, 0, 1, 1], [], []>} : vector<16x4xbf16>, vector<4x1xbf16>, vector<16x1xf32> -> vector<16x1xf32>
    %526 = arith.maximumf %521, %525 : vector<16x1xf32>
    %c3_379 = arith.constant 3 : index
    %c0_380 = arith.constant 0 : index
    %c0_381 = arith.constant 0 : index
    %527 = vector.load %arg25[%c3_379, %c0_380, %c0_381] : memref<4x4x1xbf16, #tpu.memory_space<vmem>>, vector<1x4x1xbf16>
    %528 = vector.shape_cast %527 : vector<1x4x1xbf16> to vector<4x1xbf16>
    %529 = arith.truncf %512 : vector<16x4xf32> to vector<16x4xbf16>
    %cst_382 = arith.constant dense<0.000000e+00> : vector<16x1xf32>
    %530 = tpu.matmul %529, %528, %cst_382 {dimension_numbers = #tpu.dot_dimension_numbers<[1], [0], [0], [1], [0, 0, 1, 1], [], []>} : vector<16x4xbf16>, vector<4x1xbf16>, vector<16x1xf32> -> vector<16x1xf32>
    %531 = arith.maximumf %526, %530 : vector<16x1xf32>
    %c0_383 = arith.constant 0 : index
    %c0_384 = arith.constant 0 : index
    %c0_385 = arith.constant 0 : index
    %532 = vector.load %arg26[%c0_383, %c0_384, %c0_385] : memref<1x16x10xf32, #tpu.memory_space<vmem>>, vector<1x16x9xf32>
    %533 = vector.shape_cast %532 : vector<1x16x9xf32> to vector<16x9xf32>
    %534 = vector.shape_cast %203 : vector<16x9xf32> to vector<1x16x9xf32>
    tpu.vector_store %arg26[%c0_383, %c0_384, %c0_385], %534 {strides = array<i32>} : memref<1x16x10xf32, #tpu.memory_space<vmem>>, vector<1x16x9xf32>,
    %c0_386 = arith.constant 0 : index
    %c0_387 = arith.constant 0 : index
    %c9_388 = arith.constant 9 : index
    %535 = vector.load %arg26[%c0_386, %c0_387, %c9_388] : memref<1x16x10xf32, #tpu.memory_space<vmem>>, vector<1x16x1xf32>
    %536 = vector.shape_cast %535 : vector<1x16x1xf32> to vector<16x1xf32>
    %537 = vector.shape_cast %531 : vector<16x1xf32> to vector<1x16x1xf32>
    tpu.vector_store %arg26[%c0_386, %c0_387, %c9_388], %537 {strides = array<i32>} : memref<1x16x10xf32, #tpu.memory_space<vmem>>, vector<1x16x1xf32>,
    return
  }
  func.func @transform_0(%arg0: i32) -> (i32, i32, i32) {
    %c0_i32 = arith.constant 0 : i32
    %c0_i32_0 = arith.constant 0 : i32
    %c0_i32_1 = arith.constant 0 : i32
    return %arg0, %c0_i32, %c0_i32_0 : i32, i32, i32
  }
  func.func @transform_1(%arg0: i32) -> (i32, i32) {
    %c0_i32 = arith.constant 0 : i32
    %c0_i32_0 = arith.constant 0 : i32
    %c0_i32_1 = arith.constant 0 : i32
    return %c0_i32, %c0_i32_0 : i32, i32
  }
  func.func @transform_2(%arg0: i32) -> (i32, i32, i32) {
    %c0_i32 = arith.constant 0 : i32
    %c0_i32_0 = arith.constant 0 : i32
    %c0_i32_1 = arith.constant 0 : i32
    %c0_i32_2 = arith.constant 0 : i32
    return %c0_i32, %c0_i32_0, %c0_i32_1 : i32, i32, i32
  }
  func.func @transform_3(%arg0: i32) -> (i32, i32) {
    %c0_i32 = arith.constant 0 : i32
    %c0_i32_0 = arith.constant 0 : i32
    %c0_i32_1 = arith.constant 0 : i32
    return %c0_i32, %c0_i32_0 : i32, i32
  }
  func.func @transform_4(%arg0: i32) -> (i32, i32, i32) {
    %c0_i32 = arith.constant 0 : i32
    %c0_i32_0 = arith.constant 0 : i32
    %c0_i32_1 = arith.constant 0 : i32
    %c0_i32_2 = arith.constant 0 : i32
    return %c0_i32, %c0_i32_0, %c0_i32_1 : i32, i32, i32
  }
  func.func @transform_5(%arg0: i32) -> (i32, i32) {
    %c0_i32 = arith.constant 0 : i32
    %c0_i32_0 = arith.constant 0 : i32
    %c0_i32_1 = arith.constant 0 : i32
    return %c0_i32, %c0_i32_0 : i32, i32
  }
  func.func @transform_6(%arg0: i32) -> (i32, i32) {
    %c0_i32 = arith.constant 0 : i32
    %c0_i32_0 = arith.constant 0 : i32
    %c0_i32_1 = arith.constant 0 : i32
    return %c0_i32, %c0_i32_0 : i32, i32
  }
  func.func @transform_7(%arg0: i32) -> (i32, i32, i32) {
    %c0_i32 = arith.constant 0 : i32
    %c0_i32_0 = arith.constant 0 : i32
    %c0_i32_1 = arith.constant 0 : i32
    %c0_i32_2 = arith.constant 0 : i32
    return %c0_i32, %c0_i32_0, %c0_i32_1 : i32, i32, i32
  }
  func.func @transform_8(%arg0: i32) -> (i32, i32) {
    %c0_i32 = arith.constant 0 : i32
    %c0_i32_0 = arith.constant 0 : i32
    %c0_i32_1 = arith.constant 0 : i32
    return %c0_i32, %c0_i32_0 : i32, i32
  }
  func.func @transform_9(%arg0: i32) -> (i32, i32) {
    %c0_i32 = arith.constant 0 : i32
    %c0_i32_0 = arith.constant 0 : i32
    %c0_i32_1 = arith.constant 0 : i32
    return %c0_i32, %c0_i32_0 : i32, i32
  }
  func.func @transform_10(%arg0: i32) -> (i32, i32) {
    %c0_i32 = arith.constant 0 : i32
    %c0_i32_0 = arith.constant 0 : i32
    %c0_i32_1 = arith.constant 0 : i32
    return %c0_i32, %c0_i32_0 : i32, i32
  }
  func.func @transform_11(%arg0: i32) -> (i32, i32) {
    %c0_i32 = arith.constant 0 : i32
    %c0_i32_0 = arith.constant 0 : i32
    %c0_i32_1 = arith.constant 0 : i32
    return %c0_i32, %c0_i32_0 : i32, i32
  }
  func.func @transform_12(%arg0: i32) -> (i32, i32) {
    %c0_i32 = arith.constant 0 : i32
    %c0_i32_0 = arith.constant 0 : i32
    %c0_i32_1 = arith.constant 0 : i32
    return %c0_i32, %c0_i32_0 : i32, i32
  }
  func.func @transform_13(%arg0: i32) -> (i32, i32) {
    %c0_i32 = arith.constant 0 : i32
    %c0_i32_0 = arith.constant 0 : i32
    %c0_i32_1 = arith.constant 0 : i32
    return %c0_i32, %c0_i32_0 : i32, i32
  }
  func.func @transform_14(%arg0: i32) -> (i32, i32) {
    %c0_i32 = arith.constant 0 : i32
    %c0_i32_0 = arith.constant 0 : i32
    %c0_i32_1 = arith.constant 0 : i32
    return %c0_i32, %c0_i32_0 : i32, i32
  }
  func.func @transform_15(%arg0: i32) -> (i32, i32) {
    %c0_i32 = arith.constant 0 : i32
    %c0_i32_0 = arith.constant 0 : i32
    %c0_i32_1 = arith.constant 0 : i32
    return %c0_i32, %c0_i32_0 : i32, i32
  }
  func.func @transform_16(%arg0: i32) -> (i32, i32) {
    %c0_i32 = arith.constant 0 : i32
    %c0_i32_0 = arith.constant 0 : i32
    %c0_i32_1 = arith.constant 0 : i32
    return %c0_i32, %c0_i32_0 : i32, i32
  }
  func.func @transform_17(%arg0: i32) -> (i32, i32) {
    %c0_i32 = arith.constant 0 : i32
    %c0_i32_0 = arith.constant 0 : i32
    %c0_i32_1 = arith.constant 0 : i32
    return %c0_i32, %c0_i32_0 : i32, i32
  }
  func.func @transform_18(%arg0: i32) -> (i32, i32) {
    %c0_i32 = arith.constant 0 : i32
    %c0_i32_0 = arith.constant 0 : i32
    %c0_i32_1 = arith.constant 0 : i32
    return %c0_i32, %c0_i32_0 : i32, i32
  }
  func.func @transform_19(%arg0: i32) -> (i32, i32) {
    %c0_i32 = arith.constant 0 : i32
    %c0_i32_0 = arith.constant 0 : i32
    %c0_i32_1 = arith.constant 0 : i32
    return %c0_i32, %c0_i32_0 : i32, i32
  }
  func.func @transform_20(%arg0: i32) -> (i32, i32) {
    %c0_i32 = arith.constant 0 : i32
    %c0_i32_0 = arith.constant 0 : i32
    %c0_i32_1 = arith.constant 0 : i32
    return %c0_i32, %c0_i32_0 : i32, i32
  }
  func.func @transform_21(%arg0: i32) -> (i32, i32) {
    %c0_i32 = arith.constant 0 : i32
    %c0_i32_0 = arith.constant 0 : i32
    %c0_i32_1 = arith.constant 0 : i32
    return %c0_i32, %c0_i32_0 : i32, i32
  }
  func.func @transform_22(%arg0: i32) -> (i32, i32) {
    %c0_i32 = arith.constant 0 : i32
    %c0_i32_0 = arith.constant 0 : i32
    %c0_i32_1 = arith.constant 0 : i32
    return %c0_i32, %c0_i32_0 : i32, i32
  }
  func.func @transform_23(%arg0: i32) -> (i32, i32, i32) {
    %c0_i32 = arith.constant 0 : i32
    %c0_i32_0 = arith.constant 0 : i32
    %c0_i32_1 = arith.constant 0 : i32
    %c0_i32_2 = arith.constant 0 : i32
    return %c0_i32, %c0_i32_0, %c0_i32_1 : i32, i32, i32
  }
  func.func @transform_24(%arg0: i32) -> (i32, i32, i32) {
    %c0_i32 = arith.constant 0 : i32
    %c0_i32_0 = arith.constant 0 : i32
    %c0_i32_1 = arith.constant 0 : i32
    %c0_i32_2 = arith.constant 0 : i32
    return %c0_i32, %c0_i32_0, %c0_i32_1 : i32, i32, i32
  }
  func.func @transform_25(%arg0: i32) -> (i32, i32, i32) {
    %c0_i32 = arith.constant 0 : i32
    %c0_i32_0 = arith.constant 0 : i32
    %c0_i32_1 = arith.constant 0 : i32
    return %arg0, %c0_i32, %c0_i32_0 : i32, i32, i32
  }
}

</mosaic_0001>

<bundles_post_ra>
// kernel: competitive_block_forward.1
= control target key start
LH: loop header
LB: loop body
LE: loop exit
PB: predicated region body
PF: predicated region fallthrough
CT: control target
= control target key end

     0   :  { %s20872_s29 = smov 0   ;;  %s25499_s0 = inlined_call_operand.vmem [shape: bf16[2,25,256], index: 0, kind: input, shape index: {}]   ;;  %s25500_s1 = inlined_call_operand.vmem [shape: bf16[16,25], index: 1, kind: input, shape index: {}]   ;;  %s25501_s2 = inlined_call_operand.vmem [shape: bf16[25,256,64], index: 2, kind: input, shape index: {}]   ;;  %s25502_s3 = inlined_call_operand.vmem [shape: bf16[400,16], index: 3, kind: input, shape index: {}]   ;;  %s25503_s4 = inlined_call_operand.vmem [shape: bf16[25,256,36], index: 4, kind: input, shape index: {}]   ;;  %s25504_s5 = inlined_call_operand.vmem [shape: bf16[400,16], index: 5, kind: input, shape index: {}]   ;;  %s25505_s6 = inlined_call_operand.vmem [shape: f32[16,1], index: 6, kind: input, shape index: {}]   ;;  %s25506_s7 = inlined_call_operand.vmem [shape: bf16[25,64,4], index: 7, kind: input, shape index: {}]   ;;  %s25507_s8 = inlined_call_operand.vmem [shape: bf16[400,16], index: 8, kind: input, shape index: {}]   ;;  %s25508_s9 = inlined_call_operand.vmem [shape: f32[16,1], index: 9, kind: input, shape index: {}]   ;;  %s25509_s10 = inlined_call_operand.vmem [shape: bf16[16,16], index: 10, kind: input, shape index: {}]   ;;  %s25510_s11 = inlined_call_operand.vmem [shape: bf16[256,16], index: 11, kind: input, shape index: {}]   ;;  %s25511_s12 = inlined_call_operand.vmem [shape: bf16[16,256], index: 12, kind: input, shape index: {}]   ;;  %s25512_s13 = inlined_call_operand.vmem [shape: bf16[256,16], index: 13, kind: input, shape index: {}]   ;;  %s25513_s14 = inlined_call_operand.vmem [shape: bf16[16,256], index: 14, kind: input, shape index: {}]   ;;  %s25514_s15 = inlined_call_operand.vmem [shape: bf16[64,8], index: 15, kind: input, shape index: {}]   ;;  %s25515_s16 = inlined_call_operand.vmem [shape: bf16[8,64], index: 16, kind: input, shape index: {}]   ;;  %s25516_s17 = inlined_call_operand.vmem [shape: bf16[64,8], index: 17, kind: input, shape index: {}]   ;;  %s25517_s18 = inlined_call_operand.vmem [shape: bf16[8,64], index: 18, kind: input, shape index: {}]   ;;  %s25518_s19 = inlined_call_operand.vmem [shape: bf16[16,16], index: 19, kind: input, shape index: {}]   ;;  %s25519_s20 = inlined_call_operand.vmem [shape: bf16[16,16], index: 20, kind: input, shape index: {}]   ;;  %s25520_s21 = inlined_call_operand.vmem [shape: bf16[16,16], index: 21, kind: input, shape index: {}]   ;;  %s25521_s22 = inlined_call_operand.vmem [shape: bf16[16,16], index: 22, kind: input, shape index: {}]   ;;  %s25522_s23 = inlined_call_operand.vmem [shape: bf16[4,36,9], index: 23, kind: input, shape index: {}]   ;;  %s25523_s24 = inlined_call_operand.vmem [shape: bf16[4,4,1], index: 24, kind: input, shape index: {}]   ;;  %s25524_s25 = inlined_call_operand.vmem [shape: f32[2,16,10], index: 25, kind: output, shape index: {}]  }
   0x1   :  { %25547 = sst [smem:[#allocation20_spill]] %s25499_s0 }
   0x2   :  { %25548 = sst [smem:[#allocation21_spill]] %s25500_s1 }
   0x3   :  { %25549 = sst [smem:[#allocation22_spill]] %s25501_s2 }
   0x4   :  { %25550 = sst [smem:[#allocation23_spill]] %s25502_s3 }
   0x5   :  { %25551 = sst [smem:[#allocation24_spill]] %s25503_s4 }
   0x6   :  { %25552 = sst [smem:[#allocation25_spill]] %s25504_s5 }
   0x7   :  { %25553 = sst [smem:[#allocation26_spill]] %s25505_s6 }
   0x8   :  { %25554 = sst [smem:[#allocation27_spill]] %s25506_s7 }
   0x9   :  { %25555 = sst [smem:[#allocation28_spill]] %s25507_s8 }
   0xa   :  { %25556 = sst [smem:[#allocation29_spill]] %s25508_s9 }
   0xb LB: > { %s14804_s2 = sadd.s32 4294967295, %s20735_s29   ;;  %p14808_p0 = scmp.ge.s32.totalorder %s20735_s29, 1  ;;  %s20735_s29 = sphi %s20872_s29, %s35_s29  }
   0xc   : > { %p687_p1 = scmp.lt.s32.totalorder %s20735_s29, 3 }
   0xe   : > { %p688_p2 = pnand %p14808_p0, %p687_p1 }
  0x10   : > { %691 = sbr.rel (%p688_p2) target bundleno = 6270 (0x187e), region = 120 }
  0x15   : > { %p755_p3 = scmp.lt.s32.totalorder %s14804_s2, 1  ;;  %vm799_vm0 = vcmask 1043456   ;;  %vm800_vm1 = vcmask 1044480   ;;  %v20737_v0 = vmov 65535   ;;  %v25533_v2 = vmov 0   ;;  %s25557_s3 = sld [smem:[#allocation20_spill]] }
  0x16   : > { %v801_v1 = vsel %vm799_vm0, 4294967295, %v20737_v0  ;;  %841 = vmatprep.mubr.bf16.mxu0 %v25533_v2  ;;  %922 = vmatprep.mubr.bf16.mxu1 %v25533_v2  ;;  %vm795_vm2 = vcmask 203776   ;;  %s25558_s27 = sld [smem:[#allocation21_spill]]  ;;  %vm886_vm3 = vcmask 130048   ;;  %v19627_v37 = vld [vmem:[%s25510_s11 + $0x78] sm:$0xff]   ;;  %v19626_v41 = vld [vmem:[%s25509_s10] sm:$0xff]  }
  0x17   : > { %s25668_s2 = smov (!%p755_p3, %s14804_s2), 1  ;;  %v802_v3 = vsel %vm800_vm1, %v801_v1, 0  ;;  %19617 = vset.pattern.permute.xlu1 %v25533_v2  ;;  %19618 = vset.pattern.permute.xlu0 %v25533_v2  ;;  %v19628_v42 = vld [vmem:[%s25510_s11 + $0x38] sm:$0xff]   ;;  %v19629_v43 = vld [vmem:[%s25510_s11 + $0x70] sm:$0xff]   ;;  %v19631_v45 = vld [vmem:[%s25510_s11 + $0x68] sm:$0xff]   ;;  %vm20740_vm4 = vmmov 0  }
  0x18   : > { %s17723_s6 = sshll.u32 %s25668_s2, 5  ;;  %v19630_v44 = vld [vmem:[%s25510_s11 + $0x30] sm:$0xff]   ;;  %v19632_v46 = vld [vmem:[%s25510_s11 + $0x28] sm:$0xff]   ;;  %v19633_v47 = vld [vmem:[%s25510_s11 + $0x60] sm:$0xff]   ;;  %s25561_s5 = sld [smem:[#allocation26_spill]]  ;;  %vm6472_vm5 = vcmask 1041408  }
  0x19   : > { %v19634_v48 = vld [vmem:[%s25510_s11 + $0x20] sm:$0xff]   ;;  %v19635_v49 = vld [vmem:[%s25510_s11 + $0x58] sm:$0xff]   ;;  %v19637_v51 = vld [vmem:[%s25510_s11 + $0x50] sm:$0xff]   ;;  %s25563_s0 = sld [smem:[#allocation24_spill]]  ;;  %vm6468_vm6 = vcmask 293888   ;;  %s17724_s9 = sshll.u32 %s25668_s2, 4 }
  0x1a   : > { %v19636_v50 = vld [vmem:[%s25510_s11 + $0x18] sm:$0xff]   ;;  %v19638_v52 = vld [vmem:[%s25510_s11 + $0x10] sm:$0xff]   ;;  %v19639_v53 = vld [vmem:[%s25510_s11 + $0x48] sm:$0xff]   ;;  %s25614_s28 = sld [smem:[#allocation23_spill]]  ;;  %vm14735_vm7 = vcmask 72704   ;;  %vm11592_vm8 = vcmask 523264  }
  0x1b   : > { %s759_s26 = scalar_lea.vmem %s25557_s3, %s17723_s6  ;;  %v19640_v54 = vld [vmem:[%s25510_s11 + $0x8] sm:$0xff]   ;;  %v19641_v55 = vld [vmem:[%s25510_s11 + $0x40] sm:$0xff]   ;;  %v19646_v59 = vld [vmem:[%s25512_s13 + $0x78] sm:$0xff]   ;;  %s25562_s3 = sld [smem:[#allocation25_spill]]  ;;  %vm11732_vm9 = vcmask 64512   ;;  %vm14543_vm10 = vcmask 31744  }
  0x1c   : > { %v19619_v4 = vld [vmem:[%s759_s26 + $0x14] ss:$8 sps:$4 sm:$0x1f]   ;;  %v19621_v5 = vld [vmem:[%s759_s26 + $0x10] ss:$8 sps:$4 sm:$0x1f]  }
  0x1d   : > { %v807_v6 = vand.u32 %v19619_v4, %v802_v3  ;;  %v19622_v7 = vld [vmem:[%s759_s26 + $0x4] ss:$8 sps:$4 sm:$0xff]   ;;  %v804_v8 = vand.u32 %v19621_v5, %v802_v3  ;;  %v19624_v9 = vld [vmem:[%s759_s26] ss:$8 sps:$4 sm:$0xff]   ;;  %v19647_v5 = vld [vmem:[%s25512_s13 + $0x38] sm:$0xff]   ;;  %s25664_s30 = sld [smem:[#allocation29_spill]] }
  0x1e   : > { %v19625_v10 = vld [vmem:[%s25558_s27] sm:$0xff]   ;;  %s25665_s27 = sld [smem:[#allocation28_spill]]  ;;  %vm14746_vm11 = vcmask 80968  }
  0x1f   : > { %821 = vmatprep.subr.bf16.mxu0 %v807_v6  ;;  %v19642_v56 = vld [vmem:[%s25510_s11] sm:$0xff]   ;;  %s25666_s1 = sld [smem:[#allocation27_spill]] }
  0x20   : > { %822 = vmatpush1.bf16.msra.mxu0 %v804_v8  ;;  %v19645_v57 = vld [vmem:[%s25511_s12 + $0x4] ss:$8 sps:$4 sm:$0xff]   ;;  %v19643_v58 = vld [vmem:[%s25511_s12] ss:$8 sps:$4 sm:$0xff]   ;;  %v19648_v8 = vld [vmem:[%s25512_s13 + $0x70] sm:$0xff]  }
  0x21   : > { %823 = vmatprep.subr.bf16.mxu0 %v19622_v7 }
  0x24   : > { %824 = vmatpush1.bf16.msra.mxu0 %v19624_v9 }
  0x25   : > { %1132 = vmatprep.subr.bf16.mxu0 %v19645_v57 }
  0x27   : > { %14818 = vmatmul.mubr.msk.bf16.vlgmr.msra.gmra.mxu0 %vm795_vm2, %v19625_v10  ;;  %v19649_v10 = vld [vmem:[%s25512_s13 + $0x30] sm:$0xff]  }
  0x28   : > { %1150 = vmatprep.mubr.bf16.mxu0 %v25533_v2  ;;  %1133 = vmatpush1.bf16.msra.mxu0 %v19643_v58 }
  0x29   : > { %17747 = vmatprep.subr.bf16.mxu0 %v19646_v59 }
  0xe7   : > { %v20895_v11 = vpop.f32.mrf.mxu0 }
  0xe8   : > { %25559 = vst [vmem:[#allocation2_spill] sm:$0xff] %v20895_v11 }
  0xe9   : > { %v20897_v12 = vpop.f32.mrf.mxu0 }
  0xea   : > { %v852_v15 = vmax.f32 %v20895_v11, %v20897_v12 }
  0xeb   : > { %v20899_v13 = vpop.f32.mrf.mxu0 }
  0xec   : > { %25560 = vst [vmem:[#allocation3_spill] sm:$0xff] %v20899_v13 }
  0xed   : > { %v20901_v14 = vpop.f32.mrf.mxu0 }
  0xee   : > { %v853_v16 = vmax.f32 %v20899_v13, %v20901_v14 }
  0xf0   : > { %v854_v17 = vmax.f32 %v852_v15, %v853_v16  ;;  %v19650_v15 = vld [vmem:[%s25512_s13 + $0x68] sm:$0xff]  }
  0xf1   : > { %v19651_v16 = vld [vmem:[%s25512_s13 + $0x28] sm:$0xff]  }
  0xf2   : > { %855 = vmax.xlane.f32.xlu0 %v854_v17  ;;  %v19652_v17 = vld [vmem:[%s25512_s13 + $0x60] sm:$0xff]  }
 0x17b   : > { %v856_v18 = vpop.xlane.xlu0 %855 }
 0x17c   : > { %v857_v19 = vrot.slane %v856_v18, 4 }
 0x17e   : > { %v858_v20 = vmax.f32 %v856_v18, %v857_v19  ;;  %v19653_v18 = vld [vmem:[%s25512_s13 + $0x20] sm:$0xff]   ;;  %v19654_v19 = vld [vmem:[%s25512_s13 + $0x58] sm:$0xff]  }
 0x180   : > { %v859_v21 = vrot.slane %v858_v20, 2 }
 0x182   : > { %v860_v22 = vmax.f32 %v858_v20, %v859_v21  ;;  %v19655_v20 = vld [vmem:[%s25512_s13 + $0x18] sm:$0xff]   ;;  %v19656_v21 = vld [vmem:[%s25512_s13 + $0x50] sm:$0xff]  }
 0x184   : > { %v861_v23 = vrot.slane %v860_v22, 1 }
 0x186   : > { %v862_v24 = vmax.f32 %v860_v22, %v861_v23  ;;  %v19657_v22 = vld [vmem:[%s25512_s13 + $0x10] sm:$0xff]   ;;  %v19658_v23 = vld [vmem:[%s25512_s13 + $0x48] sm:$0xff]  }
 0x188   : > { %19600 = vpush %v862_v24  ;;  %v19659_v24 = vld [vmem:[%s25512_s13 + $0x8] sm:$0xff]  }
 0x1b9   : > { %s19601_s4 = spop %19600 }
 0x1ba   : > { %v864_v25 = vstv %s19601_s4  ;;  %s25615_s4 = sld [smem:[#allocation22_spill]] }
 0x1bb   : > { %v865_v26 = vsub.f32 %v20895_v11, %v864_v25  ;;  %v866_v27 = vsub.f32 %v20897_v12, %v864_v25  ;;  %v867_v28 = vsub.f32 %v20899_v13, %v864_v25  ;;  %v868_v29 = vsub.f32 %v20901_v14, %v864_v25  ;;  %v19660_v25 = vld [vmem:[%s25512_s13 + $0x40] sm:$0xff]  }
 0x1bd   : > { %v869_v30 = vmul.f32 1.442695, %v865_v26  ;;  %v871_v31 = vmul.f32 1.442695, %v866_v27  ;;  %v873_v32 = vmul.f32 1.442695, %v867_v28 }
 0x1be   : > { %v875_v33 = vmul.f32 1.442695, %v868_v29  ;;  %v19661_v26 = vld [vmem:[%s25512_s13] sm:$0xff]  }
 0x1bf   : > { %20664 = vpow2.f32 %v869_v30  ;;  %v19664_v27 = vld [vmem:[%s25513_s14 + $0x4] ss:$8 sps:$4 sm:$0xff]   ;;  %v19662_v28 = vld [vmem:[%s25513_s14] ss:$8 sps:$4 sm:$0xff]  }
 0x1c0   : > { %20666 = vpow2.f32 %v871_v31 }
 0x1c1   : > { %20668 = vpow2.f32 %v873_v32 }
 0x1c2   : > { %20670 = vpow2.f32 %v875_v33 }
 0x1cc   : > { %v20911_v34 = vpop.eup %20664 }
 0x1cd   : > { %v20913_v35 = vpop.eup %20666 }
 0x1ce   : > { %v20915_v36 = vpop.eup %20668 }
 0x1cf   : > { %v20920_v38 = vpop.eup %20670  ;;  %v20924_v39 = vpack.c.bf16 %v20915_v36, %v20911_v34 }
 0x1d0   : > { %v878_v40 = vpack.c.bf16 %v20920_v38, %v20913_v35 }
 0x1d2   : > { %904 = vmatprep.subr.bf16.mxu1 %v878_v40 }
 0x1d3   : > { %905 = vmatpush1.bf16.msra.mxu1 %v20924_v39 }
 0x1d4   : > { %17725 = vmatprep.subr.bf16.mxu1 %v19627_v37 }
 0x1d6   : > { %14820 = vmatmul.mubr.msk.bf16.vlgmr.msra.gmra.mxu1 %vm886_vm3, %v19626_v41 }
 0x1d7   : > { %17726 = vmatpush3.bf16.msra.mxu1 %v19628_v42  ;;  %1093 = vmatprep.mubr.bf16.mxu1 %v878_v40 }
 0x1d8   : > { %17727 = vmatprep.subr.bf16.mxu1 %v19629_v43 }
 0x1db   : > { %17728 = vmatpush3.bf16.msra.mxu1 %v19630_v44 }
 0x1dc   : > { %17729 = vmatprep.subr.bf16.mxu1 %v19631_v45 }
 0x1df   : > { %17730 = vmatpush3.bf16.msra.mxu1 %v19632_v46 }
 0x1e0   : > { %17731 = vmatprep.subr.bf16.mxu1 %v19633_v47 }
 0x1e3   : > { %17732 = vmatpush3.bf16.msra.mxu1 %v19634_v48 }
 0x1e4   : > { %17733 = vmatprep.subr.bf16.mxu1 %v19635_v49 }
 0x1e7   : > { %17734 = vmatpush3.bf16.msra.mxu1 %v19636_v50 }
 0x1e8   : > { %17735 = vmatprep.subr.bf16.mxu1 %v19637_v51 }
 0x1eb   : > { %17736 = vmatpush3.bf16.msra.mxu1 %v19638_v52 }
 0x1ec   : > { %17737 = vmatprep.subr.bf16.mxu1 %v19639_v53 }
 0x1ef   : > { %17738 = vmatpush3.bf16.msra.mxu1 %v19640_v54 }
 0x1f0   : > { %17739 = vmatprep.subr.bf16.mxu1 %v19641_v55 }
 0x1f3   : > { %17740 = vmatpush3.bf16.msra.mxu1 %v19642_v56 }
 0x1f4   : > { %1360 = vmatprep.subr.bf16.mxu1 %v19664_v27 }
 0x1f6   : > { %1094 = vmatmul.mubr.bf16.vlgmr.msra.gmra.mxu1 %v20924_v39 }
 0x1f7   : > { %1378 = vmatprep.mubr.bf16.mxu1 %v25533_v2  ;;  %1361 = vmatpush1.bf16.msra.mxu1 %v19662_v28 }
 0x296   : > { %v924_v60 = vpop.f32.mrf.mxu1 }
 0x297   : > { %20672 = vrcp.f32 %v924_v60 }
 0x298   : > { %v926_v61 = vpop.f32.mrf.mxu1 }
 0x299   : > { %20674 = vrcp.f32 %v926_v61 }
 0x29a   : > { %v928_v62 = vpop.f32.mrf.mxu1 }
 0x29b   : > { %20676 = vrcp.f32 %v928_v62 }
 0x29c   : > { %v930_v63 = vpop.f32.mrf.mxu1 }
 0x29d   : > { %20678 = vrcp.f32 %v930_v63 }
 0x2a4   : > { %v20673_v48 = vpop.eup %20672 }
 0x2a5   : > { %v1393_v58 = vmul.f32 0.8, %v20673_v48 }
 0x2a6   : > { %v20675_v49 = vpop.eup %20674 }
 0x2a7   : > { %v1394_v63 = vmul.f32 0.8, %v20675_v49 }
 0x2a8   : > { %v20677_v50 = vpop.eup %20676 }
 0x2aa   : > { %v20679_v51 = vpop.eup %20678 }
 0x2b6   : > { %v17741_v0 = vpop.f32.mrf.mxu1 }
 0x2b8   : > { %v17742_v1 = vpop.f32.mrf.mxu1 }
 0x2b9   : > { %v17743_v6 = vadd.f32 %v17742_v1, %v17741_v0 }
 0x2ba   : > { %v17744_v3 = vpop.f32.mrf.mxu1 }
 0x2bc   : > { %v17745_v4 = vpop.f32.mrf.mxu1 }
 0x2bd   : > { %v17746_v7 = vadd.f32 %v17745_v4, %v17744_v3 }
 0x2bf   : > { %v1104_v9 = vpack.c.bf16 %v17746_v7, %v17743_v6 }
 0x2c1   : > { %14839 = vmatmul.mubr.msk.bf16.vlgmr.msra.gmra.mxu0 %vm886_vm3, %v1104_v9  ;;  %v1396_v9 = vmul.f32 0.8, %v20679_v51  ;;  %v6433_v51 = vld [vmem:[%s25561_s5] sm:$0xff] }
 0x2c2   : > { %17748 = vmatpush3.bf16.msra.mxu0 %v19647_v5  ;;  %1321 = vmatprep.mubr.bf16.mxu0 %v878_v40  ;;  %v1395_v5 = vmul.f32 0.8, %v20677_v50 }
 0x2c3   : > { %17749 = vmatprep.subr.bf16.mxu0 %v19648_v8 }
 0x2c6   : > { %17750 = vmatpush3.bf16.msra.mxu0 %v19649_v10 }
 0x2c7   : > { %17751 = vmatprep.subr.bf16.mxu0 %v19650_v15 }
 0x2ca   : > { %17752 = vmatpush3.bf16.msra.mxu0 %v19651_v16 }
 0x2cb   : > { %17753 = vmatprep.subr.bf16.mxu0 %v19652_v17 }
 0x2ce   : > { %17754 = vmatpush3.bf16.msra.mxu0 %v19653_v18 }
 0x2cf   : > { %17755 = vmatprep.subr.bf16.mxu0 %v19654_v19 }
 0x2d2   : > { %17756 = vmatpush3.bf16.msra.mxu0 %v19655_v20 }
 0x2d3   : > { %17757 = vmatprep.subr.bf16.mxu0 %v19656_v21 }
 0x2d6   : > { %17758 = vmatpush3.bf16.msra.mxu0 %v19657_v22 }
 0x2d7   : > { %17759 = vmatprep.subr.bf16.mxu0 %v19658_v23  ;;  %v25535_v23 = vmov 0.0  }
 0x2d8   : > { %19068 = vmatprep.subr.bf16.mxu1 %v25535_v23 }
 0x2da   : > { %17760 = vmatpush3.bf16.msra.mxu0 %v19659_v24 }
 0x2db   : > { %17761 = vmatprep.subr.bf16.mxu0 %v19660_v25 }
 0x2de   : > { %17762 = vmatpush3.bf16.msra.mxu0 %v19661_v26 }
 0x2df   : > { %19074 = vmatprep.subr.bf16.mxu0 %v25535_v23 }
 0x2e1   : > { %1322 = vmatmul.mubr.bf16.vlgmr.msra.gmra.mxu0 %v20924_v39 }
 0x2e2   : > { %19076 = vmatprep.mubr.msk.bf16.mxu0 %vm20740_vm4, %v25535_v23 }
 0x381   : > { %v1152_v29 = vpop.f32.mrf.mxu0 }
 0x382   : > { %20680 = vrcp.f32 %v1152_v29 }
 0x383   : > { %v1154_v30 = vpop.f32.mrf.mxu0 }
 0x385   : > { %v1156_v31 = vpop.f32.mrf.mxu0 }
 0x387   : > { %v1158_v32 = vpop.f32.mrf.mxu0 }
 0x38f   : > { %v20681_v52 = vpop.eup %20680 }
 0x3a1   : > { %v17763_v33 = vpop.f32.mrf.mxu0 }
 0x3a3   : > { %v17764_v37 = vpop.f32.mrf.mxu0 }
 0x3a4   : > { %v17765_v42 = vadd.f32 %v17764_v37, %v17763_v33  ;;  %v19666_v33 = vld [vmem:[%s25519_s20] sm:$0xff]  }
 0x3a5   : > { %v17766_v40 = vpop.f32.mrf.mxu0 }
 0x3a7   : > { %v17767_v41 = vpop.f32.mrf.mxu0 }
 0x3a8   : > { %v17768_v39 = vadd.f32 %v17767_v41, %v17766_v40 }
 0x3aa   : > { %v1332_v43 = vpack.c.bf16 %v17768_v39, %v17765_v42 }
 0x3ac   : > { %14858 = vmatmul.mubr.msk.bf16.vlgmr.msra.gmra.mxu1 %vm886_vm3, %v1332_v43 }
 0x3ad   : > { %19070 = vmatprep.mubr.msk.bf16.mxu1 %vm20740_vm4, %v25535_v23 }
 0x46c   : > { %v1380_v44 = vpop.f32.mrf.mxu1 }
 0x46d   : > { %20682 = vrcp.f32 %v1380_v44 }
 0x46e   : > { %20684 = vrcp.f32 %v1154_v30  ;;  %v1382_v45 = vpop.f32.mrf.mxu1 }
 0x46f   : > { %20686 = vrcp.f32 %v1382_v45 }
 0x470   : > { %20688 = vrcp.f32 %v1156_v31  ;;  %v1384_v46 = vpop.f32.mrf.mxu1 }
 0x471   : > { %20690 = vrcp.f32 %v1384_v46 }
 0x472   : > { %20692 = vrcp.f32 %v1158_v32  ;;  %v1386_v47 = vpop.f32.mrf.mxu1 }
 0x473   : > { %20694 = vrcp.f32 %v1386_v47 }
 0x47a   : > { %v20683_v53 = vpop.eup %20682 }
 0x47b   : > { %v20685_v54 = vpop.eup %20684  ;;  %v1405_v55 = vadd.f32 %v20683_v53, %v20681_v52  ;;  %v6434_v53 = vld [vmem:[%s25561_s5 + $0x8] sm:$0xff] }
 0x47c   : > { %v20687_v56 = vpop.eup %20686 }
 0x47d   : > { %v20689_v57 = vpop.eup %20688  ;;  %v1406_v59 = vadd.f32 %v20687_v56, %v20685_v54  ;;  %v1409_v60 = vmul.f32 0.1, %v1405_v55 }
 0x47e   : > { %v20691_v61 = vpop.eup %20690 }
 0x47f   : > { %v20693_v62 = vpop.eup %20692  ;;  %v1410_v0 = vmul.f32 0.1, %v1406_v59  ;;  %v1413_v1 = vadd.f32 %v1409_v60, %v1393_v58  ;;  %v1407_v3 = vadd.f32 %v20691_v61, %v20689_v57 }
 0x480   : > { %v20695_v4 = vpop.eup %20694 }
 0x481   : > { %v1414_v6 = vadd.f32 %v1410_v0, %v1394_v63  ;;  %v1408_v7 = vadd.f32 %v20695_v4, %v20693_v62  ;;  %v1411_v8 = vmul.f32 0.1, %v1407_v3  ;;  %v1417_v10 = vmul.f32 %v20911_v34, %v1413_v1  ;;  %v19667_v62 = vld [vmem:[%s25562_s3] sm:$0xff]   ;;  %v19668_v63 = vld [vmem:[%s25562_s3 + $0x8] sm:$0xff]   ;;  %v19669_v0 = vld [vmem:[%s25562_s3 + $0x10] sm:$0xff]  }
 0x482   : > { %v19670_v1 = vld [vmem:[%s25562_s3 + $0x18] sm:$0xff]   ;;  %v19671_v3 = vld [vmem:[%s25562_s3 + $0x20] sm:$0xff]   ;;  %v19672_v4 = vld [vmem:[%s25562_s3 + $0x28] sm:$0xff]  }
 0x483   : > { %v1418_v15 = vmul.f32 %v20913_v35, %v1414_v6  ;;  %v1412_v16 = vmul.f32 0.1, %v1408_v7  ;;  %v1415_v17 = vadd.f32 %v1411_v8, %v1395_v5  ;;  %v19673_v5 = vld [vmem:[%s25562_s3 + $0x30] sm:$0xff]   ;;  %v19674_v6 = vld [vmem:[%s25562_s3 + $0x38] sm:$0xff]   ;;  %v19675_v7 = vld [vmem:[%s25562_s3 + $0x40] sm:$0xff]  }
 0x484   : > { %v19685_v8 = vld [vmem:[%s25563_s0 + $0x3f8] sm:$0xff]  }
 0x485   : > { %v1421_v18 = vadd.f32 %v1418_v15, %v1417_v10  ;;  %v1416_v19 = vadd.f32 %v1412_v16, %v1396_v9  ;;  %v1419_v20 = vmul.f32 %v20915_v36, %v1415_v17  ;;  %v19686_v9 = vld [vmem:[%s25563_s0 + $0x3b8] sm:$0xff]   ;;  %v19690_v17 = vld [vmem:[%s25563_s0 + $0x270] sm:$0xff]  }
 0x486   : > { %v19689_v16 = vld [vmem:[%s25563_s0 + $0x238] sm:$0xff]  }
 0x487   : > { %1422 = vadd.xlane.f32.xlu0 %v1421_v18  ;;  %v1420_v21 = vmul.f32 %v20920_v38, %v1416_v19  ;;  %v19665_v38 = vld [vmem:[%s25518_s19] sm:$0xff]   ;;  %v19677_v18 = vld [vmem:[%s25562_s3 + $0x50] sm:$0xff]  }
 0x488   : > { %v19691_v19 = vld [vmem:[%s25563_s0 + $0x230] sm:$0xff]  }
 0x489   : > { %v1424_v22 = vadd.f32 %v1420_v21, %v1419_v20 }
 0x48b   : > { %1425 = vadd.xlane.f32.xlu1 %v1424_v22  ;;  %v19695_v22 = vld [vmem:[%s25563_s0 + $0x260] sm:$0xff]  }
 0x510   : > { %v1423_v34 = vpop.xlane.xlu0 %1422 }
 0x511   : > { %v1427_v24 = vmul.f32 0.00390625, %v1423_v34  ;;  %v19678_v34 = vld [vmem:[%s25562_s3 + $0x58] sm:$0xff]  }
 0x514   : > { %v1426_v35 = vpop.xlane.xlu1 %1425 }
 0x515   : > { %v1428_v36 = vmul.f32 0.00390625, %v1426_v35  ;;  %v19696_v35 = vld [vmem:[%s25563_s0 + $0x220] sm:$0xff]  }
 0x517   : > { %v1431_v25 = vpack.c.bf16 %v1428_v36, %v1427_v24  ;;  %v19697_v24 = vld [vmem:[%s25563_s0 + $0x258] sm:$0xff]  }
 0x518   : > { %v19699_v36 = vld [vmem:[%s25563_s0 + $0x218] sm:$0xff]  }
 0x519   : > { %19069 = vmatpush3.bf16.msra.mxu1 %v1431_v25  ;;  %v19700_v25 = vld [vmem:[%s25563_s0 + $0x3f0] sm:$0xff]  }
 0x51c   : > { %19071 = vmatmul.mubr.msk.bf16.vlgmr.msra.gmra.mxu1 %vm886_vm3, %v19665_v38  ;;  %v19702_v38 = vld [vmem:[%s25563_s0 + $0x250] sm:$0xff]  }
 0x51d   : > { %1843 = vmatprep.mubr.bf16.mxu1 %v25533_v2 }
 0x5dc   : > { %v1474_v26 = vpop.f32.mrf.mxu1 }
 0x5dd   : > { %v1481_v29 = vmax.f32 %v1474_v26, 0.0  ;;  %v19679_v26 = vld [vmem:[%s25562_s3 + $0x60] sm:$0xff]  }
 0x5de   : > { %v19072_v27 = vpop.f32.mrf.mxu1 }
 0x5df   : > { %v19703_v27 = vld [vmem:[%s25563_s0 + $0x210] sm:$0xff]  }
 0x5e0   : > { %v1477_v28 = vpop.f32.mrf.mxu1 }
 0x5e1   : > { %v1482_v30 = vmax.f32 %v1477_v28, 0.0  ;;  %v19701_v28 = vld [vmem:[%s25563_s0 + $0x3b0] sm:$0xff]  }
 0x5e2   : > { %v19073_v31 = vpop.f32.mrf.mxu1 }
 0x5e3   : > { %v1485_v32 = vpack.c.bf16 %v1482_v30, %v1481_v29  ;;  %v19704_v29 = vld [vmem:[%s25563_s0 + $0x248] sm:$0xff]   ;;  %v19707_v31 = vld [vmem:[%s25563_s0 + $0x240] sm:$0xff]  }
 0x5e4   : > { %v19706_v30 = vld [vmem:[%s25563_s0 + $0x208] sm:$0xff]  }
 0x5e5   : > { %19075 = vmatpush3.bf16.msra.mxu0 %v1485_v32  ;;  %v19680_v32 = vld [vmem:[%s25562_s3 + $0x68] sm:$0xff]  }
 0x5e8   : > { %19077 = vmatmul.mubr.msk.bf16.vlgmr.msra.gmra.mxu0 %vm886_vm3, %v19666_v33  ;;  %v19708_v33 = vld [vmem:[%s25563_s0 + $0x200] sm:$0xff]  }
 0x6a8   : > { %v1528_v37 = vpop.f32.mrf.mxu0 }
 0x6a9   : > { %v1535_v40 = vsub.f32 0.0, %v1528_v37  ;;  %v19709_v37 = vld [vmem:[%s25563_s0 + $0x78] sm:$0xff]  }
 0x6aa   : > { %v19078_v41 = vpop.f32.mrf.mxu0 }
 0x6ab   : > { %v1537_v42 = vmul.f32 1.442695, %v1535_v40  ;;  %v19710_v40 = vld [vmem:[%s25563_s0 + $0x3e8] sm:$0xff]  }
 0x6ac   : > { %v1531_v39 = vpop.f32.mrf.mxu0  ;;  %v19713_v41 = vld [vmem:[%s25563_s0 + $0x3a8] sm:$0xff]  }
 0x6ad   : > { %20696 = vpow2.f32 %v1537_v42  ;;  %v1536_v43 = vsub.f32 0.0, %v1531_v39  ;;  %v19681_v42 = vld [vmem:[%s25562_s3 + $0x70] sm:$0xff]   ;;  %v19715_v39 = vld [vmem:[%s25563_s0 + $0x3e0] sm:$0xff]  }
 0x6ae   : > { %v19079_v44 = vpop.f32.mrf.mxu0 }
 0x6af   : > { %v1539_v45 = vmul.f32 1.442695, %v1536_v43  ;;  %v19717_v43 = vld [vmem:[%s25563_s0 + $0x3a0] sm:$0xff]   ;;  %v19719_v44 = vld [vmem:[%s25563_s0 + $0x3d8] sm:$0xff]  }
 0x6b1   : > { %20698 = vpow2.f32 %v1539_v45  ;;  %v19722_v45 = vld [vmem:[%s25563_s0 + $0x398] sm:$0xff]  }
 0x6ba   : > { %v20697_v46 = vpop.eup %20696 }
 0x6bb   : > { %v1541_v47 = vadd.f32 1.0, %v20697_v46  ;;  %v19682_v46 = vld [vmem:[%s25562_s3 + $0x78] sm:$0xff]  }
 0x6bd   : > { %20700 = vrcp.f32 %v1541_v47  ;;  %v19724_v47 = vld [vmem:[%s25563_s0 + $0x3d0] sm:$0xff]  }
 0x6be   : > { %v20699_v48 = vpop.eup %20698 }
 0x6bf   : > { %v1542_v49 = vadd.f32 1.0, %v20699_v48  ;;  %v19726_v48 = vld [vmem:[%s25563_s0 + $0x390] sm:$0xff]  }
 0x6c1   : > { %20702 = vrcp.f32 %v1542_v49  ;;  %v19728_v49 = vld [vmem:[%s25563_s0 + $0x3c8] sm:$0xff]  }
 0x6ca   : > { %v20701_v50 = vpop.eup %20700 }
 0x6cb   : > { %1547 = vperm.xlu1 %19617, %v20701_v50   ;;  %v19731_v50 = vld [vmem:[%s25563_s0 + $0x388] sm:$0xff]  }
 0x6ce   : > { %v20703_v52 = vpop.eup %20702 }
 0x6cf   : > { %6437 = vperm.xlu1 %19617, %v6433_v51   ;;  %1552 = vperm.xlu0 %19618, %v20703_v52   ;;  %v19683_v51 = vld [vmem:[%s25562_s3 + $0x80] sm:$0xff]  }
 0x6d0   : > { %v19733_v52 = vld [vmem:[%s25563_s0 + $0x3c0] sm:$0xff]  }
 0x6d3   : > { %6442 = vperm.xlu1 %19617, %v6434_v53   ;;  %v19735_v53 = vld [vmem:[%s25563_s0 + $0x380] sm:$0xff]  }
 0x746   : > { %v1548_v54 = vpop.permute.xlu1 %1547 }
 0x747   : > { %v1555_v56 = vmul.f32 %v1548_v54, %v1417_v10  ;;  %v1556_v57 = vmul.f32 %v1548_v54, %v1418_v15  ;;  %v19676_v10 = vld [vmem:[%s25562_s3 + $0x48] sm:$0xff]   ;;  %v19687_v15 = vld [vmem:[%s25563_s0 + $0x278] sm:$0xff]  }
 0x748   : > { %17773 = vmatprep.subr.bf16.mxu0 %v19687_v15  ;;  %v19737_v54 = vld [vmem:[%s25563_s0 + $0x478] sm:$0xff]  }
 0x749   : > { %17774 = vmatpush3.bf16.msra.mxu0 %v19689_v16 }
 0x74a   : > { %v1553_v55 = vpop.permute.xlu0 %1552  ;;  %17775 = vmatprep.subr.bf16.mxu0 %v19690_v17 }
 0x74b   : > { %v1557_v58 = vmul.f32 %v1553_v55, %v1419_v20  ;;  %v1558_v59 = vmul.f32 %v1553_v55, %v1420_v21  ;;  %v19692_v20 = vld [vmem:[%s25563_s0 + $0x268] sm:$0xff]  }
 0x74c   : > { %v19694_v21 = vld [vmem:[%s25563_s0 + $0x228] sm:$0xff]  }
 0x74d   : > { %v1609_v60 = vpack.c.bf16 %v1557_v58, %v1555_v56  ;;  %v1610_v61 = vpack.c.bf16 %v1558_v59, %v1556_v57  ;;  %17776 = vmatpush3.bf16.msra.mxu0 %v19691_v19  ;;  %v19684_v55 = vld [vmem:[%s25562_s3 + $0x88] sm:$0xff]   ;;  %v19688_v56 = vld [vmem:[%s25562_s3 + $0x90] sm:$0xff]   ;;  %v19693_v57 = vld [vmem:[%s25562_s3 + $0x98] sm:$0xff]  }
 0x74e   : > { %17777 = vmatprep.subr.bf16.mxu0 %v19692_v20  ;;  %v19698_v58 = vld [vmem:[%s25562_s3 + $0xa0] sm:$0xff]   ;;  %v19705_v59 = vld [vmem:[%s25562_s3 + $0xa8] sm:$0xff]  }
 0x74f   : > { %1825 = vmatprep.subr.bf16.mxu1 %v1610_v61  ;;  %v19720_v61 = vld [vmem:[%s25562_s3 + $0xb8] sm:$0xff]  }
 0x750   : > { %1826 = vmatpush1.bf16.msra.mxu1 %v1609_v60  ;;  %v19711_v60 = vld [vmem:[%s25562_s3 + $0xb0] sm:$0xff]  }
 0x751   : > { %17905 = vmatprep.subr.bf16.mxu1 %v19685_v8  ;;  %17778 = vmatpush3.bf16.msra.mxu0 %v19694_v21 }
 0x752   : > { %17779 = vmatprep.subr.bf16.mxu0 %v19695_v22 }
 0x753   : > { %14888 = vmatmul.mubr.msk.bf16.vlgmr.msra.gmra.mxu1 %vm886_vm3, %v19667_v62  ;;  %v19729_v62 = vld [vmem:[%s25562_s3 + $0xc0] sm:$0xff]  }
 0x754   : > { %1853 = vmatprep.mubr.bf16.mxu1 %v25533_v2  ;;  %17906 = vmatpush3.bf16.msra.mxu1 %v19686_v9 }
 0x755   : > { %17780 = vmatpush3.bf16.msra.mxu0 %v19696_v35  ;;  %17907 = vmatprep.subr.bf16.mxu1 %v19700_v25 }
 0x756   : > { %17781 = vmatprep.subr.bf16.mxu0 %v19697_v24 }
 0x758   : > { %17908 = vmatpush3.bf16.msra.mxu1 %v19701_v28 }
 0x759   : > { %17782 = vmatpush3.bf16.msra.mxu0 %v19699_v36  ;;  %17909 = vmatprep.subr.bf16.mxu1 %v19710_v40 }
 0x75a   : > { %17783 = vmatprep.subr.bf16.mxu0 %v19702_v38 }
 0x75b   : > { %14889 = vmatmul.mubr.msk.bf16.gmra.mxu1 %vm886_vm3, %v19668_v63 }
 0x75c   : > { %1863 = vmatprep.mubr.bf16.mxu1 %v25533_v2  ;;  %17910 = vmatpush3.bf16.msra.mxu1 %v19713_v41  ;;  %v19721_v41 = vld [vmem:[%s25563_s0 + $0x28] sm:$0xff]  }
 0x75d   : > { %17784 = vmatpush3.bf16.msra.mxu0 %v19703_v27  ;;  %17911 = vmatprep.subr.bf16.mxu1 %v19715_v39  ;;  %v19723_v39 = vld [vmem:[%s25563_s0 + $0x60] sm:$0xff]  }
 0x75e   : > { %17785 = vmatprep.subr.bf16.mxu0 %v19704_v29  ;;  %v19714_v29 = vld [vmem:[%s25563_s0 + $0x70] sm:$0xff]  }
 0x760   : > { %17912 = vmatpush3.bf16.msra.mxu1 %v19717_v43 }
 0x761   : > { %17786 = vmatpush3.bf16.msra.mxu0 %v19706_v30  ;;  %17913 = vmatprep.subr.bf16.mxu1 %v19719_v44  ;;  %v19725_v44 = vld [vmem:[%s25563_s0 + $0x20] sm:$0xff]  }
 0x762   : > { %17787 = vmatprep.subr.bf16.mxu0 %v19707_v31 }
 0x763   : > { %14890 = vmatmul.mubr.msk.bf16.gmra.mxu1 %vm886_vm3, %v19669_v0 }
 0x764   : > { %1873 = vmatprep.mubr.bf16.mxu1 %v25533_v2  ;;  %17914 = vmatpush3.bf16.msra.mxu1 %v19722_v45 }
 0x765   : > { %17788 = vmatpush3.bf16.msra.mxu0 %v19708_v33  ;;  %17915 = vmatprep.subr.bf16.mxu1 %v19724_v47 }
 0x766   : > { %17795 = vmatprep.subr.bf16.mxu0 %v19709_v37  ;;  %v19718_v37 = vld [vmem:[%s25563_s0 + $0x68] sm:$0xff]  }
 0x768   : > { %17916 = vmatpush3.bf16.msra.mxu1 %v19726_v48 }
 0x769   : > { %17917 = vmatprep.subr.bf16.mxu1 %v19728_v49  ;;  %v19730_v49 = vld [vmem:[%s25563_s0 + $0x18] sm:$0xff]  }
 0x76b   : > { %14891 = vmatmul.mubr.msk.bf16.gmra.mxu1 %vm886_vm3, %v19670_v1 }
 0x76c   : > { %1883 = vmatprep.mubr.bf16.mxu1 %v25533_v2  ;;  %17918 = vmatpush3.bf16.msra.mxu1 %v19731_v50 }
 0x76d   : > { %17919 = vmatprep.subr.bf16.mxu1 %v19733_v52 }
 0x770   : > { %17920 = vmatpush3.bf16.msra.mxu1 %v19735_v53  ;;  %v19734_v53 = vld [vmem:[%s25563_s0 + $0x10] sm:$0xff]  }
 0x771   : > { %17949 = vmatprep.subr.bf16.mxu1 %v19737_v54 }
 0x773   : > { %14892 = vmatmul.mubr.msk.bf16.gmra.mxu1 %vm886_vm3, %v19671_v3 }
 0x774   : > { %1893 = vmatprep.mubr.bf16.mxu1 %v25533_v2 }
 0x77b   : > { %14893 = vmatmul.mubr.msk.bf16.gmra.mxu1 %vm886_vm3, %v19672_v4 }
 0x77c   : > { %1903 = vmatprep.mubr.bf16.mxu1 %v25533_v2 }
 0x783   : > { %14894 = vmatmul.mubr.msk.bf16.gmra.mxu1 %vm886_vm3, %v19673_v5 }
 0x784   : > { %1913 = vmatprep.mubr.bf16.mxu1 %v25533_v2 }
 0x78b   : > { %14895 = vmatmul.mubr.msk.bf16.gmra.mxu1 %vm886_vm3, %v19674_v6 }
 0x78c   : > { %1923 = vmatprep.mubr.bf16.mxu1 %v25533_v2 }
 0x793   : > { %14896 = vmatmul.mubr.msk.bf16.gmra.mxu1 %vm886_vm3, %v19675_v7 }
 0x794   : > { %1933 = vmatprep.mubr.bf16.mxu1 %v25533_v2 }
 0x79b   : > { %14897 = vmatmul.mubr.msk.bf16.gmra.mxu1 %vm886_vm3, %v19676_v10 }
 0x79c   : > { %1943 = vmatprep.mubr.bf16.mxu1 %v25533_v2 }
 0x7a3   : > { %14898 = vmatmul.mubr.msk.bf16.gmra.mxu1 %vm886_vm3, %v19677_v18 }
 0x7a4   : > { %1953 = vmatprep.mubr.bf16.mxu1 %v25533_v2 }
 0x7ab   : > { %14899 = vmatmul.mubr.msk.bf16.gmra.mxu1 %vm886_vm3, %v19678_v34 }
 0x7ac   : > { %1963 = vmatprep.mubr.bf16.mxu1 %v25533_v2 }
 0x7b3   : > { %14900 = vmatmul.mubr.msk.bf16.gmra.mxu1 %vm886_vm3, %v19679_v26  ;;  %v19712_v26 = vld [vmem:[%s25563_s0 + $0x38] sm:$0xff]  }
 0x7b4   : > { %1973 = vmatprep.mubr.bf16.mxu1 %v25533_v2 }
 0x7bb   : > { %14901 = vmatmul.mubr.msk.bf16.gmra.mxu1 %vm886_vm3, %v19680_v32  ;;  %v19716_v32 = vld [vmem:[%s25563_s0 + $0x30] sm:$0xff]  }
 0x7bc   : > { %1983 = vmatprep.mubr.bf16.mxu1 %v25533_v2 }
 0x7c3   : > { %14902 = vmatmul.mubr.msk.bf16.gmra.mxu1 %vm886_vm3, %v19681_v42 }
 0x7c4   : > { %1993 = vmatprep.mubr.bf16.mxu1 %v25533_v2 }
 0x7cb   : > { %14903 = vmatmul.mubr.msk.bf16.gmra.mxu1 %vm886_vm3, %v19682_v46  ;;  %v19727_v46 = vld [vmem:[%s25563_s0 + $0x58] sm:$0xff]  }
 0x7cc   : > { %2003 = vmatprep.mubr.bf16.mxu1 %v25533_v2 }
 0x7d3   : > { %14904 = vmatmul.mubr.msk.bf16.gmra.mxu1 %vm886_vm3, %v19683_v51  ;;  %v19732_v51 = vld [vmem:[%s25563_s0 + $0x50] sm:$0xff]  }
 0x7d4   : > { %2013 = vmatprep.mubr.bf16.mxu1 %v25533_v2 }
 0x7db   : > { %14905 = vmatmul.mubr.msk.bf16.gmra.mxu1 %vm886_vm3, %v19684_v55  ;;  %v19736_v55 = vld [vmem:[%s25563_s0 + $0x48] sm:$0xff]  }
 0x7dc   : > { %2023 = vmatprep.mubr.bf16.mxu1 %v25533_v2 }
 0x7e3   : > { %14906 = vmatmul.mubr.msk.bf16.gmra.mxu1 %vm886_vm3, %v19688_v56 }
 0x7e4   : > { %2033 = vmatprep.mubr.bf16.mxu1 %v25533_v2 }
 0x7eb   : > { %14907 = vmatmul.mubr.msk.bf16.gmra.mxu1 %vm886_vm3, %v19693_v57 }
 0x7ec   : > { %2043 = vmatprep.mubr.bf16.mxu1 %v25533_v2 }
 0x7f3   : > { %14908 = vmatmul.mubr.msk.bf16.gmra.mxu1 %vm886_vm3, %v19698_v58 }
 0x7f4   : > { %2053 = vmatprep.mubr.bf16.mxu1 %v25533_v2 }
 0x7fb   : > { %14909 = vmatmul.mubr.msk.bf16.gmra.mxu1 %vm886_vm3, %v19705_v59  ;;  %v19738_v59 = vld [vmem:[%s25563_s0 + $0x8] sm:$0xff]  }
 0x7fc   : > { %2063 = vmatprep.mubr.bf16.mxu1 %v25533_v2 }
 0x803   : > { %14910 = vmatmul.mubr.msk.bf16.gmra.mxu1 %vm886_vm3, %v19711_v60  ;;  %v19739_v60 = vld [vmem:[%s25563_s0 + $0x438] sm:$0xff]  }
 0x804   : > { %2073 = vmatprep.mubr.bf16.mxu1 %v25533_v2 }
 0x80b   : > { %14911 = vmatmul.mubr.msk.bf16.gmra.mxu1 %vm886_vm3, %v19720_v61  ;;  %v19740_v61 = vld [vmem:[%s25563_s0 + $0x40] sm:$0xff]  }
 0x80c   : > { %2083 = vmatprep.mubr.bf16.mxu1 %v25533_v2 }
 0x813   : > { %v21293_v63 = vpop.f32.mrf.mxu1  ;;  %14912 = vmatmul.mubr.msk.bf16.gmra.mxu1 %vm886_vm3, %v19729_v62  ;;  %v19741_v62 = vld [vmem:[%s25563_s0 + $0x470] sm:$0xff]  }
 0x815   : > { %v1847_v0 = vpop.f32.mrf.mxu1 }
 0x817   : > { %v21296_v1 = vpop.f32.mrf.mxu1 }
 0x818   : > { %v2094_v3 = vpack.c.bf16 %v21296_v1, %v21293_v63  ;;  %v19753_v63 = vld [vmem:[%s25563_s0 + $0x458] sm:$0xff]  }
 0x819   : > { %v1851_v4 = vpop.f32.mrf.mxu1 }
 0x81a   : > { %v2095_v30 = vpack.c.bf16 %v1851_v4, %v1847_v0 }
 0x81b   : > { %v21300_v5 = vpop.f32.mrf.mxu1 }
 0x81d   : > { %v21302_v6 = vpop.f32.mrf.mxu1 }
 0x81f   : > { %v21304_v7 = vpop.f32.mrf.mxu1 }
 0x820   : > { %v2096_v8 = vpack.c.bf16 %v21304_v7, %v21300_v5  ;;  %v19817_v7 = vld [vmem:[%s25563_s0 + $0x658] sm:$0xff]  }
 0x821   : > { %v21308_v9 = vpop.f32.mrf.mxu1 }
 0x823   : > { %v21310_v10 = vpop.f32.mrf.mxu1 }
 0x825   : > { %v21312_v15 = vpop.f32.mrf.mxu1 }
 0x827   : > { %v21314_v16 = vpop.f32.mrf.mxu1 }
 0x829   : > { %v21318_v18 = vpop.f32.mrf.mxu1 }
 0x82b   : > { %v21320_v19 = vpop.f32.mrf.mxu1 }
 0x82d   : > { %v21322_v20 = vpop.f32.mrf.mxu1 }
 0x82f   : > { %v21324_v21 = vpop.f32.mrf.mxu1 }
 0x831   : > { %v21328_v34 = vpop.f32.mrf.mxu1 }
 0x833   : > { %v1885_v35 = vpop.f32.mrf.mxu1 }
 0x835   : > { %v1887_v24 = vpop.f32.mrf.mxu1 }
 0x837   : > { %v1889_v36 = vpop.f32.mrf.mxu1 }
 0x838   : > { %v2102_v27 = vpack.c.bf16 %v1889_v36, %v1885_v35  ;;  %v19742_v35 = vld [vmem:[%s25563_s0] sm:$0xff]   ;;  %v19744_v36 = vld [vmem:[%s25563_s0 + $0x2f8] sm:$0xff]  }
 0x839   : > { %v1891_v25 = vpop.f32.mrf.mxu1 }
 0x83a   : > { %v2103_v38 = vpack.c.bf16 %v1891_v25, %v1887_v24  ;;  %v19743_v24 = vld [vmem:[%s25563_s0 + $0x430] sm:$0xff]   ;;  %v19745_v25 = vld [vmem:[%s25563_s0 + $0x468] sm:$0xff]  }
 0x83b   : > { %v21333_v28 = vpop.f32.mrf.mxu1 }
 0x83c   : > { %2436 = vmatprep.mubr.bf16.mxu0 %v2103_v38 }
 0x83d   : > { %v21338_v31 = vpop.f32.mrf.mxu1  ;;  %2437 = vmatmul.mubr.bf16.vlgmr.msra.gmra.mxu0 %v2102_v27  ;;  %v19746_v27 = vld [vmem:[%s25563_s0 + $0x2b8] sm:$0xff]  }
 0x83e   : > { %17796 = vmatpush3.bf16.msra.mxu0 %v19712_v26  ;;  %2573 = vmatprep.mubr.bf16.mxu0 %v2095_v30 }
 0x83f   : > { %v21343_v33 = vpop.f32.mrf.mxu1  ;;  %17797 = vmatprep.subr.bf16.mxu0 %v19714_v29  ;;  %v19747_v29 = vld [vmem:[%s25563_s0 + $0x428] sm:$0xff]  }
 0x841   : > { %v21348_v40 = vpop.f32.mrf.mxu1 }
 0x842   : > { %17798 = vmatpush3.bf16.msra.mxu0 %v19716_v32  ;;  %v19748_v32 = vld [vmem:[%s25563_s0 + $0x2f0] sm:$0xff]  }
 0x843   : > { %v21353_v42 = vpop.f32.mrf.mxu1  ;;  %17799 = vmatprep.subr.bf16.mxu0 %v19718_v37  ;;  %v19749_v37 = vld [vmem:[%s25563_s0 + $0x460] sm:$0xff]  }
 0x845   : > { %v21358_v43 = vpop.f32.mrf.mxu1 }
 0x846   : > { %17800 = vmatpush3.bf16.msra.mxu0 %v19721_v41 }
 0x847   : > { %v21363_v45 = vpop.f32.mrf.mxu1  ;;  %17801 = vmatprep.subr.bf16.mxu0 %v19723_v39  ;;  %v2105_v39 = vpack.c.bf16 %v21348_v40, %v21338_v31  ;;  %v19752_v31 = vld [vmem:[%s25563_s0 + $0x2e8] sm:$0xff]  }
 0x848   : > { %v2106_v47 = vpack.c.bf16 %v21363_v45, %v21353_v42  ;;  %v19849_v45 = vld [vmem:[%s25563_s0 + $0x758] sm:$0xff]  }
 0x849   : > { %v21370_v48 = vpop.f32.mrf.mxu1 }
 0x84a   : > { %17802 = vmatpush3.bf16.msra.mxu0 %v19725_v44 }
 0x84b   : > { %v1915_v50 = vpop.f32.mrf.mxu1  ;;  %17803 = vmatprep.subr.bf16.mxu0 %v19727_v46  ;;  %v19750_v46 = vld [vmem:[%s25563_s0 + $0x2b0] sm:$0xff]  }
 0x84d   : > { %v1917_v52 = vpop.f32.mrf.mxu1 }
 0x84e   : > { %17804 = vmatpush3.bf16.msra.mxu0 %v19730_v49  ;;  %v19751_v49 = vld [vmem:[%s25563_s0 + $0x420] sm:$0xff]  }
 0x84f   : > { %v1919_v54 = vpop.f32.mrf.mxu1  ;;  %17805 = vmatprep.subr.bf16.mxu0 %v19732_v51  ;;  %v19755_v51 = vld [vmem:[%s25563_s0 + $0x418] sm:$0xff]  }
 0x850   : > { %v2108_v56 = vpack.c.bf16 %v1919_v54, %v1915_v50  ;;  %v19754_v50 = vld [vmem:[%s25563_s0 + $0x2a8] sm:$0xff]  }
 0x851   : > { %v1921_v57 = vpop.f32.mrf.mxu1 }
 0x852   : > { %v2109_v58 = vpack.c.bf16 %v1921_v57, %v1917_v52  ;;  %17806 = vmatpush3.bf16.msra.mxu0 %v19734_v53  ;;  %v19756_v52 = vld [vmem:[%s25563_s0 + $0x2e0] sm:$0xff]   ;;  %v19757_v53 = vld [vmem:[%s25563_s0 + $0x450] sm:$0xff]  }
 0x853   : > { %17807 = vmatprep.subr.bf16.mxu0 %v19736_v55  ;;  %v21396_v0 = vpop.f32.mrf.mxu1  ;;  %v19759_v57 = vld [vmem:[%s25563_s0 + $0x410] sm:$0xff]  }
 0x854   : > { %3357 = vmatprep.mubr.bf16.mxu1 %v2109_v58  ;;  %v19760_v58 = vld [vmem:[%s25563_s0 + $0x2d8] sm:$0xff]  }
 0x855   : > { %3358 = vmatmul.mubr.bf16.vlgmr.msra.gmra.mxu1 %v2108_v56  ;;  %v1927_v4 = vpop.f32.mrf.mxu1  ;;  %v19758_v56 = vld [vmem:[%s25563_s0 + $0x2a0] sm:$0xff]  }
 0x856   : > { %17808 = vmatpush3.bf16.msra.mxu0 %v19738_v59  ;;  %17950 = vmatpush3.bf16.msra.mxu1 %v19739_v60  ;;  %v19761_v59 = vld [vmem:[%s25563_s0 + $0x448] sm:$0xff]  }
 0x857   : > { %17809 = vmatprep.subr.bf16.mxu0 %v19740_v61  ;;  %17951 = vmatprep.subr.bf16.mxu1 %v19741_v62  ;;  %v21410_v38 = vpop.f32.mrf.mxu1  ;;  %v19762_v62 = vld [vmem:[%s25563_s0 + $0x298] sm:$0xff]  }
 0x859   : > { %v1931_v26 = vpop.f32.mrf.mxu1 }
 0x85a   : > { %17810 = vmatpush3.bf16.msra.mxu0 %v19742_v35  ;;  %17952 = vmatpush3.bf16.msra.mxu1 %v19743_v24  ;;  %v2111_v30 = vpack.c.bf16 %v1931_v26, %v1927_v4  ;;  %v19763_v4 = vld [vmem:[%s25563_s0 + $0x408] sm:$0xff]   ;;  %v19764_v35 = vld [vmem:[%s25563_s0 + $0x2d0] sm:$0xff]   ;;  %v19765_v24 = vld [vmem:[%s25563_s0 + $0x440] sm:$0xff]  }
 0x85b   : > { %17817 = vmatprep.subr.bf16.mxu0 %v19744_v36  ;;  %17953 = vmatprep.subr.bf16.mxu1 %v19745_v25  ;;  %v21424_v41 = vpop.f32.mrf.mxu1  ;;  %v19766_v26 = vld [vmem:[%s25563_s0 + $0x290] sm:$0xff]  }
 0x85c   : > { %3664 = vmatprep.mubr.bf16.mxu1 %v2111_v30  ;;  %v19769_v30 = vld [vmem:[%s25563_s0 + $0x578] sm:$0xff]  }
 0x85d   : > { %2574 = vmatmul.mubr.bf16.vlgmr.msra.gmra.mxu0 %v2094_v3  ;;  %v21431_v44 = vpop.f32.mrf.mxu1 }
 0x85e   : > { %17818 = vmatpush3.bf16.msra.mxu0 %v19746_v27  ;;  %17954 = vmatpush3.bf16.msra.mxu1 %v19747_v29  ;;  %v19767_v27 = vld [vmem:[%s25563_s0 + $0x400] sm:$0xff]   ;;  %v19768_v29 = vld [vmem:[%s25563_s0 + $0x2c8] sm:$0xff]  }
 0x85f   : > { %17819 = vmatprep.subr.bf16.mxu0 %v19748_v32  ;;  %17955 = vmatprep.subr.bf16.mxu1 %v19749_v37  ;;  %v21445_v1 = vpop.f32.mrf.mxu1  ;;  %v19834_v37 = vld [vmem:[%s25563_s0 + $0x308] sm:$0xff]  }
 0x860   : > { %2743 = vmatprep.mubr.bf16.mxu0 %v2105_v39  ;;  %v2110_v39 = vpack.c.bf16 %v21410_v38, %v21396_v0  ;;  %v19773_v0 = vld [vmem:[%s25563_s0 + $0x570] sm:$0xff]  }
 0x861   : > { %v21449_v40 = vpop.f32.mrf.mxu1 }
 0x862   : > { %17820 = vmatpush3.bf16.msra.mxu0 %v19750_v46  ;;  %17956 = vmatpush3.bf16.msra.mxu1 %v19751_v49  ;;  %v19770_v49 = vld [vmem:[%s25563_s0 + $0x288] sm:$0xff]  }
 0x863   : > { %17821 = vmatprep.subr.bf16.mxu0 %v19752_v31  ;;  %17957 = vmatprep.subr.bf16.mxu1 %v19753_v63  ;;  %v21463_v54 = vpop.f32.mrf.mxu1  ;;  %v19771_v31 = vld [vmem:[%s25563_s0 + $0x538] sm:$0xff]   ;;  %v19772_v63 = vld [vmem:[%s25563_s0 + $0x2c0] sm:$0xff]  }
 0x865   : > { %v1947_v55 = vpop.f32.mrf.mxu1 }
 0x866   : > { %17822 = vmatpush3.bf16.msra.mxu0 %v19754_v50  ;;  %17958 = vmatpush3.bf16.msra.mxu1 %v19755_v51 }
 0x867   : > { %17823 = vmatprep.subr.bf16.mxu0 %v19756_v52  ;;  %17959 = vmatprep.subr.bf16.mxu1 %v19757_v53  ;;  %v21477_v60 = vpop.f32.mrf.mxu1  ;;  %v19774_v52 = vld [vmem:[%s25563_s0 + $0x280] sm:$0xff]   ;;  %v19775_v53 = vld [vmem:[%s25563_s0 + $0x530] sm:$0xff]  }
 0x869   : > { %v1951_v61 = vpop.f32.mrf.mxu1 }
 0x86a   : > { %17824 = vmatpush3.bf16.msra.mxu0 %v19758_v56  ;;  %17960 = vmatpush3.bf16.msra.mxu1 %v19759_v57  ;;  %v2115_v50 = vpack.c.bf16 %v1951_v61, %v1947_v55  ;;  %v19776_v56 = vld [vmem:[%s25563_s0 + $0xf8] sm:$0xff]   ;;  %v19777_v55 = vld [vmem:[%s25563_s0 + $0x568] sm:$0xff]   ;;  %v2104_v61 = vpack.c.bf16 %v21343_v33, %v21333_v28  ;;  %v19782_v33 = vld [vmem:[%s25563_s0 + $0xb0] sm:$0xff]  }
 0x86b   : > { %17825 = vmatprep.subr.bf16.mxu0 %v19760_v58  ;;  %17961 = vmatprep.subr.bf16.mxu1 %v19761_v59  ;;  %v21491_v36 = vpop.f32.mrf.mxu1  ;;  %v19778_v59 = vld [vmem:[%s25563_s0 + $0xb8] sm:$0xff]  }
 0x86d   : > { %v21493_v25 = vpop.f32.mrf.mxu1 }
 0x86e   : > { %17826 = vmatpush3.bf16.msra.mxu0 %v19762_v62  ;;  %17962 = vmatpush3.bf16.msra.mxu1 %v19763_v4  ;;  %v19779_v62 = vld [vmem:[%s25563_s0 + $0x528] sm:$0xff]   ;;  %v19780_v4 = vld [vmem:[%s25563_s0 + $0xf0] sm:$0xff]  }
 0x86f   : > { %17827 = vmatprep.subr.bf16.mxu0 %v19764_v35  ;;  %17963 = vmatprep.subr.bf16.mxu1 %v19765_v24  ;;  %v21507_v32 = vpop.f32.mrf.mxu1  ;;  %v2097_v24 = vpack.c.bf16 %v21308_v9, %v21302_v6  ;;  %v19784_v6 = vld [vmem:[%s25563_s0 + $0xe8] sm:$0xff]  }
 0x871   : > { %v21513_v46 = vpop.f32.mrf.mxu1 }
 0x872   : > { %17828 = vmatpush3.bf16.msra.mxu0 %v19766_v26  ;;  %17964 = vmatpush3.bf16.msra.mxu1 %v19767_v27  ;;  %v19781_v26 = vld [vmem:[%s25563_s0 + $0x560] sm:$0xff]  }
 0x873   : > { %17829 = vmatprep.subr.bf16.mxu0 %v19768_v29  ;;  %17993 = vmatprep.subr.bf16.mxu1 %v19769_v30  ;;  %v21527_v38 = vpop.f32.mrf.mxu1  ;;  %v19783_v27 = vld [vmem:[%s25563_s0 + $0x520] sm:$0xff]   ;;  %v19785_v29 = vld [vmem:[%s25563_s0 + $0x558] sm:$0xff]  }
 0x874   : > { %v19836_v30 = vld [vmem:[%s25563_s0 + $0x340] sm:$0xff]  }
 0x875   : > { %3665 = vmatmul.mubr.bf16.vlgmr.msra.gmra.mxu1 %v2110_v39  ;;  %v21529_v51 = vpop.f32.mrf.mxu1 }
 0x876   : > { %17830 = vmatpush3.bf16.msra.mxu0 %v19770_v49  ;;  %17994 = vmatpush3.bf16.msra.mxu1 %v19771_v31  ;;  %v19786_v49 = vld [vmem:[%s25563_s0 + $0xa8] sm:$0xff]   ;;  %v19787_v31 = vld [vmem:[%s25563_s0 + $0x518] sm:$0xff]  }
 0x877   : > { %17831 = vmatprep.subr.bf16.mxu0 %v19772_v63  ;;  %17995 = vmatprep.subr.bf16.mxu1 %v19773_v0  ;;  %v21543_v57 = vpop.f32.mrf.mxu1  ;;  %v19788_v63 = vld [vmem:[%s25563_s0 + $0xe0] sm:$0xff]  }
 0x878   : > { %4008 = vmatprep.mubr.bf16.mxu1 %v2115_v50  ;;  %v19789_v50 = vld [vmem:[%s25563_s0 + $0x550] sm:$0xff]  }
 0x879   : > { %v21545_v58 = vpop.f32.mrf.mxu1 }
 0x87a   : > { %17832 = vmatpush3.bf16.msra.mxu0 %v19774_v52  ;;  %17996 = vmatpush3.bf16.msra.mxu1 %v19775_v53  ;;  %v19790_v53 = vld [vmem:[%s25563_s0 + $0xa0] sm:$0xff]  }
 0x87b   : > { %17839 = vmatprep.subr.bf16.mxu0 %v19776_v56  ;;  %17997 = vmatprep.subr.bf16.mxu1 %v19777_v55  ;;  %v21558_v35 = vpop.f32.mrf.mxu1  ;;  %v19791_v56 = vld [vmem:[%s25563_s0 + $0x510] sm:$0xff]   ;;  %v19792_v55 = vld [vmem:[%s25563_s0 + $0xd8] sm:$0xff]  }
 0x87d   : > { %2744 = vmatmul.mubr.bf16.vlgmr.msra.gmra.mxu0 %v2104_v61  ;;  %v21565_v28 = vpop.f32.mrf.mxu1  ;;  %v19793_v61 = vld [vmem:[%s25563_s0 + $0x548] sm:$0xff]  }
 0x87e   : > { %17840 = vmatpush3.bf16.msra.mxu0 %v19778_v59  ;;  %2880 = vmatprep.mubr.bf16.mxu0 %v2097_v24  ;;  %v19795_v24 = vld [vmem:[%s25563_s0 + $0x508] sm:$0xff]  }
 0x87f   : > { %17998 = vmatpush3.bf16.msra.mxu1 %v19779_v62  ;;  %17841 = vmatprep.subr.bf16.mxu0 %v19780_v4  ;;  %v21576_v9 = vpop.f32.mrf.mxu1  ;;  %v19794_v4 = vld [vmem:[%s25563_s0 + $0x98] sm:$0xff]  }
 0x880   : > { %17999 = vmatprep.subr.bf16.mxu1 %v19781_v26  ;;  %v19796_v26 = vld [vmem:[%s25563_s0 + $0xd0] sm:$0xff]  }
 0x881   : > { %v21583_v39 = vpop.f32.mrf.mxu1 }
 0x882   : > { %17842 = vmatpush3.bf16.msra.mxu0 %v19782_v33 }
 0x883   : > { %18000 = vmatpush3.bf16.msra.mxu1 %v19783_v27  ;;  %17843 = vmatprep.subr.bf16.mxu0 %v19784_v6  ;;  %v21594_v0 = vpop.f32.mrf.mxu1  ;;  %v19797_v27 = vld [vmem:[%s25563_s0 + $0x540] sm:$0xff]  }
 0x884   : > { %18001 = vmatprep.subr.bf16.mxu1 %v19785_v29  ;;  %v19798_v29 = vld [vmem:[%s25563_s0 + $0x90] sm:$0xff]  }
 0x885   : > { %v21599_v52 = vpop.f32.mrf.mxu1 }
 0x886   : > { %17844 = vmatpush3.bf16.msra.mxu0 %v19786_v49  ;;  %v19799_v49 = vld [vmem:[%s25563_s0 + $0x500] sm:$0xff]  }
 0x887   : > { %18002 = vmatpush3.bf16.msra.mxu1 %v19787_v31  ;;  %17845 = vmatprep.subr.bf16.mxu0 %v19788_v63  ;;  %v21610_v59 = vpop.f32.mrf.mxu1  ;;  %v19800_v31 = vld [vmem:[%s25563_s0 + $0xc8] sm:$0xff]  }
 0x888   : > { %18003 = vmatprep.subr.bf16.mxu1 %v19789_v50  ;;  %v19801_v50 = vld [vmem:[%s25563_s0 + $0x678] sm:$0xff]  }
 0x889   : > { %v21615_v62 = vpop.f32.mrf.mxu1 }
 0x88a   : > { %17846 = vmatpush3.bf16.msra.mxu0 %v19790_v53 }
 0x88b   : > { %18004 = vmatpush3.bf16.msra.mxu1 %v19791_v56  ;;  %17847 = vmatprep.subr.bf16.mxu0 %v19792_v55  ;;  %v21626_v33 = vpop.f32.mrf.mxu1  ;;  %v2114_v55 = vpack.c.bf16 %v21477_v60, %v21463_v54  ;;  %v19805_v54 = vld [vmem:[%s25563_s0 + $0x670] sm:$0xff]   ;;  %v2119_v60 = vpack.c.bf16 %v21545_v58, %v21529_v51  ;;  %v19809_v51 = vld [vmem:[%s25563_s0 + $0x668] sm:$0xff]  }
 0x88c   : > { %18005 = vmatprep.subr.bf16.mxu1 %v19793_v61  ;;  %v19802_v61 = vld [vmem:[%s25563_s0 + $0x88] sm:$0xff]  }
 0x88d   : > { %v21631_v6 = vpop.f32.mrf.mxu1 }
 0x88e   : > { %17848 = vmatpush3.bf16.msra.mxu0 %v19794_v4  ;;  %v19803_v4 = vld [vmem:[%s25563_s0 + $0x638] sm:$0xff]  }
 0x88f   : > { %18006 = vmatpush3.bf16.msra.mxu1 %v19795_v24  ;;  %17849 = vmatprep.subr.bf16.mxu0 %v19796_v26  ;;  %v21642_v63 = vpop.f32.mrf.mxu1  ;;  %v19804_v24 = vld [vmem:[%s25563_s0 + $0xc0] sm:$0xff]  }
 0x890   : > { %18007 = vmatprep.subr.bf16.mxu1 %v19797_v27 }
 0x891   : > { %v21649_v56 = vpop.f32.mrf.mxu1 }
 0x892   : > { %17850 = vmatpush3.bf16.msra.mxu0 %v19798_v29  ;;  %v19806_v29 = vld [vmem:[%s25563_s0 + $0x80] sm:$0xff]  }
 0x893   : > { %18008 = vmatpush3.bf16.msra.mxu1 %v19799_v49  ;;  %17851 = vmatprep.subr.bf16.mxu0 %v19800_v31  ;;  %v21662_v26 = vpop.f32.mrf.mxu1  ;;  %v19807_v49 = vld [vmem:[%s25563_s0 + $0x630] sm:$0xff]   ;;  %v19808_v31 = vld [vmem:[%s25563_s0 + $0x378] sm:$0xff]  }
 0x894   : > { %18037 = vmatprep.subr.bf16.mxu1 %v19801_v50 }
 0x895   : > { %v21669_v27 = vpop.f32.mrf.mxu1 }
 0x896   : > { %17852 = vmatpush3.bf16.msra.mxu0 %v19802_v61  ;;  %4009 = vmatmul.mubr.bf16.vlgmr.msra.gmra.mxu1 %v2114_v55  ;;  %v2107_v55 = vpack.c.bf16 %v21370_v48, %v21358_v43  ;;  %v19810_v61 = vld [vmem:[%s25563_s0 + $0x338] sm:$0xff]   ;;  %v19813_v43 = vld [vmem:[%s25563_s0 + $0x660] sm:$0xff]  }
 0x897   : > { %18038 = vmatpush3.bf16.msra.mxu1 %v19803_v4  ;;  %17853 = vmatprep.subr.bf16.mxu0 %v19804_v24  ;;  %v21680_v50 = vpop.f32.mrf.mxu1  ;;  %v19811_v4 = vld [vmem:[%s25563_s0 + $0x628] sm:$0xff]   ;;  %v19812_v24 = vld [vmem:[%s25563_s0 + $0x370] sm:$0xff]  }
 0x898   : > { %18039 = vmatprep.subr.bf16.mxu1 %v19805_v54  ;;  %4352 = vmatprep.mubr.bf16.mxu1 %v2119_v60  ;;  %v19814_v60 = vld [vmem:[%s25563_s0 + $0x330] sm:$0xff]  }
 0x899   : > { %v21685_v58 = vpop.f32.mrf.mxu1 }
 0x89a   : > { %17854 = vmatpush3.bf16.msra.mxu0 %v19806_v29  ;;  %v19815_v29 = vld [vmem:[%s25563_s0 + $0x620] sm:$0xff]  }
 0x89b   : > { %18040 = vmatpush3.bf16.msra.mxu1 %v19807_v49  ;;  %17861 = vmatprep.subr.bf16.mxu0 %v19808_v31  ;;  %v21698_v54 = vpop.f32.mrf.mxu1  ;;  %v19816_v49 = vld [vmem:[%s25563_s0 + $0x368] sm:$0xff]  }
 0x89c   : > { %18041 = vmatprep.subr.bf16.mxu1 %v19809_v51  ;;  %v19818_v51 = vld [vmem:[%s25563_s0 + $0x328] sm:$0xff]  }
 0x89d   : > { %2881 = vmatmul.mubr.bf16.vlgmr.msra.gmra.mxu0 %v2096_v8  ;;  %v21706_v48 = vpop.f32.mrf.mxu1 }
 0x89e   : > { %17862 = vmatpush3.bf16.msra.mxu0 %v19810_v61  ;;  %3050 = vmatprep.mubr.bf16.mxu0 %v2107_v55  ;;  %v19819_v55 = vld [vmem:[%s25563_s0 + $0x618] sm:$0xff]   ;;  %v19820_v61 = vld [vmem:[%s25563_s0 + $0x360] sm:$0xff]  }
 0x89f   : > { %18042 = vmatpush3.bf16.msra.mxu1 %v19811_v4  ;;  %17863 = vmatprep.subr.bf16.mxu0 %v19812_v24  ;;  %v21717_v5 = vpop.f32.mrf.mxu1  ;;  %v19821_v24 = vld [vmem:[%s25563_s0 + $0x650] sm:$0xff]  }
 0x8a0   : > { %18043 = vmatprep.subr.bf16.mxu1 %v19813_v43 }
 0x8a1   : > { %v21724_v31 = vpop.f32.mrf.mxu1 }
 0x8a2   : > { %17864 = vmatpush3.bf16.msra.mxu0 %v19814_v60  ;;  %v19822_v60 = vld [vmem:[%s25563_s0 + $0x320] sm:$0xff]  }
 0x8a3   : > { %18044 = vmatpush3.bf16.msra.mxu1 %v19815_v29  ;;  %17865 = vmatprep.subr.bf16.mxu0 %v19816_v49  ;;  %v21735_v4 = vpop.f32.mrf.mxu1  ;;  %v19823_v29 = vld [vmem:[%s25563_s0 + $0x610] sm:$0xff]   ;;  %v19824_v49 = vld [vmem:[%s25563_s0 + $0x358] sm:$0xff]  }
 0x8a4   : > { %18045 = vmatprep.subr.bf16.mxu1 %v19817_v7 }
 0x8a5   : > { %v21740_v43 = vpop.f32.mrf.mxu1 }
 0x8a6   : > { %17866 = vmatpush3.bf16.msra.mxu0 %v19818_v51  ;;  %v19825_v51 = vld [vmem:[%s25563_s0 + $0x648] sm:$0xff]  }
 0x8a7   : > { %18046 = vmatpush3.bf16.msra.mxu1 %v19819_v55  ;;  %17867 = vmatprep.subr.bf16.mxu0 %v19820_v61  ;;  %v21751_v7 = vpop.f32.mrf.mxu1  ;;  %v19826_v55 = vld [vmem:[%s25563_s0 + $0x318] sm:$0xff]   ;;  %v19827_v61 = vld [vmem:[%s25563_s0 + $0x608] sm:$0xff]  }
 0x8a8   : > { %18047 = vmatprep.subr.bf16.mxu1 %v19821_v24  ;;  %v19828_v24 = vld [vmem:[%s25563_s0 + $0x350] sm:$0xff]  }
 0x8a9   : > { %v21756_v2 = vpop.f32.mrf.mxu1 }
 0x8aa   : > { %17868 = vmatpush3.bf16.msra.mxu0 %v19822_v60  ;;  %v19829_v60 = vld [vmem:[%s25563_s0 + $0x640] sm:$0xff]  }
 0x8ab   : > { %18048 = vmatpush3.bf16.msra.mxu1 %v19823_v29  ;;  %17869 = vmatprep.subr.bf16.mxu0 %v19824_v49  ;;  %v21767_v8 = vpop.f32.mrf.mxu1  ;;  %v19830_v29 = vld [vmem:[%s25563_s0 + $0x310] sm:$0xff]   ;;  %v19831_v49 = vld [vmem:[%s25563_s0 + $0x600] sm:$0xff]  }
 0x8ac   : > { %18049 = vmatprep.subr.bf16.mxu1 %v19825_v51  ;;  %v19832_v51 = vld [vmem:[%s25563_s0 + $0x348] sm:$0xff]  }
 0x8ad   : > { %v21772_v53 = vpop.f32.mrf.mxu1 }
 0x8ae   : > { %17870 = vmatpush3.bf16.msra.mxu0 %v19826_v55  ;;  %v19833_v55 = vld [vmem:[%s25563_s0 + $0x778] sm:$0xff]  }
 0x8af   : > { %18050 = vmatpush3.bf16.msra.mxu1 %v19827_v61  ;;  %17871 = vmatprep.subr.bf16.mxu0 %v19828_v24  ;;  %v21783_v23 = vpop.f32.mrf.mxu1  ;;  %v2118_v24 = vpack.c.bf16 %v21543_v57, %v21527_v38  ;;  %v19837_v38 = vld [vmem:[%s25563_s0 + $0x770] sm:$0xff]   ;;  %v2123_v57 = vpack.c.bf16 %v21615_v62, %v21599_v52  ;;  %v19843_v62 = vld [vmem:[%s25563_s0 + $0x728] sm:$0xff]  }
 0x8b0   : > { %18051 = vmatprep.subr.bf16.mxu1 %v19829_v60  ;;  %v19835_v60 = vld [vmem:[%s25563_s0 + $0x738] sm:$0xff]  }
 0x8b1   : > { %v21790_v61 = vpop.f32.mrf.mxu1 }
 0x8b2   : > { %17872 = vmatpush3.bf16.msra.mxu0 %v19830_v29 }
 0x8b3   : > { %18052 = vmatpush3.bf16.msra.mxu1 %v19831_v49  ;;  %17873 = vmatprep.subr.bf16.mxu0 %v19832_v51  ;;  %v21803_v3 = vpop.f32.mrf.mxu1  ;;  %v19838_v49 = vld [vmem:[%s25563_s0 + $0x300] sm:$0xff]   ;;  %v19839_v51 = vld [vmem:[%s25563_s0 + $0x730] sm:$0xff]  }
 0x8b4   : > { %18081 = vmatprep.subr.bf16.mxu1 %v19833_v55  ;;  %v19840_v55 = vld [vmem:[%s25563_s0 + $0x178] sm:$0xff]  }
 0x8b5   : > { %v21810_v29 = vpop.f32.mrf.mxu1 }
 0x8b6   : > { %4353 = vmatmul.mubr.bf16.vlgmr.msra.gmra.mxu1 %v2118_v24  ;;  %17874 = vmatpush3.bf16.msra.mxu0 %v19834_v37  ;;  %v19841_v37 = vld [vmem:[%s25563_s0 + $0x768] sm:$0xff]   ;;  %v19844_v24 = vld [vmem:[%s25563_s0 + $0x170] sm:$0xff]  }
 0x8b7   : > { %18082 = vmatpush3.bf16.msra.mxu1 %v19835_v60  ;;  %17875 = vmatprep.subr.bf16.mxu0 %v19836_v30  ;;  %v21821_v22 = vpop.f32.mrf.mxu1  ;;  %v19842_v30 = vld [vmem:[%s25563_s0 + $0x138] sm:$0xff]  }
 0x8b8   : > { %18083 = vmatprep.subr.bf16.mxu1 %v19837_v38  ;;  %4696 = vmatprep.mubr.bf16.mxu1 %v2123_v57  ;;  %v2099_v38 = vpack.c.bf16 %v21318_v18, %v21312_v15  ;;  %v19845_v57 = vld [vmem:[%s25563_s0 + $0x760] sm:$0xff]   ;;  %v19848_v18 = vld [vmem:[%s25563_s0 + $0x168] sm:$0xff]  }
 0x8b9   : > { %v21826_v52 = vpop.f32.mrf.mxu1  ;;  %v19847_v15 = vld [vmem:[%s25563_s0 + $0x720] sm:$0xff]  }
 0x8ba   : > { %17876 = vmatpush3.bf16.msra.mxu0 %v19838_v49 }
 0x8bb   : > { %18084 = vmatpush3.bf16.msra.mxu1 %v19839_v51  ;;  %17883 = vmatprep.subr.bf16.mxu0 %v19840_v55  ;;  %v21837_v60 = vpop.f32.mrf.mxu1  ;;  %v19846_v51 = vld [vmem:[%s25563_s0 + $0x130] sm:$0xff]  }
 0x8bc   : > { %25564 = vst [vmem:[#allocation4_spill] sm:$0xff] %v21837_v60  ;;  %18085 = vmatprep.subr.bf16.mxu1 %v19841_v37  ;;  %v19850_v37 = vld [vmem:[%s25563_s0 + $0x128] sm:$0xff]  }
 0x8bd   : > { %3051 = vmatmul.mubr.bf16.vlgmr.msra.gmra.mxu0 %v2106_v47  ;;  %v21847_v49 = vpop.f32.mrf.mxu1 }
 0x8be   : > { %17884 = vmatpush3.bf16.msra.mxu0 %v19842_v30  ;;  %3187 = vmatprep.mubr.bf16.mxu0 %v2099_v38  ;;  %v19851_v30 = vld [vmem:[%s25563_s0 + $0x718] sm:$0xff]   ;;  %v19853_v38 = vld [vmem:[%s25563_s0 + $0x750] sm:$0xff]  }
 0x8bf   : > { %18086 = vmatpush3.bf16.msra.mxu1 %v19843_v62  ;;  %17885 = vmatprep.subr.bf16.mxu0 %v19844_v24  ;;  %v21858_v42 = vpop.f32.mrf.mxu1  ;;  %v19852_v62 = vld [vmem:[%s25563_s0 + $0x160] sm:$0xff]  }
 0x8c0   : > { %25565 = vst [vmem:[#allocation5_spill] sm:$0xff] %v21858_v42  ;;  %18087 = vmatprep.subr.bf16.mxu1 %v19845_v57  ;;  %v19868_v42 = vld [vmem:[%s25563_s0 + $0x140] sm:$0xff]  }
 0x8c1   : > { %v21865_v55 = vpop.f32.mrf.mxu1 }
 0x8c2   : > { %17886 = vmatpush3.bf16.msra.mxu0 %v19846_v51  ;;  %v19854_v51 = vld [vmem:[%s25563_s0 + $0x120] sm:$0xff]  }
 0x8c3   : > { %18088 = vmatpush3.bf16.msra.mxu1 %v19847_v15  ;;  %17887 = vmatprep.subr.bf16.mxu0 %v19848_v18  ;;  %v21876_v24 = vpop.f32.mrf.mxu1  ;;  %v19855_v15 = vld [vmem:[%s25563_s0 + $0x710] sm:$0xff]   ;;  %v19856_v18 = vld [vmem:[%s25563_s0 + $0x158] sm:$0xff]  }
 0x8c4   : > { %18089 = vmatprep.subr.bf16.mxu1 %v19849_v45 }
 0x8c5   : > { %v21881_v57 = vpop.f32.mrf.mxu1 }
 0x8c6   : > { %17888 = vmatpush3.bf16.msra.mxu0 %v19850_v37  ;;  %v19857_v37 = vld [vmem:[%s25563_s0 + $0x748] sm:$0xff]  }
 0x8c7   : > { %18090 = vmatpush3.bf16.msra.mxu1 %v19851_v30  ;;  %17889 = vmatprep.subr.bf16.mxu0 %v19852_v62  ;;  %v21892_v45 = vpop.f32.mrf.mxu1  ;;  %v19858_v30 = vld [vmem:[%s25563_s0 + $0x118] sm:$0xff]   ;;  %v19859_v62 = vld [vmem:[%s25563_s0 + $0x708] sm:$0xff]  }
 0x8c8   : > { %18091 = vmatprep.subr.bf16.mxu1 %v19853_v38  ;;  %v19860_v38 = vld [vmem:[%s25563_s0 + $0x150] sm:$0xff]  }
 0x8c9   : > { %v21897_v47 = vpop.f32.mrf.mxu1 }
 0x8ca   : > { %17890 = vmatpush3.bf16.msra.mxu0 %v19854_v51  ;;  %v19861_v51 = vld [vmem:[%s25563_s0 + $0x740] sm:$0xff]  }
 0x8cb   : > { %18092 = vmatpush3.bf16.msra.mxu1 %v19855_v15  ;;  %17891 = vmatprep.subr.bf16.mxu0 %v19856_v18  ;;  %v21908_v17 = vpop.f32.mrf.mxu1  ;;  %v19862_v15 = vld [vmem:[%s25563_s0 + $0x110] sm:$0xff]   ;;  %v19863_v18 = vld [vmem:[%s25563_s0 + $0x700] sm:$0xff]  }
 0x8cc   : > { %18093 = vmatprep.subr.bf16.mxu1 %v19857_v37  ;;  %v19864_v37 = vld [vmem:[%s25563_s0 + $0x148] sm:$0xff]  }
 0x8cd   : > { %v21913_v13 = vpop.f32.mrf.mxu1 }
 0x8ce   : > { %17892 = vmatpush3.bf16.msra.mxu0 %v19858_v30  ;;  %v19865_v30 = vld [vmem:[%s25563_s0 + $0x878] sm:$0xff]  }
 0x8cf   : > { %18094 = vmatpush3.bf16.msra.mxu1 %v19859_v62  ;;  %17893 = vmatprep.subr.bf16.mxu0 %v19860_v38  ;;  %v21924_v11 = vpop.f32.mrf.mxu1  ;;  %v2122_v62 = vpack.c.bf16 %v21610_v59, %v21594_v0  ;;  %v19866_v38 = vld [vmem:[%s25563_s0 + $0x108] sm:$0xff]   ;;  %v19869_v0 = vld [vmem:[%s25563_s0 + $0x870] sm:$0xff]   ;;  %v2127_v59 = vpack.c.bf16 %v21685_v58, %v21669_v27  ;;  %v19874_v58 = vld [vmem:[%s25563_s0 + $0x1b8] sm:$0xff]  }
 0x8d0   : > { %18095 = vmatprep.subr.bf16.mxu1 %v19861_v51  ;;  %v2140_v60 = vpack.c.bf16 %v21924_v11, %v21908_v17  ;;  %v19867_v51 = vld [vmem:[%s25563_s0 + $0x838] sm:$0xff]   ;;  %v19873_v27 = vld [vmem:[%s25563_s0 + $0x868] sm:$0xff]  }
 0x8d2   : > { %17894 = vmatpush3.bf16.msra.mxu0 %v19862_v15  ;;  %v19870_v15 = vld [vmem:[%s25563_s0 + $0x100] sm:$0xff]  }
 0x8d3   : > { %18096 = vmatpush3.bf16.msra.mxu1 %v19863_v18  ;;  %17895 = vmatprep.subr.bf16.mxu0 %v19864_v37  ;;  %v19871_v18 = vld [vmem:[%s25563_s0 + $0x830] sm:$0xff]   ;;  %v19872_v37 = vld [vmem:[%s25563_s0 + $0x1f8] sm:$0xff]  }
 0x8d4   : > { %18125 = vmatprep.subr.bf16.mxu1 %v19865_v30  ;;  %v19876_v30 = vld [vmem:[%s25563_s0 + $0x1f0] sm:$0xff]  }
 0x8d6   : > { %17896 = vmatpush3.bf16.msra.mxu0 %v19866_v38  ;;  %4697 = vmatmul.mubr.bf16.vlgmr.msra.gmra.mxu1 %v2122_v62  ;;  %v2101_v62 = vpack.c.bf16 %v21328_v34, %v21322_v20  ;;  %v19877_v38 = vld [vmem:[%s25563_s0 + $0x860] sm:$0xff]   ;;  %v19880_v34 = vld [vmem:[%s25563_s0 + $0x1e8] sm:$0xff]  }
 0x8d7   : > { %18126 = vmatpush3.bf16.msra.mxu1 %v19867_v51  ;;  %17897 = vmatprep.subr.bf16.mxu0 %v19868_v42  ;;  %v19875_v42 = vld [vmem:[%s25563_s0 + $0x828] sm:$0xff]   ;;  %v25566_v51 = vpack.c.bf16 %v21314_v16, %v21310_v10  ;;  %v19879_v20 = vld [vmem:[%s25563_s0 + $0x820] sm:$0xff]   ;;  %v19881_v10 = vld [vmem:[%s25563_s0 + $0x858] sm:$0xff]  }
 0x8d8   : > { %18127 = vmatprep.subr.bf16.mxu1 %v19869_v0  ;;  %5040 = vmatprep.mubr.bf16.mxu1 %v2127_v59  ;;  %v19878_v0 = vld [vmem:[%s25563_s0 + $0x1b0] sm:$0xff]   ;;  %v19882_v16 = vld [vmem:[%s25563_s0 + $0x1a8] sm:$0xff]   ;;  %v19883_v59 = vld [vmem:[%s25563_s0 + $0x818] sm:$0xff]  }
 0x8da   : > { %17898 = vmatpush3.bf16.msra.mxu0 %v19870_v15  ;;  %v19884_v15 = vld [vmem:[%s25563_s0 + $0x1e0] sm:$0xff]  }
 0x8db   : > { %18128 = vmatpush3.bf16.msra.mxu1 %v19871_v18  ;;  %17927 = vmatprep.subr.bf16.mxu0 %v19872_v37  ;;  %v19885_v18 = vld [vmem:[%s25563_s0 + $0x850] sm:$0xff]   ;;  %v19886_v37 = vld [vmem:[%s25563_s0 + $0x1a0] sm:$0xff]  }
 0x8dc   : > { %18129 = vmatprep.subr.bf16.mxu1 %v19873_v27  ;;  %v19887_v27 = vld [vmem:[%s25563_s0 + $0x810] sm:$0xff]  }
 0x8dd   : > { %3188 = vmatmul.mubr.bf16.vlgmr.msra.gmra.mxu0 %v25566_v51  ;;  %v19893_v51 = vld [vmem:[%s25563_s0 + $0x840] sm:$0xff]  }
 0x8de   : > { %17928 = vmatpush3.bf16.msra.mxu0 %v19874_v58  ;;  %3494 = vmatprep.mubr.bf16.mxu0 %v2101_v62  ;;  %v19888_v58 = vld [vmem:[%s25563_s0 + $0x1d8] sm:$0xff]   ;;  %v19891_v62 = vld [vmem:[%s25563_s0 + $0x808] sm:$0xff]  }
 0x8df   : > { %18130 = vmatpush3.bf16.msra.mxu1 %v19875_v42  ;;  %17929 = vmatprep.subr.bf16.mxu0 %v19876_v30  ;;  %v19889_v42 = vld [vmem:[%s25563_s0 + $0x848] sm:$0xff]   ;;  %v19890_v30 = vld [vmem:[%s25563_s0 + $0x198] sm:$0xff]  }
 0x8e0   : > { %18131 = vmatprep.subr.bf16.mxu1 %v19877_v38  ;;  %v19892_v38 = vld [vmem:[%s25563_s0 + $0x1d0] sm:$0xff]  }
 0x8e2   : > { %17930 = vmatpush3.bf16.msra.mxu0 %v19878_v0  ;;  %v19894_v0 = vld [vmem:[%s25563_s0 + $0x190] sm:$0xff]  }
 0x8e3   : > { %18132 = vmatpush3.bf16.msra.mxu1 %v19879_v20  ;;  %17931 = vmatprep.subr.bf16.mxu0 %v19880_v34  ;;  %v19895_v20 = vld [vmem:[%s25563_s0 + $0x800] sm:$0xff]   ;;  %v19896_v34 = vld [vmem:[%s25563_s0 + $0x1c8] sm:$0xff]  }
 0x8e4   : > { %18133 = vmatprep.subr.bf16.mxu1 %v19881_v10  ;;  %v19897_v10 = vld [vmem:[%s25563_s0 + $0x978] sm:$0xff]  }
 0x8e6   : > { %17932 = vmatpush3.bf16.msra.mxu0 %v19882_v16  ;;  %v2126_v16 = vpack.c.bf16 %v21680_v50, %v21662_v26  ;;  %v19901_v26 = vld [vmem:[%s25563_s0 + $0x970] sm:$0xff]   ;;  %v2131_v50 = vpack.c.bf16 %v21756_v2, %v21740_v43  ;;  %v19905_v2 = vld [vmem:[%s25563_s0 + $0x968] sm:$0xff]   ;;  %v2113_v43 = vpack.c.bf16 %v21449_v40, %v21431_v44  ;;  %v19909_v44 = vld [vmem:[%s25563_s0 + $0x960] sm:$0xff]   ;;  %v25567_v40 = vpack.c.bf16 %v21324_v21, %v21320_v19 }
 0x8e7   : > { %18134 = vmatpush3.bf16.msra.mxu1 %v19883_v59  ;;  %17933 = vmatprep.subr.bf16.mxu0 %v19884_v15  ;;  %v19898_v59 = vld [vmem:[%s25563_s0 + $0x188] sm:$0xff]   ;;  %v19899_v15 = vld [vmem:[%s25563_s0 + $0x938] sm:$0xff]  }
 0x8e8   : > { %18135 = vmatprep.subr.bf16.mxu1 %v19885_v18  ;;  %v19900_v18 = vld [vmem:[%s25563_s0 + $0x1c0] sm:$0xff]   ;;  %v19913_v21 = vld [vmem:[%s25563_s0 + $0x958] sm:$0xff]  }
 0x8ea   : > { %17934 = vmatpush3.bf16.msra.mxu0 %v19886_v37  ;;  %v19902_v37 = vld [vmem:[%s25563_s0 + $0x180] sm:$0xff]  }
 0x8eb   : > { %18136 = vmatpush3.bf16.msra.mxu1 %v19887_v27  ;;  %17935 = vmatprep.subr.bf16.mxu0 %v19888_v58  ;;  %v19903_v27 = vld [vmem:[%s25563_s0 + $0x930] sm:$0xff]   ;;  %v19904_v58 = vld [vmem:[%s25563_s0 + $0x4f8] sm:$0xff]  }
 0x8ec   : > { %18137 = vmatprep.subr.bf16.mxu1 %v19889_v42  ;;  %v19906_v42 = vld [vmem:[%s25563_s0 + $0x4b8] sm:$0xff]  }
 0x8ee   : > { %17936 = vmatpush3.bf16.msra.mxu0 %v19890_v30  ;;  %v19907_v30 = vld [vmem:[%s25563_s0 + $0x928] sm:$0xff]  }
 0x8ef   : > { %18138 = vmatpush3.bf16.msra.mxu1 %v19891_v62  ;;  %17937 = vmatprep.subr.bf16.mxu0 %v19892_v38  ;;  %v19908_v62 = vld [vmem:[%s25563_s0 + $0x4f0] sm:$0xff]  }
 0x8f0   : > { %18139 = vmatprep.subr.bf16.mxu1 %v19893_v51  ;;  %v19910_v51 = vld [vmem:[%s25563_s0 + $0x4b0] sm:$0xff]  }
 0x8f2   : > { %17938 = vmatpush3.bf16.msra.mxu0 %v19894_v0 }
 0x8f3   : > { %18140 = vmatpush3.bf16.msra.mxu1 %v19895_v20  ;;  %17939 = vmatprep.subr.bf16.mxu0 %v19896_v34  ;;  %v19911_v20 = vld [vmem:[%s25563_s0 + $0x920] sm:$0xff]   ;;  %v19912_v34 = vld [vmem:[%s25563_s0 + $0x4e8] sm:$0xff]  }
 0x8f4   : > { %18169 = vmatprep.subr.bf16.mxu1 %v19897_v10  ;;  %v22095_v10 = vpop.f32.mrf.mxu1 }
 0x8f6   : > { %5041 = vmatmul.mubr.bf16.vlgmr.msra.gmra.mxu1 %v2126_v16  ;;  %17940 = vmatpush3.bf16.msra.mxu0 %v19898_v59  ;;  %v19914_v16 = vld [vmem:[%s25563_s0 + $0x4a8] sm:$0xff]   ;;  %v19915_v59 = vld [vmem:[%s25563_s0 + $0x918] sm:$0xff]  }
 0x8f7   : > { %18170 = vmatpush3.bf16.msra.mxu1 %v19899_v15  ;;  %17941 = vmatprep.subr.bf16.mxu0 %v19900_v18  ;;  %v19916_v15 = vld [vmem:[%s25563_s0 + $0x4e0] sm:$0xff]   ;;  %v19917_v18 = vld [vmem:[%s25563_s0 + $0x950] sm:$0xff]  }
 0x8f8   : > { %18171 = vmatprep.subr.bf16.mxu1 %v19901_v26  ;;  %5384 = vmatprep.mubr.bf16.mxu1 %v2131_v50  ;;  %v22109_v26 = vpop.f32.mrf.mxu1  ;;  %v19918_v50 = vld [vmem:[%s25563_s0 + $0x4a0] sm:$0xff]  }
 0x8fa   : > { %17942 = vmatpush3.bf16.msra.mxu0 %v19902_v37  ;;  %v19919_v37 = vld [vmem:[%s25563_s0 + $0x910] sm:$0xff]  }
 0x8fb   : > { %18172 = vmatpush3.bf16.msra.mxu1 %v19903_v27  ;;  %17971 = vmatprep.subr.bf16.mxu0 %v19904_v58  ;;  %v19920_v27 = vld [vmem:[%s25563_s0 + $0x4d8] sm:$0xff]   ;;  %v19921_v58 = vld [vmem:[%s25563_s0 + $0x948] sm:$0xff]  }
 0x8fc   : > { %18173 = vmatprep.subr.bf16.mxu1 %v19905_v2  ;;  %v22123_v2 = vpop.f32.mrf.mxu1 }
 0x8fd   : > { %3495 = vmatmul.mubr.bf16.vlgmr.msra.gmra.mxu0 %v25567_v40  ;;  %v17789_v38 = vpop.f32.mrf.mxu0  ;;  %v19926_v40 = vld [vmem:[%s25563_s0 + $0x490] sm:$0xff]  }
 0x8fe   : > { %17972 = vmatpush3.bf16.msra.mxu0 %v19906_v42  ;;  %3836 = vmatprep.mubr.bf16.mxu0 %v2113_v43  ;;  %v19922_v43 = vld [vmem:[%s25563_s0 + $0x498] sm:$0xff]   ;;  %v19923_v42 = vld [vmem:[%s25563_s0 + $0x908] sm:$0xff]  }
 0x8ff   : > { %18174 = vmatpush3.bf16.msra.mxu1 %v19907_v30  ;;  %v17790_v0 = vpop.f32.mrf.mxu0  ;;  %17973 = vmatprep.subr.bf16.mxu0 %v19908_v62  ;;  %v19924_v30 = vld [vmem:[%s25563_s0 + $0x4d0] sm:$0xff]   ;;  %v19925_v62 = vld [vmem:[%s25563_s0 + $0x940] sm:$0xff]  }
 0x900   : > { %v22090_v19 = vadd.f32 %v17790_v0, %v17789_v38  ;;  %18175 = vmatprep.subr.bf16.mxu1 %v19909_v44  ;;  %v22137_v44 = vpop.f32.mrf.mxu1  ;;  %v19927_v38 = vld [vmem:[%s25563_s0 + $0x900] sm:$0xff]   ;;  %v19929_v0 = vld [vmem:[%s25563_s0 + $0xa78] sm:$0xff]  }
 0x902   : > { %17974 = vmatpush3.bf16.msra.mxu0 %v19910_v51  ;;  %v19928_v51 = vld [vmem:[%s25563_s0 + $0x4c8] sm:$0xff]  }
 0x903   : > { %18176 = vmatpush3.bf16.msra.mxu1 %v19911_v20  ;;  %17975 = vmatprep.subr.bf16.mxu0 %v19912_v34  ;;  %v22151_v20 = vpop.f32.mrf.mxu1  ;;  %v2130_v34 = vpack.c.bf16 %v21751_v7, %v21735_v4  ;;  %v19933_v4 = vld [vmem:[%s25563_s0 + $0xa70] sm:$0xff]  }
 0x904   : > { %18177 = vmatprep.subr.bf16.mxu1 %v19913_v21  ;;  %v19930_v21 = vld [vmem:[%s25563_s0 + $0x488] sm:$0xff]  }
 0x906   : > { %17976 = vmatpush3.bf16.msra.mxu0 %v19914_v16  ;;  %v19931_v16 = vld [vmem:[%s25563_s0 + $0xa38] sm:$0xff]  }
 0x907   : > { %18178 = vmatpush3.bf16.msra.mxu1 %v19915_v59  ;;  %17977 = vmatprep.subr.bf16.mxu0 %v19916_v15  ;;  %v19932_v59 = vld [vmem:[%s25563_s0 + $0x4c0] sm:$0xff]   ;;  %v2135_v15 = vpack.c.bf16 %v21826_v52, %v21810_v29  ;;  %v19936_v29 = vld [vmem:[%s25563_s0 + $0x5f8] sm:$0xff]  }
 0x908   : > { %18179 = vmatprep.subr.bf16.mxu1 %v19917_v18  ;;  %v19934_v18 = vld [vmem:[%s25563_s0 + $0x480] sm:$0xff]  }
 0x90a   : > { %17978 = vmatpush3.bf16.msra.mxu0 %v19918_v50  ;;  %v17792_v50 = vpop.f32.mrf.mxu0 }
 0x90b   : > { %18180 = vmatpush3.bf16.msra.mxu1 %v19919_v37  ;;  %17979 = vmatprep.subr.bf16.mxu0 %v19920_v27  ;;  %v19935_v37 = vld [vmem:[%s25563_s0 + $0xa30] sm:$0xff]   ;;  %v19937_v27 = vld [vmem:[%s25563_s0 + $0xa68] sm:$0xff]  }
 0x90c   : > { %18181 = vmatprep.subr.bf16.mxu1 %v19921_v58 }
 0x90e   : > { %17980 = vmatpush3.bf16.msra.mxu0 %v19922_v43  ;;  %v2117_v43 = vpack.c.bf16 %v21513_v46, %v21493_v25  ;;  %v19941_v25 = vld [vmem:[%s25563_s0 + $0xa60] sm:$0xff]  }
 0x90f   : > { %18182 = vmatpush3.bf16.msra.mxu1 %v19923_v42  ;;  %17981 = vmatprep.subr.bf16.mxu0 %v19924_v30  ;;  %v19938_v42 = vld [vmem:[%s25563_s0 + $0x5b8] sm:$0xff]   ;;  %v17793_v30 = vpop.f32.mrf.mxu0 }
 0x910   : > { %18183 = vmatprep.subr.bf16.mxu1 %v19925_v62  ;;  %v19939_v62 = vld [vmem:[%s25563_s0 + $0xa28] sm:$0xff]  }
 0x912   : > { %17982 = vmatpush3.bf16.msra.mxu0 %v19926_v40  ;;  %v19940_v40 = vld [vmem:[%s25563_s0 + $0x5f0] sm:$0xff]  }
 0x913   : > { %18184 = vmatpush3.bf16.msra.mxu1 %v19927_v38  ;;  %17983 = vmatprep.subr.bf16.mxu0 %v19928_v51  ;;  %v25569_v38 = vpack.c.bf16 %v21445_v1, %v21424_v41  ;;  %v19942_v51 = vld [vmem:[%s25563_s0 + $0x5b0] sm:$0xff]   ;;  %v19945_v41 = vld [vmem:[%s25563_s0 + $0xa58] sm:$0xff]  }
 0x914   : > { %18213 = vmatprep.subr.bf16.mxu1 %v19929_v0 }
 0x915   : > { %v17921_v7 = vpop.f32.mrf.mxu1 }
 0x916   : > { %5385 = vmatmul.mubr.bf16.vlgmr.msra.gmra.mxu1 %v2130_v34  ;;  %17984 = vmatpush3.bf16.msra.mxu0 %v19930_v21  ;;  %v19943_v34 = vld [vmem:[%s25563_s0 + $0xa20] sm:$0xff]   ;;  %v19944_v21 = vld [vmem:[%s25563_s0 + $0x5e8] sm:$0xff]  }
 0x917   : > { %18214 = vmatpush3.bf16.msra.mxu1 %v19931_v16  ;;  %17985 = vmatprep.subr.bf16.mxu0 %v19932_v59  ;;  %v17922_v52 = vpop.f32.mrf.mxu1 }
 0x918   : > { %18215 = vmatprep.subr.bf16.mxu1 %v19933_v4  ;;  %v22181_v58 = vadd.f32 %v17922_v52, %v17921_v7  ;;  %5728 = vmatprep.mubr.bf16.mxu1 %v2135_v15  ;;  %v19946_v15 = vld [vmem:[%s25563_s0 + $0x5a8] sm:$0xff]   ;;  %v19947_v7 = vld [vmem:[%s25563_s0 + $0xa18] sm:$0xff]  }
 0x91a   : > { %25568 = vst [vmem:[#allocation6_spill] sm:$0xff] %v22181_v58  ;;  %17986 = vmatpush3.bf16.msra.mxu0 %v19934_v18  ;;  %v19948_v18 = vld [vmem:[%s25563_s0 + $0x5e0] sm:$0xff]  }
 0x91b   : > { %18216 = vmatpush3.bf16.msra.mxu1 %v19935_v37  ;;  %18015 = vmatprep.subr.bf16.mxu0 %v19936_v29  ;;  %v17794_v37 = vadd.f32 %v17793_v30, %v17792_v50  ;;  %v19952_v50 = vld [vmem:[%s25563_s0 + $0x5d8] sm:$0xff]  }
 0x91c   : > { %18217 = vmatprep.subr.bf16.mxu1 %v19937_v27  ;;  %v19950_v27 = vld [vmem:[%s25563_s0 + $0x5a0] sm:$0xff]   ;;  %v19954_v30 = vld [vmem:[%s25563_s0 + $0x598] sm:$0xff]  }
 0x91d   : > { %v17811_v46 = vpop.f32.mrf.mxu0  ;;  %3837 = vmatmul.mubr.bf16.vlgmr.msra.gmra.mxu0 %v25569_v38  ;;  %v19959_v38 = vld [vmem:[%s25563_s0 + $0xa00] sm:$0xff]  }
 0x91e   : > { %18016 = vmatpush3.bf16.msra.mxu0 %v19938_v42  ;;  %4180 = vmatprep.mubr.bf16.mxu0 %v2117_v43  ;;  %v19951_v43 = vld [vmem:[%s25563_s0 + $0xa10] sm:$0xff]   ;;  %v19953_v42 = vld [vmem:[%s25563_s0 + $0xa48] sm:$0xff]  }
 0x91f   : > { %18218 = vmatpush3.bf16.msra.mxu1 %v19939_v62  ;;  %v17812_v0 = vpop.f32.mrf.mxu0  ;;  %18017 = vmatprep.subr.bf16.mxu0 %v19940_v40  ;;  %v19955_v62 = vld [vmem:[%s25563_s0 + $0xa08] sm:$0xff]   ;;  %v19956_v40 = vld [vmem:[%s25563_s0 + $0x5d0] sm:$0xff]  }
 0x920   : > { %v17813_v16 = vadd.f32 %v17812_v0, %v17811_v46  ;;  %18219 = vmatprep.subr.bf16.mxu1 %v19941_v25  ;;  %v19957_v25 = vld [vmem:[%s25563_s0 + $0xa40] sm:$0xff]   ;;  %v19958_v46 = vld [vmem:[%s25563_s0 + $0x590] sm:$0xff]   ;;  %v19961_v0 = vld [vmem:[%s25563_s0 + $0xb78] sm:$0xff]  }
 0x921   : > { %v17814_v1 = vpop.f32.mrf.mxu0 }
 0x922   : > { %v22213_v59 = vadd.f32 %v17813_v16, %v22090_v19  ;;  %18018 = vmatpush3.bf16.msra.mxu0 %v19942_v51  ;;  %v19949_v19 = vld [vmem:[%s25563_s0 + $0xa50] sm:$0xff]   ;;  %v19960_v51 = vld [vmem:[%s25563_s0 + $0x5c8] sm:$0xff]   ;;  %v19963_v16 = vld [vmem:[%s25563_s0 + $0xb38] sm:$0xff]  }
 0x923   : > { %18220 = vmatpush3.bf16.msra.mxu1 %v19943_v34  ;;  %v17815_v4 = vpop.f32.mrf.mxu0  ;;  %18019 = vmatprep.subr.bf16.mxu0 %v19944_v21  ;;  %v2134_v34 = vpack.c.bf16 %v21821_v22, %v21803_v3  ;;  %v19962_v21 = vld [vmem:[%s25563_s0 + $0x588] sm:$0xff]   ;;  %v19965_v22 = vld [vmem:[%s25563_s0 + $0xb70] sm:$0xff]   ;;  %v19966_v3 = vld [vmem:[%s25563_s0 + $0x580] sm:$0xff]  }
 0x924   : > { %v17816_v29 = vadd.f32 %v17815_v4, %v17814_v1  ;;  %18221 = vmatprep.subr.bf16.mxu1 %v19945_v41  ;;  %v19964_v41 = vld [vmem:[%s25563_s0 + $0x5c0] sm:$0xff]   ;;  %v2139_v1 = vpack.c.bf16 %v21897_v47, %v21881_v57  ;;  %v19968_v47 = vld [vmem:[%s25563_s0 + $0x6f8] sm:$0xff]   ;;  %v19969_v57 = vld [vmem:[%s25563_s0 + $0xb68] sm:$0xff]   ;;  %v2121_v4 = vpack.c.bf16 %v21583_v39, %v21565_v28 }
 0x925   : > { %v19973_v28 = vld [vmem:[%s25563_s0 + $0xb60] sm:$0xff]  }
 0x926   : > { %v22227_v52 = vadd.f32 %v17816_v29, %v17794_v37  ;;  %18020 = vmatpush3.bf16.msra.mxu0 %v19946_v15  ;;  %v19967_v15 = vld [vmem:[%s25563_s0 + $0xb30] sm:$0xff]   ;;  %v25570_v29 = vpack.c.bf16 %v21507_v32, %v21491_v36  ;;  %v19977_v36 = vld [vmem:[%s25563_s0 + $0xb58] sm:$0xff]   ;;  %v19978_v32 = vld [vmem:[%s25563_s0 + $0x6a8] sm:$0xff]  }
 0x927   : > { %18222 = vmatpush3.bf16.msra.mxu1 %v19947_v7  ;;  %18021 = vmatprep.subr.bf16.mxu0 %v19948_v18  ;;  %v19970_v7 = vld [vmem:[%s25563_s0 + $0x6b8] sm:$0xff]   ;;  %v19971_v18 = vld [vmem:[%s25563_s0 + $0xb28] sm:$0xff]   ;;  %v19972_v37 = vld [vmem:[%s25563_s0 + $0x6f0] sm:$0xff]  }
 0x928   : > { %18223 = vmatprep.subr.bf16.mxu1 %v19949_v19  ;;  %v19974_v19 = vld [vmem:[%s25563_s0 + $0x6b0] sm:$0xff]  }
 0x92a   : > { %18022 = vmatpush3.bf16.msra.mxu0 %v19950_v27 }
 0x92b   : > { %18224 = vmatpush3.bf16.msra.mxu1 %v19951_v43  ;;  %18023 = vmatprep.subr.bf16.mxu0 %v19952_v50  ;;  %v19975_v43 = vld [vmem:[%s25563_s0 + $0xb20] sm:$0xff]   ;;  %v19976_v50 = vld [vmem:[%s25563_s0 + $0x6e8] sm:$0xff]  }
 0x92c   : > { %18225 = vmatprep.subr.bf16.mxu1 %v19953_v42 }
 0x92e   : > { %18024 = vmatpush3.bf16.msra.mxu0 %v19954_v30  ;;  %v19979_v30 = vld [vmem:[%s25563_s0 + $0xb18] sm:$0xff]  }
 0x92f   : > { %18226 = vmatpush3.bf16.msra.mxu1 %v19955_v62  ;;  %18025 = vmatprep.subr.bf16.mxu0 %v19956_v40  ;;  %v19980_v62 = vld [vmem:[%s25563_s0 + $0x6e0] sm:$0xff]   ;;  %v19981_v40 = vld [vmem:[%s25563_s0 + $0xb50] sm:$0xff]  }
 0x930   : > { %18227 = vmatprep.subr.bf16.mxu1 %v19957_v25  ;;  %v19982_v25 = vld [vmem:[%s25563_s0 + $0x6a0] sm:$0xff]  }
 0x932   : > { %18026 = vmatpush3.bf16.msra.mxu0 %v19958_v46  ;;  %v19983_v46 = vld [vmem:[%s25563_s0 + $0xb10] sm:$0xff]  }
 0x933   : > { %18228 = vmatpush3.bf16.msra.mxu1 %v19959_v38  ;;  %18027 = vmatprep.subr.bf16.mxu0 %v19960_v51  ;;  %v19984_v38 = vld [vmem:[%s25563_s0 + $0x6d8] sm:$0xff]   ;;  %v19985_v51 = vld [vmem:[%s25563_s0 + $0xb48] sm:$0xff]  }
 0x934   : > { %18257 = vmatprep.subr.bf16.mxu1 %v19961_v0  ;;  %v19986_v0 = vld [vmem:[%s25563_s0 + $0x698] sm:$0xff]  }
 0x936   : > { %5729 = vmatmul.mubr.bf16.vlgmr.msra.gmra.mxu1 %v2134_v34  ;;  %18028 = vmatpush3.bf16.msra.mxu0 %v19962_v21  ;;  %v19987_v34 = vld [vmem:[%s25563_s0 + $0xb08] sm:$0xff]   ;;  %v19988_v21 = vld [vmem:[%s25563_s0 + $0x6d0] sm:$0xff]  }
 0x937   : > { %18258 = vmatpush3.bf16.msra.mxu1 %v19963_v16  ;;  %18029 = vmatprep.subr.bf16.mxu0 %v19964_v41  ;;  %v19989_v16 = vld [vmem:[%s25563_s0 + $0xb40] sm:$0xff]   ;;  %v19990_v41 = vld [vmem:[%s25563_s0 + $0x690] sm:$0xff]  }
 0x938   : > { %18259 = vmatprep.subr.bf16.mxu1 %v19965_v22  ;;  %6072 = vmatprep.mubr.bf16.mxu1 %v2139_v1  ;;  %v19991_v1 = vld [vmem:[%s25563_s0 + $0xb00] sm:$0xff]   ;;  %v19992_v22 = vld [vmem:[%s25563_s0 + $0x6c8] sm:$0xff]  }
 0x93a   : > { %18030 = vmatpush3.bf16.msra.mxu0 %v19966_v3  ;;  %v19993_v3 = vld [vmem:[%s25563_s0 + $0xc78] sm:$0xff]  }
 0x93b   : > { %18260 = vmatpush3.bf16.msra.mxu1 %v19967_v15  ;;  %18059 = vmatprep.subr.bf16.mxu0 %v19968_v47  ;;  %v2138_v15 = vpack.c.bf16 %v21892_v45, %v21876_v24  ;;  %v19994_v47 = vld [vmem:[%s25563_s0 + $0x688] sm:$0xff]   ;;  %v19997_v24 = vld [vmem:[%s25563_s0 + $0xc70] sm:$0xff]   ;;  %v19998_v45 = vld [vmem:[%s25563_s0 + $0x680] sm:$0xff]  }
 0x93c   : > { %18261 = vmatprep.subr.bf16.mxu1 %v19969_v57  ;;  %v19995_v57 = vld [vmem:[%s25563_s0 + $0xc38] sm:$0xff]  }
 0x93d   : > { %v17833_v39 = vpop.f32.mrf.mxu0  ;;  %4181 = vmatmul.mubr.bf16.vlgmr.msra.gmra.mxu0 %v25570_v29  ;;  %v20003_v29 = vld [vmem:[%s25563_s0 + $0xc28] sm:$0xff]  }
 0x93e   : > { %18060 = vmatpush3.bf16.msra.mxu0 %v19970_v7  ;;  %4524 = vmatprep.mubr.bf16.mxu0 %v2121_v4  ;;  %v19996_v4 = vld [vmem:[%s25563_s0 + $0x6c0] sm:$0xff]   ;;  %v2143_v7 = vpack.c.bf16 %v22151_v20, %v22123_v2  ;;  %v20000_v2 = vld [vmem:[%s25563_s0 + $0x7f8] sm:$0xff]   ;;  %v20001_v20 = vld [vmem:[%s25563_s0 + $0xc68] sm:$0xff]  }
 0x93f   : > { %18262 = vmatpush3.bf16.msra.mxu1 %v19971_v18  ;;  %v17834_v27 = vpop.f32.mrf.mxu0  ;;  %18061 = vmatprep.subr.bf16.mxu0 %v19972_v37  ;;  %v19999_v37 = vld [vmem:[%s25563_s0 + $0xc30] sm:$0xff]  }
 0x940   : > { %v22319_v42 = vadd.f32 %v17834_v27, %v17833_v39  ;;  %18263 = vmatprep.subr.bf16.mxu1 %v19973_v28  ;;  %v20002_v28 = vld [vmem:[%s25563_s0 + $0x7b8] sm:$0xff]   ;;  %v2125_v27 = vpack.c.bf16 %v21649_v56, %v21631_v6  ;;  %v20007_v6 = vld [vmem:[%s25563_s0 + $0xc20] sm:$0xff]   ;;  %v20008_v56 = vld [vmem:[%s25563_s0 + $0x7e8] sm:$0xff]  }
 0x941   : > { %v17836_v18 = vpop.f32.mrf.mxu0 }
 0x942   : > { %18062 = vmatpush3.bf16.msra.mxu0 %v19974_v19  ;;  %v20004_v19 = vld [vmem:[%s25563_s0 + $0x7f0] sm:$0xff]  }
 0x943   : > { %18264 = vmatpush3.bf16.msra.mxu1 %v19975_v43  ;;  %18063 = vmatprep.subr.bf16.mxu0 %v19976_v50  ;;  %v17837_v39 = vpop.f32.mrf.mxu0  ;;  %v20005_v43 = vld [vmem:[%s25563_s0 + $0xc60] sm:$0xff]  }
 0x944   : > { %18265 = vmatprep.subr.bf16.mxu1 %v19977_v36  ;;  %v25571_v36 = vpack.c.bf16 %v21576_v9, %v21558_v35  ;;  %v20009_v35 = vld [vmem:[%s25563_s0 + $0xc58] sm:$0xff]  }
 0x946   : > { %18064 = vmatpush3.bf16.msra.mxu0 %v19978_v32  ;;  %v20006_v32 = vld [vmem:[%s25563_s0 + $0x7b0] sm:$0xff]  }
 0x947   : > { %18266 = vmatpush3.bf16.msra.mxu1 %v19979_v30  ;;  %18065 = vmatprep.subr.bf16.mxu0 %v19980_v62 }
 0x948   : > { %18267 = vmatprep.subr.bf16.mxu1 %v19981_v40 }
 0x94a   : > { %18066 = vmatpush3.bf16.msra.mxu0 %v19982_v25  ;;  %v20010_v25 = vld [vmem:[%s25563_s0 + $0x7a8] sm:$0xff]  }
 0x94b   : > { %18268 = vmatpush3.bf16.msra.mxu1 %v19983_v46  ;;  %18067 = vmatprep.subr.bf16.mxu0 %v19984_v38  ;;  %v20011_v38 = vld [vmem:[%s25563_s0 + $0xc18] sm:$0xff]  }
 0x94c   : > { %18269 = vmatprep.subr.bf16.mxu1 %v19985_v51  ;;  %v20012_v51 = vld [vmem:[%s25563_s0 + $0x7e0] sm:$0xff]  }
 0x94e   : > { %18068 = vmatpush3.bf16.msra.mxu0 %v19986_v0  ;;  %v17838_v0 = vadd.f32 %v17837_v39, %v17836_v18  ;;  %v2142_v18 = vpack.c.bf16 %v22137_v44, %v22109_v26  ;;  %v20028_v26 = vld [vmem:[%s25563_s0 + $0x780] sm:$0xff]   ;;  %v20029_v44 = vld [vmem:[%s25522_s23 + $0x30] sm:$0xff]   ;;  %v20030_v39 = vld [vmem:[%s25563_s0 + $0x8f8] sm:$0xff]  }
 0x94f   : > { %18270 = vmatpush3.bf16.msra.mxu1 %v19987_v34  ;;  %18069 = vmatprep.subr.bf16.mxu0 %v19988_v21 }
 0x950   : > { %18271 = vmatprep.subr.bf16.mxu1 %v19989_v16  ;;  %v20014_v16 = vld [vmem:[%s25563_s0 + $0x7a0] sm:$0xff]  }
 0x952   : > { %18070 = vmatpush3.bf16.msra.mxu0 %v19990_v41  ;;  %v20015_v41 = vld [vmem:[%s25563_s0 + $0xc10] sm:$0xff]  }
 0x953   : > { %18272 = vmatpush3.bf16.msra.mxu1 %v19991_v1  ;;  %18071 = vmatprep.subr.bf16.mxu0 %v19992_v22  ;;  %v20016_v1 = vld [vmem:[%s25563_s0 + $0x7d8] sm:$0xff]   ;;  %v20017_v22 = vld [vmem:[%s25563_s0 + $0xc48] sm:$0xff]  }
 0x954   : > { %18301 = vmatprep.subr.bf16.mxu1 %v19993_v3  ;;  %v20018_v3 = vld [vmem:[%s25563_s0 + $0x798] sm:$0xff]  }
 0x956   : > { %6073 = vmatmul.mubr.bf16.vlgmr.msra.gmra.mxu1 %v2138_v15  ;;  %18072 = vmatpush3.bf16.msra.mxu0 %v19994_v47  ;;  %v20019_v15 = vld [vmem:[%s25563_s0 + $0xc08] sm:$0xff]   ;;  %v20020_v47 = vld [vmem:[%s25563_s0 + $0x7d0] sm:$0xff]  }
 0x957   : > { %18302 = vmatpush3.bf16.msra.mxu1 %v19995_v57  ;;  %18073 = vmatprep.subr.bf16.mxu0 %v19996_v4  ;;  %v20021_v57 = vld [vmem:[%s25563_s0 + $0xc40] sm:$0xff]   ;;  %v20022_v4 = vld [vmem:[%s25563_s0 + $0x790] sm:$0xff]  }
 0x958   : > { %18303 = vmatprep.subr.bf16.mxu1 %v19997_v24  ;;  %6416 = vmatprep.mubr.bf16.mxu1 %v2143_v7  ;;  %v20023_v7 = vld [vmem:[%s25563_s0 + $0xc00] sm:$0xff]   ;;  %v20024_v24 = vld [vmem:[%s25563_s0 + $0x7c8] sm:$0xff]  }
 0x95a   : > { %18074 = vmatpush3.bf16.msra.mxu0 %v19998_v45  ;;  %v20026_v45 = vld [vmem:[%s25522_s23 + $0x38] ss:$0 sps:$4 sm:$0x33]  }
 0x95b   : > { %18304 = vmatpush3.bf16.msra.mxu1 %v19999_v37  ;;  %18103 = vmatprep.subr.bf16.mxu0 %v20000_v2  ;;  %v20025_v37 = vld [vmem:[%s25563_s0 + $0x788] sm:$0xff]   ;;  %v20027_v2 = vld [vmem:[%s25563_s0 + $0x7c0] sm:$0xff]  }
 0x95c   : > { %18305 = vmatprep.subr.bf16.mxu1 %v20001_v20  ;;  %v25572_v20 = vmov 0.0  }
 0x95d   : > { %v17855_v50 = vpop.f32.mrf.mxu0  ;;  %4525 = vmatmul.mubr.bf16.vlgmr.msra.gmra.mxu0 %v25571_v36  ;;  %v25573_v36 = vpack.c.bf16 %v21642_v63, %v21626_v33  ;;  %v20036_v33 = vld [vmem:[%s25563_s0 + $0x8a8] sm:$0xff]   ;;  %v20039_v63 = vld [vmem:[%s25563_s0 + $0x8d8] sm:$0xff]  }
 0x95e   : > { %18104 = vmatpush3.bf16.msra.mxu0 %v20002_v28  ;;  %4868 = vmatprep.mubr.bf16.mxu0 %v2125_v27  ;;  %v6606_v28 = vsel %vm6472_vm5, %v20026_v45, 0  ;;  %v20033_v27 = vld [vmem:[%s25563_s0 + $0x8f0] sm:$0xff]  }
 0x95f   : > { %18306 = vmatpush3.bf16.msra.mxu1 %v20003_v29  ;;  %v17856_v30 = vpop.f32.mrf.mxu0  ;;  %18105 = vmatprep.subr.bf16.mxu0 %v20004_v19  ;;  %v20031_v29 = vld [vmem:[%s25563_s0 + $0x8b8] sm:$0xff]   ;;  %v20032_v19 = vld [vmem:[%s25522_s23 + $0x28] sm:$0xff]  }
 0x960   : > { %v17857_v62 = vadd.f32 %v17856_v30, %v17855_v50  ;;  %18307 = vmatprep.subr.bf16.mxu1 %v20005_v43  ;;  %v2129_v43 = vpack.c.bf16 %v21724_v31, %v21706_v48  ;;  %v20034_v30 = vld [vmem:[%s25563_s0 + $0x8b0] sm:$0xff]   ;;  %v20035_v48 = vld [vmem:[%s25563_s0 + $0x8e8] sm:$0xff]  }
 0x961   : > { %v17858_v9 = vpop.f32.mrf.mxu0 }
 0x962   : > { %v22430_v40 = vadd.f32 %v17857_v62, %v22319_v42  ;;  %18106 = vmatpush3.bf16.msra.mxu0 %v20006_v32  ;;  %v20013_v42 = vld [vmem:[%s25563_s0 + $0xc50] sm:$0xff]   ;;  %v6769_v32 = vpack.c.bf16 %v20901_v14, %v20897_v12  ;;  %v20037_v12 = vld [vmem:[%s25563_s0 + $0x8e0] sm:$0xff]  }
 0x963   : > { %18308 = vmatpush3.bf16.msra.mxu1 %v20007_v6  ;;  %v17859_v46 = vpop.f32.mrf.mxu0  ;;  %18107 = vmatprep.subr.bf16.mxu0 %v20008_v56  ;;  %v20038_v14 = vld [vmem:[%s25563_s0 + $0x8a0] sm:$0xff]   ;;  %v20040_v56 = vld [vmem:[%s25563_s0 + $0x898] sm:$0xff]   ;;  %v20041_v62 = vld [vmem:[%s25563_s0 + $0x8d0] sm:$0xff]  }
 0x964   : > { %v17860_v34 = vadd.f32 %v17859_v46, %v17858_v9  ;;  %18309 = vmatprep.subr.bf16.mxu1 %v20009_v35  ;;  %v20042_v35 = vld [vmem:[%s25563_s0 + $0x890] sm:$0xff]   ;;  %v20043_v9 = vld [vmem:[%s25563_s0 + $0x8c8] sm:$0xff]   ;;  %v20045_v46 = vld [vmem:[%s25563_s0 + $0x8c0] sm:$0xff]  }
 0x966   : > { %v22444_v21 = vadd.f32 %v17860_v34, %v17838_v0  ;;  %18108 = vmatpush3.bf16.msra.mxu0 %v20010_v25  ;;  %v20044_v25 = vld [vmem:[%s25563_s0 + $0x888] sm:$0xff]   ;;  %v20047_v0 = vld [vmem:[%s25563_s0 + $0x9f8] sm:$0xff]  }
 0x967   : > { %18310 = vmatpush3.bf16.msra.mxu1 %v20011_v38  ;;  %18109 = vmatprep.subr.bf16.mxu0 %v20012_v51  ;;  %v20046_v38 = vld [vmem:[%s25563_s0 + $0x880] sm:$0xff]   ;;  %v20048_v34 = vld [vmem:[%s25563_s0 + $0x9b8] sm:$0xff]  }
 0x968   : > { %18311 = vmatprep.subr.bf16.mxu1 %v20013_v42 }
 0x96a   : > { %18110 = vmatpush3.bf16.msra.mxu0 %v20014_v16  ;;  %v20049_v16 = vld [vmem:[%s25563_s0 + $0x9f0] sm:$0xff]  }
 0x96b   : > { %18312 = vmatpush3.bf16.msra.mxu1 %v20015_v41  ;;  %18111 = vmatprep.subr.bf16.mxu0 %v20016_v1  ;;  %v2133_v41 = vpack.c.bf16 %v21790_v61, %v21772_v53  ;;  %v20053_v61 = vld [vmem:[%s25563_s0 + $0x9e0] sm:$0xff]  }
 0x96c   : > { %18313 = vmatprep.subr.bf16.mxu1 %v20017_v22  ;;  %v25574_v22 = vpack.c.bf16 %v21717_v5, %v21698_v54  ;;  %v20052_v54 = vld [vmem:[%s25563_s0 + $0x9a8] sm:$0xff]  }
 0x96e   : > { %18112 = vmatpush3.bf16.msra.mxu0 %v20018_v3  ;;  %v20050_v3 = vld [vmem:[%s25563_s0 + $0x9b0] sm:$0xff]  }
 0x96f   : > { %18314 = vmatpush3.bf16.msra.mxu1 %v20019_v15  ;;  %18113 = vmatprep.subr.bf16.mxu0 %v20020_v47  ;;  %v20051_v47 = vld [vmem:[%s25563_s0 + $0x9e8] sm:$0xff]  }
 0x970   : > { %18315 = vmatprep.subr.bf16.mxu1 %v20021_v57 }
 0x972   : > { %18114 = vmatpush3.bf16.msra.mxu0 %v20022_v4 }
 0x973   : > { %18316 = vmatpush3.bf16.msra.mxu1 %v20023_v7  ;;  %18115 = vmatprep.subr.bf16.mxu0 %v20024_v24 }
 0x974   : > { %19100 = vmatprep.subr.bf16.mxu1 %v25572_v20 }
 0x976   : > { %6417 = vmatmul.mubr.bf16.vlgmr.msra.gmra.mxu1 %v2142_v18  ;;  %18116 = vmatpush3.bf16.msra.mxu0 %v20025_v37  ;;  %v20054_v18 = vld [vmem:[%s25563_s0 + $0x9a0] sm:$0xff]   ;;  %v20055_v37 = vld [vmem:[%s25563_s0 + $0x9d8] sm:$0xff]  }
 0x977   : > { %19101 = vmatpush3.bf16.msra.mxu1 %v6606_v28  ;;  %18117 = vmatprep.subr.bf16.mxu0 %v20027_v2  ;;  %v20056_v2 = vld [vmem:[%s25563_s0 + $0x998] sm:$0xff]   ;;  %v20057_v28 = vld [vmem:[%s25563_s0 + $0x9d0] sm:$0xff]  }
 0x978   : > { %19102 = vmatprep.subr.bf16.mxu1 %v25572_v20  ;;  %19106 = vmatprep.mubr.msk.bf16.mxu1 %vm20740_vm4, %v25572_v20 }
 0x97a   : > { %18118 = vmatpush3.bf16.msra.mxu0 %v20028_v26  ;;  %v20058_v26 = vld [vmem:[%s25563_s0 + $0x990] sm:$0xff]  }
 0x97b   : > { %19103 = vmatpush3.bf16.msra.mxu1 %v20029_v44  ;;  %18147 = vmatprep.subr.bf16.mxu0 %v20030_v39  ;;  %v20059_v44 = vld [vmem:[%s25563_s0 + $0x9c8] sm:$0xff]  }
 0x97c   : > { %19104 = vmatprep.subr.bf16.mxu1 %v25572_v20  ;;  %v20060_v39 = vld [vmem:[%s25563_s0 + $0x988] sm:$0xff]  }
 0x97d   : > { %v17877_v50 = vpop.f32.mrf.mxu0  ;;  %4869 = vmatmul.mubr.bf16.vlgmr.msra.gmra.mxu0 %v25573_v36  ;;  %v2137_v36 = vpack.c.bf16 %v21865_v55, %v21847_v49  ;;  %v20068_v49 = vld [vmem:[%s25563_s0 + $0xaa8] sm:$0xff]   ;;  %v20071_v55 = vld [vmem:[%s25563_s0 + $0xad8] sm:$0xff]  }
 0x97e   : > { %18148 = vmatpush3.bf16.msra.mxu0 %v20031_v29  ;;  %5212 = vmatprep.mubr.bf16.mxu0 %v2129_v43  ;;  %v20061_v29 = vld [vmem:[%s25563_s0 + $0x9c0] sm:$0xff]   ;;  %v20064_v43 = vld [vmem:[%s25563_s0 + $0xab8] sm:$0xff]  }
 0x97f   : > { %19105 = vmatpush3.bf16.msra.mxu1 %v20032_v19  ;;  %v17878_v6 = vpop.f32.mrf.mxu0  ;;  %18149 = vmatprep.subr.bf16.mxu0 %v20033_v27  ;;  %v20062_v19 = vld [vmem:[%s25563_s0 + $0x980] sm:$0xff]   ;;  %v20063_v27 = vld [vmem:[%s25563_s0 + $0xaf8] sm:$0xff]  }
 0x980   : > { %v17879_v31 = vadd.f32 %v17878_v6, %v17877_v50  ;;  %6984 = vmatprep.subr.bf16.mxu1 %v6769_v32  ;;  %v20065_v50 = vld [vmem:[%s25563_s0 + $0xaf0] sm:$0xff]   ;;  %v25575_v32 = vpack.c.bf16 %v21783_v23, %v21767_v8  ;;  %v20067_v6 = vld [vmem:[%s25563_s0 + $0xae8] sm:$0xff]   ;;  %v20069_v23 = vld [vmem:[%s25563_s0 + $0xae0] sm:$0xff]  }
 0x981   : > { %v17880_v51 = vpop.f32.mrf.mxu0  ;;  %v20070_v8 = vld [vmem:[%s25563_s0 + $0xaa0] sm:$0xff]  }
 0x982   : > { %18150 = vmatpush3.bf16.msra.mxu0 %v20034_v30  ;;  %v20066_v30 = vld [vmem:[%s25563_s0 + $0xab0] sm:$0xff]  }
 0x983   : > { %18151 = vmatprep.subr.bf16.mxu0 %v20035_v48  ;;  %v17881_v42 = vpop.f32.mrf.mxu0  ;;  %v20072_v48 = vld [vmem:[%s25563_s0 + $0xa98] sm:$0xff]  }
 0x984   : > { %v17882_v7 = vadd.f32 %v17881_v42, %v17880_v51  ;;  %v20086_v42 = vld [vmem:[%s25563_s0 + $0xba0] sm:$0xff]  }
 0x986   : > { %18152 = vmatpush3.bf16.msra.mxu0 %v20036_v33  ;;  %v20074_v33 = vld [vmem:[%s25563_s0 + $0xa90] sm:$0xff]  }
 0x987   : > { %18153 = vmatprep.subr.bf16.mxu0 %v20037_v12  ;;  %v20075_v12 = vld [vmem:[%s25563_s0 + $0xac8] sm:$0xff]  }
 0x98a   : > { %18154 = vmatpush3.bf16.msra.mxu0 %v20038_v14  ;;  %v20076_v14 = vld [vmem:[%s25563_s0 + $0xa88] sm:$0xff]  }
 0x98b   : > { %18155 = vmatprep.subr.bf16.mxu0 %v20039_v63  ;;  %v20077_v63 = vld [vmem:[%s25563_s0 + $0xac0] sm:$0xff]  }
 0x98e   : > { %18156 = vmatpush3.bf16.msra.mxu0 %v20040_v56  ;;  %v20078_v56 = vld [vmem:[%s25563_s0 + $0xa80] sm:$0xff]  }
 0x98f   : > { %18157 = vmatprep.subr.bf16.mxu0 %v20041_v62  ;;  %v20079_v62 = vld [vmem:[%s25563_s0 + $0xbf8] sm:$0xff]  }
 0x992   : > { %18158 = vmatpush3.bf16.msra.mxu0 %v20042_v35  ;;  %v20080_v35 = vld [vmem:[%s25563_s0 + $0xbb8] sm:$0xff]  }
 0x993   : > { %18159 = vmatprep.subr.bf16.mxu0 %v20043_v9  ;;  %v20081_v9 = vld [vmem:[%s25563_s0 + $0xbf0] sm:$0xff]  }
 0x996   : > { %18160 = vmatpush3.bf16.msra.mxu0 %v20044_v25  ;;  %v2141_v25 = vpack.c.bf16 %v22095_v10, %v21913_v13  ;;  %v20084_v13 = vld [vmem:[%s25563_s0 + $0xba8] sm:$0xff]   ;;  %v20085_v10 = vld [vmem:[%s25563_s0 + $0xbe0] sm:$0xff]  }
 0x997   : > { %18161 = vmatprep.subr.bf16.mxu0 %v20045_v46  ;;  %v25576_v46 = vld [vmem:[#allocation5_spill] sm:$0xff] }
 0x99a   : > { %18162 = vmatpush3.bf16.msra.mxu0 %v20046_v38  ;;  %v25577_v38 = vld [vmem:[#allocation4_spill] sm:$0xff] }
 0x99b   : > { %18191 = vmatprep.subr.bf16.mxu0 %v20047_v0  ;;  %v25578_v51 = vpack.c.bf16 %v25576_v46, %v25577_v38  ;;  %v20082_v0 = vld [vmem:[%s25563_s0 + $0xbb0] sm:$0xff]  }
 0x99d   : > { %v17899_v1 = vpop.f32.mrf.mxu0  ;;  %5213 = vmatmul.mubr.bf16.vlgmr.msra.gmra.mxu0 %v25574_v22  ;;  %v20090_v22 = vld [vmem:[%s25563_s0 + $0xb90] sm:$0xff]  }
 0x99e   : > { %18192 = vmatpush3.bf16.msra.mxu0 %v20048_v34  ;;  %5556 = vmatprep.mubr.bf16.mxu0 %v2133_v41  ;;  %v20083_v34 = vld [vmem:[%s25563_s0 + $0xbe8] sm:$0xff]   ;;  %v20088_v41 = vld [vmem:[%s25563_s0 + $0xb98] sm:$0xff]  }
 0x99f   : > { %v17900_v15 = vpop.f32.mrf.mxu0  ;;  %18193 = vmatprep.subr.bf16.mxu0 %v20049_v16  ;;  %v20087_v16 = vld [vmem:[%s25563_s0 + $0xbd8] sm:$0xff]  }
 0x9a0   : > { %v17901_v57 = vadd.f32 %v17900_v15, %v17899_v1  ;;  %v20089_v1 = vld [vmem:[%s25563_s0 + $0xbd0] sm:$0xff]   ;;  %v20092_v15 = vld [vmem:[%s25563_s0 + $0xb88] sm:$0xff]  }
 0x9a1   : > { %v17902_v4 = vpop.f32.mrf.mxu0 }
 0x9a2   : > { %v22580_v53 = vadd.f32 %v17901_v57, %v17879_v31  ;;  %18194 = vmatpush3.bf16.msra.mxu0 %v20050_v3  ;;  %v20073_v31 = vld [vmem:[%s25563_s0 + $0xad0] sm:$0xff]   ;;  %v20091_v3 = vld [vmem:[%s25563_s0 + $0xbc8] sm:$0xff]   ;;  %v20094_v57 = vld [vmem:[%s25563_s0 + $0xb80] sm:$0xff]  }
 0x9a3   : > { %v17903_v5 = vpop.f32.mrf.mxu0  ;;  %18195 = vmatprep.subr.bf16.mxu0 %v20051_v47  ;;  %v20093_v47 = vld [vmem:[%s25563_s0 + $0xbc0] sm:$0xff]   ;;  %s23118_s0 = scalar_lea.vmem %s25524_s25, %s17724_s9  ;;  %s20741_s9 = smov 9  }
 0x9a4   : > { %v17904_v24 = vadd.f32 %v17903_v5, %v17902_v4  ;;  %v22729_v4 = vpop.f32.mrf.mxu1 }
 0x9a5   : > { %25579 = vst [vmem:[#allocation5_spill] sm:$0xff] %v22729_v4 }
 0x9a6   : > { %v22588_v45 = vadd.f32 %v17904_v24, %v17882_v7  ;;  %18196 = vmatpush3.bf16.msra.mxu0 %v20052_v54  ;;  %v22731_v54 = vpop.f32.mrf.mxu1 }
 0x9a7   : > { %18197 = vmatprep.subr.bf16.mxu0 %v20053_v61  ;;  %25580 = vst [vmem:[#allocation4_spill] sm:$0xff] %v22731_v54 }
 0x9a8   : > { %v22733_v5 = vpop.f32.mrf.mxu1 }
 0x9aa   : > { %18198 = vmatpush3.bf16.msra.mxu0 %v20054_v18  ;;  %v22735_v61 = vpop.f32.mrf.mxu1 }
 0x9ab   : > { %18199 = vmatprep.subr.bf16.mxu0 %v20055_v37 }
 0x9ac   : > { %v22737_v7 = vpop.f32.mrf.mxu1 }
 0x9ae   : > { %18200 = vmatpush3.bf16.msra.mxu0 %v20056_v2  ;;  %v22739_v24 = vpop.f32.mrf.mxu1 }
 0x9af   : > { %18201 = vmatprep.subr.bf16.mxu0 %v20057_v28 }
 0x9b0   : > { %v22741_v18 = vpop.f32.mrf.mxu1 }
 0x9b2   : > { %18202 = vmatpush3.bf16.msra.mxu0 %v20058_v26  ;;  %v22743_v37 = vpop.f32.mrf.mxu1  ;;  %v20095_v26 = vld [vmem:[%s25522_s23 + $0x10] ss:$0 sps:$4 sm:$0x33]  }
 0x9b3   : > { %18203 = vmatprep.subr.bf16.mxu0 %v20059_v44  ;;  %v6474_v44 = vsel %vm6472_vm5, %v20095_v26, 0 }
 0x9b4   : > { %v22745_v11 = vpop.f32.mrf.mxu1 }
 0x9b6   : > { %18204 = vmatpush3.bf16.msra.mxu0 %v20060_v39  ;;  %v22747_v17 = vpop.f32.mrf.mxu1 }
 0x9b7   : > { %18205 = vmatprep.subr.bf16.mxu0 %v20061_v29 }
 0x9b8   : > { %v22751_v2 = vpop.f32.mrf.mxu1 }
 0x9ba   : > { %18206 = vmatpush3.bf16.msra.mxu0 %v20062_v19  ;;  %v18054_v39 = vpop.f32.mrf.mxu1  ;;  %v20096_v19 = vld [vmem:[%s25522_s23 + $0x8] sm:$0xff]  }
 0x9bb   : > { %18235 = vmatprep.subr.bf16.mxu0 %v20063_v27 }
 0x9bc   : > { %v18056_v27 = vpop.f32.mrf.mxu1 }
 0x9bd   : > { %5557 = vmatmul.mubr.bf16.vlgmr.msra.gmra.mxu0 %v25575_v32 }
 0x9be   : > { %18236 = vmatpush3.bf16.msra.mxu0 %v20064_v43  ;;  %5900 = vmatprep.mubr.bf16.mxu0 %v2137_v36  ;;  %v20097_v36 = vld [vmem:[%s25522_s23] sm:$0xff]   ;;  %v18057_v32 = vpop.f32.mrf.mxu1 }
 0x9bf   : > { %18237 = vmatprep.subr.bf16.mxu0 %v20065_v50  ;;  %v18058_v58 = vadd.f32 %v18057_v32, %v18056_v27 }
 0x9c2   : > { %18238 = vmatpush3.bf16.msra.mxu0 %v20066_v30  ;;  %v18097_v30 = vpop.f32.mrf.mxu1 }
 0x9c3   : > { %18239 = vmatprep.subr.bf16.mxu0 %v20067_v6 }
 0x9c6   : > { %18240 = vmatpush3.bf16.msra.mxu0 %v20068_v49  ;;  %v18098_v49 = vpop.f32.mrf.mxu1 }
 0x9c7   : > { %18241 = vmatprep.subr.bf16.mxu0 %v20069_v23 }
 0x9ca   : > { %18242 = vmatpush3.bf16.msra.mxu0 %v20070_v8  ;;  %v18100_v8 = vpop.f32.mrf.mxu1 }
 0x9cb   : > { %18243 = vmatprep.subr.bf16.mxu0 %v20071_v55 }
 0x9ce   : > { %18244 = vmatpush3.bf16.msra.mxu0 %v20072_v48 }
 0x9cf   : > { %18245 = vmatprep.subr.bf16.mxu0 %v20073_v31  ;;  %v18101_v31 = vpop.f32.mrf.mxu1 }
 0x9d2   : > { %18246 = vmatpush3.bf16.msra.mxu0 %v20074_v33  ;;  %v18141_v33 = vpop.f32.mrf.mxu1 }
 0x9d3   : > { %18247 = vmatprep.subr.bf16.mxu0 %v20075_v12 }
 0x9d6   : > { %18248 = vmatpush3.bf16.msra.mxu0 %v20076_v14  ;;  %v18142_v14 = vpop.f32.mrf.mxu1 }
 0x9d7   : > { %18249 = vmatprep.subr.bf16.mxu0 %v20077_v63 }
 0x9da   : > { %18250 = vmatpush3.bf16.msra.mxu0 %v20078_v56  ;;  %v18144_v56 = vpop.f32.mrf.mxu1 }
 0x9db   : > { %18279 = vmatprep.subr.bf16.mxu0 %v20079_v62 }
 0x9dd   : > { %5901 = vmatmul.mubr.bf16.vlgmr.msra.gmra.mxu0 %v25578_v51 }
 0x9de   : > { %18280 = vmatpush3.bf16.msra.mxu0 %v20080_v35  ;;  %6244 = vmatprep.mubr.bf16.mxu0 %v2141_v25 }
 0x9df   : > { %18281 = vmatprep.subr.bf16.mxu0 %v20081_v9  ;;  %v18145_v9 = vpop.f32.mrf.mxu1 }
 0x9e1   : > { %v18185_v25 = vpop.f32.mrf.mxu1 }
 0x9e2   : > { %18282 = vmatpush3.bf16.msra.mxu0 %v20082_v0 }
 0x9e3   : > { %18283 = vmatprep.subr.bf16.mxu0 %v20083_v34  ;;  %v18186_v38 = vpop.f32.mrf.mxu1 }
 0x9e5   : > { %v22780_v0 = vpop.f32.mrf.mxu1 }
 0x9e6   : > { %18284 = vmatpush3.bf16.msra.mxu0 %v20084_v13 }
 0x9e7   : > { %18285 = vmatprep.subr.bf16.mxu0 %v20085_v10  ;;  %v22784_v10 = vpop.f32.mrf.mxu1 }
 0x9ea   : > { %18286 = vmatpush3.bf16.msra.mxu0 %v20086_v42 }
 0x9eb   : > { %18287 = vmatprep.subr.bf16.mxu0 %v20087_v16 }
 0x9ee   : > { %18288 = vmatpush3.bf16.msra.mxu0 %v20088_v41 }
 0x9ef   : > { %18289 = vmatprep.subr.bf16.mxu0 %v20089_v1 }
 0x9f2   : > { %18290 = vmatpush3.bf16.msra.mxu0 %v20090_v22 }
 0x9f3   : > { %18291 = vmatprep.subr.bf16.mxu0 %v20091_v3 }
 0x9f6   : > { %18292 = vmatpush3.bf16.msra.mxu0 %v20092_v15  ;;  %v18229_v42 = vpop.f32.mrf.mxu1 }
 0x9f7   : > { %18293 = vmatprep.subr.bf16.mxu0 %v20093_v47 }
 0x9f8   : > { %v18230_v41 = vpop.f32.mrf.mxu1 }
 0x9fa   : > { %18294 = vmatpush3.bf16.msra.mxu0 %v20094_v57  ;;  %v18232_v22 = vpop.f32.mrf.mxu1 }
 0x9fb   : > { %19080 = vmatprep.subr.bf16.mxu0 %v25572_v20 }
 0x9fc   : > { %v18233_v47 = vpop.f32.mrf.mxu1 }
 0x9fd   : > { %6245 = vmatmul.mubr.bf16.vlgmr.msra.gmra.mxu0 %v2140_v60  ;;  %v22749_v60 = vpop.f32.mrf.mxu0 }
 0x9fe   : > { %19086 = vmatprep.mubr.msk.bf16.mxu0 %vm20740_vm4, %v25572_v20  ;;  %19081 = vmatpush3.bf16.msra.mxu0 %v6474_v44 }
 0x9ff   : > { %v22753_v28 = vpop.f32.mrf.mxu0  ;;  %19082 = vmatprep.subr.bf16.mxu0 %v25572_v20 }
 0xa00   : > { %25581 = vst [vmem:[#allocation7_spill] sm:$0xff] %v22753_v28 }
 0xa01   : > { %v22759_v29 = vpop.f32.mrf.mxu0 }
 0xa02   : > { %25582 = vst [vmem:[#allocation8_spill] sm:$0xff] %v22759_v29  ;;  %19083 = vmatpush3.bf16.msra.mxu0 %v20096_v19 }
 0xa03   : > { %v22765_v43 = vpop.f32.mrf.mxu0  ;;  %19084 = vmatprep.subr.bf16.mxu0 %v25572_v20 }
 0xa04   : > { %25583 = vst [vmem:[#allocation9_spill] sm:$0xff] %v22765_v43 }
 0xa05   : > { %v17987_v50 = vpop.f32.mrf.mxu0 }
 0xa06   : > { %19085 = vmatpush3.bf16.msra.mxu0 %v20097_v36 }
 0xa07   : > { %19090 = vmatprep.subr.bf16.mxu0 %v25572_v20  ;;  %v17988_v6 = vpop.f32.mrf.mxu0 }
 0xa09   : > { %v17990_v23 = vpop.f32.mrf.mxu0 }
 0xa0b   : > { %v17991_v55 = vpop.f32.mrf.mxu0 }
 0xa0d   : > { %v22772_v48 = vpop.f32.mrf.mxu0 }
 0xa0e   : > { %25584 = vst [vmem:[#allocation10_spill] sm:$0xff] %v22772_v48  ;;  %v18099_v48 = vadd.f32 %v18098_v49, %v18097_v30  ;;  %v18146_v30 = vadd.f32 %v18145_v9, %v18144_v56 }
 0xa0f   : > { %v22774_v12 = vpop.f32.mrf.mxu0 }
 0xa10   : > { %25585 = vst [vmem:[#allocation11_spill] sm:$0xff] %v22774_v12 }
 0xa11   : > { %v22776_v63 = vpop.f32.mrf.mxu0 }
 0xa12   : > { %25586 = vst [vmem:[#allocation12_spill] sm:$0xff] %v22776_v63 }
 0xa13   : > { %v22778_v62 = vpop.f32.mrf.mxu0 }
 0xa14   : > { %25587 = vst [vmem:[#allocation13_spill] sm:$0xff] %v22778_v62 }
 0xa16   : > { %v18273_v57 = vpop.f32.mrf.mxu1 }
 0xa18   : > { %v18274_v44 = vpop.f32.mrf.mxu1 }
 0xa1a   : > { %v18276_v36 = vpop.f32.mrf.mxu1 }
 0xa1c   : > { %v18277_v63 = vpop.f32.mrf.mxu1 }
 0xa1d   : > { %v18075_v35 = vpop.f32.mrf.mxu0 }
 0xa1f   : > { %v18076_v46 = vpop.f32.mrf.mxu0 }
 0xa20   : > { %v18077_v28 = vadd.f32 %v18076_v46, %v18075_v35 }
 0xa21   : > { %v18078_v51 = vpop.f32.mrf.mxu0 }
 0xa23   : > { %v18079_v34 = vpop.f32.mrf.mxu0 }
 0xa36   : > { %v18317_v54 = vpop.f32.mrf.mxu1 }
 0xa38   : > { %v18318_v43 = vpop.f32.mrf.mxu1 }
 0xa39   : > { %v18319_v35 = vadd.f32 %v18318_v43, %v18317_v54 }
 0xa3d   : > { %v22782_v13 = vpop.f32.mrf.mxu0 }
 0xa3e   : > { %25588 = vst [vmem:[#allocation14_spill] sm:$0xff] %v22782_v13  ;;  %v18055_v13 = vadd.f32 %v18054_v39, %v22751_v2 }
 0xa3f   : > { %v22786_v16 = vpop.f32.mrf.mxu0 }
 0xa40   : > { %25589 = vst [vmem:[#allocation15_spill] sm:$0xff] %v22786_v16  ;;  %v17970_v16 = vadd.f32 %v22739_v24, %v22737_v7  ;;  %v17992_v24 = vadd.f32 %v17991_v55, %v17990_v23  ;;  %v18234_v23 = vadd.f32 %v18233_v47, %v18232_v22  ;;  %v18275_v55 = vadd.f32 %v18274_v44, %v18273_v57  ;;  %v25595_v47 = vld [vmem:[#allocation10_spill] sm:$0xff]  ;;  %v25596_v57 = vld [vmem:[#allocation11_spill] sm:$0xff] }
 0xa41   : > { %v22788_v1 = vpop.f32.mrf.mxu0  ;;  %v25597_v44 = vld [vmem:[#allocation6_spill] sm:$0xff] }
 0xa42   : > { %25590 = vst [vmem:[#allocation16_spill] sm:$0xff] %v22788_v1  ;;  %v17967_v1 = vadd.f32 %v22735_v61, %v22733_v5  ;;  %v3674_v5 = vadd.f32 %v17970_v16, %v22227_v52  ;;  %v18143_v61 = vadd.f32 %v18142_v14, %v18141_v33  ;;  %v18080_v14 = vadd.f32 %v18079_v34, %v18078_v51 }
 0xa43   : > { %v22790_v3 = vpop.f32.mrf.mxu0  ;;  %v18278_v51 = vadd.f32 %v18277_v63, %v18276_v36  ;;  %v25599_v63 = vld [vmem:[#allocation9_spill] sm:$0xff] }
 0xa44   : > { %25591 = vst [vmem:[#allocation17_spill] sm:$0xff] %v22790_v3  ;;  %v18011_v3 = vadd.f32 %v22743_v37, %v22741_v18  ;;  %v3673_v12 = vadd.f32 %v17967_v1, %v22213_v59  ;;  %v18014_v18 = vadd.f32 %v22747_v17, %v22745_v11  ;;  %v18320_v37 = vpop.f32.mrf.mxu1  ;;  %v4362_v39 = vadd.f32 %v18058_v58, %v3674_v5  ;;  %v25598_v5 = vld [vmem:[#allocation8_spill] sm:$0xff] }
 0xa45   : > { %v3846_v17 = vadd.f32 %v17992_v24, %v22444_v21  ;;  %v17948_v36 = vadd.f32 %v25599_v63, %v25598_v5  ;;  %v25602_v24 = vld [vmem:[#allocation5_spill] sm:$0xff]  ;;  %v20113_v5 = vld [vmem:[%s25614_s28 + $0x48] sm:$0xff]  }
 0xa46   : > { %v4361_v7 = vadd.f32 %v18055_v13, %v3673_v12  ;;  %v4018_v11 = vadd.f32 %v18014_v18, %v22588_v45  ;;  %v18321_v58 = vpop.f32.mrf.mxu1  ;;  %v20123_v63 = vld [vmem:[%s25615_s4 + $0x3b8] sm:$0xff]  }
 0xa47   : > { %v4534_v56 = vadd.f32 %v18080_v14, %v3846_v17  ;;  %v18322_v43 = vadd.f32 %v18321_v58, %v18320_v37  ;;  %v25601_v18 = vld [vmem:[#allocation15_spill] sm:$0xff]  ;;  %v25603_v37 = vld [vmem:[#allocation4_spill] sm:$0xff] }
 0xa48   : > { %v5049_v49 = vadd.f32 %v18143_v61, %v4361_v7  ;;  %v25600_v61 = vld [vmem:[#allocation14_spill] sm:$0xff] }
 0xa49   : > { %v18121_v7 = vadd.f32 %v25601_v18, %v25600_v61  ;;  %v20126_v61 = vld [vmem:[%s25615_s4 + $0x238] sm:$0xff]   ;;  %v20114_v18 = vld [vmem:[%s25614_s28 + $0x50] sm:$0xff]  }
 0xa4b   : > { %v25609_v14 = vld [vmem:[#allocation17_spill] sm:$0xff] }
 0xa5d   : > { %v18163_v15 = vpop.f32.mrf.mxu0 }
 0xa5f   : > { %v18164_v26 = vpop.f32.mrf.mxu0 }
 0xa60   : > { %v18165_v59 = vadd.f32 %v18164_v26, %v18163_v15  ;;  %v18033_v26 = vadd.f32 %v25596_v57, %v25595_v47  ;;  %v20109_v47 = vld [vmem:[%s25614_s28 + $0x28] sm:$0xff]   ;;  %v20110_v57 = vld [vmem:[%s25614_s28 + $0x30] sm:$0xff]  }
 0xa61   : > { %v18166_v19 = vpop.f32.mrf.mxu0 }
 0xa63   : > { %v18167_v20 = vpop.f32.mrf.mxu0 }
 0xa64   : > { %v18168_v46 = vadd.f32 %v18167_v20, %v18166_v19 }
 0xa66   : > { %v5222_v34 = vadd.f32 %v18168_v46, %v4534_v56  ;;  %v6438_v46 = vpop.permute.xlu1 %6437 }
 0xa7d   : > { %v22792_v62 = vpop.f32.mrf.mxu0 }
 0xa7e   : > { %25592 = vst [vmem:[#allocation18_spill] sm:$0xff] %v22792_v62  ;;  %v17989_v62 = vadd.f32 %v17988_v6, %v17987_v50  ;;  %v18231_v50 = vadd.f32 %v18230_v41, %v18229_v42  ;;  %v18187_v6 = vadd.f32 %v18186_v38, %v18185_v25 }
 0xa7f   : > { %v22794_v4 = vpop.f32.mrf.mxu0 }
 0xa80   : > { %25593 = vst [vmem:[#allocation19_spill] sm:$0xff] %v22794_v4  ;;  %v4017_v4 = vadd.f32 %v18011_v3, %v22580_v53  ;;  %v3845_v27 = vadd.f32 %v17989_v62, %v22430_v40  ;;  %v18102_v53 = vadd.f32 %v18101_v31, %v18100_v8  ;;  %v5737_v40 = vadd.f32 %v18231_v50, %v5049_v49  ;;  %v25604_v50 = vld [vmem:[#allocation12_spill] sm:$0xff] }
 0xa81   : > { %v22803_v29 = vpop.f32.mrf.mxu0  ;;  %v5050_v8 = vadd.f32 %v18146_v30, %v4362_v39  ;;  %v18190_v31 = vadd.f32 %v22784_v10, %v22780_v0  ;;  %v25594_v10 = vld [vmem:[#allocation7_spill] sm:$0xff]  ;;  %v17926_v39 = vadd.f32 %v25603_v37, %v25602_v24  ;;  %v20128_v24 = vld [vmem:[%s25615_s4 + $0x230] sm:$0xff]  }
 0xa82   : > { %v4705_v32 = vadd.f32 %v18099_v48, %v4017_v4  ;;  %v4533_v33 = vadd.f32 %v18077_v28, %v3845_v27  ;;  %v6425_v54 = vadd.f32 %v18319_v35, %v5737_v40  ;;  %v4706_v9 = vadd.f32 %v18102_v53, %v4018_v11  ;;  %v20129_v37 = vld [vmem:[%s25615_s4 + $0x268] sm:$0xff]  }
 0xa83   : > { %v22810_v2 = vpop.f32.mrf.mxu0  ;;  %v5738_v21 = vadd.f32 %v18234_v23, %v5050_v8  ;;  %v17945_v15 = vadd.f32 %v25594_v10, %v22749_v60  ;;  %v20107_v10 = vld [vmem:[%s25614_s28 + $0x18] sm:$0xff]  }
 0xa84   : > { %v5221_v62 = vadd.f32 %v18165_v59, %v4533_v33  ;;  %v5393_v48 = vadd.f32 %v18187_v6, %v4705_v32  ;;  %v5394_v20 = vadd.f32 %v18190_v31, %v4706_v9  ;;  %v25605_v59 = vld [vmem:[#allocation13_spill] sm:$0xff]  ;;  %v25608_v33 = vld [vmem:[#allocation16_spill] sm:$0xff] }
 0xa85   : > { %v6426_v16 = vadd.f32 %v18322_v43, %v5738_v21  ;;  %v3497_v19 = vadd.f32 %v17945_v15, %v25597_v44  ;;  %v18036_v32 = vadd.f32 %v25605_v59, %v25604_v50  ;;  %v25606_v53 = vld [vmem:[#allocation18_spill] sm:$0xff]  ;;  %v18124_v35 = vadd.f32 %v25609_v14, %v25608_v33  ;;  %v6443_v43 = vpop.permute.xlu1 %6442  ;;  %v20141_v33 = vld [vmem:[%s25615_s4 + $0x248] sm:$0xff]  }
 0xa86   : > { %v6081_v25 = vadd.f32 %v18275_v55, %v5393_v48  ;;  %v6082_v22 = vadd.f32 %v18278_v51, %v5394_v20  ;;  %v18212_v55 = vadd.f32 %v22810_v2, %v22803_v29  ;;  %v25610_v21 = vld [vmem:[#allocation2_spill] sm:$0xff]  ;;  %v20100_v20 = vld [vmem:[%s25522_s23 + $0x14] sm:$0xff]   ;;  %v20143_v14 = vld [vmem:[%s25615_s4 + $0x208] sm:$0xff]  }
 0xa87   : > { %v4189_v27 = vadd.f32 %v18033_v26, %v3497_v19  ;;  %v25607_v60 = vld [vmem:[#allocation19_spill] sm:$0xff]  ;;  %v20099_v51 = vld [vmem:[%s25522_s23 + $0x1c] sm:$0xff]  }
 0xa88   : > { %v18209_v30 = vadd.f32 %v25607_v60, %v25606_v53  ;;  %v20108_v15 = vld [vmem:[%s25614_s28 + $0x20] sm:$0xff]   ;;  %v20111_v26 = vld [vmem:[%s25614_s28 + $0x38] sm:$0xff]   ;;  %v20137_v60 = vld [vmem:[%s25615_s4 + $0x3f0] sm:$0xff]  }
 0xa89   : > { %v4877_v49 = vadd.f32 %v18121_v7, %v4189_v27  ;;  %v20112_v44 = vld [vmem:[%s25614_s28 + $0x40] sm:$0xff]   ;;  %v20122_v19 = vld [vmem:[%s25615_s4 + $0x3f8] sm:$0xff]   ;;  %v20127_v7 = vld [vmem:[%s25615_s4 + $0x270] sm:$0xff]  }
 0xa8a   : > { %v20115_v27 = vld [vmem:[%s25614_s28 + $0x58] sm:$0xff]   ;;  %v20132_v50 = vld [vmem:[%s25615_s4 + $0x260] sm:$0xff]  }
 0xa8b   : > { %v5565_v23 = vadd.f32 %v18209_v30, %v4877_v49  ;;  %v20133_v59 = vld [vmem:[%s25615_s4 + $0x220] sm:$0xff]   ;;  %v20136_v53 = vld [vmem:[%s25615_s4 + $0x218] sm:$0xff]   ;;  %v20140_v49 = vld [vmem:[%s25615_s4 + $0x210] sm:$0xff]  }
 0xa8c   : > { %v20116_v30 = vld [vmem:[%s25614_s28 + $0x60] sm:$0xff]  }
 0xa9d   : > { %v18251_v52 = vpop.f32.mrf.mxu0 }
 0xa9f   : > { %v18252_v12 = vpop.f32.mrf.mxu0 }
 0xaa0   : > { %v18253_v4 = vadd.f32 %v18252_v12, %v18251_v52  ;;  %v3500_v52 = vadd.f32 %v17948_v36, %v17926_v39  ;;  %v20124_v36 = vld [vmem:[%s25615_s4 + $0x278] sm:$0xff]   ;;  %v20131_v39 = vld [vmem:[%s25615_s4 + $0x228] sm:$0xff]  }
 0xaa1   : > { %v18254_v28 = vpop.f32.mrf.mxu0 }
 0xaa2   : > { %v5909_v45 = vadd.f32 %v18253_v4, %v5221_v62  ;;  %v4190_v17 = vadd.f32 %v18036_v32, %v3500_v52  ;;  %v20134_v32 = vld [vmem:[%s25615_s4 + $0x258] sm:$0xff]   ;;  %v20138_v52 = vld [vmem:[%s25615_s4 + $0x3b0] sm:$0xff]  }
 0xaa3   : > { %v18255_v38 = vpop.f32.mrf.mxu0 }
 0xaa4   : > { %v6427_v13 = vadd.f32 %v6425_v54, %v5909_v45  ;;  %v18256_v42 = vadd.f32 %v18255_v38, %v18254_v28  ;;  %v4878_v40 = vadd.f32 %v18124_v35, %v4190_v17  ;;  %v20098_v54 = vld [vmem:[%s25522_s23 + $0x24] ss:$0 sps:$4 sm:$0x33]   ;;  %v20117_v35 = vld [vmem:[%s25614_s28 + $0x68] sm:$0xff]  }
 0xaa5   : > { %v6539_v2 = vsel %vm6472_vm5, %v20098_v54, 0  ;;  %v20145_v17 = vld [vmem:[%s25615_s4 + $0x200] sm:$0xff]  }
 0xaa6   : > { %v5910_v41 = vadd.f32 %v18256_v42, %v5222_v34  ;;  %v6429_v1 = vadd.f32 %v6427_v13, %v6081_v25  ;;  %v5566_v8 = vadd.f32 %v18212_v55, %v4878_v40  ;;  %v25611_v25 = vld [vmem:[#allocation3_spill] sm:$0xff]  ;;  %v25612_v34 = vmov 0.0   ;;  %v20101_v42 = vld [vmem:[%s25614_s28] sm:$0xff]  }
 0xaa7   : > { %v6768_v38 = vpack.c.bf16 %v25611_v25, %v25610_v21  ;;  %v25613_v13 = vmov 0   ;;  %v20147_v55 = vld [vmem:[%s25615_s4 + $0x3e8] sm:$0xff]   ;;  %v20152_v40 = vld [vmem:[%s25615_s4 + $0x3e0] sm:$0xff]   ;;  %v20130_v21 = vld [vmem:[%s25614_s28 + $0x98] sm:$0xff]  }
 0xaa8   : > { %v6428_v3 = vadd.f32 %v6426_v16, %v5910_v41  ;;  %v20102_v16 = vld [vmem:[%s25522_s23 + $0x4c] ss:$0 sps:$4 sm:$0x33]   ;;  %v20120_v54 = vld [vmem:[%s25614_s28 + $0x80] sm:$0xff]  }
 0xaa9   : > { %v6673_v41 = vsel %vm6472_vm5, %v20102_v16, 0  ;;  %v20135_v25 = vld [vmem:[%s25614_s28 + $0xa0] sm:$0xff]  }
 0xaaa   : > { %v6430_v0 = vadd.f32 %v6428_v3, %v6082_v22  ;;  %v20103_v22 = vld [vmem:[%s25522_s23 + $0x44] sm:$0xff]   ;;  %v20105_v3 = vld [vmem:[%s25522_s23 + $0x3c] sm:$0xff]  }
 0xabd   : > { %v18295_v6 = vpop.f32.mrf.mxu0 }
 0xabf   : > { %v18296_v11 = vpop.f32.mrf.mxu0 }
 0xac0   : > { %v18297_v58 = vadd.f32 %v18296_v11, %v18295_v6  ;;  %v20139_v6 = vld [vmem:[%s25615_s4 + $0x250] sm:$0xff]   ;;  %v20144_v11 = vld [vmem:[%s25615_s4 + $0x240] sm:$0xff]  }
 0xac1   : > { %v18298_v12 = vpop.f32.mrf.mxu0 }
 0xac2   : > { %v6253_v62 = vadd.f32 %v18297_v58, %v5565_v23  ;;  %v20146_v23 = vld [vmem:[%s25615_s4 + $0x78] sm:$0xff]   ;;  %v20150_v58 = vld [vmem:[%s25615_s4 + $0x3a8] sm:$0xff]  }
 0xac3   : > { %v18299_v4 = vpop.f32.mrf.mxu0 }
 0xac4   : > { %v6431_v48 = vadd.f32 %v6429_v1, %v6253_v62  ;;  %v18300_v31 = vadd.f32 %v18299_v4, %v18298_v12  ;;  %v20104_v1 = vld [vmem:[%s25614_s28 + $0x8] sm:$0xff]   ;;  %v20118_v12 = vld [vmem:[%s25614_s28 + $0x70] sm:$0xff]   ;;  %v20154_v62 = vld [vmem:[%s25615_s4 + $0x3a0] sm:$0xff]  }
 0xac5   : > { %v20159_v4 = vld [vmem:[%s25615_s4 + $0x398] sm:$0xff]  }
 0xac6   : > { %v6254_v28 = vadd.f32 %v18300_v31, %v5566_v8  ;;  %v6445_v45 = vadd.f32 %v6438_v46, %v6431_v48  ;;  %v20156_v46 = vld [vmem:[%s25615_s4 + $0x3d8] sm:$0xff]   ;;  %v20161_v48 = vld [vmem:[%s25615_s4 + $0x3d0] sm:$0xff]  }
 0xac7   : > { %v20119_v8 = vld [vmem:[%s25614_s28 + $0x78] sm:$0xff]   ;;  %v20163_v31 = vld [vmem:[%s25615_s4 + $0x390] sm:$0xff]  }
 0xac8   : > { %v6432_v56 = vadd.f32 %v6430_v0, %v6254_v28  ;;  %v20106_v0 = vld [vmem:[%s25614_s28 + $0x10] sm:$0xff]   ;;  %v20165_v28 = vld [vmem:[%s25615_s4 + $0x3c8] sm:$0xff]  }
 0xaca   : > { %v6446_v9 = vadd.f32 %v6443_v43, %v6432_v56  ;;  %v20168_v56 = vld [vmem:[%s25615_s4 + $0x388] sm:$0xff]   ;;  %v20170_v43 = vld [vmem:[%s25615_s4 + $0x3c0] sm:$0xff]  }
 0xacc   : > { %v6452_v29 = vpack.c.bf16 %v6446_v9, %v6445_v45  ;;  %v20172_v45 = vld [vmem:[%s25615_s4 + $0x380] sm:$0xff]   ;;  %v20174_v9 = vld [vmem:[%s25615_s4 + $0x478] sm:$0xff]  }
 0xace   : > { %19087 = vmatmul.mubr.msk.bf16.vlgmr.msra.gmra.mxu0 %vm6468_vm6, %v6452_v29  ;;  %19107 = vmatmul.mubr.msk.bf16.vlgmr.msra.gmra.mxu1 %vm6468_vm6, %v6452_v29 }
 0xacf   : > { %19091 = vmatpush3.bf16.msra.mxu0 %v6539_v2  ;;  %6985 = vmatpush1.bf16.msra.mxu1 %v6768_v38  ;;  %v20125_v2 = vld [vmem:[%s25614_s28 + $0x90] sm:$0xff]   ;;  %v20142_v38 = vld [vmem:[%s25614_s28 + $0xa8] sm:$0xff]  }
 0xad0   : > { %19092 = vmatprep.subr.bf16.mxu0 %v25612_v34  ;;  %7002 = vmatprep.mubr.bf16.mxu1 %v25613_v13 }
 0xad1   : > { %19096 = vmatprep.mubr.msk.bf16.mxu0 %vm20740_vm4, %v25612_v34  ;;  %18471 = vmatprep.subr.bf16.mxu1 %v20122_v19 }
 0xad3   : > { %19093 = vmatpush3.bf16.msra.mxu0 %v20099_v51  ;;  %v20148_v51 = vld [vmem:[%s25614_s28 + $0xb0] sm:$0xff]  }
 0xad4   : > { %19094 = vmatprep.subr.bf16.mxu0 %v25612_v34 }
 0xad6   : > { %16137 = vmatmul.mubr.msk.bf16.vlgmr.msra.gmra.mxu1 %vm886_vm3, %v20101_v42  ;;  %v20157_v42 = vld [vmem:[%s25614_s28 + $0xb8] sm:$0xff]  }
 0xad7   : > { %19095 = vmatpush3.bf16.msra.mxu0 %v20100_v20  ;;  %7012 = vmatprep.mubr.bf16.mxu1 %v25613_v13 }
 0xad8   : > { %19110 = vmatprep.subr.bf16.mxu0 %v25612_v34  ;;  %18472 = vmatpush3.bf16.msra.mxu1 %v20123_v63 }
 0xad9   : > { %18473 = vmatprep.subr.bf16.mxu1 %v20137_v60 }
 0xada   : > { %19097 = vmatmul.mubr.msk.bf16.vlgmr.msra.gmra.mxu0 %vm6468_vm6, %v6452_v29 }
 0xadb   : > { %19111 = vmatpush3.bf16.msra.mxu0 %v6673_v41  ;;  %19116 = vmatprep.mubr.msk.bf16.mxu0 %vm20740_vm4, %v25612_v34 }
 0xadc   : > { %19112 = vmatprep.subr.bf16.mxu0 %v25612_v34  ;;  %18474 = vmatpush3.bf16.msra.mxu1 %v20138_v52 }
 0xadd   : > { %18475 = vmatprep.subr.bf16.mxu1 %v20147_v55 }
 0xade   : > { %16138 = vmatmul.mubr.msk.bf16.gmra.mxu1 %vm886_vm3, %v20104_v1 }
 0xadf   : > { %19113 = vmatpush3.bf16.msra.mxu0 %v20103_v22  ;;  %7022 = vmatprep.mubr.bf16.mxu1 %v25613_v13 }
 0xae0   : > { %19114 = vmatprep.subr.bf16.mxu0 %v25612_v34  ;;  %18476 = vmatpush3.bf16.msra.mxu1 %v20150_v58 }
 0xae1   : > { %18477 = vmatprep.subr.bf16.mxu1 %v20152_v40 }
 0xae3   : > { %19115 = vmatpush3.bf16.msra.mxu0 %v20105_v3 }
 0xae4   : > { %18339 = vmatprep.subr.bf16.mxu0 %v20124_v36  ;;  %18478 = vmatpush3.bf16.msra.mxu1 %v20154_v62 }
 0xae5   : > { %18479 = vmatprep.subr.bf16.mxu1 %v20156_v46 }
 0xae6   : > { %19117 = vmatmul.mubr.msk.bf16.vlgmr.msra.gmra.mxu0 %vm6468_vm6, %v6452_v29  ;;  %16139 = vmatmul.mubr.msk.bf16.gmra.mxu1 %vm886_vm3, %v20106_v0  ;;  %v20121_v29 = vld [vmem:[%s25614_s28 + $0x88] sm:$0xff]   ;;  %v20166_v0 = vld [vmem:[%s25614_s28 + $0xc0] sm:$0xff]  }
 0xae7   : > { %7032 = vmatprep.mubr.bf16.mxu1 %v25613_v13  ;;  %18340 = vmatpush3.bf16.msra.mxu0 %v20126_v61 }
 0xae8   : > { %18341 = vmatprep.subr.bf16.mxu0 %v20127_v7  ;;  %18480 = vmatpush3.bf16.msra.mxu1 %v20159_v4 }
 0xae9   : > { %18481 = vmatprep.subr.bf16.mxu1 %v20161_v48  ;;  %v20149_v48 = vld [vmem:[%s25615_s4 + $0x38] sm:$0xff]  }
 0xaeb   : > { %18342 = vmatpush3.bf16.msra.mxu0 %v20128_v24 }
 0xaec   : > { %18343 = vmatprep.subr.bf16.mxu0 %v20129_v37  ;;  %18482 = vmatpush3.bf16.msra.mxu1 %v20163_v31 }
 0xaed   : > { %18483 = vmatprep.subr.bf16.mxu1 %v20165_v28 }
 0xaee   : > { %16140 = vmatmul.mubr.msk.bf16.gmra.mxu1 %vm886_vm3, %v20107_v10 }
 0xaef   : > { %7042 = vmatprep.mubr.bf16.mxu1 %v25613_v13  ;;  %18344 = vmatpush3.bf16.msra.mxu0 %v20131_v39 }
 0xaf0   : > { %18345 = vmatprep.subr.bf16.mxu0 %v20132_v50  ;;  %18484 = vmatpush3.bf16.msra.mxu1 %v20168_v56  ;;  %v20151_v56 = vld [vmem:[%s25615_s4 + $0x70] sm:$0xff]  }
 0xaf1   : > { %18485 = vmatprep.subr.bf16.mxu1 %v20170_v43 }
 0xaf3   : > { %18346 = vmatpush3.bf16.msra.mxu0 %v20133_v59 }
 0xaf4   : > { %18347 = vmatprep.subr.bf16.mxu0 %v20134_v32  ;;  %18486 = vmatpush3.bf16.msra.mxu1 %v20172_v45  ;;  %v20153_v45 = vld [vmem:[%s25615_s4 + $0x30] sm:$0xff]  }
 0xaf5   : > { %18515 = vmatprep.subr.bf16.mxu1 %v20174_v9 }
 0xaf6   : > { %16141 = vmatmul.mubr.msk.bf16.gmra.mxu1 %vm886_vm3, %v20108_v15 }
 0xaf7   : > { %7052 = vmatprep.mubr.bf16.mxu1 %v25613_v13  ;;  %18348 = vmatpush3.bf16.msra.mxu0 %v20136_v53 }
 0xaf8   : > { %18349 = vmatprep.subr.bf16.mxu0 %v20139_v6 }
 0xafb   : > { %18350 = vmatpush3.bf16.msra.mxu0 %v20140_v49 }
 0xafc   : > { %18351 = vmatprep.subr.bf16.mxu0 %v20141_v33 }
 0xafe   : > { %16142 = vmatmul.mubr.msk.bf16.gmra.mxu1 %vm886_vm3, %v20109_v47 }
 0xaff   : > { %7062 = vmatprep.mubr.bf16.mxu1 %v25613_v13  ;;  %18352 = vmatpush3.bf16.msra.mxu0 %v20143_v14 }
 0xb00   : > { %18353 = vmatprep.subr.bf16.mxu0 %v20144_v11 }
 0xb03   : > { %18354 = vmatpush3.bf16.msra.mxu0 %v20145_v17 }
 0xb04   : > { %18361 = vmatprep.subr.bf16.mxu0 %v20146_v23 }
 0xb06   : > { %16143 = vmatmul.mubr.msk.bf16.gmra.mxu1 %vm886_vm3, %v20110_v57 }
 0xb07   : > { %7072 = vmatprep.mubr.bf16.mxu1 %v25613_v13 }
 0xb0e   : > { %16144 = vmatmul.mubr.msk.bf16.gmra.mxu1 %vm886_vm3, %v20111_v26 }
 0xb0f   : > { %7082 = vmatprep.mubr.bf16.mxu1 %v25613_v13 }
 0xb16   : > { %16145 = vmatmul.mubr.msk.bf16.gmra.mxu1 %vm886_vm3, %v20112_v44 }
 0xb17   : > { %7092 = vmatprep.mubr.bf16.mxu1 %v25613_v13 }
 0xb1e   : > { %16146 = vmatmul.mubr.msk.bf16.gmra.mxu1 %vm886_vm3, %v20113_v5 }
 0xb1f   : > { %7102 = vmatprep.mubr.bf16.mxu1 %v25613_v13 }
 0xb26   : > { %16147 = vmatmul.mubr.msk.bf16.gmra.mxu1 %vm886_vm3, %v20114_v18 }
 0xb27   : > { %7112 = vmatprep.mubr.bf16.mxu1 %v25613_v13 }
 0xb2e   : > { %16148 = vmatmul.mubr.msk.bf16.gmra.mxu1 %vm886_vm3, %v20115_v27 }
 0xb2f   : > { %7122 = vmatprep.mubr.bf16.mxu1 %v25613_v13 }
 0xb36   : > { %16149 = vmatmul.mubr.msk.bf16.gmra.mxu1 %vm886_vm3, %v20116_v30 }
 0xb37   : > { %7132 = vmatprep.mubr.bf16.mxu1 %v25613_v13 }
 0xb3e   : > { %16150 = vmatmul.mubr.msk.bf16.gmra.mxu1 %vm886_vm3, %v20117_v35 }
 0xb3f   : > { %7142 = vmatprep.mubr.bf16.mxu1 %v25613_v13 }
 0xb46   : > { %16151 = vmatmul.mubr.msk.bf16.gmra.mxu1 %vm886_vm3, %v20118_v12 }
 0xb47   : > { %7152 = vmatprep.mubr.bf16.mxu1 %v25613_v13 }
 0xb4e   : > { %16152 = vmatmul.mubr.msk.bf16.gmra.mxu1 %vm886_vm3, %v20119_v8 }
 0xb4f   : > { %7162 = vmatprep.mubr.bf16.mxu1 %v25613_v13 }
 0xb56   : > { %16153 = vmatmul.mubr.msk.bf16.gmra.mxu1 %vm886_vm3, %v20120_v54 }
 0xb57   : > { %7172 = vmatprep.mubr.bf16.mxu1 %v25613_v13 }
 0xb5e   : > { %16154 = vmatmul.mubr.msk.bf16.gmra.mxu1 %vm886_vm3, %v20121_v29  ;;  %v20155_v29 = vld [vmem:[%s25615_s4 + $0x68] sm:$0xff]  }
 0xb5f   : > { %7182 = vmatprep.mubr.bf16.mxu1 %v25613_v13 }
 0xb66   : > { %16155 = vmatmul.mubr.msk.bf16.gmra.mxu1 %vm886_vm3, %v20125_v2 }
 0xb67   : > { %7192 = vmatprep.mubr.bf16.mxu1 %v25613_v13 }
 0xb6e   : > { %16156 = vmatmul.mubr.msk.bf16.gmra.mxu1 %vm886_vm3, %v20130_v21  ;;  %v20158_v21 = vld [vmem:[%s25615_s4 + $0x28] sm:$0xff]  }
 0xb6f   : > { %7202 = vmatprep.mubr.bf16.mxu1 %v25613_v13 }
 0xb76   : > { %16157 = vmatmul.mubr.msk.bf16.gmra.mxu1 %vm886_vm3, %v20135_v25 }
 0xb77   : > { %7212 = vmatprep.mubr.bf16.mxu1 %v25613_v13 }
 0xb7e   : > { %16158 = vmatmul.mubr.msk.bf16.gmra.mxu1 %vm886_vm3, %v20142_v38  ;;  %v20160_v38 = vld [vmem:[%s25615_s4 + $0x60] sm:$0xff]  }
 0xb7f   : > { %7222 = vmatprep.mubr.bf16.mxu1 %v25613_v13 }
 0xb86   : > { %16159 = vmatmul.mubr.msk.bf16.gmra.mxu1 %vm886_vm3, %v20148_v51 }
 0xb87   : > { %7232 = vmatprep.mubr.bf16.mxu1 %v25613_v13 }
 0xb8e   : > { %v6510_v20 = vpop.f32.mrf.mxu0  ;;  %v6642_v16 = vpop.f32.mrf.mxu1  ;;  %16160 = vmatmul.mubr.msk.bf16.gmra.mxu1 %vm886_vm3, %v20157_v42  ;;  %v20162_v42 = vld [vmem:[%s25615_s4 + $0x20] sm:$0xff]  }
 0xb8f   : > { %7242 = vmatprep.mubr.bf16.mxu1 %v25613_v13 }
 0xb90   : > { %v19088_v41 = vpop.f32.mrf.mxu0  ;;  %v19108_v1 = vpop.f32.mrf.mxu1 }
 0xb92   : > { %v6513_v22 = vpop.f32.mrf.mxu0  ;;  %v6645_v3 = vpop.f32.mrf.mxu1 }
 0xb94   : > { %v19089_v10 = vpop.f32.mrf.mxu0  ;;  %v19109_v15 = vpop.f32.mrf.mxu1 }
 0xb95   : > { %v20171_v15 = vld [vmem:[%s25615_s4 + $0x10] sm:$0xff]  }
 0xb96   : > { %v23097_v47 = vpop.f32.mrf.mxu1  ;;  %16161 = vmatmul.mubr.msk.bf16.gmra.mxu1 %vm886_vm3, %v20166_v0  ;;  %v20169_v0 = vld [vmem:[%s25615_s4 + $0x50] sm:$0xff]  }
 0xb98   : > { %v7006_v57 = vpop.f32.mrf.mxu1 }
 0xb9a   : > { %v6575_v26 = vpop.f32.mrf.mxu0  ;;  %v23100_v44 = vpop.f32.mrf.mxu1 }
 0xb9b   : > { %v7253_v13 = vpack.c.bf16 %v23100_v44, %v23097_v47  ;;  %v6582_v7 = vmax.f32 %v6510_v20, %v6575_v26  ;;  %v20173_v26 = vld [vmem:[%s25615_s4 + $0x48] sm:$0xff]   ;;  %v20190_v47 = vld [vmem:[%s25615_s4 + $0x458] sm:$0xff]  }
 0xb9c   : > { %v19098_v19 = vpop.f32.mrf.mxu0  ;;  %v7010_v5 = vpop.f32.mrf.mxu1 }
 0xb9d   : > { %v6649_v50 = vmax.f32 %v6582_v7, %v6642_v16  ;;  %v7254_v54 = vpack.c.bf16 %v7010_v5, %v7006_v57  ;;  %v20164_v16 = vld [vmem:[%s25615_s4 + $0x58] sm:$0xff]  }
 0xb9e   : > { %v6578_v63 = vpop.f32.mrf.mxu0  ;;  %v23104_v36 = vpop.f32.mrf.mxu1  ;;  %v20176_v7 = vld [vmem:[%s25615_s4 + $0x438] sm:$0xff]  }
 0xb9f   : > { %v6583_v27 = vmax.f32 %v6513_v22, %v6578_v63  ;;  %v20167_v22 = vld [vmem:[%s25615_s4 + $0x18] sm:$0xff]  }
 0xba0   : > { %v19099_v61 = vpop.f32.mrf.mxu0  ;;  %v23106_v18 = vpop.f32.mrf.mxu1 }
 0xba1   : > { %v6650_v6 = vmax.f32 %v6583_v27, %v6645_v3  ;;  %v20175_v61 = vld [vmem:[%s25615_s4 + $0x8] sm:$0xff]   ;;  %v20177_v27 = vld [vmem:[%s25615_s4 + $0x40] sm:$0xff]  }
 0xba2   : > { %v23108_v24 = vpop.f32.mrf.mxu1 }
 0xba3   : > { %v7255_v37 = vpack.c.bf16 %v23108_v24, %v23104_v36  ;;  %v20254_v24 = vld [vmem:[%s25615_s4 + $0x658] sm:$0xff]  }
 0xba4   : > { %v23113_v39 = vpop.f32.mrf.mxu1 }
 0xba6   : > { %v6709_v59 = vpop.f32.mrf.mxu0  ;;  %v23120_v32 = vpop.f32.mrf.mxu1 }
 0xba7   : > { %v6716_v53 = vmax.f32 %v6649_v50, %v6709_v59  ;;  %v20178_v50 = vld [vmem:[%s25615_s4 + $0x470] sm:$0xff]  }
 0xba8   : > { %v19118_v60 = vpop.f32.mrf.mxu0  ;;  %v23122_v30 = vpop.f32.mrf.mxu1 }
 0xba9   : > { %14736 = vst.msk [vmem:[%s23118_s0] sm:$0xff] %vm14735_vm7, %v6716_v53  ;;  %v20179_v60 = vld [vmem:[%s25615_s4] sm:$0xff]  }
 0xbaa   : > { %v6712_v52 = vpop.f32.mrf.mxu0  ;;  %v23125_v49 = vpop.f32.mrf.mxu1 }
 0xbab   : > { %v6717_v33 = vmax.f32 %v6650_v6, %v6712_v52  ;;  %v20180_v6 = vld [vmem:[%s25615_s4 + $0x430] sm:$0xff]   ;;  %v20181_v52 = vld [vmem:[%s25615_s4 + $0x2f8] sm:$0xff]  }
 0xbac   : > { %v19119_v35 = vpop.f32.mrf.mxu0  ;;  %v23129_v11 = vpop.f32.mrf.mxu1 }
 0xbad   : > { %14737 = vst.msk [vmem:[%s23118_s0 + $0x8] sm:$0xff] %vm14735_vm7, %v6717_v33  ;;  %v20182_v33 = vld [vmem:[%s25615_s4 + $0x468] sm:$0xff]  }
 0xbae   : > { %v23132_v17 = vpop.f32.mrf.mxu1 }
 0xbb0   : > { %v23134_v23 = vpop.f32.mrf.mxu1 }
 0xbb2   : > { %v23136_v55 = vpop.f32.mrf.mxu1 }
 0xbb4   : > { %v23140_v12 = vpop.f32.mrf.mxu1 }
 0xbb6   : > { %v7044_v40 = vpop.f32.mrf.mxu1 }
 0xbb8   : > { %v7046_v62 = vpop.f32.mrf.mxu1 }
 0xbba   : > { %v7048_v46 = vpop.f32.mrf.mxu1 }
 0xbbb   : > { %v7261_v31 = vpack.c.bf16 %v7048_v46, %v7044_v40  ;;  %v20184_v46 = vld [vmem:[%s25615_s4 + $0x428] sm:$0xff]  }
 0xbbc   : > { %v7050_v4 = vpop.f32.mrf.mxu1 }
 0xbbd   : > { %v7262_v8 = vpack.c.bf16 %v7050_v4, %v7046_v62  ;;  %v20183_v62 = vld [vmem:[%s25615_s4 + $0x2b8] sm:$0xff]  }
 0xbbe   : > { %v23145_v28 = vpop.f32.mrf.mxu1 }
 0xbbf   : > { %7595 = vmatprep.mubr.bf16.mxu0 %v7262_v8  ;;  %v20185_v8 = vld [vmem:[%s25615_s4 + $0x2f0] sm:$0xff]  }
 0xbc0   : > { %v23150_v43 = vpop.f32.mrf.mxu1  ;;  %7596 = vmatmul.mubr.bf16.vlgmr.msra.gmra.mxu0 %v7261_v31 }
 0xbc1   : > { %18362 = vmatpush3.bf16.msra.mxu0 %v20149_v48  ;;  %7732 = vmatprep.mubr.bf16.mxu0 %v7254_v54  ;;  %v20186_v48 = vld [vmem:[%s25615_s4 + $0x460] sm:$0xff]  }
 0xbc2   : > { %v23155_v9 = vpop.f32.mrf.mxu1  ;;  %18363 = vmatprep.subr.bf16.mxu0 %v20151_v56 }
 0xbc4   : > { %v23160_v2 = vpop.f32.mrf.mxu1 }
 0xbc5   : > { %18364 = vmatpush3.bf16.msra.mxu0 %v20153_v45  ;;  %v7264_v56 = vpack.c.bf16 %v23160_v2, %v23150_v43  ;;  %v20187_v45 = vld [vmem:[%s25615_s4 + $0x2b0] sm:$0xff]   ;;  %v20189_v43 = vld [vmem:[%s25615_s4 + $0x2e8] sm:$0xff]  }
 0xbc6   : > { %v23165_v25 = vpop.f32.mrf.mxu1  ;;  %18365 = vmatprep.subr.bf16.mxu0 %v20155_v29  ;;  %v20188_v29 = vld [vmem:[%s25615_s4 + $0x420] sm:$0xff]  }
 0xbc8   : > { %v23170_v51 = vpop.f32.mrf.mxu1 }
 0xbc9   : > { %18366 = vmatpush3.bf16.msra.mxu0 %v20158_v21  ;;  %v20191_v21 = vld [vmem:[%s25615_s4 + $0x2a8] sm:$0xff]  }
 0xbca   : > { %v23175_v20 = vpop.f32.mrf.mxu1  ;;  %18367 = vmatprep.subr.bf16.mxu0 %v20160_v38  ;;  %v20192_v38 = vld [vmem:[%s25615_s4 + $0x418] sm:$0xff]  }
 0xbcb   : > { %v7265_v41 = vpack.c.bf16 %v23175_v20, %v23165_v25  ;;  %v20286_v20 = vld [vmem:[%s25615_s4 + $0x758] sm:$0xff]  }
 0xbcc   : > { %v23182_v1 = vpop.f32.mrf.mxu1 }
 0xbcd   : > { %18368 = vmatpush3.bf16.msra.mxu0 %v20162_v42  ;;  %v20193_v42 = vld [vmem:[%s25615_s4 + $0x2e0] sm:$0xff]  }
 0xbce   : > { %v7074_v3 = vpop.f32.mrf.mxu1  ;;  %18369 = vmatprep.subr.bf16.mxu0 %v20164_v16  ;;  %v20194_v16 = vld [vmem:[%s25615_s4 + $0x450] sm:$0xff]  }
 0xbd0   : > { %v7076_v10 = vpop.f32.mrf.mxu1 }
 0xbd1   : > { %18370 = vmatpush3.bf16.msra.mxu0 %v20167_v22 }
 0xbd2   : > { %v7078_v57 = vpop.f32.mrf.mxu1  ;;  %18371 = vmatprep.subr.bf16.mxu0 %v20169_v0  ;;  %v20195_v0 = vld [vmem:[%s25615_s4 + $0x2a0] sm:$0xff]  }
 0xbd3   : > { %v7267_v19 = vpack.c.bf16 %v7078_v57, %v7074_v3  ;;  %v20198_v57 = vld [vmem:[%s25615_s4 + $0x448] sm:$0xff]  }
 0xbd4   : > { %v7080_v5 = vpop.f32.mrf.mxu1 }
 0xbd5   : > { %v7268_v63 = vpack.c.bf16 %v7080_v5, %v7076_v10  ;;  %18372 = vmatpush3.bf16.msra.mxu0 %v20171_v15  ;;  %v20196_v10 = vld [vmem:[%s25615_s4 + $0x410] sm:$0xff]   ;;  %v20197_v15 = vld [vmem:[%s25615_s4 + $0x2d8] sm:$0xff]  }
 0xbd6   : > { %18373 = vmatprep.subr.bf16.mxu0 %v20173_v26  ;;  %v23208_v59 = vpop.f32.mrf.mxu1  ;;  %v20199_v5 = vld [vmem:[%s25615_s4 + $0x298] sm:$0xff]  }
 0xbd7   : > { %8516 = vmatprep.mubr.bf16.mxu1 %v7268_v63  ;;  %v20200_v63 = vld [vmem:[%s25615_s4 + $0x408] sm:$0xff]  }
 0xbd8   : > { %8517 = vmatmul.mubr.bf16.vlgmr.msra.gmra.mxu1 %v7267_v19  ;;  %v7086_v53 = vpop.f32.mrf.mxu1 }
 0xbd9   : > { %18374 = vmatpush3.bf16.msra.mxu0 %v20175_v61  ;;  %18516 = vmatpush3.bf16.msra.mxu1 %v20176_v7  ;;  %v20201_v61 = vld [vmem:[%s25615_s4 + $0x2d0] sm:$0xff]   ;;  %v20202_v7 = vld [vmem:[%s25615_s4 + $0x440] sm:$0xff]  }
 0xbda   : > { %18375 = vmatprep.subr.bf16.mxu0 %v20177_v27  ;;  %18517 = vmatprep.subr.bf16.mxu1 %v20178_v50  ;;  %v23222_v35 = vpop.f32.mrf.mxu1 }
 0xbdc   : > { %v7090_v40 = vpop.f32.mrf.mxu1 }
 0xbdd   : > { %18376 = vmatpush3.bf16.msra.mxu0 %v20179_v60  ;;  %18518 = vmatpush3.bf16.msra.mxu1 %v20180_v6  ;;  %v7270_v4 = vpack.c.bf16 %v7090_v40, %v7086_v53  ;;  %v20203_v53 = vld [vmem:[%s25615_s4 + $0x290] sm:$0xff]   ;;  %v20204_v60 = vld [vmem:[%s25615_s4 + $0x400] sm:$0xff]   ;;  %v20205_v6 = vld [vmem:[%s25615_s4 + $0x2c8] sm:$0xff]  }
 0xbde   : > { %18383 = vmatprep.subr.bf16.mxu0 %v20181_v52  ;;  %18519 = vmatprep.subr.bf16.mxu1 %v20182_v33  ;;  %v23236_v31 = vpop.f32.mrf.mxu1  ;;  %v20206_v52 = vld [vmem:[%s25615_s4 + $0x578] sm:$0xff]  }
 0xbdf   : > { %8823 = vmatprep.mubr.bf16.mxu1 %v7270_v4  ;;  %v20207_v4 = vld [vmem:[%s25615_s4 + $0x288] sm:$0xff]  }
 0xbe0   : > { %7733 = vmatmul.mubr.bf16.vlgmr.msra.gmra.mxu0 %v7253_v13  ;;  %v23243_v54 = vpop.f32.mrf.mxu1 }
 0xbe1   : > { %18384 = vmatpush3.bf16.msra.mxu0 %v20183_v62  ;;  %18520 = vmatpush3.bf16.msra.mxu1 %v20184_v46  ;;  %v7269_v62 = vpack.c.bf16 %v23222_v35, %v23208_v59  ;;  %v20210_v59 = vld [vmem:[%s25615_s4 + $0x570] sm:$0xff]  }
 0xbe2   : > { %18385 = vmatprep.subr.bf16.mxu0 %v20185_v8  ;;  %18521 = vmatprep.subr.bf16.mxu1 %v20186_v48  ;;  %v23257_v44 = vpop.f32.mrf.mxu1  ;;  %v20208_v8 = vld [vmem:[%s25615_s4 + $0x538] sm:$0xff]   ;;  %v20209_v48 = vld [vmem:[%s25615_s4 + $0x2c0] sm:$0xff]  }
 0xbe3   : > { %7902 = vmatprep.mubr.bf16.mxu0 %v7264_v56 }
 0xbe4   : > { %v23261_v2 = vpop.f32.mrf.mxu1 }
 0xbe5   : > { %18386 = vmatpush3.bf16.msra.mxu0 %v20187_v45  ;;  %18522 = vmatpush3.bf16.msra.mxu1 %v20188_v29  ;;  %v20211_v29 = vld [vmem:[%s25615_s4 + $0x280] sm:$0xff]  }
 0xbe6   : > { %18387 = vmatprep.subr.bf16.mxu0 %v20189_v43  ;;  %18523 = vmatprep.subr.bf16.mxu1 %v20190_v47  ;;  %v23275_v22 = vpop.f32.mrf.mxu1  ;;  %v20212_v43 = vld [vmem:[%s25615_s4 + $0x530] sm:$0xff]   ;;  %v20213_v47 = vld [vmem:[%s25615_s4 + $0xf8] sm:$0xff]  }
 0xbe8   : > { %v7106_v3 = vpop.f32.mrf.mxu1 }
 0xbe9   : > { %18388 = vmatpush3.bf16.msra.mxu0 %v20191_v21  ;;  %18524 = vmatpush3.bf16.msra.mxu1 %v20192_v38  ;;  %v20214_v21 = vld [vmem:[%s25615_s4 + $0x568] sm:$0xff]  }
 0xbea   : > { %18389 = vmatprep.subr.bf16.mxu0 %v20193_v42  ;;  %18525 = vmatprep.subr.bf16.mxu1 %v20194_v16  ;;  %v23289_v26 = vpop.f32.mrf.mxu1  ;;  %v20215_v16 = vld [vmem:[%s25615_s4 + $0xb8] sm:$0xff]  }
 0xbec   : > { %v7110_v19 = vpop.f32.mrf.mxu1 }
 0xbed   : > { %18390 = vmatpush3.bf16.msra.mxu0 %v20195_v0  ;;  %18526 = vmatpush3.bf16.msra.mxu1 %v20196_v10  ;;  %v7274_v56 = vpack.c.bf16 %v7110_v19, %v7106_v3  ;;  %v7263_v3 = vpack.c.bf16 %v23155_v9, %v23145_v28  ;;  %v20216_v0 = vld [vmem:[%s25615_s4 + $0x528] sm:$0xff]   ;;  %v20217_v10 = vld [vmem:[%s25615_s4 + $0xf0] sm:$0xff]   ;;  %v20218_v19 = vld [vmem:[%s25615_s4 + $0x560] sm:$0xff]  }
 0xbee   : > { %18391 = vmatprep.subr.bf16.mxu0 %v20197_v15  ;;  %18527 = vmatprep.subr.bf16.mxu1 %v20198_v57  ;;  %v23303_v27 = vpop.f32.mrf.mxu1  ;;  %v7256_v57 = vpack.c.bf16 %v23113_v39, %v23106_v18  ;;  %v20219_v9 = vld [vmem:[%s25615_s4 + $0xb0] sm:$0xff]   ;;  %v20221_v18 = vld [vmem:[%s25615_s4 + $0xe8] sm:$0xff]  }
 0xbf0   : > { %v23305_v50 = vpop.f32.mrf.mxu1 }
 0xbf1   : > { %18392 = vmatpush3.bf16.msra.mxu0 %v20199_v5  ;;  %18528 = vmatpush3.bf16.msra.mxu1 %v20200_v63  ;;  %v20220_v5 = vld [vmem:[%s25615_s4 + $0x520] sm:$0xff]   ;;  %v20222_v63 = vld [vmem:[%s25615_s4 + $0x558] sm:$0xff]  }
 0xbf2   : > { %18393 = vmatprep.subr.bf16.mxu0 %v20201_v61  ;;  %18529 = vmatprep.subr.bf16.mxu1 %v20202_v7  ;;  %v23319_v33 = vpop.f32.mrf.mxu1 }
 0xbf4   : > { %v23325_v46 = vpop.f32.mrf.mxu1 }
 0xbf5   : > { %18394 = vmatpush3.bf16.msra.mxu0 %v20203_v53  ;;  %18530 = vmatpush3.bf16.msra.mxu1 %v20204_v60  ;;  %v20223_v53 = vld [vmem:[%s25615_s4 + $0xa8] sm:$0xff]   ;;  %v20224_v60 = vld [vmem:[%s25615_s4 + $0x518] sm:$0xff]  }
 0xbf6   : > { %18395 = vmatprep.subr.bf16.mxu0 %v20205_v6  ;;  %18559 = vmatprep.subr.bf16.mxu1 %v20206_v52  ;;  %v23339_v35 = vpop.f32.mrf.mxu1  ;;  %v20225_v6 = vld [vmem:[%s25615_s4 + $0xe0] sm:$0xff]  }
 0xbf8   : > { %8824 = vmatmul.mubr.bf16.vlgmr.msra.gmra.mxu1 %v7269_v62  ;;  %v23341_v45 = vpop.f32.mrf.mxu1  ;;  %v20226_v62 = vld [vmem:[%s25615_s4 + $0x550] sm:$0xff]  }
 0xbf9   : > { %18396 = vmatpush3.bf16.msra.mxu0 %v20207_v4  ;;  %18560 = vmatpush3.bf16.msra.mxu1 %v20208_v8  ;;  %v20227_v8 = vld [vmem:[%s25615_s4 + $0xa0] sm:$0xff]  }
 0xbfa   : > { %18397 = vmatprep.subr.bf16.mxu0 %v20209_v48  ;;  %18561 = vmatprep.subr.bf16.mxu1 %v20210_v59  ;;  %v23355_v38 = vpop.f32.mrf.mxu1  ;;  %v20228_v48 = vld [vmem:[%s25615_s4 + $0x510] sm:$0xff]   ;;  %v20229_v59 = vld [vmem:[%s25615_s4 + $0xd8] sm:$0xff]  }
 0xbfb   : > { %9167 = vmatprep.mubr.bf16.mxu1 %v7274_v56 }
 0xbfc   : > { %v23357_v42 = vpop.f32.mrf.mxu1 }
 0xbfd   : > { %18398 = vmatpush3.bf16.msra.mxu0 %v20211_v29  ;;  %18562 = vmatpush3.bf16.msra.mxu1 %v20212_v43  ;;  %v20230_v29 = vld [vmem:[%s25615_s4 + $0x548] sm:$0xff]  }
 0xbfe   : > { %18405 = vmatprep.subr.bf16.mxu0 %v20213_v47  ;;  %18563 = vmatprep.subr.bf16.mxu1 %v20214_v21  ;;  %v23370_v15 = vpop.f32.mrf.mxu1  ;;  %v20231_v47 = vld [vmem:[%s25615_s4 + $0x98] sm:$0xff]   ;;  %v20232_v21 = vld [vmem:[%s25615_s4 + $0x508] sm:$0xff]  }
 0xc00   : > { %7903 = vmatmul.mubr.bf16.vlgmr.msra.gmra.mxu0 %v7263_v3  ;;  %v23377_v28 = vpop.f32.mrf.mxu1 }
 0xc01   : > { %18406 = vmatpush3.bf16.msra.mxu0 %v20215_v16  ;;  %8039 = vmatprep.mubr.bf16.mxu0 %v7256_v57  ;;  %v20233_v16 = vld [vmem:[%s25615_s4 + $0xd0] sm:$0xff]  }
 0xc02   : > { %18564 = vmatpush3.bf16.msra.mxu1 %v20216_v0  ;;  %18407 = vmatprep.subr.bf16.mxu0 %v20217_v10  ;;  %v23388_v39 = vpop.f32.mrf.mxu1  ;;  %v20234_v0 = vld [vmem:[%s25615_s4 + $0x540] sm:$0xff]   ;;  %v20235_v57 = vld [vmem:[%s25615_s4 + $0x90] sm:$0xff]  }
 0xc03   : > { %18565 = vmatprep.subr.bf16.mxu1 %v20218_v19  ;;  %v20236_v19 = vld [vmem:[%s25615_s4 + $0x500] sm:$0xff]  }
 0xc04   : > { %v23395_v7 = vpop.f32.mrf.mxu1 }
 0xc05   : > { %18408 = vmatpush3.bf16.msra.mxu0 %v20219_v9  ;;  %v20237_v9 = vld [vmem:[%s25615_s4 + $0xc8] sm:$0xff]  }
 0xc06   : > { %18566 = vmatpush3.bf16.msra.mxu1 %v20220_v5  ;;  %18409 = vmatprep.subr.bf16.mxu0 %v20221_v18  ;;  %v23406_v52 = vpop.f32.mrf.mxu1  ;;  %v20238_v18 = vld [vmem:[%s25615_s4 + $0x678] sm:$0xff]  }
 0xc07   : > { %18567 = vmatprep.subr.bf16.mxu1 %v20222_v63 }
 0xc08   : > { %v23411_v4 = vpop.f32.mrf.mxu1 }
 0xc09   : > { %18410 = vmatpush3.bf16.msra.mxu0 %v20223_v53 }
 0xc0a   : > { %18568 = vmatpush3.bf16.msra.mxu1 %v20224_v60  ;;  %18411 = vmatprep.subr.bf16.mxu0 %v20225_v6  ;;  %v23422_v56 = vpop.f32.mrf.mxu1  ;;  %v7273_v60 = vpack.c.bf16 %v23289_v26, %v23275_v22  ;;  %v20239_v6 = vld [vmem:[%s25615_s4 + $0x88] sm:$0xff]   ;;  %v20242_v22 = vld [vmem:[%s25615_s4 + $0x670] sm:$0xff]   ;;  %v7278_v26 = vpack.c.bf16 %v23357_v42, %v23341_v45 }
 0xc0b   : > { %18569 = vmatprep.subr.bf16.mxu1 %v20226_v62  ;;  %v20240_v62 = vld [vmem:[%s25615_s4 + $0x638] sm:$0xff]   ;;  %v20246_v45 = vld [vmem:[%s25615_s4 + $0x668] sm:$0xff]  }
 0xc0c   : > { %v23427_v43 = vpop.f32.mrf.mxu1 }
 0xc0d   : > { %18412 = vmatpush3.bf16.msra.mxu0 %v20227_v8  ;;  %v20241_v8 = vld [vmem:[%s25615_s4 + $0xc0] sm:$0xff]  }
 0xc0e   : > { %18570 = vmatpush3.bf16.msra.mxu1 %v20228_v48  ;;  %18413 = vmatprep.subr.bf16.mxu0 %v20229_v59  ;;  %v23438_v3 = vpop.f32.mrf.mxu1 }
 0xc0f   : > { %18571 = vmatprep.subr.bf16.mxu1 %v20230_v29  ;;  %v20243_v29 = vld [vmem:[%s25615_s4 + $0x80] sm:$0xff]  }
 0xc10   : > { %v23443_v10 = vpop.f32.mrf.mxu1 }
 0xc11   : > { %18414 = vmatpush3.bf16.msra.mxu0 %v20231_v47  ;;  %v20244_v47 = vld [vmem:[%s25615_s4 + $0x630] sm:$0xff]  }
 0xc12   : > { %18572 = vmatpush3.bf16.msra.mxu1 %v20232_v21  ;;  %18415 = vmatprep.subr.bf16.mxu0 %v20233_v16  ;;  %v23454_v5 = vpop.f32.mrf.mxu1  ;;  %v20245_v21 = vld [vmem:[%s25615_s4 + $0x378] sm:$0xff]  }
 0xc13   : > { %18573 = vmatprep.subr.bf16.mxu1 %v20234_v0  ;;  %v7266_v0 = vpack.c.bf16 %v23182_v1, %v23170_v51  ;;  %v20250_v51 = vld [vmem:[%s25615_s4 + $0x660] sm:$0xff]  }
 0xc14   : > { %v23461_v53 = vpop.f32.mrf.mxu1 }
 0xc15   : > { %18416 = vmatpush3.bf16.msra.mxu0 %v20235_v57  ;;  %v20247_v57 = vld [vmem:[%s25615_s4 + $0x338] sm:$0xff]  }
 0xc16   : > { %18574 = vmatpush3.bf16.msra.mxu1 %v20236_v19  ;;  %18417 = vmatprep.subr.bf16.mxu0 %v20237_v9  ;;  %v23474_v48 = vpop.f32.mrf.mxu1  ;;  %v20248_v19 = vld [vmem:[%s25615_s4 + $0x628] sm:$0xff]   ;;  %v20249_v9 = vld [vmem:[%s25615_s4 + $0x370] sm:$0xff]  }
 0xc17   : > { %18603 = vmatprep.subr.bf16.mxu1 %v20238_v18 }
 0xc18   : > { %v23481_v59 = vpop.f32.mrf.mxu1 }
 0xc19   : > { %18418 = vmatpush3.bf16.msra.mxu0 %v20239_v6  ;;  %9168 = vmatmul.mubr.bf16.vlgmr.msra.gmra.mxu1 %v7273_v60  ;;  %v20251_v60 = vld [vmem:[%s25615_s4 + $0x330] sm:$0xff]   ;;  %v20252_v6 = vld [vmem:[%s25615_s4 + $0x620] sm:$0xff]  }
 0xc1a   : > { %18604 = vmatpush3.bf16.msra.mxu1 %v20240_v62  ;;  %18419 = vmatprep.subr.bf16.mxu0 %v20241_v8  ;;  %v23492_v16 = vpop.f32.mrf.mxu1  ;;  %v20253_v62 = vld [vmem:[%s25615_s4 + $0x368] sm:$0xff]  }
 0xc1b   : > { %18605 = vmatprep.subr.bf16.mxu1 %v20242_v22  ;;  %9511 = vmatprep.mubr.bf16.mxu1 %v7278_v26  ;;  %v20255_v22 = vld [vmem:[%s25615_s4 + $0x328] sm:$0xff]   ;;  %v20256_v26 = vld [vmem:[%s25615_s4 + $0x618] sm:$0xff]  }
 0xc1c   : > { %v23497_v42 = vpop.f32.mrf.mxu1 }
 0xc1d   : > { %18420 = vmatpush3.bf16.msra.mxu0 %v20243_v29  ;;  %v20257_v29 = vld [vmem:[%s25615_s4 + $0x360] sm:$0xff]  }
 0xc1e   : > { %18606 = vmatpush3.bf16.msra.mxu1 %v20244_v47  ;;  %18427 = vmatprep.subr.bf16.mxu0 %v20245_v21  ;;  %v23510_v18 = vpop.f32.mrf.mxu1  ;;  %v20258_v21 = vld [vmem:[%s25615_s4 + $0x650] sm:$0xff]  }
 0xc1f   : > { %18607 = vmatprep.subr.bf16.mxu1 %v20246_v45 }
 0xc20   : > { %8040 = vmatmul.mubr.bf16.vlgmr.msra.gmra.mxu0 %v7255_v37  ;;  %v23518_v1 = vpop.f32.mrf.mxu1  ;;  %v20271_v37 = vld [vmem:[%s25615_s4 + $0x308] sm:$0xff]  }
 0xc21   : > { %18428 = vmatpush3.bf16.msra.mxu0 %v20247_v57  ;;  %8209 = vmatprep.mubr.bf16.mxu0 %v7266_v0  ;;  %v20259_v0 = vld [vmem:[%s25615_s4 + $0x320] sm:$0xff]   ;;  %v20260_v57 = vld [vmem:[%s25615_s4 + $0x610] sm:$0xff]  }
 0xc22   : > { %18608 = vmatpush3.bf16.msra.mxu1 %v20248_v19  ;;  %18429 = vmatprep.subr.bf16.mxu0 %v20249_v9  ;;  %v23529_v36 = vpop.f32.mrf.mxu1  ;;  %v20261_v19 = vld [vmem:[%s25615_s4 + $0x358] sm:$0xff]  }
 0xc23   : > { %18609 = vmatprep.subr.bf16.mxu1 %v20250_v51  ;;  %v20262_v51 = vld [vmem:[%s25615_s4 + $0x648] sm:$0xff]  }
 0xc24   : > { %v23536_v8 = vpop.f32.mrf.mxu1 }
 0xc25   : > { %18430 = vmatpush3.bf16.msra.mxu0 %v20251_v60 }
 0xc26   : > { %18610 = vmatpush3.bf16.msra.mxu1 %v20252_v6  ;;  %18431 = vmatprep.subr.bf16.mxu0 %v20253_v62  ;;  %v23547_v47 = vpop.f32.mrf.mxu1  ;;  %v20263_v6 = vld [vmem:[%s25615_s4 + $0x318] sm:$0xff]   ;;  %v20264_v62 = vld [vmem:[%s25615_s4 + $0x608] sm:$0xff]  }
 0xc27   : > { %18611 = vmatprep.subr.bf16.mxu1 %v20254_v24  ;;  %v20265_v24 = vld [vmem:[%s25615_s4 + $0x350] sm:$0xff]  }
 0xc28   : > { %v23552_v45 = vpop.f32.mrf.mxu1 }
 0xc29   : > { %18432 = vmatpush3.bf16.msra.mxu0 %v20255_v22 }
 0xc2a   : > { %18612 = vmatpush3.bf16.msra.mxu1 %v20256_v26  ;;  %18433 = vmatprep.subr.bf16.mxu0 %v20257_v29  ;;  %v23563_v9 = vpop.f32.mrf.mxu1  ;;  %v20266_v26 = vld [vmem:[%s25615_s4 + $0x640] sm:$0xff]  }
 0xc2b   : > { %18613 = vmatprep.subr.bf16.mxu1 %v20258_v21  ;;  %v20267_v21 = vld [vmem:[%s25615_s4 + $0x310] sm:$0xff]  }
 0xc2c   : > { %v23568_v60 = vpop.f32.mrf.mxu1 }
 0xc2d   : > { %18434 = vmatpush3.bf16.msra.mxu0 %v20259_v0  ;;  %v20268_v0 = vld [vmem:[%s25615_s4 + $0x600] sm:$0xff]  }
 0xc2e   : > { %18614 = vmatpush3.bf16.msra.mxu1 %v20260_v57  ;;  %18435 = vmatprep.subr.bf16.mxu0 %v20261_v19  ;;  %v23579_v22 = vpop.f32.mrf.mxu1  ;;  %v20269_v57 = vld [vmem:[%s25615_s4 + $0x348] sm:$0xff]  }
 0xc2f   : > { %18615 = vmatprep.subr.bf16.mxu1 %v20262_v51  ;;  %v20270_v51 = vld [vmem:[%s25615_s4 + $0x778] sm:$0xff]  }
 0xc30   : > { %v23584_v29 = vpop.f32.mrf.mxu1 }
 0xc31   : > { %18436 = vmatpush3.bf16.msra.mxu0 %v20263_v6  ;;  %v20273_v6 = vld [vmem:[%s25615_s4 + $0x340] sm:$0xff]  }
 0xc32   : > { %18616 = vmatpush3.bf16.msra.mxu1 %v20264_v62  ;;  %18437 = vmatprep.subr.bf16.mxu0 %v20265_v24  ;;  %v23595_v19 = vpop.f32.mrf.mxu1  ;;  %v7277_v24 = vpack.c.bf16 %v23355_v38, %v23339_v35  ;;  %v20274_v35 = vld [vmem:[%s25615_s4 + $0x770] sm:$0xff]   ;;  %v7282_v38 = vpack.c.bf16 %v23427_v43, %v23411_v4  ;;  %v20278_v4 = vld [vmem:[%s25615_s4 + $0x768] sm:$0xff]  }
 0xc33   : > { %18617 = vmatprep.subr.bf16.mxu1 %v20266_v26  ;;  %v20272_v26 = vld [vmem:[%s25615_s4 + $0x738] sm:$0xff]  }
 0xc34   : > { %v23602_v62 = vpop.f32.mrf.mxu1 }
 0xc35   : > { %18438 = vmatpush3.bf16.msra.mxu0 %v20267_v21 }
 0xc36   : > { %18618 = vmatpush3.bf16.msra.mxu1 %v20268_v0  ;;  %18439 = vmatprep.subr.bf16.mxu0 %v20269_v57  ;;  %v23615_v63 = vpop.f32.mrf.mxu1  ;;  %v20275_v0 = vld [vmem:[%s25615_s4 + $0x300] sm:$0xff]   ;;  %v20276_v57 = vld [vmem:[%s25615_s4 + $0x730] sm:$0xff]  }
 0xc37   : > { %18647 = vmatprep.subr.bf16.mxu1 %v20270_v51  ;;  %v20277_v51 = vld [vmem:[%s25615_s4 + $0x178] sm:$0xff]  }
 0xc38   : > { %v23622_v21 = vpop.f32.mrf.mxu1 }
 0xc39   : > { %9512 = vmatmul.mubr.bf16.vlgmr.msra.gmra.mxu1 %v7277_v24  ;;  %18440 = vmatpush3.bf16.msra.mxu0 %v20271_v37  ;;  %v20279_v37 = vld [vmem:[%s25615_s4 + $0x138] sm:$0xff]   ;;  %v20281_v24 = vld [vmem:[%s25615_s4 + $0x170] sm:$0xff]  }
 0xc3a   : > { %18648 = vmatpush3.bf16.msra.mxu1 %v20272_v26  ;;  %18441 = vmatprep.subr.bf16.mxu0 %v20273_v6  ;;  %v23633_v61 = vpop.f32.mrf.mxu1  ;;  %v20280_v6 = vld [vmem:[%s25615_s4 + $0x728] sm:$0xff]  }
 0xc3b   : > { %18649 = vmatprep.subr.bf16.mxu1 %v20274_v35  ;;  %9855 = vmatprep.mubr.bf16.mxu1 %v7282_v38  ;;  %v7258_v35 = vpack.c.bf16 %v23129_v11, %v23122_v30  ;;  %v20282_v38 = vld [vmem:[%s25615_s4 + $0x760] sm:$0xff]   ;;  %v20285_v11 = vld [vmem:[%s25615_s4 + $0x168] sm:$0xff]  }
 0xc3c   : > { %v23638_v43 = vpop.f32.mrf.mxu1  ;;  %v20284_v30 = vld [vmem:[%s25615_s4 + $0x720] sm:$0xff]  }
 0xc3d   : > { %18442 = vmatpush3.bf16.msra.mxu0 %v20275_v0 }
 0xc3e   : > { %18650 = vmatpush3.bf16.msra.mxu1 %v20276_v57  ;;  %18449 = vmatprep.subr.bf16.mxu0 %v20277_v51  ;;  %v23649_v26 = vpop.f32.mrf.mxu1  ;;  %v20283_v57 = vld [vmem:[%s25615_s4 + $0x130] sm:$0xff]  }
 0xc3f   : > { %25616 = vst [vmem:[#allocation7_spill] sm:$0xff] %v23649_v26  ;;  %18651 = vmatprep.subr.bf16.mxu1 %v20278_v4  ;;  %v20287_v4 = vld [vmem:[%s25615_s4 + $0x128] sm:$0xff]   ;;  %v20305_v26 = vld [vmem:[%s25615_s4 + $0x140] sm:$0xff]  }
 0xc40   : > { %8210 = vmatmul.mubr.bf16.vlgmr.msra.gmra.mxu0 %v7265_v41  ;;  %v23659_v0 = vpop.f32.mrf.mxu1 }
 0xc41   : > { %18450 = vmatpush3.bf16.msra.mxu0 %v20279_v37  ;;  %8346 = vmatprep.mubr.bf16.mxu0 %v7258_v35  ;;  %v20288_v37 = vld [vmem:[%s25615_s4 + $0x718] sm:$0xff]   ;;  %v20290_v35 = vld [vmem:[%s25615_s4 + $0x750] sm:$0xff]  }
 0xc42   : > { %18652 = vmatpush3.bf16.msra.mxu1 %v20280_v6  ;;  %18451 = vmatprep.subr.bf16.mxu0 %v20281_v24  ;;  %v23670_v25 = vpop.f32.mrf.mxu1  ;;  %v20289_v6 = vld [vmem:[%s25615_s4 + $0x160] sm:$0xff]  }
 0xc43   : > { %18653 = vmatprep.subr.bf16.mxu1 %v20282_v38 }
 0xc44   : > { %v23677_v51 = vpop.f32.mrf.mxu1 }
 0xc45   : > { %18452 = vmatpush3.bf16.msra.mxu0 %v20283_v57  ;;  %v20291_v57 = vld [vmem:[%s25615_s4 + $0x120] sm:$0xff]  }
 0xc46   : > { %18654 = vmatpush3.bf16.msra.mxu1 %v20284_v30  ;;  %18453 = vmatprep.subr.bf16.mxu0 %v20285_v11  ;;  %v23688_v24 = vpop.f32.mrf.mxu1  ;;  %v20292_v30 = vld [vmem:[%s25615_s4 + $0x710] sm:$0xff]   ;;  %v20293_v11 = vld [vmem:[%s25615_s4 + $0x158] sm:$0xff]  }
 0xc47   : > { %18655 = vmatprep.subr.bf16.mxu1 %v20286_v20 }
 0xc48   : > { %v23693_v38 = vpop.f32.mrf.mxu1 }
 0xc49   : > { %18454 = vmatpush3.bf16.msra.mxu0 %v20287_v4  ;;  %v20294_v4 = vld [vmem:[%s25615_s4 + $0x748] sm:$0xff]  }
 0xc4a   : > { %18656 = vmatpush3.bf16.msra.mxu1 %v20288_v37  ;;  %18455 = vmatprep.subr.bf16.mxu0 %v20289_v6  ;;  %v23704_v20 = vpop.f32.mrf.mxu1  ;;  %v20295_v37 = vld [vmem:[%s25615_s4 + $0x118] sm:$0xff]   ;;  %v20296_v6 = vld [vmem:[%s25615_s4 + $0x708] sm:$0xff]  }
 0xc4b   : > { %18657 = vmatprep.subr.bf16.mxu1 %v20290_v35  ;;  %v20297_v35 = vld [vmem:[%s25615_s4 + $0x150] sm:$0xff]  }
 0xc4c   : > { %v23709_v41 = vpop.f32.mrf.mxu1 }
 0xc4d   : > { %18456 = vmatpush3.bf16.msra.mxu0 %v20291_v57  ;;  %v20298_v57 = vld [vmem:[%s25615_s4 + $0x740] sm:$0xff]  }
 0xc4e   : > { %18658 = vmatpush3.bf16.msra.mxu1 %v20292_v30  ;;  %18457 = vmatprep.subr.bf16.mxu0 %v20293_v11  ;;  %v23720_v40 = vpop.f32.mrf.mxu1  ;;  %v20299_v30 = vld [vmem:[%s25615_s4 + $0x110] sm:$0xff]   ;;  %v20300_v11 = vld [vmem:[%s25615_s4 + $0x700] sm:$0xff]  }
 0xc4f   : > { %18659 = vmatprep.subr.bf16.mxu1 %v20294_v4  ;;  %v20301_v4 = vld [vmem:[%s25615_s4 + $0x148] sm:$0xff]  }
 0xc50   : > { %v23725_v13 = vpop.f32.mrf.mxu1 }
 0xc51   : > { %18458 = vmatpush3.bf16.msra.mxu0 %v20295_v37  ;;  %v20302_v37 = vld [vmem:[%s25615_s4 + $0x878] sm:$0xff]  }
 0xc52   : > { %18660 = vmatpush3.bf16.msra.mxu1 %v20296_v6  ;;  %18459 = vmatprep.subr.bf16.mxu0 %v20297_v35  ;;  %v23736_v58 = vpop.f32.mrf.mxu1  ;;  %v7281_v6 = vpack.c.bf16 %v23422_v56, %v23406_v52  ;;  %v20303_v35 = vld [vmem:[%s25615_s4 + $0x108] sm:$0xff]   ;;  %v20306_v52 = vld [vmem:[%s25615_s4 + $0x870] sm:$0xff]   ;;  %v7286_v56 = vpack.c.bf16 %v23497_v42, %v23481_v59  ;;  %v20311_v42 = vld [vmem:[%s25615_s4 + $0x1b8] sm:$0xff]  }
 0xc53   : > { %18661 = vmatprep.subr.bf16.mxu1 %v20298_v57  ;;  %v7299_v14 = vpack.c.bf16 %v23736_v58, %v23720_v40  ;;  %v20304_v57 = vld [vmem:[%s25615_s4 + $0x838] sm:$0xff]   ;;  %v20310_v59 = vld [vmem:[%s25615_s4 + $0x868] sm:$0xff]  }
 0xc55   : > { %18460 = vmatpush3.bf16.msra.mxu0 %v20299_v30  ;;  %v20307_v30 = vld [vmem:[%s25615_s4 + $0x100] sm:$0xff]  }
 0xc56   : > { %18662 = vmatpush3.bf16.msra.mxu1 %v20300_v11  ;;  %18461 = vmatprep.subr.bf16.mxu0 %v20301_v4  ;;  %v20308_v11 = vld [vmem:[%s25615_s4 + $0x830] sm:$0xff]   ;;  %v20309_v4 = vld [vmem:[%s25615_s4 + $0x1f8] sm:$0xff]  }
 0xc57   : > { %18691 = vmatprep.subr.bf16.mxu1 %v20302_v37  ;;  %v20313_v37 = vld [vmem:[%s25615_s4 + $0x1f0] sm:$0xff]  }
 0xc59   : > { %18462 = vmatpush3.bf16.msra.mxu0 %v20303_v35  ;;  %9856 = vmatmul.mubr.bf16.vlgmr.msra.gmra.mxu1 %v7281_v6  ;;  %v7260_v6 = vpack.c.bf16 %v23140_v12, %v23134_v23  ;;  %v20314_v35 = vld [vmem:[%s25615_s4 + $0x860] sm:$0xff]   ;;  %v20317_v12 = vld [vmem:[%s25615_s4 + $0x1e8] sm:$0xff]  }
 0xc5a   : > { %18692 = vmatpush3.bf16.msra.mxu1 %v20304_v57  ;;  %18463 = vmatprep.subr.bf16.mxu0 %v20305_v26  ;;  %v20312_v26 = vld [vmem:[%s25615_s4 + $0x828] sm:$0xff]   ;;  %v25617_v57 = vpack.c.bf16 %v23125_v49, %v23120_v32  ;;  %v20316_v23 = vld [vmem:[%s25615_s4 + $0x820] sm:$0xff]   ;;  %v20318_v32 = vld [vmem:[%s25615_s4 + $0x858] sm:$0xff]  }
 0xc5b   : > { %18693 = vmatprep.subr.bf16.mxu1 %v20306_v52  ;;  %10199 = vmatprep.mubr.bf16.mxu1 %v7286_v56  ;;  %v20315_v52 = vld [vmem:[%s25615_s4 + $0x1b0] sm:$0xff]   ;;  %v20319_v49 = vld [vmem:[%s25615_s4 + $0x1a8] sm:$0xff]   ;;  %v20320_v56 = vld [vmem:[%s25615_s4 + $0x818] sm:$0xff]  }
 0xc5d   : > { %18464 = vmatpush3.bf16.msra.mxu0 %v20307_v30  ;;  %v20321_v30 = vld [vmem:[%s25615_s4 + $0x1e0] sm:$0xff]  }
 0xc5e   : > { %18694 = vmatpush3.bf16.msra.mxu1 %v20308_v11  ;;  %18493 = vmatprep.subr.bf16.mxu0 %v20309_v4  ;;  %v20322_v11 = vld [vmem:[%s25615_s4 + $0x850] sm:$0xff]   ;;  %v20323_v4 = vld [vmem:[%s25615_s4 + $0x1a0] sm:$0xff]  }
 0xc5f   : > { %18695 = vmatprep.subr.bf16.mxu1 %v20310_v59  ;;  %v20324_v59 = vld [vmem:[%s25615_s4 + $0x810] sm:$0xff]  }
 0xc60   : > { %8347 = vmatmul.mubr.bf16.vlgmr.msra.gmra.mxu0 %v25617_v57  ;;  %v20330_v57 = vld [vmem:[%s25615_s4 + $0x840] sm:$0xff]  }
 0xc61   : > { %18494 = vmatpush3.bf16.msra.mxu0 %v20311_v42  ;;  %8653 = vmatprep.mubr.bf16.mxu0 %v7260_v6  ;;  %v20325_v42 = vld [vmem:[%s25615_s4 + $0x1d8] sm:$0xff]   ;;  %v20328_v6 = vld [vmem:[%s25615_s4 + $0x808] sm:$0xff]  }
 0xc62   : > { %18696 = vmatpush3.bf16.msra.mxu1 %v20312_v26  ;;  %18495 = vmatprep.subr.bf16.mxu0 %v20313_v37  ;;  %v20326_v26 = vld [vmem:[%s25615_s4 + $0x848] sm:$0xff]   ;;  %v20327_v37 = vld [vmem:[%s25615_s4 + $0x198] sm:$0xff]  }
 0xc63   : > { %18697 = vmatprep.subr.bf16.mxu1 %v20314_v35  ;;  %v20329_v35 = vld [vmem:[%s25615_s4 + $0x1d0] sm:$0xff]  }
 0xc65   : > { %18496 = vmatpush3.bf16.msra.mxu0 %v20315_v52  ;;  %v20331_v52 = vld [vmem:[%s25615_s4 + $0x190] sm:$0xff]  }
 0xc66   : > { %18698 = vmatpush3.bf16.msra.mxu1 %v20316_v23  ;;  %18497 = vmatprep.subr.bf16.mxu0 %v20317_v12  ;;  %v20332_v23 = vld [vmem:[%s25615_s4 + $0x800] sm:$0xff]   ;;  %v20333_v12 = vld [vmem:[%s25615_s4 + $0x1c8] sm:$0xff]  }
 0xc67   : > { %18699 = vmatprep.subr.bf16.mxu1 %v20318_v32  ;;  %v20334_v32 = vld [vmem:[%s25615_s4 + $0x978] sm:$0xff]  }
 0xc69   : > { %18498 = vmatpush3.bf16.msra.mxu0 %v20319_v49  ;;  %v7285_v49 = vpack.c.bf16 %v23492_v16, %v23474_v48  ;;  %v20338_v48 = vld [vmem:[%s25615_s4 + $0x970] sm:$0xff]   ;;  %v7290_v16 = vpack.c.bf16 %v23568_v60, %v23552_v45  ;;  %v20342_v45 = vld [vmem:[%s25615_s4 + $0x968] sm:$0xff]   ;;  %v7272_v60 = vpack.c.bf16 %v23261_v2, %v23243_v54  ;;  %v20346_v54 = vld [vmem:[%s25615_s4 + $0x960] sm:$0xff]   ;;  %v25618_v2 = vpack.c.bf16 %v23136_v55, %v23132_v17 }
 0xc6a   : > { %18700 = vmatpush3.bf16.msra.mxu1 %v20320_v56  ;;  %18499 = vmatprep.subr.bf16.mxu0 %v20321_v30  ;;  %v20335_v56 = vld [vmem:[%s25615_s4 + $0x188] sm:$0xff]   ;;  %v20336_v30 = vld [vmem:[%s25615_s4 + $0x938] sm:$0xff]  }
 0xc6b   : > { %18701 = vmatprep.subr.bf16.mxu1 %v20322_v11  ;;  %v20337_v11 = vld [vmem:[%s25615_s4 + $0x1c0] sm:$0xff]   ;;  %v20350_v55 = vld [vmem:[%s25615_s4 + $0x958] sm:$0xff]  }
 0xc6d   : > { %18500 = vmatpush3.bf16.msra.mxu0 %v20323_v4  ;;  %v20339_v4 = vld [vmem:[%s25615_s4 + $0x180] sm:$0xff]  }
 0xc6e   : > { %18702 = vmatpush3.bf16.msra.mxu1 %v20324_v59  ;;  %18501 = vmatprep.subr.bf16.mxu0 %v20325_v42  ;;  %v20340_v59 = vld [vmem:[%s25615_s4 + $0x930] sm:$0xff]   ;;  %v20341_v42 = vld [vmem:[%s25615_s4 + $0x4f8] sm:$0xff]  }
 0xc6f   : > { %18703 = vmatprep.subr.bf16.mxu1 %v20326_v26  ;;  %v20343_v26 = vld [vmem:[%s25615_s4 + $0x4b8] sm:$0xff]  }
 0xc71   : > { %18502 = vmatpush3.bf16.msra.mxu0 %v20327_v37  ;;  %v20344_v37 = vld [vmem:[%s25615_s4 + $0x928] sm:$0xff]  }
 0xc72   : > { %18704 = vmatpush3.bf16.msra.mxu1 %v20328_v6  ;;  %18503 = vmatprep.subr.bf16.mxu0 %v20329_v35  ;;  %v20345_v6 = vld [vmem:[%s25615_s4 + $0x4f0] sm:$0xff]  }
 0xc73   : > { %18705 = vmatprep.subr.bf16.mxu1 %v20330_v57  ;;  %v20347_v57 = vld [vmem:[%s25615_s4 + $0x4b0] sm:$0xff]  }
 0xc75   : > { %18504 = vmatpush3.bf16.msra.mxu0 %v20331_v52 }
 0xc76   : > { %18706 = vmatpush3.bf16.msra.mxu1 %v20332_v23  ;;  %18505 = vmatprep.subr.bf16.mxu0 %v20333_v12  ;;  %v20348_v23 = vld [vmem:[%s25615_s4 + $0x920] sm:$0xff]   ;;  %v20349_v12 = vld [vmem:[%s25615_s4 + $0x4e8] sm:$0xff]  }
 0xc77   : > { %18735 = vmatprep.subr.bf16.mxu1 %v20334_v32  ;;  %v23907_v32 = vpop.f32.mrf.mxu1 }
 0xc79   : > { %10200 = vmatmul.mubr.bf16.vlgmr.msra.gmra.mxu1 %v7285_v49  ;;  %18506 = vmatpush3.bf16.msra.mxu0 %v20335_v56  ;;  %v20351_v49 = vld [vmem:[%s25615_s4 + $0x4a8] sm:$0xff]   ;;  %v20352_v56 = vld [vmem:[%s25615_s4 + $0x918] sm:$0xff]  }
 0xc7a   : > { %18736 = vmatpush3.bf16.msra.mxu1 %v20336_v30  ;;  %18507 = vmatprep.subr.bf16.mxu0 %v20337_v11  ;;  %v20353_v30 = vld [vmem:[%s25615_s4 + $0x4e0] sm:$0xff]   ;;  %v20354_v11 = vld [vmem:[%s25615_s4 + $0x950] sm:$0xff]  }
 0xc7b   : > { %18737 = vmatprep.subr.bf16.mxu1 %v20338_v48  ;;  %10543 = vmatprep.mubr.bf16.mxu1 %v7290_v16  ;;  %v23921_v48 = vpop.f32.mrf.mxu1  ;;  %v20355_v16 = vld [vmem:[%s25615_s4 + $0x4a0] sm:$0xff]  }
 0xc7d   : > { %18508 = vmatpush3.bf16.msra.mxu0 %v20339_v4  ;;  %v20356_v4 = vld [vmem:[%s25615_s4 + $0x910] sm:$0xff]  }
 0xc7e   : > { %18738 = vmatpush3.bf16.msra.mxu1 %v20340_v59  ;;  %18537 = vmatprep.subr.bf16.mxu0 %v20341_v42  ;;  %v20357_v59 = vld [vmem:[%s25615_s4 + $0x4d8] sm:$0xff]   ;;  %v20358_v42 = vld [vmem:[%s25615_s4 + $0x948] sm:$0xff]  }
 0xc7f   : > { %18739 = vmatprep.subr.bf16.mxu1 %v20342_v45  ;;  %v23935_v45 = vpop.f32.mrf.mxu1 }
 0xc80   : > { %8654 = vmatmul.mubr.bf16.vlgmr.msra.gmra.mxu0 %v25618_v2  ;;  %v18355_v35 = vpop.f32.mrf.mxu0  ;;  %v20363_v2 = vld [vmem:[%s25615_s4 + $0x490] sm:$0xff]  }
 0xc81   : > { %18538 = vmatpush3.bf16.msra.mxu0 %v20343_v26  ;;  %8995 = vmatprep.mubr.bf16.mxu0 %v7272_v60  ;;  %v20359_v60 = vld [vmem:[%s25615_s4 + $0x498] sm:$0xff]   ;;  %v20360_v26 = vld [vmem:[%s25615_s4 + $0x908] sm:$0xff]  }
 0xc82   : > { %18740 = vmatpush3.bf16.msra.mxu1 %v20344_v37  ;;  %v18356_v52 = vpop.f32.mrf.mxu0  ;;  %18539 = vmatprep.subr.bf16.mxu0 %v20345_v6  ;;  %v20361_v37 = vld [vmem:[%s25615_s4 + $0x4d0] sm:$0xff]   ;;  %v20362_v6 = vld [vmem:[%s25615_s4 + $0x940] sm:$0xff]  }
 0xc83   : > { %v23902_v17 = vadd.f32 %v18356_v52, %v18355_v35  ;;  %18741 = vmatprep.subr.bf16.mxu1 %v20346_v54  ;;  %v23949_v54 = vpop.f32.mrf.mxu1  ;;  %v20364_v35 = vld [vmem:[%s25615_s4 + $0x900] sm:$0xff]   ;;  %v20366_v52 = vld [vmem:[%s25615_s4 + $0xa78] sm:$0xff]  }
 0xc85   : > { %18540 = vmatpush3.bf16.msra.mxu0 %v20347_v57  ;;  %v20365_v57 = vld [vmem:[%s25615_s4 + $0x4c8] sm:$0xff]  }
 0xc86   : > { %18742 = vmatpush3.bf16.msra.mxu1 %v20348_v23  ;;  %18541 = vmatprep.subr.bf16.mxu0 %v20349_v12  ;;  %v23963_v23 = vpop.f32.mrf.mxu1  ;;  %v7289_v12 = vpack.c.bf16 %v23563_v9, %v23547_v47  ;;  %v20370_v47 = vld [vmem:[%s25615_s4 + $0xa70] sm:$0xff]  }
 0xc87   : > { %18743 = vmatprep.subr.bf16.mxu1 %v20350_v55  ;;  %v20367_v55 = vld [vmem:[%s25615_s4 + $0x488] sm:$0xff]  }
 0xc89   : > { %18542 = vmatpush3.bf16.msra.mxu0 %v20351_v49  ;;  %v20368_v49 = vld [vmem:[%s25615_s4 + $0xa38] sm:$0xff]  }
 0xc8a   : > { %18744 = vmatpush3.bf16.msra.mxu1 %v20352_v56  ;;  %18543 = vmatprep.subr.bf16.mxu0 %v20353_v30  ;;  %v20369_v56 = vld [vmem:[%s25615_s4 + $0x4c0] sm:$0xff]   ;;  %v7294_v30 = vpack.c.bf16 %v23638_v43, %v23622_v21  ;;  %v20373_v21 = vld [vmem:[%s25615_s4 + $0x5f8] sm:$0xff]  }
 0xc8b   : > { %18745 = vmatprep.subr.bf16.mxu1 %v20354_v11  ;;  %v20371_v11 = vld [vmem:[%s25615_s4 + $0x480] sm:$0xff]  }
 0xc8d   : > { %18544 = vmatpush3.bf16.msra.mxu0 %v20355_v16  ;;  %v18358_v16 = vpop.f32.mrf.mxu0 }
 0xc8e   : > { %18746 = vmatpush3.bf16.msra.mxu1 %v20356_v4  ;;  %18545 = vmatprep.subr.bf16.mxu0 %v20357_v59  ;;  %v20372_v4 = vld [vmem:[%s25615_s4 + $0xa30] sm:$0xff]   ;;  %v20374_v59 = vld [vmem:[%s25615_s4 + $0xa68] sm:$0xff]  }
 0xc8f   : > { %18747 = vmatprep.subr.bf16.mxu1 %v20358_v42 }
 0xc91   : > { %18546 = vmatpush3.bf16.msra.mxu0 %v20359_v60  ;;  %v7276_v60 = vpack.c.bf16 %v23325_v46, %v23305_v50  ;;  %v20378_v50 = vld [vmem:[%s25615_s4 + $0xa60] sm:$0xff]  }
 0xc92   : > { %18748 = vmatpush3.bf16.msra.mxu1 %v20360_v26  ;;  %18547 = vmatprep.subr.bf16.mxu0 %v20361_v37  ;;  %v20375_v26 = vld [vmem:[%s25615_s4 + $0x5b8] sm:$0xff]   ;;  %v18359_v37 = vpop.f32.mrf.mxu0 }
 0xc93   : > { %18749 = vmatprep.subr.bf16.mxu1 %v20362_v6  ;;  %v20376_v6 = vld [vmem:[%s25615_s4 + $0xa28] sm:$0xff]  }
 0xc95   : > { %18548 = vmatpush3.bf16.msra.mxu0 %v20363_v2  ;;  %v20377_v2 = vld [vmem:[%s25615_s4 + $0x5f0] sm:$0xff]  }
 0xc96   : > { %18750 = vmatpush3.bf16.msra.mxu1 %v20364_v35  ;;  %18549 = vmatprep.subr.bf16.mxu0 %v20365_v57  ;;  %v25620_v35 = vpack.c.bf16 %v23257_v44, %v23236_v31  ;;  %v20379_v57 = vld [vmem:[%s25615_s4 + $0x5b0] sm:$0xff]   ;;  %v20382_v31 = vld [vmem:[%s25615_s4 + $0xa58] sm:$0xff]  }
 0xc97   : > { %18779 = vmatprep.subr.bf16.mxu1 %v20366_v52 }
 0xc98   : > { %v18487_v9 = vpop.f32.mrf.mxu1 }
 0xc99   : > { %10544 = vmatmul.mubr.bf16.vlgmr.msra.gmra.mxu1 %v7289_v12  ;;  %18550 = vmatpush3.bf16.msra.mxu0 %v20367_v55  ;;  %v20380_v12 = vld [vmem:[%s25615_s4 + $0xa20] sm:$0xff]   ;;  %v20381_v55 = vld [vmem:[%s25615_s4 + $0x5e8] sm:$0xff]  }
 0xc9a   : > { %18780 = vmatpush3.bf16.msra.mxu1 %v20368_v49  ;;  %18551 = vmatprep.subr.bf16.mxu0 %v20369_v56  ;;  %v18488_v43 = vpop.f32.mrf.mxu1 }
 0xc9b   : > { %18781 = vmatprep.subr.bf16.mxu1 %v20370_v47  ;;  %v23993_v42 = vadd.f32 %v18488_v43, %v18487_v9  ;;  %10887 = vmatprep.mubr.bf16.mxu1 %v7294_v30  ;;  %v20383_v30 = vld [vmem:[%s25615_s4 + $0x5a8] sm:$0xff]   ;;  %v20384_v9 = vld [vmem:[%s25615_s4 + $0xa18] sm:$0xff]  }
 0xc9d   : > { %25619 = vst [vmem:[#allocation10_spill] sm:$0xff] %v23993_v42  ;;  %18552 = vmatpush3.bf16.msra.mxu0 %v20371_v11  ;;  %v20385_v11 = vld [vmem:[%s25615_s4 + $0x5e0] sm:$0xff]  }
 0xc9e   : > { %18782 = vmatpush3.bf16.msra.mxu1 %v20372_v4  ;;  %18581 = vmatprep.subr.bf16.mxu0 %v20373_v21  ;;  %v18360_v4 = vadd.f32 %v18359_v37, %v18358_v16  ;;  %v20389_v16 = vld [vmem:[%s25615_s4 + $0x5d8] sm:$0xff]  }
 0xc9f   : > { %18783 = vmatprep.subr.bf16.mxu1 %v20374_v59  ;;  %v20387_v59 = vld [vmem:[%s25615_s4 + $0x5a0] sm:$0xff]   ;;  %v20391_v37 = vld [vmem:[%s25615_s4 + $0x598] sm:$0xff]  }
 0xca0   : > { %v18377_v46 = vpop.f32.mrf.mxu0  ;;  %8996 = vmatmul.mubr.bf16.vlgmr.msra.gmra.mxu0 %v25620_v35  ;;  %v20396_v35 = vld [vmem:[%s25615_s4 + $0xa00] sm:$0xff]  }
 0xca1   : > { %18582 = vmatpush3.bf16.msra.mxu0 %v20375_v26  ;;  %9339 = vmatprep.mubr.bf16.mxu0 %v7276_v60  ;;  %v20388_v60 = vld [vmem:[%s25615_s4 + $0xa10] sm:$0xff]   ;;  %v20390_v26 = vld [vmem:[%s25615_s4 + $0xa48] sm:$0xff]  }
 0xca2   : > { %18784 = vmatpush3.bf16.msra.mxu1 %v20376_v6  ;;  %v18378_v52 = vpop.f32.mrf.mxu0  ;;  %18583 = vmatprep.subr.bf16.mxu0 %v20377_v2  ;;  %v20392_v6 = vld [vmem:[%s25615_s4 + $0xa08] sm:$0xff]   ;;  %v20393_v2 = vld [vmem:[%s25615_s4 + $0x5d0] sm:$0xff]  }
 0xca3   : > { %v18379_v49 = vadd.f32 %v18378_v52, %v18377_v46  ;;  %18785 = vmatprep.subr.bf16.mxu1 %v20378_v50  ;;  %v20394_v50 = vld [vmem:[%s25615_s4 + $0xa40] sm:$0xff]   ;;  %v20395_v46 = vld [vmem:[%s25615_s4 + $0x590] sm:$0xff]   ;;  %v20398_v52 = vld [vmem:[%s25615_s4 + $0xb78] sm:$0xff]  }
 0xca4   : > { %v18380_v44 = vpop.f32.mrf.mxu0 }
 0xca5   : > { %v24025_v56 = vadd.f32 %v18379_v49, %v23902_v17  ;;  %18584 = vmatpush3.bf16.msra.mxu0 %v20379_v57  ;;  %v20386_v17 = vld [vmem:[%s25615_s4 + $0xa50] sm:$0xff]   ;;  %v20397_v57 = vld [vmem:[%s25615_s4 + $0x5c8] sm:$0xff]   ;;  %v20400_v49 = vld [vmem:[%s25615_s4 + $0xb38] sm:$0xff]  }
 0xca6   : > { %18786 = vmatpush3.bf16.msra.mxu1 %v20380_v12  ;;  %v18381_v47 = vpop.f32.mrf.mxu0  ;;  %18585 = vmatprep.subr.bf16.mxu0 %v20381_v55  ;;  %v7293_v12 = vpack.c.bf16 %v23633_v61, %v23615_v63  ;;  %v20399_v55 = vld [vmem:[%s25615_s4 + $0x588] sm:$0xff]   ;;  %v20402_v61 = vld [vmem:[%s25615_s4 + $0xb70] sm:$0xff]   ;;  %v20403_v63 = vld [vmem:[%s25615_s4 + $0x580] sm:$0xff]  }
 0xca7   : > { %v18382_v21 = vadd.f32 %v18381_v47, %v18380_v44  ;;  %18787 = vmatprep.subr.bf16.mxu1 %v20382_v31  ;;  %v20401_v31 = vld [vmem:[%s25615_s4 + $0x5c0] sm:$0xff]   ;;  %v7298_v44 = vpack.c.bf16 %v23709_v41, %v23693_v38  ;;  %v20405_v41 = vld [vmem:[%s25615_s4 + $0x6f8] sm:$0xff]   ;;  %v20406_v38 = vld [vmem:[%s25615_s4 + $0xb68] sm:$0xff]   ;;  %v7280_v47 = vpack.c.bf16 %v23395_v7, %v23377_v28 }
 0xca8   : > { %v20410_v28 = vld [vmem:[%s25615_s4 + $0xb60] sm:$0xff]  }
 0xca9   : > { %v24039_v43 = vadd.f32 %v18382_v21, %v18360_v4  ;;  %18586 = vmatpush3.bf16.msra.mxu0 %v20383_v30  ;;  %v20404_v30 = vld [vmem:[%s25615_s4 + $0xb30] sm:$0xff]   ;;  %v25621_v21 = vpack.c.bf16 %v23319_v33, %v23303_v27  ;;  %v20414_v27 = vld [vmem:[%s25615_s4 + $0xb58] sm:$0xff]   ;;  %v20415_v33 = vld [vmem:[%s25615_s4 + $0x6a8] sm:$0xff]  }
 0xcaa   : > { %18788 = vmatpush3.bf16.msra.mxu1 %v20384_v9  ;;  %18587 = vmatprep.subr.bf16.mxu0 %v20385_v11  ;;  %v20407_v9 = vld [vmem:[%s25615_s4 + $0x6b8] sm:$0xff]   ;;  %v20408_v11 = vld [vmem:[%s25615_s4 + $0xb28] sm:$0xff]   ;;  %v20409_v4 = vld [vmem:[%s25615_s4 + $0x6f0] sm:$0xff]  }
 0xcab   : > { %18789 = vmatprep.subr.bf16.mxu1 %v20386_v17  ;;  %v20411_v17 = vld [vmem:[%s25615_s4 + $0x6b0] sm:$0xff]  }
 0xcad   : > { %18588 = vmatpush3.bf16.msra.mxu0 %v20387_v59 }
 0xcae   : > { %18790 = vmatpush3.bf16.msra.mxu1 %v20388_v60  ;;  %18589 = vmatprep.subr.bf16.mxu0 %v20389_v16  ;;  %v20412_v60 = vld [vmem:[%s25615_s4 + $0xb20] sm:$0xff]   ;;  %v20413_v16 = vld [vmem:[%s25615_s4 + $0x6e8] sm:$0xff]  }
 0xcaf   : > { %18791 = vmatprep.subr.bf16.mxu1 %v20390_v26 }
 0xcb1   : > { %18590 = vmatpush3.bf16.msra.mxu0 %v20391_v37  ;;  %v20416_v37 = vld [vmem:[%s25615_s4 + $0xb18] sm:$0xff]  }
 0xcb2   : > { %18792 = vmatpush3.bf16.msra.mxu1 %v20392_v6  ;;  %18591 = vmatprep.subr.bf16.mxu0 %v20393_v2  ;;  %v20417_v6 = vld [vmem:[%s25615_s4 + $0x6e0] sm:$0xff]   ;;  %v20418_v2 = vld [vmem:[%s25615_s4 + $0xb50] sm:$0xff]  }
 0xcb3   : > { %18793 = vmatprep.subr.bf16.mxu1 %v20394_v50  ;;  %v20419_v50 = vld [vmem:[%s25615_s4 + $0x6a0] sm:$0xff]  }
 0xcb5   : > { %18592 = vmatpush3.bf16.msra.mxu0 %v20395_v46  ;;  %v20420_v46 = vld [vmem:[%s25615_s4 + $0xb10] sm:$0xff]  }
 0xcb6   : > { %18794 = vmatpush3.bf16.msra.mxu1 %v20396_v35  ;;  %18593 = vmatprep.subr.bf16.mxu0 %v20397_v57  ;;  %v20421_v35 = vld [vmem:[%s25615_s4 + $0x6d8] sm:$0xff]   ;;  %v20422_v57 = vld [vmem:[%s25615_s4 + $0xb48] sm:$0xff]  }
 0xcb7   : > { %18823 = vmatprep.subr.bf16.mxu1 %v20398_v52  ;;  %v20423_v52 = vld [vmem:[%s25615_s4 + $0x698] sm:$0xff]  }
 0xcb9   : > { %10888 = vmatmul.mubr.bf16.vlgmr.msra.gmra.mxu1 %v7293_v12  ;;  %18594 = vmatpush3.bf16.msra.mxu0 %v20399_v55  ;;  %v20424_v12 = vld [vmem:[%s25615_s4 + $0xb08] sm:$0xff]   ;;  %v20425_v55 = vld [vmem:[%s25615_s4 + $0x6d0] sm:$0xff]  }
 0xcba   : > { %18824 = vmatpush3.bf16.msra.mxu1 %v20400_v49  ;;  %18595 = vmatprep.subr.bf16.mxu0 %v20401_v31  ;;  %v20426_v49 = vld [vmem:[%s25615_s4 + $0xb40] sm:$0xff]   ;;  %v20427_v31 = vld [vmem:[%s25615_s4 + $0x690] sm:$0xff]  }
 0xcbb   : > { %18825 = vmatprep.subr.bf16.mxu1 %v20402_v61  ;;  %11231 = vmatprep.mubr.bf16.mxu1 %v7298_v44  ;;  %v20428_v44 = vld [vmem:[%s25615_s4 + $0xb00] sm:$0xff]   ;;  %v20429_v61 = vld [vmem:[%s25615_s4 + $0x6c8] sm:$0xff]  }
 0xcbd   : > { %18596 = vmatpush3.bf16.msra.mxu0 %v20403_v63  ;;  %v20430_v63 = vld [vmem:[%s25615_s4 + $0xc78] sm:$0xff]  }
 0xcbe   : > { %18826 = vmatpush3.bf16.msra.mxu1 %v20404_v30  ;;  %18625 = vmatprep.subr.bf16.mxu0 %v20405_v41  ;;  %v7297_v30 = vpack.c.bf16 %v23704_v20, %v23688_v24  ;;  %v20431_v41 = vld [vmem:[%s25615_s4 + $0x688] sm:$0xff]   ;;  %v20434_v24 = vld [vmem:[%s25615_s4 + $0xc70] sm:$0xff]   ;;  %v20435_v20 = vld [vmem:[%s25615_s4 + $0x680] sm:$0xff]  }
 0xcbf   : > { %18827 = vmatprep.subr.bf16.mxu1 %v20406_v38  ;;  %v20432_v38 = vld [vmem:[%s25615_s4 + $0xc38] sm:$0xff]  }
 0xcc0   : > { %v18399_v7 = vpop.f32.mrf.mxu0  ;;  %9340 = vmatmul.mubr.bf16.vlgmr.msra.gmra.mxu0 %v25621_v21  ;;  %v20440_v21 = vld [vmem:[%s25615_s4 + $0xc28] sm:$0xff]  }
 0xcc1   : > { %18626 = vmatpush3.bf16.msra.mxu0 %v20407_v9  ;;  %9683 = vmatprep.mubr.bf16.mxu0 %v7280_v47  ;;  %v20433_v47 = vld [vmem:[%s25615_s4 + $0x6c0] sm:$0xff]   ;;  %v7302_v9 = vpack.c.bf16 %v23963_v23, %v23935_v45  ;;  %v20437_v45 = vld [vmem:[%s25615_s4 + $0x7f8] sm:$0xff]   ;;  %v20438_v23 = vld [vmem:[%s25615_s4 + $0xc68] sm:$0xff]  }
 0xcc2   : > { %18828 = vmatpush3.bf16.msra.mxu1 %v20408_v11  ;;  %v18400_v59 = vpop.f32.mrf.mxu0  ;;  %18627 = vmatprep.subr.bf16.mxu0 %v20409_v4  ;;  %v20436_v4 = vld [vmem:[%s25615_s4 + $0xc30] sm:$0xff]  }
 0xcc3   : > { %v24131_v26 = vadd.f32 %v18400_v59, %v18399_v7  ;;  %18829 = vmatprep.subr.bf16.mxu1 %v20410_v28  ;;  %v20439_v28 = vld [vmem:[%s25615_s4 + $0x7b8] sm:$0xff]   ;;  %v7284_v59 = vpack.c.bf16 %v23461_v53, %v23443_v10  ;;  %v20444_v10 = vld [vmem:[%s25615_s4 + $0xc20] sm:$0xff]   ;;  %v20445_v53 = vld [vmem:[%s25615_s4 + $0x7e8] sm:$0xff]  }
 0xcc4   : > { %v18402_v11 = vpop.f32.mrf.mxu0 }
 0xcc5   : > { %18628 = vmatpush3.bf16.msra.mxu0 %v20411_v17  ;;  %v20441_v17 = vld [vmem:[%s25615_s4 + $0x7f0] sm:$0xff]  }
 0xcc6   : > { %18830 = vmatpush3.bf16.msra.mxu1 %v20412_v60  ;;  %18629 = vmatprep.subr.bf16.mxu0 %v20413_v16  ;;  %v18403_v7 = vpop.f32.mrf.mxu0  ;;  %v20442_v60 = vld [vmem:[%s25615_s4 + $0xc60] sm:$0xff]  }
 0xcc7   : > { %18831 = vmatprep.subr.bf16.mxu1 %v20414_v27  ;;  %v25622_v27 = vpack.c.bf16 %v23388_v39, %v23370_v15  ;;  %v20446_v15 = vld [vmem:[%s25615_s4 + $0xc58] sm:$0xff]  }
 0xcc9   : > { %18630 = vmatpush3.bf16.msra.mxu0 %v20415_v33  ;;  %v20443_v33 = vld [vmem:[%s25615_s4 + $0x7b0] sm:$0xff]  }
 0xcca   : > { %18832 = vmatpush3.bf16.msra.mxu1 %v20416_v37  ;;  %18631 = vmatprep.subr.bf16.mxu0 %v20417_v6 }
 0xccb   : > { %18833 = vmatprep.subr.bf16.mxu1 %v20418_v2 }
 0xccd   : > { %18632 = vmatpush3.bf16.msra.mxu0 %v20419_v50  ;;  %v20447_v50 = vld [vmem:[%s25615_s4 + $0x7a8] sm:$0xff]  }
 0xcce   : > { %18834 = vmatpush3.bf16.msra.mxu1 %v20420_v46  ;;  %18633 = vmatprep.subr.bf16.mxu0 %v20421_v35  ;;  %v20448_v35 = vld [vmem:[%s25615_s4 + $0xc18] sm:$0xff]  }
 0xccf   : > { %18835 = vmatprep.subr.bf16.mxu1 %v20422_v57  ;;  %v20449_v57 = vld [vmem:[%s25615_s4 + $0x7e0] sm:$0xff]  }
 0xcd1   : > { %18634 = vmatpush3.bf16.msra.mxu0 %v20423_v52  ;;  %v18404_v52 = vadd.f32 %v18403_v7, %v18402_v11  ;;  %v20462_v11 = vld [vmem:[%s25615_s4 + $0x788] sm:$0xff]  }
 0xcd2   : > { %18836 = vmatpush3.bf16.msra.mxu1 %v20424_v12  ;;  %18635 = vmatprep.subr.bf16.mxu0 %v20425_v55 }
 0xcd3   : > { %18837 = vmatprep.subr.bf16.mxu1 %v20426_v49  ;;  %v20451_v49 = vld [vmem:[%s25615_s4 + $0x7a0] sm:$0xff]  }
 0xcd5   : > { %18636 = vmatpush3.bf16.msra.mxu0 %v20427_v31  ;;  %v20452_v31 = vld [vmem:[%s25615_s4 + $0xc10] sm:$0xff]  }
 0xcd6   : > { %18838 = vmatpush3.bf16.msra.mxu1 %v20428_v44  ;;  %18637 = vmatprep.subr.bf16.mxu0 %v20429_v61  ;;  %v20453_v44 = vld [vmem:[%s25615_s4 + $0x7d8] sm:$0xff]   ;;  %v20454_v61 = vld [vmem:[%s25615_s4 + $0xc48] sm:$0xff]  }
 0xcd7   : > { %18867 = vmatprep.subr.bf16.mxu1 %v20430_v63  ;;  %v20455_v63 = vld [vmem:[%s25615_s4 + $0x798] sm:$0xff]  }
 0xcd9   : > { %11232 = vmatmul.mubr.bf16.vlgmr.msra.gmra.mxu1 %v7297_v30  ;;  %18638 = vmatpush3.bf16.msra.mxu0 %v20431_v41  ;;  %v20456_v30 = vld [vmem:[%s25615_s4 + $0xc08] sm:$0xff]   ;;  %v20457_v41 = vld [vmem:[%s25615_s4 + $0x7d0] sm:$0xff]  }
 0xcda   : > { %18868 = vmatpush3.bf16.msra.mxu1 %v20432_v38  ;;  %18639 = vmatprep.subr.bf16.mxu0 %v20433_v47  ;;  %v20458_v38 = vld [vmem:[%s25615_s4 + $0xc40] sm:$0xff]   ;;  %v20459_v47 = vld [vmem:[%s25615_s4 + $0x790] sm:$0xff]  }
 0xcdb   : > { %18869 = vmatprep.subr.bf16.mxu1 %v20434_v24  ;;  %11575 = vmatprep.mubr.bf16.mxu1 %v7302_v9  ;;  %v20460_v9 = vld [vmem:[%s25615_s4 + $0xc00] sm:$0xff]   ;;  %v20461_v24 = vld [vmem:[%s25615_s4 + $0x7c8] sm:$0xff]  }
 0xcdd   : > { %18640 = vmatpush3.bf16.msra.mxu0 %v20435_v20  ;;  %v7301_v20 = vpack.c.bf16 %v23949_v54, %v23921_v48  ;;  %v20465_v48 = vld [vmem:[%s25615_s4 + $0x8f8] sm:$0xff]  }
 0xcde   : > { %18870 = vmatpush3.bf16.msra.mxu1 %v20436_v4  ;;  %18669 = vmatprep.subr.bf16.mxu0 %v20437_v45  ;;  %v20463_v4 = vld [vmem:[%s25615_s4 + $0x7c0] sm:$0xff]   ;;  %v20466_v54 = vld [vmem:[%s25615_s4 + $0x8b8] sm:$0xff]  }
 0xcdf   : > { %18871 = vmatprep.subr.bf16.mxu1 %v20438_v23  ;;  %v20464_v45 = vld [vmem:[%s25615_s4 + $0x780] sm:$0xff]   ;;  %v20467_v23 = vld [vmem:[%s25615_s4 + $0x8f0] sm:$0xff]  }
 0xce0   : > { %v18421_v16 = vpop.f32.mrf.mxu0  ;;  %9684 = vmatmul.mubr.bf16.vlgmr.msra.gmra.mxu0 %v25622_v27  ;;  %v20474_v27 = vld [vmem:[%s25615_s4 + $0x898] sm:$0xff]  }
 0xce1   : > { %18670 = vmatpush3.bf16.msra.mxu0 %v20439_v28  ;;  %10027 = vmatprep.mubr.bf16.mxu0 %v7284_v59  ;;  %v7288_v28 = vpack.c.bf16 %v23536_v8, %v23518_v1  ;;  %v20470_v1 = vld [vmem:[%s25615_s4 + $0x8a8] sm:$0xff]   ;;  %v20473_v8 = vld [vmem:[%s25615_s4 + $0x8d8] sm:$0xff]  }
 0xce2   : > { %18872 = vmatpush3.bf16.msra.mxu1 %v20440_v21  ;;  %v18422_v37 = vpop.f32.mrf.mxu0  ;;  %18671 = vmatprep.subr.bf16.mxu0 %v20441_v17  ;;  %v25623_v21 = vpack.c.bf16 %v23454_v5, %v23438_v3  ;;  %v20468_v17 = vld [vmem:[%s25615_s4 + $0x8b0] sm:$0xff]   ;;  %v20471_v3 = vld [vmem:[%s25615_s4 + $0x8e0] sm:$0xff]  }
 0xce3   : > { %v18423_v6 = vadd.f32 %v18422_v37, %v18421_v16  ;;  %18873 = vmatprep.subr.bf16.mxu1 %v20442_v60  ;;  %v20469_v60 = vld [vmem:[%s25615_s4 + $0x8e8] sm:$0xff]   ;;  %v20472_v5 = vld [vmem:[%s25615_s4 + $0x8a0] sm:$0xff]   ;;  %v20476_v37 = vld [vmem:[%s25615_s4 + $0x890] sm:$0xff]  }
 0xce4   : > { %v18424_v39 = vpop.f32.mrf.mxu0 }
 0xce5   : > { %v24242_v2 = vadd.f32 %v18423_v6, %v24131_v26  ;;  %18672 = vmatpush3.bf16.msra.mxu0 %v20443_v33  ;;  %v20450_v26 = vld [vmem:[%s25615_s4 + $0xc50] sm:$0xff]   ;;  %v20479_v6 = vld [vmem:[%s25615_s4 + $0x8c0] sm:$0xff]  }
 0xce6   : > { %18874 = vmatpush3.bf16.msra.mxu1 %v20444_v10  ;;  %v18425_v46 = vpop.f32.mrf.mxu0  ;;  %18673 = vmatprep.subr.bf16.mxu0 %v20445_v53  ;;  %v20475_v33 = vld [vmem:[%s25615_s4 + $0x8d0] sm:$0xff]   ;;  %v20477_v10 = vld [vmem:[%s25615_s4 + $0x8c8] sm:$0xff]  }
 0xce7   : > { %v18426_v12 = vadd.f32 %v18425_v46, %v18424_v39  ;;  %18875 = vmatprep.subr.bf16.mxu1 %v20446_v15  ;;  %v20478_v53 = vld [vmem:[%s25615_s4 + $0x888] sm:$0xff]   ;;  %v20480_v15 = vld [vmem:[%s25615_s4 + $0x880] sm:$0xff]   ;;  %v20482_v46 = vld [vmem:[%s25615_s4 + $0x9b8] sm:$0xff]  }
 0xce9   : > { %v24256_v55 = vadd.f32 %v18426_v12, %v18404_v52  ;;  %18674 = vmatpush3.bf16.msra.mxu0 %v20447_v50  ;;  %v20481_v50 = vld [vmem:[%s25615_s4 + $0x9f8] sm:$0xff]   ;;  %v7292_v52 = vpack.c.bf16 %v23602_v62, %v23584_v29  ;;  %v20487_v62 = vld [vmem:[%s25615_s4 + $0x9e0] sm:$0xff]  }
 0xcea   : > { %18876 = vmatpush3.bf16.msra.mxu1 %v20448_v35  ;;  %18675 = vmatprep.subr.bf16.mxu0 %v20449_v57  ;;  %v20483_v57 = vld [vmem:[%s25615_s4 + $0x9f0] sm:$0xff]  }
 0xceb   : > { %18877 = vmatprep.subr.bf16.mxu1 %v20450_v26  ;;  %v25624_v26 = vpack.c.bf16 %v23529_v36, %v23510_v18  ;;  %v20486_v18 = vld [vmem:[%s25615_s4 + $0x9a8] sm:$0xff]  }
 0xced   : > { %18676 = vmatpush3.bf16.msra.mxu0 %v20451_v49  ;;  %v20484_v49 = vld [vmem:[%s25615_s4 + $0x9b0] sm:$0xff]  }
 0xcee   : > { %18878 = vmatpush3.bf16.msra.mxu1 %v20452_v31  ;;  %18677 = vmatprep.subr.bf16.mxu0 %v20453_v44  ;;  %v20485_v44 = vld [vmem:[%s25615_s4 + $0x9e8] sm:$0xff]  }
 0xcef   : > { %18879 = vmatprep.subr.bf16.mxu1 %v20454_v61 }
 0xcf1   : > { %18678 = vmatpush3.bf16.msra.mxu0 %v20455_v63 }
 0xcf2   : > { %18880 = vmatpush3.bf16.msra.mxu1 %v20456_v30  ;;  %18679 = vmatprep.subr.bf16.mxu0 %v20457_v41 }
 0xcf3   : > { %18881 = vmatprep.subr.bf16.mxu1 %v20458_v38 }
 0xcf5   : > { %18680 = vmatpush3.bf16.msra.mxu0 %v20459_v47  ;;  %v20488_v47 = vld [vmem:[%s25615_s4 + $0x9a0] sm:$0xff]  }
 0xcf6   : > { %18882 = vmatpush3.bf16.msra.mxu1 %v20460_v9  ;;  %18681 = vmatprep.subr.bf16.mxu0 %v20461_v24  ;;  %v20489_v9 = vld [vmem:[%s25615_s4 + $0x9d8] sm:$0xff]  }
 0xcf7   : > { %19126 = vmatprep.subr.bf16.mxu1 %v25612_v34  ;;  %v20490_v24 = vld [vmem:[%s25615_s4 + $0x998] sm:$0xff]  }
 0xcf9   : > { %11576 = vmatmul.mubr.bf16.vlgmr.msra.gmra.mxu1 %v7301_v20  ;;  %18682 = vmatpush3.bf16.msra.mxu0 %v20462_v11  ;;  %v20491_v20 = vld [vmem:[%s25615_s4 + $0x9d0] sm:$0xff]  }
 0xcfa   : > { %18683 = vmatprep.subr.bf16.mxu0 %v20463_v4  ;;  %19134 = vmatprep.mubr.msk.bf16.mxu1 %vm20740_vm4, %v25612_v34  ;;  %v20492_v11 = vld [vmem:[%s25615_s4 + $0x990] sm:$0xff]   ;;  %v20493_v4 = vld [vmem:[%s25615_s4 + $0x9c8] sm:$0xff]  }
 0xcfd   : > { %18684 = vmatpush3.bf16.msra.mxu0 %v20464_v45  ;;  %v20494_v45 = vld [vmem:[%s25615_s4 + $0x988] sm:$0xff]  }
 0xcfe   : > { %18713 = vmatprep.subr.bf16.mxu0 %v20465_v48  ;;  %v20495_v48 = vld [vmem:[%s25615_s4 + $0x9c0] sm:$0xff]  }
 0xd00   : > { %v18443_v7 = vpop.f32.mrf.mxu0  ;;  %10028 = vmatmul.mubr.bf16.vlgmr.msra.gmra.mxu0 %v25623_v21  ;;  %v7296_v21 = vpack.c.bf16 %v23677_v51, %v23659_v0  ;;  %v20502_v0 = vld [vmem:[%s25615_s4 + $0xaa8] sm:$0xff]   ;;  %v20505_v51 = vld [vmem:[%s25615_s4 + $0xad8] sm:$0xff]  }
 0xd01   : > { %18714 = vmatpush3.bf16.msra.mxu0 %v20466_v54  ;;  %10371 = vmatprep.mubr.bf16.mxu0 %v7288_v28  ;;  %v20496_v54 = vld [vmem:[%s25615_s4 + $0x980] sm:$0xff]   ;;  %v20498_v28 = vld [vmem:[%s25615_s4 + $0xab8] sm:$0xff]  }
 0xd02   : > { %v18444_v59 = vpop.f32.mrf.mxu0  ;;  %18715 = vmatprep.subr.bf16.mxu0 %v20467_v23  ;;  %v20497_v23 = vld [vmem:[%s25615_s4 + $0xaf8] sm:$0xff]  }
 0xd03   : > { %v18445_v16 = vadd.f32 %v18444_v59, %v18443_v7  ;;  %v20499_v7 = vld [vmem:[%s25615_s4 + $0xaf0] sm:$0xff]  }
 0xd04   : > { %v18446_v39 = vpop.f32.mrf.mxu0  ;;  %v20500_v59 = vld [vmem:[%s25615_s4 + $0xab0] sm:$0xff]  }
 0xd05   : > { %18716 = vmatpush3.bf16.msra.mxu0 %v20468_v17  ;;  %v25625_v17 = vpack.c.bf16 %v23595_v19, %v23579_v22  ;;  %v20503_v22 = vld [vmem:[%s25615_s4 + $0xae0] sm:$0xff]  }
 0xd06   : > { %18717 = vmatprep.subr.bf16.mxu0 %v20469_v60  ;;  %v18447_v35 = vpop.f32.mrf.mxu0  ;;  %v20501_v60 = vld [vmem:[%s25615_s4 + $0xae8] sm:$0xff]   ;;  %v20504_v19 = vld [vmem:[%s25615_s4 + $0xaa0] sm:$0xff]  }
 0xd07   : > { %v18448_v30 = vadd.f32 %v18447_v35, %v18446_v39  ;;  %v20521_v35 = vld [vmem:[%s25615_s4 + $0xbd8] sm:$0xff]  }
 0xd09   : > { %18718 = vmatpush3.bf16.msra.mxu0 %v20470_v1  ;;  %v20507_v1 = vld [vmem:[%s25615_s4 + $0xad0] sm:$0xff]  }
 0xd0a   : > { %18719 = vmatprep.subr.bf16.mxu0 %v20471_v3  ;;  %v20508_v3 = vld [vmem:[%s25615_s4 + $0xa90] sm:$0xff]  }
 0xd0d   : > { %18720 = vmatpush3.bf16.msra.mxu0 %v20472_v5  ;;  %v20509_v5 = vld [vmem:[%s25615_s4 + $0xac8] sm:$0xff]  }
 0xd0e   : > { %18721 = vmatprep.subr.bf16.mxu0 %v20473_v8  ;;  %v20510_v8 = vld [vmem:[%s25615_s4 + $0xa88] sm:$0xff]  }
 0xd11   : > { %18722 = vmatpush3.bf16.msra.mxu0 %v20474_v27  ;;  %v20511_v27 = vld [vmem:[%s25615_s4 + $0xac0] sm:$0xff]  }
 0xd12   : > { %18723 = vmatprep.subr.bf16.mxu0 %v20475_v33  ;;  %v20512_v33 = vld [vmem:[%s25615_s4 + $0xa80] sm:$0xff]  }
 0xd15   : > { %18724 = vmatpush3.bf16.msra.mxu0 %v20476_v37  ;;  %v20513_v37 = vld [vmem:[%s25615_s4 + $0xbf8] sm:$0xff]  }
 0xd16   : > { %18725 = vmatprep.subr.bf16.mxu0 %v20477_v10  ;;  %v20514_v10 = vld [vmem:[%s25615_s4 + $0xbb8] sm:$0xff]  }
 0xd19   : > { %18726 = vmatpush3.bf16.msra.mxu0 %v20478_v53  ;;  %v20515_v53 = vld [vmem:[%s25615_s4 + $0xbf0] sm:$0xff]  }
 0xd1a   : > { %18727 = vmatprep.subr.bf16.mxu0 %v20479_v6  ;;  %v7300_v6 = vpack.c.bf16 %v23907_v32, %v23725_v13  ;;  %v20518_v13 = vld [vmem:[%s25615_s4 + $0xba8] sm:$0xff]   ;;  %v20520_v32 = vld [vmem:[%s25615_s4 + $0xba0] sm:$0xff]  }
 0xd1d   : > { %18728 = vmatpush3.bf16.msra.mxu0 %v20480_v15  ;;  %v25626_v15 = vld [vmem:[#allocation7_spill] sm:$0xff] }
 0xd1e   : > { %18757 = vmatprep.subr.bf16.mxu0 %v20481_v50  ;;  %v25627_v39 = vpack.c.bf16 %v23670_v25, %v25626_v15  ;;  %v20516_v50 = vld [vmem:[%s25615_s4 + $0xbb0] sm:$0xff]   ;;  %v20519_v25 = vld [vmem:[%s25615_s4 + $0xbe0] sm:$0xff]  }
 0xd20   : > { %v18465_v12 = vpop.f32.mrf.mxu0  ;;  %10372 = vmatmul.mubr.bf16.vlgmr.msra.gmra.mxu0 %v25624_v26  ;;  %v20525_v26 = vld [vmem:[%s25615_s4 + $0xbc8] sm:$0xff]  }
 0xd21   : > { %18758 = vmatpush3.bf16.msra.mxu0 %v20482_v46  ;;  %10715 = vmatprep.mubr.bf16.mxu0 %v7292_v52  ;;  %v20517_v46 = vld [vmem:[%s25615_s4 + $0xbe8] sm:$0xff]   ;;  %v20523_v52 = vld [vmem:[%s25615_s4 + $0xbd0] sm:$0xff]  }
 0xd22   : > { %v18466_v31 = vpop.f32.mrf.mxu0  ;;  %18759 = vmatprep.subr.bf16.mxu0 %v20483_v57  ;;  %v20522_v57 = vld [vmem:[%s25615_s4 + $0xb98] sm:$0xff]  }
 0xd23   : > { %v18467_v61 = vadd.f32 %v18466_v31, %v18465_v12  ;;  %v20524_v12 = vld [vmem:[%s25615_s4 + $0xb90] sm:$0xff]   ;;  %v20527_v31 = vld [vmem:[%s25615_s4 + $0xbc0] sm:$0xff]  }
 0xd24   : > { %v18468_v63 = vpop.f32.mrf.mxu0 }
 0xd25   : > { %v24378_v29 = vadd.f32 %v18467_v61, %v18445_v16  ;;  %18760 = vmatpush3.bf16.msra.mxu0 %v20484_v49  ;;  %v20506_v16 = vld [vmem:[%s25615_s4 + $0xa98] sm:$0xff]   ;;  %v20526_v49 = vld [vmem:[%s25615_s4 + $0xb88] sm:$0xff]   ;;  %v24527_v61 = vpop.f32.mrf.mxu1 }
 0xd26   : > { %v18469_v36 = vpop.f32.mrf.mxu0  ;;  %18761 = vmatprep.subr.bf16.mxu0 %v20485_v44  ;;  %v20528_v44 = vld [vmem:[%s25615_s4 + $0xb80] sm:$0xff]   ;;  %25628 = vst [vmem:[#allocation11_spill] sm:$0xff] %v24527_v61 }
 0xd27   : > { %v18470_v41 = vadd.f32 %v18469_v36, %v18468_v63  ;;  %v24529_v63 = vpop.f32.mrf.mxu1 }
 0xd28   : > { %25629 = vst [vmem:[#allocation6_spill] sm:$0xff] %v24529_v63 }
 0xd29   : > { %v24386_v38 = vadd.f32 %v18470_v41, %v18448_v30  ;;  %18762 = vmatpush3.bf16.msra.mxu0 %v20486_v18  ;;  %v18531_v18 = vpop.f32.mrf.mxu1 }
 0xd2a   : > { %18763 = vmatprep.subr.bf16.mxu0 %v20487_v62 }
 0xd2b   : > { %v18532_v36 = vpop.f32.mrf.mxu1 }
 0xd2d   : > { %18764 = vmatpush3.bf16.msra.mxu0 %v20488_v47  ;;  %v18534_v62 = vpop.f32.mrf.mxu1 }
 0xd2e   : > { %18765 = vmatprep.subr.bf16.mxu0 %v20489_v9 }
 0xd2f   : > { %v18535_v30 = vpop.f32.mrf.mxu1 }
 0xd31   : > { %18766 = vmatpush3.bf16.msra.mxu0 %v20490_v24  ;;  %v18575_v41 = vpop.f32.mrf.mxu1 }
 0xd32   : > { %18767 = vmatprep.subr.bf16.mxu0 %v20491_v20 }
 0xd33   : > { %v18576_v47 = vpop.f32.mrf.mxu1 }
 0xd35   : > { %18768 = vmatpush3.bf16.msra.mxu0 %v20492_v11  ;;  %v24531_v9 = vpop.f32.mrf.mxu1 }
 0xd36   : > { %18769 = vmatprep.subr.bf16.mxu0 %v20493_v4 }
 0xd37   : > { %v24533_v24 = vpop.f32.mrf.mxu1 }
 0xd39   : > { %18770 = vmatpush3.bf16.msra.mxu0 %v20494_v45 }
 0xd3a   : > { %18771 = vmatprep.subr.bf16.mxu0 %v20495_v48 }
 0xd3d   : > { %18772 = vmatpush3.bf16.msra.mxu0 %v20496_v54 }
 0xd3e   : > { %18801 = vmatprep.subr.bf16.mxu0 %v20497_v23 }
 0xd40   : > { %10716 = vmatmul.mubr.bf16.vlgmr.msra.gmra.mxu0 %v25625_v17  ;;  %v24535_v20 = vpop.f32.mrf.mxu0 }
 0xd41   : > { %18802 = vmatpush3.bf16.msra.mxu0 %v20498_v28  ;;  %11059 = vmatprep.mubr.bf16.mxu0 %v7296_v21  ;;  %25630 = vst [vmem:[#allocation8_spill] sm:$0xff] %v24535_v20 }
 0xd42   : > { %18803 = vmatprep.subr.bf16.mxu0 %v20499_v7  ;;  %v24537_v58 = vpop.f32.mrf.mxu0 }
 0xd43   : > { %25631 = vst [vmem:[#allocation9_spill] sm:$0xff] %v24537_v58 }
 0xd44   : > { %v24539_v11 = vpop.f32.mrf.mxu0 }
 0xd45   : > { %18804 = vmatpush3.bf16.msra.mxu0 %v20500_v59  ;;  %25632 = vst [vmem:[#allocation14_spill] sm:$0xff] %v24539_v11 }
 0xd46   : > { %18805 = vmatprep.subr.bf16.mxu0 %v20501_v60  ;;  %v24541_v45 = vpop.f32.mrf.mxu0 }
 0xd47   : > { %25633 = vst [vmem:[#allocation15_spill] sm:$0xff] %v24541_v45 }
 0xd49   : > { %18806 = vmatpush3.bf16.msra.mxu0 %v20502_v0 }
 0xd4a   : > { %18807 = vmatprep.subr.bf16.mxu0 %v20503_v22 }
 0xd4d   : > { %18808 = vmatpush3.bf16.msra.mxu0 %v20504_v19 }
 0xd4e   : > { %18809 = vmatprep.subr.bf16.mxu0 %v20505_v51 }
 0xd51   : > { %18810 = vmatpush3.bf16.msra.mxu0 %v20506_v16 }
 0xd52   : > { %18811 = vmatprep.subr.bf16.mxu0 %v20507_v1 }
 0xd55   : > { %18812 = vmatpush3.bf16.msra.mxu0 %v20508_v3 }
 0xd56   : > { %18813 = vmatprep.subr.bf16.mxu0 %v20509_v5 }
 0xd59   : > { %18814 = vmatpush3.bf16.msra.mxu0 %v20510_v8 }
 0xd5a   : > { %18815 = vmatprep.subr.bf16.mxu0 %v20511_v27 }
 0xd5d   : > { %18816 = vmatpush3.bf16.msra.mxu0 %v20512_v33 }
 0xd5e   : > { %18845 = vmatprep.subr.bf16.mxu0 %v20513_v37 }
 0xd60   : > { %11060 = vmatmul.mubr.bf16.vlgmr.msra.gmra.mxu0 %v25627_v39  ;;  %v18553_v48 = vpop.f32.mrf.mxu0 }
 0xd61   : > { %18846 = vmatpush3.bf16.msra.mxu0 %v20514_v10  ;;  %11403 = vmatprep.mubr.bf16.mxu0 %v7300_v6 }
 0xd62   : > { %18847 = vmatprep.subr.bf16.mxu0 %v20515_v53  ;;  %v18554_v28 = vpop.f32.mrf.mxu0 }
 0xd64   : > { %v18556_v21 = vpop.f32.mrf.mxu0 }
 0xd65   : > { %18848 = vmatpush3.bf16.msra.mxu0 %v20516_v50 }
 0xd66   : > { %18849 = vmatprep.subr.bf16.mxu0 %v20517_v46  ;;  %v18557_v59 = vpop.f32.mrf.mxu0 }
 0xd69   : > { %18850 = vmatpush3.bf16.msra.mxu0 %v20518_v13 }
 0xd6a   : > { %18851 = vmatprep.subr.bf16.mxu0 %v20519_v25 }
 0xd6d   : > { %18852 = vmatpush3.bf16.msra.mxu0 %v20520_v32 }
 0xd6e   : > { %18853 = vmatprep.subr.bf16.mxu0 %v20521_v35 }
 0xd71   : > { %18854 = vmatpush3.bf16.msra.mxu0 %v20522_v57 }
 0xd72   : > { %18855 = vmatprep.subr.bf16.mxu0 %v20523_v52 }
 0xd75   : > { %18856 = vmatpush3.bf16.msra.mxu0 %v20524_v12 }
 0xd76   : > { %18857 = vmatprep.subr.bf16.mxu0 %v20525_v26 }
 0xd79   : > { %18858 = vmatpush3.bf16.msra.mxu0 %v20526_v49 }
 0xd7a   : > { %18859 = vmatprep.subr.bf16.mxu0 %v20527_v31 }
 0xd7d   : > { %18860 = vmatpush3.bf16.msra.mxu0 %v20528_v44 }
 0xd7e   : > { %19120 = vmatprep.subr.bf16.mxu0 %v25612_v34 }
 0xd80   : > { %11404 = vmatmul.mubr.bf16.vlgmr.msra.gmra.mxu0 %v7299_v14  ;;  %v18619_v14 = vpop.f32.mrf.mxu1  ;;  %v24543_v60 = vpop.f32.mrf.mxu0 }
 0xd81   : > { %19122 = vmatprep.mubr.msk.bf16.mxu0 %vm20740_vm4, %v25612_v34  ;;  %25634 = vst [vmem:[#allocation5_spill] sm:$0xff] %v24543_v60 }
 0xd82   : > { %v18620_v40 = vpop.f32.mrf.mxu1  ;;  %v24545_v19 = vpop.f32.mrf.mxu0 }
 0xd83   : > { %25635 = vst [vmem:[#allocation4_spill] sm:$0xff] %v24545_v19  ;;  %v18621_v45 = vadd.f32 %v18620_v40, %v18619_v14  ;;  %v18555_v19 = vadd.f32 %v18554_v28, %v18553_v48 }
 0xd84   : > { %v18622_v4 = vpop.f32.mrf.mxu1  ;;  %v24547_v16 = vpop.f32.mrf.mxu0 }
 0xd85   : > { %25636 = vst [vmem:[#allocation12_spill] sm:$0xff] %v24547_v16  ;;  %v9004_v14 = vadd.f32 %v18555_v19, %v24242_v2 }
 0xd86   : > { %v18623_v54 = vpop.f32.mrf.mxu1  ;;  %v24549_v3 = vpop.f32.mrf.mxu0 }
 0xd87   : > { %25637 = vst [vmem:[#allocation13_spill] sm:$0xff] %v24549_v3  ;;  %v18624_v42 = vadd.f32 %v18623_v54, %v18622_v4 }
 0xd88   : > { %v18663_v23 = vpop.f32.mrf.mxu1 }
 0xd8a   : > { %v18664_v7 = vpop.f32.mrf.mxu1 }
 0xd8b   : > { %v18665_v20 = vadd.f32 %v18664_v7, %v18663_v23 }
 0xd8c   : > { %v18666_v17 = vpop.f32.mrf.mxu1 }
 0xd8e   : > { %v18667_v0 = vpop.f32.mrf.mxu1 }
 0xd90   : > { %v18707_v22 = vpop.f32.mrf.mxu1 }
 0xd92   : > { %v18708_v51 = vpop.f32.mrf.mxu1 }
 0xd94   : > { %v18710_v1 = vpop.f32.mrf.mxu1 }
 0xd96   : > { %v18711_v8 = vpop.f32.mrf.mxu1 }
 0xd97   : > { %v18712_v48 = vadd.f32 %v18711_v8, %v18710_v1 }
 0xd98   : > { %v18751_v27 = vpop.f32.mrf.mxu1 }
 0xd9a   : > { %v18752_v37 = vpop.f32.mrf.mxu1 }
 0xd9b   : > { %v18753_v54 = vadd.f32 %v18752_v37, %v18751_v27 }
 0xd9c   : > { %v24551_v53 = vpop.f32.mrf.mxu1 }
 0xd9d   : > { %25638 = vst [vmem:[#allocation18_spill] sm:$0xff] %v24551_v53 }
 0xd9e   : > { %v24555_v39 = vpop.f32.mrf.mxu1 }
 0xd9f   : > { %25640 = vst [vmem:[#allocation16_spill] sm:$0xff] %v24555_v39  ;;  %v18709_v39 = vadd.f32 %v18708_v51, %v18707_v22 }
 0xda0   : > { %v18641_v5 = vpop.f32.mrf.mxu0  ;;  %v18795_v50 = vpop.f32.mrf.mxu1 }
 0xda2   : > { %v18642_v33 = vpop.f32.mrf.mxu0  ;;  %v18796_v13 = vpop.f32.mrf.mxu1 }
 0xda3   : > { %v18643_v53 = vadd.f32 %v18642_v33, %v18641_v5  ;;  %v18797_v40 = vadd.f32 %v18796_v13, %v18795_v50 }
 0xda4   : > { %v18644_v10 = vpop.f32.mrf.mxu0  ;;  %v18798_v32 = vpop.f32.mrf.mxu1 }
 0xda5   : > { %v9692_v28 = vadd.f32 %v18643_v53, %v9004_v14  ;;  %v25656_v14 = vld [vmem:[#allocation11_spill] sm:$0xff] }
 0xda6   : > { %v18645_v6 = vpop.f32.mrf.mxu0  ;;  %v18799_v52 = vpop.f32.mrf.mxu1  ;;  %v25646_v51 = vld [vmem:[#allocation16_spill] sm:$0xff] }
 0xda7   : > { %v18646_v7 = vadd.f32 %v18645_v6, %v18644_v10 }
 0xda8   : > { %v18839_v12 = vpop.f32.mrf.mxu1 }
 0xdaa   : > { %v18840_v49 = vpop.f32.mrf.mxu1 }
 0xdac   : > { %v18842_v44 = vpop.f32.mrf.mxu1 }
 0xdae   : > { %v18843_v16 = vpop.f32.mrf.mxu1 }
 0xdaf   : > { %v18844_v37 = vadd.f32 %v18843_v16, %v18842_v44  ;;  %v25653_v16 = vld [vmem:[#allocation15_spill] sm:$0xff] }
 0xdb9   : > { %v18883_v63 = vpop.f32.mrf.mxu1 }
 0xdbb   : > { %v18884_v11 = vpop.f32.mrf.mxu1 }
 0xdbc   : > { %v18885_v22 = vadd.f32 %v18884_v11, %v18883_v63 }
 0xdc0   : > { %v24553_v15 = vpop.f32.mrf.mxu0 }
 0xdc1   : > { %25639 = vst [vmem:[#allocation19_spill] sm:$0xff] %v24553_v15  ;;  %v18577_v15 = vadd.f32 %v18576_v47, %v18575_v41 }
 0xdc2   : > { %v24557_v46 = vpop.f32.mrf.mxu0 }
 0xdc3   : > { %25641 = vst [vmem:[#allocation17_spill] sm:$0xff] %v24557_v46  ;;  %v18533_v46 = vadd.f32 %v18532_v36, %v18531_v18  ;;  %v9176_v58 = vadd.f32 %v18577_v15, %v24378_v29  ;;  %v18580_v18 = vadd.f32 %v24533_v24, %v24531_v9  ;;  %v18668_v29 = vadd.f32 %v18667_v0, %v18666_v17  ;;  %v25645_v0 = vld [vmem:[#allocation18_spill] sm:$0xff] }
 0xdc4   : > { %v24559_v25 = vpop.f32.mrf.mxu0  ;;  %v18756_v1 = vadd.f32 %v25646_v51, %v25645_v0 }
 0xdc5   : > { %25642 = vst [vmem:[#allocation2_spill] sm:$0xff] %v24559_v25  ;;  %v18536_v25 = vadd.f32 %v18535_v30, %v18534_v62  ;;  %v8832_v60 = vadd.f32 %v18533_v46, %v24025_v56  ;;  %v18558_v62 = vadd.f32 %v18557_v59, %v18556_v21  ;;  %v18886_v30 = vpop.f32.mrf.mxu1  ;;  %v9864_v4 = vadd.f32 %v18665_v20, %v9176_v58 }
 0xdc6   : > { %v24561_v35 = vpop.f32.mrf.mxu0  ;;  %v9177_v9 = vadd.f32 %v18580_v18, %v24386_v38  ;;  %v18841_v21 = vadd.f32 %v18840_v49, %v18839_v12  ;;  %v25649_v12 = vld [vmem:[#allocation5_spill] sm:$0xff] }
 0xdc7   : > { %25643 = vst [vmem:[#allocation3_spill] sm:$0xff] %v24561_v35  ;;  %v9520_v36 = vadd.f32 %v18621_v45, %v8832_v60  ;;  %v9005_v24 = vadd.f32 %v18558_v62, %v24256_v55  ;;  %v18800_v45 = vadd.f32 %v18799_v52, %v18798_v32  ;;  %v10552_v17 = vadd.f32 %v18753_v54, %v9864_v4  ;;  %v25647_v32 = vld [vmem:[#allocation8_spill] sm:$0xff] }
 0xdc8   : > { %v9865_v8 = vadd.f32 %v18668_v29, %v9177_v9  ;;  %v25654_v62 = vld [vmem:[#allocation19_spill] sm:$0xff]  ;;  %v25658_v29 = vld [vmem:[#allocation12_spill] sm:$0xff] }
 0xdc9   : > { %v10208_v23 = vadd.f32 %v18709_v39, %v9520_v36  ;;  %v9693_v5 = vadd.f32 %v18646_v7, %v9005_v24  ;;  %v11240_v27 = vadd.f32 %v18841_v21, %v10552_v17  ;;  %v25652_v36 = vld [vmem:[#allocation14_spill] sm:$0xff] }
 0xdca   : > { %v18514_v44 = vadd.f32 %v25653_v16, %v25652_v36  ;;  %v20533_v16 = vld [vmem:[%s25516_s17 + $0x18] sm:$0xff]  }
 0xdcb   : > { %v10896_v2 = vadd.f32 %v18797_v40, %v10208_v23  ;;  %v25657_v40 = vld [vmem:[#allocation6_spill] sm:$0xff] }
 0xdcc   : > { %v25661_v9 = vld [vmem:[#allocation2_spill] sm:$0xff] }
 0xdcd   : > { %v11584_v63 = vadd.f32 %v18885_v22, %v10896_v2 }
 0xdce   : > { %v25662_v24 = vld [vmem:[#allocation3_spill] sm:$0xff] }
 0xde0   : > { %v18729_v57 = vpop.f32.mrf.mxu0 }
 0xde2   : > { %v18730_v26 = vpop.f32.mrf.mxu0 }
 0xde3   : > { %v18731_v56 = vadd.f32 %v18730_v26, %v18729_v57  ;;  %v25648_v57 = vld [vmem:[#allocation9_spill] sm:$0xff]  ;;  %v25650_v26 = vld [vmem:[#allocation4_spill] sm:$0xff] }
 0xde4   : > { %v18732_v31 = vpop.f32.mrf.mxu0  ;;  %v18511_v52 = vadd.f32 %v25648_v57, %v25647_v32  ;;  %v18599_v49 = vadd.f32 %v25650_v26, %v25649_v12  ;;  %v11730_v12 = vld [vmem:[%s25515_s16] sm:$0xf] }
 0xde5   : > { %v10380_v60 = vadd.f32 %v18731_v56, %v9692_v28  ;;  %v18492_v56 = vadd.f32 %v25657_v40, %v25656_v14  ;;  %v11737_v26 = vsel %vm799_vm0, %v11730_v12, 0  ;;  %v20534_v14 = vld [vmem:[%s25516_s17 + $0x10] sm:$0xff]  }
 0xde6   : > { %v18733_v34 = vpop.f32.mrf.mxu0 }
 0xde7   : > { %v18734_v19 = vadd.f32 %v18733_v34, %v18732_v31  ;;  %v10553_v34 = vadd.f32 %v18756_v1, %v9865_v8  ;;  %v25651_v31 = vld [vmem:[#allocation10_spill] sm:$0xff]  ;;  %v8659_v7 = vadd.f32 %v18514_v44, %v18492_v56  ;;  %v20531_v8 = vld [vmem:[%s25514_s15 + $0x8] sm:$0xff]  }
 0xde8   : > { %v8656_v18 = vadd.f32 %v18511_v52, %v25651_v31  ;;  %v20728_v52 = vld [vmem:[%s25509_s10] sm:$0xff]   ;;  %v20535_v56 = vld [vmem:[%s25516_s17 + $0x8] sm:$0xff]  }
 0xde9   : > { %v10381_v10 = vadd.f32 %v18734_v19, %v9693_v5  ;;  %v11241_v46 = vadd.f32 %v18844_v37, %v10553_v34 }
 0xdea   : > { %v9348_v4 = vadd.f32 %v18599_v49, %v8656_v18 }
 0xe00   : > { %v24563_v3 = vpop.f32.mrf.mxu0 }
 0xe01   : > { %25644 = vst [vmem:[#allocation7_spill] sm:$0xff] %v24563_v3  ;;  %v8833_v3 = vadd.f32 %v18536_v25, %v24039_v43 }
 0xe02   : > { %v24565_v61 = vpop.f32.mrf.mxu0 }
 0xe03   : > { %v9521_v47 = vadd.f32 %v18624_v42, %v8833_v3  ;;  %v18887_v42 = vpop.f32.mrf.mxu1 }
 0xe04   : > { %v24567_v35 = vpop.f32.mrf.mxu0  ;;  %v18888_v11 = vadd.f32 %v18887_v42, %v18886_v30  ;;  %v25655_v30 = vld [vmem:[#allocation17_spill] sm:$0xff] }
 0xe05   : > { %v10209_v58 = vadd.f32 %v18712_v48, %v9521_v47  ;;  %v18687_v47 = vadd.f32 %v25655_v30, %v25654_v62  ;;  %v25659_v48 = vld [vmem:[#allocation13_spill] sm:$0xff] }
 0xe06   : > { %v24574_v41 = vpop.f32.mrf.mxu0  ;;  %v18602_v54 = vadd.f32 %v25659_v48, %v25658_v29  ;;  %v11853_v29 = vld [vmem:[%s25517_s18] sm:$0xf] }
 0xe07   : > { %v10897_v55 = vadd.f32 %v18800_v45, %v10209_v58  ;;  %v10036_v22 = vadd.f32 %v18687_v47, %v9348_v4  ;;  %v18690_v45 = vadd.f32 %v25662_v24, %v25661_v9  ;;  %v18778_v2 = vadd.f32 %v24574_v41, %v24567_v35  ;;  %v20529_v35 = vld [vmem:[%s25514_s15 + $0x18] sm:$0xff]   ;;  %v20530_v41 = vld [vmem:[%s25514_s15 + $0x10] sm:$0xff]   ;;  %v20536_v4 = vld [vmem:[%s25516_s17] sm:$0xff]  }
 0xe08   : > { %v9349_v42 = vadd.f32 %v18602_v54, %v8659_v7  ;;  %19127 = vmatpush3.bf16.msra.mxu1 %v20529_v35  ;;  %v11859_v48 = vsel %vm799_vm0, %v11853_v29, 0 }
 0xe09   : > { %v11585_v15 = vadd.f32 %v18888_v11, %v10897_v55  ;;  %v20532_v55 = vld [vmem:[%s25514_s15] sm:$0xff]  }
 0xe20   : > { %v18817_v43 = vpop.f32.mrf.mxu0 }
 0xe22   : > { %v18818_v59 = vpop.f32.mrf.mxu0 }
 0xe23   : > { %v18819_v20 = vadd.f32 %v18818_v59, %v18817_v43  ;;  %v25660_v43 = vld [vmem:[#allocation7_spill] sm:$0xff] }
 0xe24   : > { %v18820_v3 = vpop.f32.mrf.mxu0  ;;  %v18775_v23 = vadd.f32 %v24565_v61, %v25660_v43 }
 0xe25   : > { %v11068_v38 = vadd.f32 %v18819_v20, %v10380_v60  ;;  %v10037_v20 = vadd.f32 %v18690_v45, %v9349_v42 }
 0xe26   : > { %v18821_v33 = vpop.f32.mrf.mxu0  ;;  %v10724_v59 = vadd.f32 %v18775_v23, %v10036_v22 }
 0xe27   : > { %v11586_v53 = vadd.f32 %v11584_v63, %v11068_v38  ;;  %v18822_v6 = vadd.f32 %v18821_v33, %v18820_v3  ;;  %v10725_v0 = vadd.f32 %v18778_v2, %v10037_v20  ;;  %v25663_v38 = vmov 0.0  }
 0xe28   : > { %19128 = vmatprep.subr.bf16.mxu1 %v25663_v38 }
 0xe29   : > { %v11069_v39 = vadd.f32 %v18822_v6, %v10381_v10  ;;  %v11588_v50 = vadd.f32 %v11586_v53, %v11240_v27  ;;  %19129 = vmatpush3.bf16.msra.mxu1 %v20530_v41 }
 0xe2a   : > { %19130 = vmatprep.subr.bf16.mxu1 %v25663_v38 }
 0xe2b   : > { %v11587_v13 = vadd.f32 %v11585_v15, %v11069_v39 }
 0xe2d   : > { %v11589_v25 = vadd.f32 %v11587_v13, %v11241_v46  ;;  %19131 = vmatpush3.bf16.msra.mxu1 %v20531_v8 }
 0xe2e   : > { %19132 = vmatprep.subr.bf16.mxu1 %v25663_v38 }
 0xe31   : > { %19133 = vmatpush3.bf16.msra.mxu1 %v20532_v55 }
 0xe32   : > { %19156 = vmatprep.subr.bf16.mxu1 %v25663_v38 }
 0xe40   : > { %v18861_v28 = vpop.f32.mrf.mxu0 }
 0xe42   : > { %v18862_v21 = vpop.f32.mrf.mxu0 }
 0xe43   : > { %v18863_v60 = vadd.f32 %v18862_v21, %v18861_v28 }
 0xe44   : > { %v18864_v19 = vpop.f32.mrf.mxu0 }
 0xe45   : > { %v11412_v58 = vadd.f32 %v18863_v60, %v10724_v59 }
 0xe46   : > { %v18865_v17 = vpop.f32.mrf.mxu0 }
 0xe47   : > { %v18866_v51 = vadd.f32 %v18865_v17, %v18864_v19  ;;  %v11590_v61 = vadd.f32 %v11588_v50, %v11412_v58 }
 0xe49   : > { %v11413_v1 = vadd.f32 %v18866_v51, %v10725_v0  ;;  %v11593_v5 = vsel %vm11592_vm8, %v11590_v61, -inf }
 0xe4b   : > { %v11591_v3 = vadd.f32 %v11589_v25, %v11413_v1 }
 0xe4d   : > { %v11594_v63 = vsel %vm11592_vm8, %v11591_v3, -inf }
 0xe4e   : > { %v11595_v11 = vmax.f32 %v11593_v5, %v11594_v63 }
 0xe50   : > { %11596 = vmax.xlane.f32.xlu1 %v11595_v11 }
 0xed9   : > { %v11597_v27 = vpop.xlane.xlu1 %11596 }
 0xeda   : > { %v11598_v33 = vrot.slane %v11597_v27, 4 }
 0xedc   : > { %v11599_v37 = vmax.f32 %v11597_v27, %v11598_v33 }
 0xede   : > { %v11600_v10 = vrot.slane %v11599_v37, 2 }
 0xee0   : > { %v11601_v53 = vmax.f32 %v11599_v37, %v11600_v10 }
 0xee2   : > { %v11602_v6 = vrot.slane %v11601_v53, 1 }
 0xee4   : > { %v11603_v34 = vmax.f32 %v11601_v53, %v11602_v6 }
 0xee6   : > { %19602 = vpush %v11603_v34  ;;  %v20537_v34 = vld [vmem:[%s25520_s21] sm:$0xff]  }
 0xf17   : > { %s19603_s2 = spop %19602 }
 0xf18   : > { %v11605_v15 = vstv %s19603_s2 }
 0xf19   : > { %v11606_v39 = vsub.f32 %v11590_v61, %v11605_v15  ;;  %v11607_v50 = vsub.f32 %v11591_v3, %v11605_v15 }
 0xf1b   : > { %v11608_v46 = vmul.f32 1.442695, %v11606_v39  ;;  %v11610_v13 = vmul.f32 1.442695, %v11607_v50 }
 0xf1d   : > { %20704 = vpow2.f32 %v11608_v46 }
 0xf1e   : > { %20706 = vpow2.f32 %v11610_v13 }
 0xf2a   : > { %v24618_v25 = vpop.eup %20704 }
 0xf2b   : > { %v24620_v32 = vpop.eup %20706 }
 0xf2c   : > { %v11612_v57 = vpack.c.bf16 %v24620_v32, %v24618_v25 }
 0xf2e   : > { %19121 = vmatpush3.bf16.msra.mxu0 %v11612_v57  ;;  %19135 = vmatmul.mubr.msk.bf16.vlgmr.msra.gmra.mxu1 %vm11592_vm8, %v11612_v57 }
 0xf2f   : > { %19138 = vmatprep.subr.bf16.mxu0 %v25663_v38  ;;  %19158 = vmatprep.mubr.msk.bf16.mxu1 %vm20740_vm4, %v25663_v38 }
 0xf30   : > { %19157 = vmatpush3.bf16.msra.mxu1 %v11859_v48 }
 0xf31   : > { %19123 = vmatmul.mubr.msk.bf16.vlgmr.msra.gmra.mxu0 %vm886_vm3, %v20728_v52  ;;  %19162 = vmatprep.subr.bf16.mxu1 %v25663_v38 }
 0xf32   : > { %19140 = vmatprep.mubr.msk.bf16.mxu0 %vm20740_vm4, %v25663_v38  ;;  %19139 = vmatpush3.bf16.msra.mxu0 %v11737_v26 }
 0xf33   : > { %19144 = vmatprep.subr.bf16.mxu0 %v25663_v38 }
 0xfee   : > { %v11723_v49 = vpop.f32.mrf.mxu1 }
 0xff0   : > { %v19136_v31 = vpop.f32.mrf.mxu1 }
 0xff1   : > { %v11647_v18 = vpop.f32.mrf.mxu0 }
 0xff2   : > { %v11726_v36 = vpop.f32.mrf.mxu1  ;;  %20708 = vrcp.f32 %v11647_v18 }
 0xff3   : > { %v11731_v44 = vpack.c.bf16 %v11726_v36, %v11723_v49  ;;  %v19124_v62 = vpop.f32.mrf.mxu0 }
 0xff4   : > { %v19137_v30 = vpop.f32.mrf.mxu1 }
 0xff5   : > { %19141 = vmatmul.mubr.msk.bf16.vlgmr.msra.gmra.mxu0 %vm11732_vm9, %v11731_v44  ;;  %v11650_v47 = vpop.f32.mrf.mxu0 }
 0xff6   : > { %19145 = vmatpush3.bf16.msra.mxu0 %v20533_v16  ;;  %19152 = vmatprep.mubr.msk.bf16.mxu0 %vm20740_vm4, %v25663_v38 }
 0xff7   : > { %19146 = vmatprep.subr.bf16.mxu0 %v25663_v38  ;;  %v19125_v40 = vpop.f32.mrf.mxu0 }
 0xff8   : > { %v14527_v40 = vld [vmem:[%s25664_s30] sm:$0xff] }
 0xffa   : > { %19147 = vmatpush3.bf16.msra.mxu0 %v20534_v14 }
 0xffb   : > { %19148 = vmatprep.subr.bf16.mxu0 %v25663_v38 }
 0xffe   : > { %19149 = vmatpush3.bf16.msra.mxu0 %v20535_v56 }
 0xfff   : > { %19150 = vmatprep.subr.bf16.mxu0 %v25663_v38  ;;  %v20709_v60 = vpop.eup %20708 }
0x1000   : > { %v11904_v51 = vmul.f32 0.8, %v20709_v60  ;;  %v20549_v60 = vld [vmem:[%s25665_s27 + $0x50] sm:$0xff]  }
0x1002   : > { %19151 = vmatpush3.bf16.msra.mxu0 %v20536_v4  ;;  %v14528_v4 = vld [vmem:[%s25664_s30 + $0x8] sm:$0xff] }
0x1003   : > { %19168 = vmatprep.subr.bf16.mxu0 %v25663_v38 }
0x1005   : > { %19153 = vmatmul.mubr.msk.bf16.vlgmr.msra.gmra.mxu0 %vm11592_vm8, %v11612_v57  ;;  %v20538_v57 = vld [vmem:[%s25521_s22] sm:$0xff]  }
0x1006   : > { %19170 = vmatprep.mubr.msk.bf16.mxu0 %vm20740_vm4, %v25663_v38 }
0x10b5   : > { %v11773_v54 = vpop.f32.mrf.mxu0 }
0x10b6   : > { %20710 = vrcp.f32 %v11773_v54 }
0x10b7   : > { %v19142_v43 = vpop.f32.mrf.mxu0 }
0x10b9   : > { %v11776_v23 = vpop.f32.mrf.mxu0 }
0x10bb   : > { %v19143_v28 = vpop.f32.mrf.mxu0 }
0x10bc   : > { %v20539_v28 = vld [vmem:[%s25665_s27] sm:$0xff]  }
0x10c3   : > { %v20711_v19 = vpop.eup %20710 }
0x10c5   : > { %v11846_v7 = vpop.f32.mrf.mxu0 }
0x10c7   : > { %v19154_v22 = vpop.f32.mrf.mxu0 }
0x10c8   : > { %v20541_v22 = vld [vmem:[%s25665_s27 + $0x10] sm:$0xff]  }
0x10c9   : > { %v11849_v9 = vpop.f32.mrf.mxu0 }
0x10ca   : > { %v11854_v24 = vpack.c.bf16 %v11849_v9, %v11846_v7  ;;  %v20540_v7 = vld [vmem:[%s25665_s27 + $0x8] sm:$0xff]   ;;  %v20542_v9 = vld [vmem:[%s25665_s27 + $0x18] sm:$0xff]  }
0x10cb   : > { %v19155_v45 = vpop.f32.mrf.mxu0 }
0x10cc   : > { %19159 = vmatmul.mubr.msk.bf16.vlgmr.msra.gmra.mxu1 %vm11732_vm9, %v11854_v24  ;;  %v20543_v24 = vld [vmem:[%s25665_s27 + $0x20] sm:$0xff]   ;;  %v20544_v45 = vld [vmem:[%s25665_s27 + $0x28] sm:$0xff]  }
0x10cd   : > { %19164 = vmatprep.mubr.msk.bf16.mxu1 %vm20740_vm4, %v25663_v38 }
0x118c   : > { %v11895_v21 = vpop.f32.mrf.mxu1 }
0x118d   : > { %20712 = vrcp.f32 %v11895_v21  ;;  %v20545_v21 = vld [vmem:[%s25665_s27 + $0x30] sm:$0xff]  }
0x118e   : > { %v19160_v42 = vpop.f32.mrf.mxu1  ;;  %20714 = vrcp.f32 %v11650_v47 }
0x118f   : > { %20716 = vrcp.f32 %v11776_v23  ;;  %v20546_v42 = vld [vmem:[%s25665_s27 + $0x38] sm:$0xff]  }
0x1190   : > { %v11898_v59 = vpop.f32.mrf.mxu1 }
0x1191   : > { %20718 = vrcp.f32 %v11898_v59  ;;  %v20547_v59 = vld [vmem:[%s25665_s27 + $0x40] sm:$0xff]  }
0x1192   : > { %v19161_v2 = vpop.f32.mrf.mxu1 }
0x1193   : > { %v20548_v2 = vld [vmem:[%s25665_s27 + $0x48] sm:$0xff]  }
0x119a   : > { %v20713_v20 = vpop.eup %20712 }
0x119b   : > { %v11910_v58 = vadd.f32 %v20713_v20, %v20711_v19  ;;  %v20715_v17 = vpop.eup %20714  ;;  %v20564_v19 = vld [vmem:[%s25666_s1 + $0x198] sm:$0xff]  }
0x119c   : > { %v20717_v0 = vpop.eup %20716  ;;  %v11905_v63 = vmul.f32 0.8, %v20715_v17  ;;  %v20550_v20 = vld [vmem:[%s25665_s27 + $0x58] sm:$0xff]   ;;  %v20566_v17 = vld [vmem:[%s25666_s1 + $0x90] sm:$0xff]  }
0x119d   : > { %v11912_v61 = vmul.f32 0.1, %v11910_v58  ;;  %v20565_v58 = vld [vmem:[%s25666_s1 + $0x98] sm:$0xff]  }
0x119e   : > { %v20719_v1 = vpop.eup %20718 }
0x119f   : > { %v11914_v3 = vadd.f32 %v11912_v61, %v11904_v51  ;;  %v11911_v5 = vadd.f32 %v20719_v1, %v20717_v0  ;;  %v20551_v0 = vld [vmem:[%s25665_s27 + $0x60] sm:$0xff]   ;;  %v20567_v51 = vld [vmem:[%s25666_s1 + $0x88] sm:$0xff]  }
0x11a0   : > { %v20568_v61 = vld [vmem:[%s25666_s1 + $0x80] sm:$0xff]   ;;  %v20552_v1 = vld [vmem:[%s25665_s27 + $0x68] sm:$0xff]  }
0x11a1   : > { %v11916_v11 = vmul.f32 %v24618_v25, %v11914_v3  ;;  %v11913_v35 = vmul.f32 0.1, %v11911_v5  ;;  %v20553_v3 = vld [vmem:[%s25665_s27 + $0x70] sm:$0xff]   ;;  %v20554_v5 = vld [vmem:[%s25665_s27 + $0x78] sm:$0xff]  }
0x11a3   : > { %v11918_v41 = vsel %vm11592_vm8, %v11916_v11, 0.0  ;;  %v11915_v8 = vadd.f32 %v11913_v35, %v11905_v63  ;;  %v20555_v63 = vld [vmem:[%s25665_s27 + $0x80] sm:$0xff]   ;;  %v20556_v35 = vld [vmem:[%s25665_s27 + $0x88] sm:$0xff]  }
0x11a4   : > { %11919 = vadd.xlane.f32.xlu0 %v11918_v41  ;;  %v20557_v41 = vld [vmem:[%s25665_s27 + $0x90] sm:$0xff]  }
0x11a5   : > { %v11917_v55 = vmul.f32 %v24620_v32, %v11915_v8  ;;  %v20558_v8 = vld [vmem:[%s25665_s27 + $0x98] sm:$0xff]  }
0x11a7   : > { %v11921_v27 = vsel %vm11592_vm8, %v11917_v55, 0.0 }
0x11a8   : > { %11922 = vadd.xlane.f32.xlu1 %v11921_v27  ;;  %v20585_v27 = vld [vmem:[%s25666_s1 + $0x188] sm:$0xff]  }
0x122d   : > { %v11920_v33 = vpop.xlane.xlu0 %11919 }
0x122e   : > { %v11924_v10 = vmul.f32 0.015625, %v11920_v33  ;;  %v20587_v33 = vld [vmem:[%s25666_s1 + $0x180] sm:$0xff]  }
0x1231   : > { %v11923_v37 = vpop.xlane.xlu1 %11922 }
0x1232   : > { %v11925_v53 = vmul.f32 0.015625, %v11923_v37  ;;  %v20560_v37 = vld [vmem:[%s25665_s27 + $0xa8] sm:$0xff]  }
0x1234   : > { %v11928_v6 = vpack.c.bf16 %v11925_v53, %v11924_v10  ;;  %v20561_v10 = vld [vmem:[%s25665_s27 + $0xb0] sm:$0xff]   ;;  %v20562_v53 = vld [vmem:[%s25665_s27 + $0xb8] sm:$0xff]  }
0x1236   : > { %19163 = vmatpush3.bf16.msra.mxu1 %v11928_v6  ;;  %v20563_v6 = vld [vmem:[%s25665_s27 + $0xc0] sm:$0xff]  }
0x1237   : > { %19174 = vmatprep.subr.bf16.mxu1 %v25663_v38 }
0x1239   : > { %19165 = vmatmul.mubr.msk.bf16.vlgmr.msra.gmra.mxu1 %vm886_vm3, %v20537_v34 }
0x123a   : > { %19176 = vmatprep.mubr.msk.bf16.mxu1 %vm20740_vm4, %v25663_v38 }
0x12f9   : > { %v11971_v15 = vpop.f32.mrf.mxu1 }
0x12fa   : > { %v11978_v46 = vmax.f32 %v11971_v15, 0.0 }
0x12fb   : > { %v19166_v39 = vpop.f32.mrf.mxu1 }
0x12fd   : > { %v11974_v50 = vpop.f32.mrf.mxu1 }
0x12fe   : > { %v11979_v13 = vmax.f32 %v11974_v50, 0.0 }
0x12ff   : > { %v19167_v25 = vpop.f32.mrf.mxu1 }
0x1300   : > { %v11982_v32 = vpack.c.bf16 %v11979_v13, %v11978_v46 }
0x1302   : > { %19169 = vmatpush3.bf16.msra.mxu0 %v11982_v32 }
0x1303   : > { %19276 = vmatprep.subr.bf16.mxu0 %v25663_v38 }
0x1305   : > { %19171 = vmatmul.mubr.msk.bf16.vlgmr.msra.gmra.mxu0 %vm886_vm3, %v20538_v57 }
0x1306   : > { %19284 = vmatprep.mubr.msk.bf16.mxu0 %vm20740_vm4, %v25663_v38  ;;  %19277 = vmatpush3.bf16.msra.mxu0 %v20565_v58 }
0x1307   : > { %19278 = vmatprep.subr.bf16.mxu0 %v25663_v38 }
0x130a   : > { %19279 = vmatpush3.bf16.msra.mxu0 %v20566_v17 }
0x130b   : > { %19280 = vmatprep.subr.bf16.mxu0 %v25663_v38 }
0x130e   : > { %19281 = vmatpush3.bf16.msra.mxu0 %v20567_v51  ;;  %v20577_v51 = vld [vmem:[%s25666_s1 + $0xa0] sm:$0xff]  }
0x130f   : > { %19282 = vmatprep.subr.bf16.mxu0 %v25663_v38 }
0x1312   : > { %19283 = vmatpush3.bf16.msra.mxu0 %v20568_v61 }
0x1313   : > { %19288 = vmatprep.subr.bf16.mxu0 %v25663_v38 }
0x13c5   : > { %v12025_v52 = vpop.f32.mrf.mxu0 }
0x13c6   : > { %v12032_v12 = vsub.f32 0.0, %v12025_v52 }
0x13c7   : > { %v19172_v26 = vpop.f32.mrf.mxu0 }
0x13c8   : > { %v12034_v49 = vmul.f32 1.442695, %v12032_v12 }
0x13c9   : > { %v12028_v31 = vpop.f32.mrf.mxu0 }
0x13ca   : > { %20720 = vpow2.f32 %v12034_v49  ;;  %v12033_v18 = vsub.f32 0.0, %v12028_v31 }
0x13cb   : > { %v19173_v36 = vpop.f32.mrf.mxu0 }
0x13cc   : > { %v12036_v16 = vmul.f32 1.442695, %v12033_v18 }
0x13ce   : > { %20722 = vpow2.f32 %v12036_v16 }
0x13d7   : > { %v20721_v44 = vpop.eup %20720 }
0x13d8   : > { %v12038_v62 = vadd.f32 1.0, %v20721_v44 }
0x13da   : > { %20724 = vrcp.f32 %v12038_v62 }
0x13db   : > { %v20723_v30 = vpop.eup %20722 }
0x13dc   : > { %v12039_v47 = vadd.f32 1.0, %v20723_v30 }
0x13de   : > { %20726 = vrcp.f32 %v12039_v47 }
0x13e7   : > { %v20725_v14 = vpop.eup %20724 }
0x13e8   : > { %12044 = vperm.xlu1 %19617, %v20725_v14  }
0x13eb   : > { %v20727_v56 = vpop.eup %20726 }
0x13ec   : > { %14531 = vperm.xlu1 %19617, %v14527_v40   ;;  %12049 = vperm.xlu0 %19618, %v20727_v56   ;;  %v20569_v40 = vld [vmem:[%s25666_s1 + $0x18] sm:$0xff]  }
0x13f0   : > { %14536 = vperm.xlu1 %19617, %v14528_v4  }
0x1463   : > { %v12045_v29 = vpop.permute.xlu1 %12044 }
0x1464   : > { %v12052_v54 = vmul.f32 %v12045_v29, %v11916_v11  ;;  %v20576_v11 = vld [vmem:[%s25666_s1 + $0x190] sm:$0xff]  }
0x1467   : > { %v12050_v48 = vpop.permute.xlu0 %12049 }
0x1468   : > { %v12053_v43 = vmul.f32 %v12050_v48, %v11917_v55  ;;  %v20559_v55 = vld [vmem:[%s25665_s27 + $0xa0] sm:$0xff]   ;;  %v20570_v48 = vld [vmem:[%s25666_s1 + $0x10] sm:$0xff]  }
0x146a   : > { %v12104_v23 = vpack.c.bf16 %v12053_v43, %v12052_v54 }
0x146c   : > { %19175 = vmatpush3.bf16.msra.mxu1 %v12104_v23  ;;  %v20571_v23 = vld [vmem:[%s25666_s1 + $0x8] sm:$0xff]  }
0x146d   : > { %19420 = vmatprep.subr.bf16.mxu1 %v25663_v38 }
0x146f   : > { %19177 = vmatmul.mubr.msk.bf16.vlgmr.msra.gmra.mxu1 %vm886_vm3, %v20539_v28 }
0x1470   : > { %19180 = vmatprep.mubr.msk.bf16.mxu1 %vm20740_vm4, %v25663_v38  ;;  %19421 = vmatpush3.bf16.msra.mxu1 %v20564_v19 }
0x1471   : > { %19422 = vmatprep.subr.bf16.mxu1 %v25663_v38 }
0x1474   : > { %19423 = vmatpush3.bf16.msra.mxu1 %v20576_v11 }
0x1475   : > { %19424 = vmatprep.subr.bf16.mxu1 %v25663_v38 }
0x1477   : > { %19181 = vmatmul.mubr.msk.bf16.gmra.mxu1 %vm886_vm3, %v20540_v7 }
0x1478   : > { %19184 = vmatprep.mubr.msk.bf16.mxu1 %vm20740_vm4, %v25663_v38  ;;  %19425 = vmatpush3.bf16.msra.mxu1 %v20585_v27  ;;  %v20580_v27 = vld [vmem:[%s25666_s1 + $0x28] sm:$0xff]  }
0x1479   : > { %19426 = vmatprep.subr.bf16.mxu1 %v25663_v38 }
0x147c   : > { %19427 = vmatpush3.bf16.msra.mxu1 %v20587_v33 }
0x147d   : > { %19444 = vmatprep.subr.bf16.mxu1 %v25663_v38 }
0x147f   : > { %19185 = vmatmul.mubr.msk.bf16.gmra.mxu1 %vm886_vm3, %v20541_v22  ;;  %v20572_v22 = vld [vmem:[%s25666_s1] sm:$0xff]  }
0x1480   : > { %19188 = vmatprep.mubr.msk.bf16.mxu1 %vm20740_vm4, %v25663_v38 }
0x1487   : > { %19189 = vmatmul.mubr.msk.bf16.gmra.mxu1 %vm886_vm3, %v20542_v9 }
0x1488   : > { %19192 = vmatprep.mubr.msk.bf16.mxu1 %vm20740_vm4, %v25663_v38 }
0x148f   : > { %19193 = vmatmul.mubr.msk.bf16.gmra.mxu1 %vm886_vm3, %v20543_v24 }
0x1490   : > { %19196 = vmatprep.mubr.msk.bf16.mxu1 %vm20740_vm4, %v25663_v38 }
0x1497   : > { %19197 = vmatmul.mubr.msk.bf16.gmra.mxu1 %vm886_vm3, %v20544_v45  ;;  %v20573_v45 = vld [vmem:[%s25666_s1 + $0xb8] sm:$0xff]  }
0x1498   : > { %19200 = vmatprep.mubr.msk.bf16.mxu1 %vm20740_vm4, %v25663_v38 }
0x149f   : > { %19201 = vmatmul.mubr.msk.bf16.gmra.mxu1 %vm886_vm3, %v20545_v21 }
0x14a0   : > { %19204 = vmatprep.mubr.msk.bf16.mxu1 %vm20740_vm4, %v25663_v38 }
0x14a7   : > { %19205 = vmatmul.mubr.msk.bf16.gmra.mxu1 %vm886_vm3, %v20546_v42 }
0x14a8   : > { %19208 = vmatprep.mubr.msk.bf16.mxu1 %vm20740_vm4, %v25663_v38 }
0x14af   : > { %19209 = vmatmul.mubr.msk.bf16.gmra.mxu1 %vm886_vm3, %v20547_v59 }
0x14b0   : > { %19212 = vmatprep.mubr.msk.bf16.mxu1 %vm20740_vm4, %v25663_v38 }
0x14b7   : > { %19213 = vmatmul.mubr.msk.bf16.gmra.mxu1 %vm886_vm3, %v20548_v2  ;;  %v20574_v2 = vld [vmem:[%s25666_s1 + $0xb0] sm:$0xff]  }
0x14b8   : > { %19216 = vmatprep.mubr.msk.bf16.mxu1 %vm20740_vm4, %v25663_v38 }
0x14bf   : > { %19217 = vmatmul.mubr.msk.bf16.gmra.mxu1 %vm886_vm3, %v20549_v60 }
0x14c0   : > { %19220 = vmatprep.mubr.msk.bf16.mxu1 %vm20740_vm4, %v25663_v38 }
0x14c7   : > { %19221 = vmatmul.mubr.msk.bf16.gmra.mxu1 %vm886_vm3, %v20550_v20  ;;  %v20575_v20 = vld [vmem:[%s25666_s1 + $0xa8] sm:$0xff]  }
0x14c8   : > { %19224 = vmatprep.mubr.msk.bf16.mxu1 %vm20740_vm4, %v25663_v38 }
0x14cf   : > { %19225 = vmatmul.mubr.msk.bf16.gmra.mxu1 %vm886_vm3, %v20551_v0 }
0x14d0   : > { %19228 = vmatprep.mubr.msk.bf16.mxu1 %vm20740_vm4, %v25663_v38 }
0x14d7   : > { %19229 = vmatmul.mubr.msk.bf16.gmra.mxu1 %vm886_vm3, %v20552_v1 }
0x14d8   : > { %19232 = vmatprep.mubr.msk.bf16.mxu1 %vm20740_vm4, %v25663_v38 }
0x14df   : > { %19233 = vmatmul.mubr.msk.bf16.gmra.mxu1 %vm886_vm3, %v20553_v3  ;;  %v20578_v3 = vld [vmem:[%s25666_s1 + $0x38] sm:$0xff]  }
0x14e0   : > { %19236 = vmatprep.mubr.msk.bf16.mxu1 %vm20740_vm4, %v25663_v38 }
0x14e7   : > { %19237 = vmatmul.mubr.msk.bf16.gmra.mxu1 %vm886_vm3, %v20554_v5 }
0x14e8   : > { %19240 = vmatprep.mubr.msk.bf16.mxu1 %vm20740_vm4, %v25663_v38 }
0x14ef   : > { %19241 = vmatmul.mubr.msk.bf16.gmra.mxu1 %vm886_vm3, %v20555_v63 }
0x14f0   : > { %19244 = vmatprep.mubr.msk.bf16.mxu1 %vm20740_vm4, %v25663_v38 }
0x14f7   : > { %19245 = vmatmul.mubr.msk.bf16.gmra.mxu1 %vm886_vm3, %v20556_v35 }
0x14f8   : > { %19248 = vmatprep.mubr.msk.bf16.mxu1 %vm20740_vm4, %v25663_v38 }
0x14ff   : > { %19249 = vmatmul.mubr.msk.bf16.gmra.mxu1 %vm886_vm3, %v20557_v41  ;;  %v20579_v41 = vld [vmem:[%s25666_s1 + $0x30] sm:$0xff]  }
0x1500   : > { %19252 = vmatprep.mubr.msk.bf16.mxu1 %vm20740_vm4, %v25663_v38 }
0x1507   : > { %19253 = vmatmul.mubr.msk.bf16.gmra.mxu1 %vm886_vm3, %v20558_v8 }
0x1508   : > { %19256 = vmatprep.mubr.msk.bf16.mxu1 %vm20740_vm4, %v25663_v38 }
0x150f   : > { %19257 = vmatmul.mubr.msk.bf16.gmra.mxu1 %vm886_vm3, %v20559_v55 }
0x1510   : > { %19260 = vmatprep.mubr.msk.bf16.mxu1 %vm20740_vm4, %v25663_v38 }
0x1517   : > { %19261 = vmatmul.mubr.msk.bf16.gmra.mxu1 %vm886_vm3, %v20560_v37 }
0x1518   : > { %19264 = vmatprep.mubr.msk.bf16.mxu1 %vm20740_vm4, %v25663_v38 }
0x151f   : > { %19265 = vmatmul.mubr.msk.bf16.gmra.mxu1 %vm886_vm3, %v20561_v10 }
0x1520   : > { %19268 = vmatprep.mubr.msk.bf16.mxu1 %vm20740_vm4, %v25663_v38 }
0x1527   : > { %19269 = vmatmul.mubr.msk.bf16.gmra.mxu1 %vm886_vm3, %v20562_v53  ;;  %v20581_v53 = vld [vmem:[%s25666_s1 + $0x20] sm:$0xff]  }
0x1528   : > { %19272 = vmatprep.mubr.msk.bf16.mxu1 %vm20740_vm4, %v25663_v38 }
0x152f   : > { %v12339_v34 = vpop.f32.mrf.mxu1  ;;  %19273 = vmatmul.mubr.msk.bf16.gmra.mxu1 %vm886_vm3, %v20563_v6 }
0x1530   : > { %19428 = vmatprep.mubr.msk.bf16.mxu1 %vm20740_vm4, %v25663_v38 }
0x1531   : > { %v19178_v15 = vpop.f32.mrf.mxu1 }
0x1532   : > { %v20582_v15 = vld [vmem:[%s25666_s1 + $0xd8] sm:$0xff]  }
0x1533   : > { %v12342_v39 = vpop.f32.mrf.mxu1 }
0x1534   : > { %v12538_v21 = vpack.c.bf16 %v12342_v39, %v12339_v34 }
0x1535   : > { %v19179_v50 = vpop.f32.mrf.mxu1 }
0x1537   : > { %v24876_v46 = vpop.f32.mrf.mxu1 }
0x1539   : > { %v19182_v13 = vpop.f32.mrf.mxu1 }
0x153b   : > { %v24878_v25 = vpop.f32.mrf.mxu1 }
0x153c   : > { %v12539_v32 = vpack.c.bf16 %v24878_v25, %v24876_v46  ;;  %v20584_v46 = vld [vmem:[%s25666_s1 + $0xc8] sm:$0xff]  }
0x153d   : > { %v19183_v57 = vpop.f32.mrf.mxu1 }
0x153e   : > { %v20583_v57 = vld [vmem:[%s25666_s1 + $0xd0] sm:$0xff]  }
0x153f   : > { %v24882_v52 = vpop.f32.mrf.mxu1 }
0x1541   : > { %v19186_v12 = vpop.f32.mrf.mxu1 }
0x1543   : > { %v24884_v26 = vpop.f32.mrf.mxu1 }
0x1544   : > { %v12540_v49 = vpack.c.bf16 %v24884_v26, %v24882_v52 }
0x1545   : > { %v19187_v31 = vpop.f32.mrf.mxu1 }
0x1547   : > { %v24888_v18 = vpop.f32.mrf.mxu1 }
0x1549   : > { %v19190_v36 = vpop.f32.mrf.mxu1 }
0x154b   : > { %v24890_v16 = vpop.f32.mrf.mxu1 }
0x154c   : > { %v12541_v44 = vpack.c.bf16 %v24890_v16, %v24888_v18 }
0x154d   : > { %v19191_v62 = vpop.f32.mrf.mxu1 }
0x154e   : > { %v20586_v62 = vld [vmem:[%s25666_s1 + $0xc0] sm:$0xff]  }
0x154f   : > { %v12371_v30 = vpop.f32.mrf.mxu1 }
0x1551   : > { %v19194_v47 = vpop.f32.mrf.mxu1 }
0x1553   : > { %v12374_v14 = vpop.f32.mrf.mxu1 }
0x1554   : > { %v12542_v56 = vpack.c.bf16 %v12374_v14, %v12371_v30  ;;  %v20588_v14 = vld [vmem:[%s25666_s1 + $0x58] sm:$0xff]  }
0x1555   : > { %v19195_v4 = vpop.f32.mrf.mxu1 }
0x1556   : > { %19285 = vmatmul.mubr.msk.bf16.vlgmr.msra.gmra.mxu0 %vm11592_vm8, %v12542_v56 }
0x1557   : > { %19289 = vmatpush3.bf16.msra.mxu0 %v20569_v40  ;;  %v12379_v29 = vpop.f32.mrf.mxu1  ;;  %19296 = vmatprep.mubr.msk.bf16.mxu0 %vm20740_vm4, %v25663_v38  ;;  %v20589_v40 = vld [vmem:[%s25666_s1 + $0x1d8] sm:$0xff]  }
0x1558   : > { %19290 = vmatprep.subr.bf16.mxu0 %v25663_v38 }
0x1559   : > { %v19198_v54 = vpop.f32.mrf.mxu1 }
0x155a   : > { %v20590_v54 = vld [vmem:[%s25666_s1 + $0x50] sm:$0xff]  }
0x155b   : > { %19291 = vmatpush3.bf16.msra.mxu0 %v20570_v48  ;;  %v12382_v43 = vpop.f32.mrf.mxu1 }
0x155c   : > { %19292 = vmatprep.subr.bf16.mxu0 %v25663_v38  ;;  %v12543_v5 = vpack.c.bf16 %v12382_v43, %v12379_v29  ;;  %v20591_v43 = vld [vmem:[%s25666_s1 + $0x1d0] sm:$0xff]  }
0x155d   : > { %v19199_v28 = vpop.f32.mrf.mxu1 }
0x155f   : > { %19293 = vmatpush3.bf16.msra.mxu0 %v20571_v23  ;;  %v24908_v7 = vpop.f32.mrf.mxu1 }
0x1560   : > { %19294 = vmatprep.subr.bf16.mxu0 %v25663_v38 }
0x1561   : > { %v19202_v9 = vpop.f32.mrf.mxu1 }
0x1563   : > { %19295 = vmatpush3.bf16.msra.mxu0 %v20572_v22  ;;  %v24914_v24 = vpop.f32.mrf.mxu1  ;;  %v20593_v22 = vld [vmem:[%s25666_s1 + $0x1c8] sm:$0xff]  }
0x1564   : > { %19300 = vmatprep.subr.bf16.mxu0 %v25663_v38  ;;  %v12544_v56 = vpack.c.bf16 %v24914_v24, %v24908_v7  ;;  %v20592_v7 = vld [vmem:[%s25666_s1 + $0x48] sm:$0xff]  }
0x1565   : > { %v19203_v42 = vpop.f32.mrf.mxu1 }
0x1566   : > { %19297 = vmatmul.mubr.msk.bf16.vlgmr.msra.gmra.mxu0 %vm11592_vm8, %v12538_v21  ;;  %v20594_v21 = vld [vmem:[%s25666_s1 + $0x40] sm:$0xff]  }
0x1567   : > { %19301 = vmatpush3.bf16.msra.mxu0 %v20573_v45  ;;  %v24921_v59 = vpop.f32.mrf.mxu1  ;;  %19308 = vmatprep.mubr.msk.bf16.mxu0 %vm20740_vm4, %v25663_v38  ;;  %v20595_v42 = vld [vmem:[%s25666_s1 + $0x1c0] sm:$0xff]  }
0x1568   : > { %19302 = vmatprep.subr.bf16.mxu0 %v25663_v38 }
0x1569   : > { %v19206_v60 = vpop.f32.mrf.mxu1 }
0x156b   : > { %19303 = vmatpush3.bf16.msra.mxu0 %v20574_v2  ;;  %v24929_v19 = vpop.f32.mrf.mxu1 }
0x156c   : > { %v12545_v58 = vpack.c.bf16 %v24929_v19, %v24921_v59  ;;  %19304 = vmatprep.subr.bf16.mxu0 %v25663_v38 }
0x156d   : > { %v19207_v17 = vpop.f32.mrf.mxu1 }
0x156e   : > { %v20597_v17 = vld [vmem:[%s25666_s1 + $0x218] sm:$0xff]  }
0x156f   : > { %19305 = vmatpush3.bf16.msra.mxu0 %v20575_v20  ;;  %v24937_v0 = vpop.f32.mrf.mxu1  ;;  %v20596_v20 = vld [vmem:[%s25666_s1 + $0xf8] sm:$0xff]  }
0x1570   : > { %19306 = vmatprep.subr.bf16.mxu0 %v25663_v38 }
0x1571   : > { %v19210_v61 = vpop.f32.mrf.mxu1 }
0x1573   : > { %19307 = vmatpush3.bf16.msra.mxu0 %v20577_v51  ;;  %v24943_v1 = vpop.f32.mrf.mxu1 }
0x1574   : > { %v12546_v63 = vpack.c.bf16 %v24943_v1, %v24937_v0  ;;  %19312 = vmatprep.subr.bf16.mxu0 %v25663_v38 }
0x1575   : > { %v19211_v11 = vpop.f32.mrf.mxu1 }
0x1576   : > { %19309 = vmatmul.mubr.msk.bf16.vlgmr.msra.gmra.mxu0 %vm11592_vm8, %v12543_v5  ;;  %v20598_v5 = vld [vmem:[%s25666_s1 + $0xf0] sm:$0xff]  }
0x1577   : > { %19313 = vmatpush3.bf16.msra.mxu0 %v20578_v3  ;;  %v24952_v35 = vpop.f32.mrf.mxu1  ;;  %19320 = vmatprep.mubr.msk.bf16.mxu0 %vm20740_vm4, %v25663_v38  ;;  %v20599_v11 = vld [vmem:[%s25666_s1 + $0x210] sm:$0xff]  }
0x1578   : > { %19314 = vmatprep.subr.bf16.mxu0 %v25663_v38 }
0x1579   : > { %v19214_v8 = vpop.f32.mrf.mxu1 }
0x157b   : > { %19315 = vmatpush3.bf16.msra.mxu0 %v20579_v41  ;;  %v24960_v55 = vpop.f32.mrf.mxu1  ;;  %v20601_v41 = vld [vmem:[%s25666_s1 + $0x208] sm:$0xff]  }
0x157c   : > { %v12547_v33 = vpack.c.bf16 %v24960_v55, %v24952_v35  ;;  %19316 = vmatprep.subr.bf16.mxu0 %v25663_v38 }
0x157d   : > { %v19215_v37 = vpop.f32.mrf.mxu1 }
0x157f   : > { %19317 = vmatpush3.bf16.msra.mxu0 %v20580_v27  ;;  %v24968_v10 = vpop.f32.mrf.mxu1 }
0x1580   : > { %19318 = vmatprep.subr.bf16.mxu0 %v25663_v38 }
0x1581   : > { %v19218_v6 = vpop.f32.mrf.mxu1 }
0x1582   : > { %v20603_v6 = vld [vmem:[%s25666_s1 + $0x200] sm:$0xff]  }
0x1583   : > { %19319 = vmatpush3.bf16.msra.mxu0 %v20581_v53  ;;  %v24974_v34 = vpop.f32.mrf.mxu1  ;;  %v20602_v53 = vld [vmem:[%s25666_s1 + $0xe0] sm:$0xff]  }
0x1584   : > { %v12548_v39 = vpack.c.bf16 %v24974_v34, %v24968_v10  ;;  %19324 = vmatprep.subr.bf16.mxu0 %v25663_v38  ;;  %v20638_v10 = vld [vmem:[%s25666_s1 + $0x168] sm:$0xff]   ;;  %v20639_v34 = vld [vmem:[%s25666_s1 + $0x160] sm:$0xff]  }
0x1585   : > { %v19219_v50 = vpop.f32.mrf.mxu1 }
0x1586   : > { %19321 = vmatmul.mubr.msk.bf16.vlgmr.msra.gmra.mxu0 %vm11592_vm8, %v12539_v32 }
0x1587   : > { %19325 = vmatpush3.bf16.msra.mxu0 %v20582_v15  ;;  %v24986_v13 = vpop.f32.mrf.mxu1  ;;  %19332 = vmatprep.mubr.msk.bf16.mxu0 %vm20740_vm4, %v25663_v38 }
0x1588   : > { %19326 = vmatprep.subr.bf16.mxu0 %v25663_v38 }
0x1589   : > { %v19222_v12 = vpop.f32.mrf.mxu1 }
0x158a   : > { %v20605_v12 = vld [vmem:[%s25666_s1 + $0x258] sm:$0xff]  }
0x158b   : > { %19327 = vmatpush3.bf16.msra.mxu0 %v20583_v57  ;;  %v24994_v31 = vpop.f32.mrf.mxu1  ;;  %v20604_v57 = vld [vmem:[%s25666_s1 + $0x78] sm:$0xff]  }
0x158c   : > { %v12549_v25 = vpack.c.bf16 %v24994_v31, %v24986_v13  ;;  %19328 = vmatprep.subr.bf16.mxu0 %v25663_v38  ;;  %v20643_v13 = vld [vmem:[%s25666_s1 + $0x1a0] sm:$0xff]   ;;  %v20644_v31 = vld [vmem:[%s25666_s1 + $0x1f8] sm:$0xff]  }
0x158d   : > { %v19223_v32 = vpop.f32.mrf.mxu1 }
0x158f   : > { %19329 = vmatpush3.bf16.msra.mxu0 %v20584_v46  ;;  %v12435_v36 = vpop.f32.mrf.mxu1 }
0x1590   : > { %19330 = vmatprep.subr.bf16.mxu0 %v25663_v38 }
0x1591   : > { %v19226_v30 = vpop.f32.mrf.mxu1 }
0x1592   : > { %v20607_v30 = vld [vmem:[%s25666_s1 + $0x250] sm:$0xff]  }
0x1593   : > { %19331 = vmatpush3.bf16.msra.mxu0 %v20586_v62  ;;  %v12438_v47 = vpop.f32.mrf.mxu1  ;;  %v20606_v62 = vld [vmem:[%s25666_s1 + $0x70] sm:$0xff]  }
0x1594   : > { %v12550_v4 = vpack.c.bf16 %v12438_v47, %v12435_v36  ;;  %19336 = vmatprep.subr.bf16.mxu0 %v25663_v38  ;;  %v20609_v47 = vld [vmem:[%s25666_s1 + $0x248] sm:$0xff]  }
0x1595   : > { %v19227_v29 = vpop.f32.mrf.mxu1 }
0x1596   : > { %19333 = vmatmul.mubr.msk.bf16.vlgmr.msra.gmra.mxu0 %vm11592_vm8, %v12544_v56  ;;  %19429 = vmatmul.mubr.msk.bf16.vlgmr.msra.gmra.mxu1 %vm11592_vm8, %v12550_v4  ;;  %v20610_v4 = vld [vmem:[%s25666_s1 + $0x60] sm:$0xff]  }
0x1597   : > { %19337 = vmatpush3.bf16.msra.mxu0 %v20588_v14  ;;  %v25017_v48 = vpop.f32.mrf.mxu1  ;;  %19445 = vmatpush3.bf16.msra.mxu1 %v20589_v40  ;;  %v20611_v29 = vld [vmem:[%s25666_s1 + $0x240] sm:$0xff]  }
0x1598   : > { %19338 = vmatprep.subr.bf16.mxu0 %v25663_v38  ;;  %19446 = vmatprep.subr.bf16.mxu1 %v25663_v38 }
0x1599   : > { %v19230_v23 = vpop.f32.mrf.mxu1  ;;  %19344 = vmatprep.mubr.msk.bf16.mxu0 %vm20740_vm4, %v25663_v38  ;;  %19452 = vmatprep.mubr.msk.bf16.mxu1 %vm20740_vm4, %v25663_v38 }
0x159a   : > { %v20612_v23 = vld [vmem:[%s25666_s1 + $0x118] sm:$0xff]  }
0x159b   : > { %19339 = vmatpush3.bf16.msra.mxu0 %v20590_v54  ;;  %v25031_v28 = vpop.f32.mrf.mxu1  ;;  %19447 = vmatpush3.bf16.msra.mxu1 %v20591_v43 }
0x159c   : > { %v12551_v9 = vpack.c.bf16 %v25031_v28, %v25017_v48  ;;  %19340 = vmatprep.subr.bf16.mxu0 %v25663_v38  ;;  %19448 = vmatprep.subr.bf16.mxu1 %v25663_v38  ;;  %v20646_v48 = vld [vmem:[%s25666_s1 + $0x1e8] sm:$0xff]  }
0x159d   : > { %v19231_v24 = vpop.f32.mrf.mxu1 }
0x159f   : > { %19341 = vmatpush3.bf16.msra.mxu0 %v20592_v7  ;;  %v12451_v45 = vpop.f32.mrf.mxu1  ;;  %19449 = vmatpush3.bf16.msra.mxu1 %v20593_v22  ;;  %v20613_v7 = vld [vmem:[%s25666_s1 + $0x298] sm:$0xff]  }
0x15a0   : > { %19342 = vmatprep.subr.bf16.mxu0 %v25663_v38  ;;  %19450 = vmatprep.subr.bf16.mxu1 %v25663_v38 }
0x15a1   : > { %v19234_v2 = vpop.f32.mrf.mxu1 }
0x15a2   : > { %v20617_v2 = vld [vmem:[%s25666_s1 + $0x288] sm:$0xff]  }
0x15a3   : > { %19343 = vmatpush3.bf16.msra.mxu0 %v20594_v21  ;;  %v12454_v60 = vpop.f32.mrf.mxu1  ;;  %19451 = vmatpush3.bf16.msra.mxu1 %v20595_v42  ;;  %v20614_v21 = vld [vmem:[%s25666_s1 + $0x110] sm:$0xff]  }
0x15a4   : > { %v12552_v51 = vpack.c.bf16 %v12454_v60, %v12451_v45  ;;  %19348 = vmatprep.subr.bf16.mxu0 %v25663_v38  ;;  %19468 = vmatprep.subr.bf16.mxu1 %v25663_v38  ;;  %v20615_v42 = vld [vmem:[%s25666_s1 + $0x290] sm:$0xff]  }
0x15a5   : > { %v19235_v61 = vpop.f32.mrf.mxu1 }
0x15a6   : > { %19345 = vmatmul.mubr.msk.bf16.vlgmr.msra.gmra.mxu0 %vm11592_vm8, %v12540_v49  ;;  %19453 = vmatmul.mubr.msk.bf16.vlgmr.msra.gmra.mxu1 %vm11592_vm8, %v12552_v51  ;;  %v20600_v49 = vld [vmem:[%s25666_s1 + $0xe8] sm:$0xff]   ;;  %v20618_v51 = vld [vmem:[%s25666_s1 + $0x100] sm:$0xff]  }
0x15a7   : > { %19349 = vmatpush3.bf16.msra.mxu0 %v20596_v20  ;;  %v25064_v3 = vpop.f32.mrf.mxu1  ;;  %19469 = vmatpush3.bf16.msra.mxu1 %v20597_v17  ;;  %v20619_v61 = vld [vmem:[%s25666_s1 + $0x280] sm:$0xff]  }
0x15a8   : > { %19350 = vmatprep.subr.bf16.mxu0 %v25663_v38  ;;  %19470 = vmatprep.subr.bf16.mxu1 %v25663_v38 }
0x15a9   : > { %v19238_v52 = vpop.f32.mrf.mxu1  ;;  %19356 = vmatprep.mubr.msk.bf16.mxu0 %vm20740_vm4, %v25663_v38  ;;  %19476 = vmatprep.mubr.msk.bf16.mxu1 %vm20740_vm4, %v25663_v38 }
0x15aa   : > { %v20620_v52 = vld [vmem:[%s25666_s1 + $0x138] sm:$0xff]  }
0x15ab   : > { %19351 = vmatpush3.bf16.msra.mxu0 %v20598_v5  ;;  %v25078_v26 = vpop.f32.mrf.mxu1  ;;  %19471 = vmatpush3.bf16.msra.mxu1 %v20599_v11 }
0x15ac   : > { %v12553_v8 = vpack.c.bf16 %v25078_v26, %v25064_v3  ;;  %19352 = vmatprep.subr.bf16.mxu0 %v25663_v38  ;;  %19472 = vmatprep.subr.bf16.mxu1 %v25663_v38  ;;  %v20650_v3 = vld [vmem:[%s25666_s1 + $0x228] sm:$0xff]  }
0x15ad   : > { %v19239_v27 = vpop.f32.mrf.mxu1 }
0x15af   : > { %19353 = vmatpush3.bf16.msra.mxu0 %v20600_v49  ;;  %v12467_v37 = vpop.f32.mrf.mxu1  ;;  %19473 = vmatpush3.bf16.msra.mxu1 %v20601_v41  ;;  %v20621_v49 = vld [vmem:[%s25666_s1 + $0x2d8] sm:$0xff]  }
0x15b0   : > { %19354 = vmatprep.subr.bf16.mxu0 %v25663_v38  ;;  %19474 = vmatprep.subr.bf16.mxu1 %v25663_v38 }
0x15b1   : > { %v19242_v15 = vpop.f32.mrf.mxu1 }
0x15b2   : > { %v20625_v15 = vld [vmem:[%s25666_s1 + $0x2c8] sm:$0xff]  }
0x15b3   : > { %19355 = vmatpush3.bf16.msra.mxu0 %v20602_v53  ;;  %v12470_v50 = vpop.f32.mrf.mxu1  ;;  %19475 = vmatpush3.bf16.msra.mxu1 %v20603_v6  ;;  %v20622_v53 = vld [vmem:[%s25666_s1 + $0x130] sm:$0xff]  }
0x15b4   : > { %v12554_v46 = vpack.c.bf16 %v12470_v50, %v12467_v37  ;;  %19360 = vmatprep.subr.bf16.mxu0 %v25663_v38  ;;  %19492 = vmatprep.subr.bf16.mxu1 %v25663_v38  ;;  %v20623_v6 = vld [vmem:[%s25666_s1 + $0x2d0] sm:$0xff]  }
0x15b5   : > { %v19243_v32 = vpop.f32.mrf.mxu1 }
0x15b6   : > { %19357 = vmatmul.mubr.msk.bf16.vlgmr.msra.gmra.mxu0 %vm11592_vm8, %v12545_v58  ;;  %19477 = vmatmul.mubr.msk.bf16.vlgmr.msra.gmra.mxu1 %vm11592_vm8, %v12554_v46  ;;  %v20608_v58 = vld [vmem:[%s25666_s1 + $0x68] sm:$0xff]   ;;  %v20626_v46 = vld [vmem:[%s25666_s1 + $0x120] sm:$0xff]  }
0x15b7   : > { %19361 = vmatpush3.bf16.msra.mxu0 %v20604_v57  ;;  %v25111_v36 = vpop.f32.mrf.mxu1  ;;  %19493 = vmatpush3.bf16.msra.mxu1 %v20605_v12  ;;  %v20627_v32 = vld [vmem:[%s25666_s1 + $0x2c0] sm:$0xff]  }
0x15b8   : > { %19362 = vmatprep.subr.bf16.mxu0 %v25663_v38  ;;  %19494 = vmatprep.subr.bf16.mxu1 %v25663_v38 }
0x15b9   : > { %v19246_v59 = vpop.f32.mrf.mxu1  ;;  %19368 = vmatprep.mubr.msk.bf16.mxu0 %vm20740_vm4, %v25663_v38  ;;  %19500 = vmatprep.mubr.msk.bf16.mxu1 %vm20740_vm4, %v25663_v38 }
0x15ba   : > { %v20628_v59 = vld [vmem:[%s25666_s1 + $0x158] sm:$0xff]  }
0x15bb   : > { %19363 = vmatpush3.bf16.msra.mxu0 %v20606_v62  ;;  %v25125_v19 = vpop.f32.mrf.mxu1  ;;  %19495 = vmatpush3.bf16.msra.mxu1 %v20607_v30 }
0x15bc   : > { %v12555_v14 = vpack.c.bf16 %v25125_v19, %v25111_v36  ;;  %19364 = vmatprep.subr.bf16.mxu0 %v25663_v38  ;;  %19496 = vmatprep.subr.bf16.mxu1 %v25663_v38  ;;  %v20655_v19 = vld [vmem:[%s25666_s1 + $0x260] sm:$0xff]  }
0x15bd   : > { %v19247_v40 = vpop.f32.mrf.mxu1 }
0x15bf   : > { %19365 = vmatpush3.bf16.msra.mxu0 %v20608_v58  ;;  %v12483_v56 = vpop.f32.mrf.mxu1  ;;  %19497 = vmatpush3.bf16.msra.mxu1 %v20609_v47  ;;  %v20629_v58 = vld [vmem:[%s25666_s1 + $0x318] sm:$0xff]  }
0x15c0   : > { %19366 = vmatprep.subr.bf16.mxu0 %v25663_v38  ;;  %19498 = vmatprep.subr.bf16.mxu1 %v25663_v38 }
0x15c1   : > { %v19250_v54 = vpop.f32.mrf.mxu1 }
0x15c2   : > { %v20633_v54 = vld [vmem:[%s25666_s1 + $0x308] sm:$0xff]  }
0x15c3   : > { %19367 = vmatpush3.bf16.msra.mxu0 %v20610_v4  ;;  %v12486_v43 = vpop.f32.mrf.mxu1  ;;  %19499 = vmatpush3.bf16.msra.mxu1 %v20611_v29  ;;  %v20630_v4 = vld [vmem:[%s25666_s1 + $0x150] sm:$0xff]  }
0x15c4   : > { %v12556_v22 = vpack.c.bf16 %v12486_v43, %v12483_v56  ;;  %19372 = vmatprep.subr.bf16.mxu0 %v25663_v38  ;;  %19516 = vmatprep.subr.bf16.mxu1 %v25663_v38  ;;  %v20631_v29 = vld [vmem:[%s25666_s1 + $0x310] sm:$0xff]  }
0x15c5   : > { %v19251_v24 = vpop.f32.mrf.mxu1 }
0x15c6   : > { %19369 = vmatmul.mubr.msk.bf16.vlgmr.msra.gmra.mxu0 %vm11592_vm8, %v12541_v44  ;;  %19501 = vmatmul.mubr.msk.bf16.vlgmr.msra.gmra.mxu1 %vm11592_vm8, %v12556_v22  ;;  %v20616_v44 = vld [vmem:[%s25666_s1 + $0x108] sm:$0xff]   ;;  %v20634_v22 = vld [vmem:[%s25666_s1 + $0x140] sm:$0xff]  }
0x15c7   : > { %19373 = vmatpush3.bf16.msra.mxu0 %v20612_v23  ;;  %v25158_v45 = vpop.f32.mrf.mxu1  ;;  %19517 = vmatpush3.bf16.msra.mxu1 %v20613_v7  ;;  %v20635_v24 = vld [vmem:[%s25666_s1 + $0x300] sm:$0xff]  }
0x15c8   : > { %19374 = vmatprep.subr.bf16.mxu0 %v25663_v38  ;;  %19518 = vmatprep.subr.bf16.mxu1 %v25663_v38 }
0x15c9   : > { %v19254_v18 = vpop.f32.mrf.mxu1  ;;  %19380 = vmatprep.mubr.msk.bf16.mxu0 %vm20740_vm4, %v25663_v38  ;;  %19524 = vmatprep.mubr.msk.bf16.mxu1 %vm20740_vm4, %v25663_v38 }
0x15ca   : > { %v20636_v18 = vld [vmem:[%s25666_s1 + $0x178] sm:$0xff]  }
0x15cb   : > { %19375 = vmatpush3.bf16.msra.mxu0 %v20614_v21  ;;  %v25172_v16 = vpop.f32.mrf.mxu1  ;;  %19519 = vmatpush3.bf16.msra.mxu1 %v20615_v42 }
0x15cc   : > { %v12557_v60 = vpack.c.bf16 %v25172_v16, %v25158_v45  ;;  %19376 = vmatprep.subr.bf16.mxu0 %v25663_v38  ;;  %19520 = vmatprep.subr.bf16.mxu1 %v25663_v38  ;;  %v20658_v45 = vld [vmem:[%s25666_s1 + $0x2a8] sm:$0xff]  }
0x15cd   : > { %v19255_v20 = vpop.f32.mrf.mxu1 }
0x15ce   : > { %v20637_v20 = vld [vmem:[%s25666_s1 + $0x170] sm:$0xff]  }
0x15cf   : > { %19377 = vmatpush3.bf16.msra.mxu0 %v20616_v44  ;;  %v12499_v17 = vpop.f32.mrf.mxu1  ;;  %19521 = vmatpush3.bf16.msra.mxu1 %v20617_v2 }
0x15d0   : > { %19378 = vmatprep.subr.bf16.mxu0 %v25663_v38  ;;  %19522 = vmatprep.subr.bf16.mxu1 %v25663_v38 }
0x15d1   : > { %v19258_v5 = vpop.f32.mrf.mxu1 }
0x15d3   : > { %19379 = vmatpush3.bf16.msra.mxu0 %v20618_v51  ;;  %v12502_v11 = vpop.f32.mrf.mxu1  ;;  %19523 = vmatpush3.bf16.msra.mxu1 %v20619_v61  ;;  %v20642_v51 = vld [vmem:[%s25666_s1 + $0x1a8] sm:$0xff]   ;;  %v20645_v61 = vld [vmem:[%s25666_s1 + $0x1f0] sm:$0xff]  }
0x15d4   : > { %v12558_v41 = vpack.c.bf16 %v12502_v11, %v12499_v17  ;;  %19384 = vmatprep.subr.bf16.mxu0 %v25663_v38  ;;  %19540 = vmatprep.subr.bf16.mxu1 %v25663_v38  ;;  %v20641_v17 = vld [vmem:[%s25666_s1 + $0x1b0] sm:$0xff]  }
0x15d5   : > { %v19259_v27 = vpop.f32.mrf.mxu1 }
0x15d6   : > { %19381 = vmatmul.mubr.msk.bf16.vlgmr.msra.gmra.mxu0 %vm11592_vm8, %v12546_v63  ;;  %19525 = vmatmul.mubr.msk.bf16.vlgmr.msra.gmra.mxu1 %vm11592_vm8, %v12558_v41  ;;  %v20624_v63 = vld [vmem:[%s25666_s1 + $0x128] sm:$0xff]   ;;  %v20649_v27 = vld [vmem:[%s25666_s1 + $0x230] sm:$0xff]  }
0x15d7   : > { %19385 = vmatpush3.bf16.msra.mxu0 %v20620_v52  ;;  %v25205_v37 = vpop.f32.mrf.mxu1  ;;  %19541 = vmatpush3.bf16.msra.mxu1 %v20621_v49  ;;  %v20648_v52 = vld [vmem:[%s25666_s1 + $0x238] sm:$0xff]  }
0x15d8   : > { %19386 = vmatprep.subr.bf16.mxu0 %v25663_v38  ;;  %19542 = vmatprep.subr.bf16.mxu1 %v25663_v38 }
0x15d9   : > { %v19262_v0 = vpop.f32.mrf.mxu1  ;;  %19392 = vmatprep.mubr.msk.bf16.mxu0 %vm20740_vm4, %v25663_v38  ;;  %19548 = vmatprep.mubr.msk.bf16.mxu1 %vm20740_vm4, %v25663_v38 }
0x15db   : > { %19387 = vmatpush3.bf16.msra.mxu0 %v20622_v53  ;;  %v25219_v1 = vpop.f32.mrf.mxu1  ;;  %19543 = vmatpush3.bf16.msra.mxu1 %v20623_v6 }
0x15dc   : > { %v12559_v50 = vpack.c.bf16 %v25219_v1, %v25205_v37  ;;  %19388 = vmatprep.subr.bf16.mxu0 %v25663_v38  ;;  %19544 = vmatprep.subr.bf16.mxu1 %v25663_v38  ;;  %v20662_v37 = vld [vmem:[%s25666_s1 + $0x2e8] sm:$0xff]  }
0x15dd   : > { %v19263_v57 = vpop.f32.mrf.mxu1 }
0x15de   : > { %v20653_v57 = vld [vmem:[%s25666_s1 + $0x270] sm:$0xff]  }
0x15df   : > { %19389 = vmatpush3.bf16.msra.mxu0 %v20624_v63  ;;  %v12515_v12 = vpop.f32.mrf.mxu1  ;;  %19545 = vmatpush3.bf16.msra.mxu1 %v20625_v15  ;;  %v20652_v63 = vld [vmem:[%s25666_s1 + $0x278] sm:$0xff]  }
0x15e0   : > { %19390 = vmatprep.subr.bf16.mxu0 %v25663_v38  ;;  %19546 = vmatprep.subr.bf16.mxu1 %v25663_v38 }
0x15e1   : > { %v19266_v62 = vpop.f32.mrf.mxu1 }
0x15e3   : > { %19391 = vmatpush3.bf16.msra.mxu0 %v20626_v46  ;;  %v12518_v30 = vpop.f32.mrf.mxu1  ;;  %19547 = vmatpush3.bf16.msra.mxu1 %v20627_v32  ;;  %v20654_v32 = vld [vmem:[%s25666_s1 + $0x268] sm:$0xff]  }
0x15e4   : > { %v12560_v47 = vpack.c.bf16 %v12518_v30, %v12515_v12  ;;  %19396 = vmatprep.subr.bf16.mxu0 %v25663_v38  ;;  %19564 = vmatprep.subr.bf16.mxu1 %v25663_v38 }
0x15e5   : > { %v19267_v40 = vpop.f32.mrf.mxu1 }
0x15e6   : > { %19393 = vmatmul.mubr.msk.bf16.vlgmr.msra.gmra.mxu0 %vm11592_vm8, %v12547_v33  ;;  %19549 = vmatmul.mubr.msk.bf16.vlgmr.msra.gmra.mxu1 %vm11592_vm8, %v12560_v47  ;;  %v20632_v33 = vld [vmem:[%s25666_s1 + $0x148] sm:$0xff]  }
0x15e7   : > { %19397 = vmatpush3.bf16.msra.mxu0 %v20628_v59  ;;  %v25252_v56 = vpop.f32.mrf.mxu1  ;;  %19565 = vmatpush3.bf16.msra.mxu1 %v20629_v58  ;;  %v20657_v59 = vld [vmem:[%s25666_s1 + $0x2b0] sm:$0xff]  }
0x15e8   : > { %19398 = vmatprep.subr.bf16.mxu0 %v25663_v38  ;;  %19566 = vmatprep.subr.bf16.mxu1 %v25663_v38 }
0x15e9   : > { %v19270_v35 = vpop.f32.mrf.mxu1  ;;  %19404 = vmatprep.mubr.msk.bf16.mxu0 %vm20740_vm4, %v25663_v38  ;;  %19572 = vmatprep.mubr.msk.bf16.mxu1 %vm20740_vm4, %v25663_v38 }
0x15eb   : > { %19399 = vmatpush3.bf16.msra.mxu0 %v20630_v4  ;;  %v25266_v55 = vpop.f32.mrf.mxu1  ;;  %19567 = vmatpush3.bf16.msra.mxu1 %v20631_v29  ;;  %v20660_v4 = vld [vmem:[%s25666_s1 + $0x2f8] sm:$0xff]  }
0x15ec   : > { %v12561_v43 = vpack.c.bf16 %v25266_v55, %v25252_v56  ;;  %19400 = vmatprep.subr.bf16.mxu0 %v25663_v38  ;;  %19568 = vmatprep.subr.bf16.mxu1 %v25663_v38 }
0x15ed   : > { %v19271_v23 = vpop.f32.mrf.mxu1 }
0x15ef   : > { %19401 = vmatpush3.bf16.msra.mxu0 %v20632_v33  ;;  %v12531_v7 = vpop.f32.mrf.mxu1  ;;  %19569 = vmatpush3.bf16.msra.mxu1 %v20633_v54  ;;  %v20661_v33 = vld [vmem:[%s25666_s1 + $0x2f0] sm:$0xff]  }
0x15f0   : > { %19402 = vmatprep.subr.bf16.mxu0 %v25663_v38  ;;  %19570 = vmatprep.subr.bf16.mxu1 %v25663_v38 }
0x15f1   : > { %v19274_v21 = vpop.f32.mrf.mxu1 }
0x15f3   : > { %19403 = vmatpush3.bf16.msra.mxu0 %v20634_v22  ;;  %v12534_v42 = vpop.f32.mrf.mxu1  ;;  %19571 = vmatpush3.bf16.msra.mxu1 %v20635_v24  ;;  %v20663_v24 = vld [vmem:[%s25666_s1 + $0x2e0] sm:$0xff]  }
0x15f4   : > { %v12562_v44 = vpack.c.bf16 %v12534_v42, %v12531_v7  ;;  %19408 = vmatprep.subr.bf16.mxu0 %v25663_v38  ;;  %19588 = vmatprep.subr.bf16.mxu1 %v25663_v38 }
0x15f5   : > { %v19275_v2 = vpop.f32.mrf.mxu1 }
0x15f6   : > { %19405 = vmatmul.mubr.msk.bf16.vlgmr.msra.gmra.mxu0 %vm11592_vm8, %v12548_v39  ;;  %19573 = vmatmul.mubr.msk.bf16.vlgmr.msra.gmra.mxu1 %vm11592_vm8, %v12562_v44  ;;  %v20640_v39 = vld [vmem:[%s25666_s1 + $0x1b8] sm:$0xff]  }
0x15f7   : > { %19409 = vmatpush3.bf16.msra.mxu0 %v20636_v18  ;;  %19416 = vmatprep.mubr.msk.bf16.mxu0 %vm20740_vm4, %v25663_v38 }
0x15f8   : > { %19410 = vmatprep.subr.bf16.mxu0 %v25663_v38  ;;  %19590 = vmatprep.mubr.msk.bf16.mxu1 %vm20740_vm4, %v25663_v38 }
0x15fb   : > { %19411 = vmatpush3.bf16.msra.mxu0 %v20637_v20 }
0x15fc   : > { %19412 = vmatprep.subr.bf16.mxu0 %v25663_v38 }
0x15ff   : > { %19413 = vmatpush3.bf16.msra.mxu0 %v20638_v10 }
0x1600   : > { %19414 = vmatprep.subr.bf16.mxu0 %v25663_v38 }
0x1603   : > { %19415 = vmatpush3.bf16.msra.mxu0 %v20639_v34 }
0x1604   : > { %19432 = vmatprep.subr.bf16.mxu0 %v25663_v38 }
0x1606   : > { %19417 = vmatmul.mubr.msk.bf16.vlgmr.msra.gmra.mxu0 %vm11592_vm8, %v12549_v25 }
0x1607   : > { %19433 = vmatpush3.bf16.msra.mxu0 %v20640_v39  ;;  %19440 = vmatprep.mubr.msk.bf16.mxu0 %vm20740_vm4, %v25663_v38 }
0x1608   : > { %19434 = vmatprep.subr.bf16.mxu0 %v25663_v38 }
0x160b   : > { %19435 = vmatpush3.bf16.msra.mxu0 %v20641_v17 }
0x160c   : > { %19436 = vmatprep.subr.bf16.mxu0 %v25663_v38 }
0x160f   : > { %19437 = vmatpush3.bf16.msra.mxu0 %v20642_v51 }
0x1610   : > { %19438 = vmatprep.subr.bf16.mxu0 %v25663_v38 }
0x1613   : > { %19439 = vmatpush3.bf16.msra.mxu0 %v20643_v13 }
0x1614   : > { %19456 = vmatprep.subr.bf16.mxu0 %v25663_v38 }
0x1616   : > { %19441 = vmatmul.mubr.msk.bf16.vlgmr.msra.gmra.mxu0 %vm11592_vm8, %v12551_v9  ;;  %v12668_v25 = vpop.f32.mrf.mxu0  ;;  %v20647_v9 = vld [vmem:[%s25666_s1 + $0x1e0] sm:$0xff]  }
0x1617   : > { %19457 = vmatpush3.bf16.msra.mxu0 %v20644_v31  ;;  %19464 = vmatprep.mubr.msk.bf16.mxu0 %vm20740_vm4, %v25663_v38 }
0x1618   : > { %v19286_v5 = vpop.f32.mrf.mxu0  ;;  %19458 = vmatprep.subr.bf16.mxu0 %v25663_v38 }
0x161a   : > { %v12671_v11 = vpop.f32.mrf.mxu0 }
0x161b   : > { %19459 = vmatpush3.bf16.msra.mxu0 %v20645_v61 }
0x161c   : > { %v19287_v28 = vpop.f32.mrf.mxu0  ;;  %19460 = vmatprep.subr.bf16.mxu0 %v25663_v38 }
0x161f   : > { %19461 = vmatpush3.bf16.msra.mxu0 %v20646_v48 }
0x1620   : > { %19462 = vmatprep.subr.bf16.mxu0 %v25663_v38 }
0x1623   : > { %19463 = vmatpush3.bf16.msra.mxu0 %v20647_v9 }
0x1624   : > { %19480 = vmatprep.subr.bf16.mxu0 %v25663_v38 }
0x1626   : > { %v12736_v49 = vpop.f32.mrf.mxu0  ;;  %19465 = vmatmul.mubr.msk.bf16.vlgmr.msra.gmra.mxu0 %vm11592_vm8, %v12553_v8  ;;  %v20651_v8 = vld [vmem:[%s25666_s1 + $0x220] sm:$0xff]  }
0x1627   : > { %v25364_v41 = vadd.f32 %v12736_v49, %v12668_v25  ;;  %19481 = vmatpush3.bf16.msra.mxu0 %v20648_v52  ;;  %19488 = vmatprep.mubr.msk.bf16.mxu0 %vm20740_vm4, %v25663_v38 }
0x1628   : > { %v19298_v53 = vpop.f32.mrf.mxu0  ;;  %19482 = vmatprep.subr.bf16.mxu0 %v25663_v38 }
0x162a   : > { %v12739_v6 = vpop.f32.mrf.mxu0 }
0x162b   : > { %v25372_v0 = vadd.f32 %v12739_v6, %v12671_v11  ;;  %19483 = vmatpush3.bf16.msra.mxu0 %v20649_v27 }
0x162c   : > { %v19299_v26 = vpop.f32.mrf.mxu0  ;;  %19484 = vmatprep.subr.bf16.mxu0 %v25663_v38 }
0x162f   : > { %19485 = vmatpush3.bf16.msra.mxu0 %v20650_v3 }
0x1630   : > { %19486 = vmatprep.subr.bf16.mxu0 %v25663_v38 }
0x1633   : > { %19487 = vmatpush3.bf16.msra.mxu0 %v20651_v8 }
0x1634   : > { %19504 = vmatprep.subr.bf16.mxu0 %v25663_v38 }
0x1636   : > { %v12813_v15 = vpop.f32.mrf.mxu0  ;;  %19489 = vmatmul.mubr.msk.bf16.vlgmr.msra.gmra.mxu0 %vm11592_vm8, %v12555_v14  ;;  %v20656_v14 = vld [vmem:[%s25666_s1 + $0x2b8] sm:$0xff]  }
0x1637   : > { %19505 = vmatpush3.bf16.msra.mxu0 %v20652_v63  ;;  %19512 = vmatprep.mubr.msk.bf16.mxu0 %vm20740_vm4, %v25663_v38 }
0x1638   : > { %v19310_v12 = vpop.f32.mrf.mxu0  ;;  %19506 = vmatprep.subr.bf16.mxu0 %v25663_v38 }
0x163a   : > { %v12816_v46 = vpop.f32.mrf.mxu0 }
0x163b   : > { %19507 = vmatpush3.bf16.msra.mxu0 %v20653_v57 }
0x163c   : > { %v19311_v36 = vpop.f32.mrf.mxu0  ;;  %19508 = vmatprep.subr.bf16.mxu0 %v25663_v38 }
0x163f   : > { %19509 = vmatpush3.bf16.msra.mxu0 %v20654_v32 }
0x1640   : > { %19510 = vmatprep.subr.bf16.mxu0 %v25663_v38 }
0x1643   : > { %19511 = vmatpush3.bf16.msra.mxu0 %v20655_v19 }
0x1644   : > { %19528 = vmatprep.subr.bf16.mxu0 %v25663_v38 }
0x1646   : > { %v12881_v62 = vpop.f32.mrf.mxu0  ;;  %19513 = vmatmul.mubr.msk.bf16.vlgmr.msra.gmra.mxu0 %vm11592_vm8, %v12557_v60  ;;  %v20659_v60 = vld [vmem:[%s25666_s1 + $0x2a0] sm:$0xff]  }
0x1647   : > { %v25412_v30 = vadd.f32 %v12881_v62, %v12813_v15  ;;  %19529 = vmatpush3.bf16.msra.mxu0 %v20656_v14  ;;  %19536 = vmatprep.mubr.msk.bf16.mxu0 %vm20740_vm4, %v25663_v38 }
0x1648   : > { %v19322_v58 = vpop.f32.mrf.mxu0  ;;  %19530 = vmatprep.subr.bf16.mxu0 %v25663_v38 }
0x164a   : > { %v12884_v47 = vpop.f32.mrf.mxu0 }
0x164b   : > { %v25420_v40 = vadd.f32 %v12884_v47, %v12816_v46  ;;  %19531 = vmatpush3.bf16.msra.mxu0 %v20657_v59 }
0x164c   : > { %v19323_v16 = vpop.f32.mrf.mxu0  ;;  %19532 = vmatprep.subr.bf16.mxu0 %v25663_v38 }
0x164f   : > { %19533 = vmatpush3.bf16.msra.mxu0 %v20658_v45 }
0x1650   : > { %19534 = vmatprep.subr.bf16.mxu0 %v25663_v38 }
0x1653   : > { %19535 = vmatpush3.bf16.msra.mxu0 %v20659_v60 }
0x1654   : > { %19552 = vmatprep.subr.bf16.mxu0 %v25663_v38 }
0x1656   : > { %v12958_v29 = vpop.f32.mrf.mxu0  ;;  %19537 = vmatmul.mubr.msk.bf16.vlgmr.msra.gmra.mxu0 %vm11592_vm8, %v12559_v50  ;;  %v13564_v35 = vpop.f32.mrf.mxu1 }
0x1657   : > { %19553 = vmatpush3.bf16.msra.mxu0 %v20660_v4  ;;  %19560 = vmatprep.mubr.msk.bf16.mxu0 %vm20740_vm4, %v25663_v38 }
0x1658   : > { %v19334_v54 = vpop.f32.mrf.mxu0  ;;  %19554 = vmatprep.subr.bf16.mxu0 %v25663_v38  ;;  %v19430_v23 = vpop.f32.mrf.mxu1 }
0x165a   : > { %v12961_v7 = vpop.f32.mrf.mxu0  ;;  %v13567_v22 = vpop.f32.mrf.mxu1 }
0x165b   : > { %19555 = vmatpush3.bf16.msra.mxu0 %v20661_v33 }
0x165c   : > { %v19335_v1 = vpop.f32.mrf.mxu0  ;;  %19556 = vmatprep.subr.bf16.mxu0 %v25663_v38  ;;  %v19431_v50 = vpop.f32.mrf.mxu1 }
0x165f   : > { %19557 = vmatpush3.bf16.msra.mxu0 %v20662_v37 }
0x1660   : > { %19558 = vmatprep.subr.bf16.mxu0 %v25663_v38 }
0x1663   : > { %19559 = vmatpush3.bf16.msra.mxu0 %v20663_v24 }
0x1664   : > { %19576 = vmatprep.subr.bf16.mxu0 %v25663_v38 }
0x1666   : > { %v13026_v21 = vpop.f32.mrf.mxu0  ;;  %19561 = vmatmul.mubr.msk.bf16.vlgmr.msra.gmra.mxu0 %vm11592_vm8, %v12561_v43  ;;  %v25457_v42 = vpop.f32.mrf.mxu1 }
0x1667   : > { %v13027_v18 = vadd.f32 %v13026_v21, %v12958_v29  ;;  %19578 = vmatprep.mubr.msk.bf16.mxu0 %vm20740_vm4, %v25663_v38 }
0x1668   : > { %v19346_v44 = vpop.f32.mrf.mxu0  ;;  %v19454_v2 = vpop.f32.mrf.mxu1 }
0x166a   : > { %v13029_v20 = vpop.f32.mrf.mxu0  ;;  %v25461_v10 = vpop.f32.mrf.mxu1 }
0x166b   : > { %v25463_v34 = vadd.f32 %v13029_v20, %v12961_v7  ;;  %v17717_v7 = vld [vmem:[%s25523_s24 + $0x4] sm:$0x3] }
0x166c   : > { %v19347_v39 = vpop.f32.mrf.mxu0  ;;  %v19455_v17 = vpop.f32.mrf.mxu1 }
0x1676   : > { %v13103_v51 = vpop.f32.mrf.mxu0  ;;  %v13880_v13 = vpop.f32.mrf.mxu1 }
0x1678   : > { %v19358_v56 = vpop.f32.mrf.mxu0  ;;  %v19478_v55 = vpop.f32.mrf.mxu1 }
0x167a   : > { %v13106_v43 = vpop.f32.mrf.mxu0  ;;  %v13883_v31 = vpop.f32.mrf.mxu1 }
0x167c   : > { %v19359_v25 = vpop.f32.mrf.mxu0  ;;  %v19479_v61 = vpop.f32.mrf.mxu1 }
0x1686   : > { %v13171_v5 = vpop.f32.mrf.mxu0  ;;  %v14038_v11 = vpop.f32.mrf.mxu1 }
0x1687   : > { %v13172_v48 = vadd.f32 %v13171_v5, %v13103_v51 }
0x1688   : > { %v19370_v28 = vpop.f32.mrf.mxu0  ;;  %v19502_v9 = vpop.f32.mrf.mxu1 }
0x168a   : > { %v13174_v52 = vpop.f32.mrf.mxu0  ;;  %v14041_v49 = vpop.f32.mrf.mxu1 }
0x168b   : > { %v13175_v27 = vadd.f32 %v13174_v52, %v13106_v43 }
0x168c   : > { %v19371_v53 = vpop.f32.mrf.mxu0  ;;  %v19503_v6 = vpop.f32.mrf.mxu1 }
0x1696   : > { %v13248_v3 = vpop.f32.mrf.mxu0  ;;  %v14196_v26 = vpop.f32.mrf.mxu1 }
0x1697   : > { %v13255_v8 = vadd.f32 %v13248_v3, %v25364_v41 }
0x1698   : > { %v19382_v63 = vpop.f32.mrf.mxu0  ;;  %v19526_v15 = vpop.f32.mrf.mxu1 }
0x1699   : > { %v13571_v57 = vadd.f32 %v13564_v35, %v13255_v8 }
0x169a   : > { %v13251_v12 = vpop.f32.mrf.mxu0  ;;  %v14199_v46 = vpop.f32.mrf.mxu1 }
0x169b   : > { %v13256_v32 = vadd.f32 %v13251_v12, %v25372_v0  ;;  %v13887_v36 = vadd.f32 %v13880_v13, %v13571_v57  ;;  %v14541_v0 = vld [vmem:[%s25523_s24] sm:$0x3] }
0x169c   : > { %v19383_v19 = vpop.f32.mrf.mxu0  ;;  %v19527_v14 = vpop.f32.mrf.mxu1 }
0x169d   : > { %v13572_v62 = vadd.f32 %v13567_v22, %v13256_v32  ;;  %v14203_v59 = vadd.f32 %v14196_v26, %v13887_v36  ;;  %v14548_v22 = vsel %vm6472_vm5, %v14541_v0, 0  ;;  %v14532_v0 = vpop.permute.xlu1 %14531 }
0x169e   : > { %19577 = vmatpush3.bf16.msra.mxu0 %v14548_v22 }
0x169f   : > { %v13888_v58 = vadd.f32 %v13883_v31, %v13572_v62  ;;  %19582 = vmatprep.subr.bf16.mxu0 %v25663_v38 }
0x16a1   : > { %v14204_v47 = vadd.f32 %v14199_v46, %v13888_v58 }
0x16a6   : > { %v13327_v45 = vpop.f32.mrf.mxu0  ;;  %v14354_v16 = vpop.f32.mrf.mxu1 }
0x16a7   : > { %v13334_v60 = vadd.f32 %v13327_v45, %v25412_v30  ;;  %v14642_v30 = vsel %vm6472_vm5, %v17717_v7, 0 }
0x16a8   : > { %v19394_v4 = vpop.f32.mrf.mxu0  ;;  %v19550_v41 = vpop.f32.mrf.mxu1  ;;  %19589 = vmatpush3.bf16.msra.mxu1 %v14642_v30 }
0x16aa   : > { %v13330_v29 = vpop.f32.mrf.mxu0  ;;  %v14357_v33 = vpop.f32.mrf.mxu1 }
0x16ab   : > { %v13335_v35 = vadd.f32 %v13330_v29, %v25420_v40 }
0x16ac   : > { %v19395_v54 = vpop.f32.mrf.mxu0  ;;  %v19551_v23 = vpop.f32.mrf.mxu1 }
0x16b6   : > { %v13406_v37 = vpop.f32.mrf.mxu0  ;;  %v14512_v40 = vpop.f32.mrf.mxu1 }
0x16b7   : > { %v13413_v1 = vadd.f32 %v13406_v37, %v13027_v18  ;;  %v14519_v50 = vadd.f32 %v14512_v40, %v14203_v59 }
0x16b8   : > { %v19406_v24 = vpop.f32.mrf.mxu0  ;;  %v19574_v21 = vpop.f32.mrf.mxu1 }
0x16b9   : > { %v13729_v44 = vadd.f32 %v25457_v42, %v13413_v1  ;;  %v14537_v21 = vpop.permute.xlu1 %14536 }
0x16ba   : > { %v13409_v2 = vpop.f32.mrf.mxu0  ;;  %v14515_v20 = vpop.f32.mrf.mxu1 }
0x16bb   : > { %v14045_v39 = vadd.f32 %v14038_v11, %v13729_v44  ;;  %v13414_v17 = vadd.f32 %v13409_v2, %v25463_v34  ;;  %v14520_v51 = vadd.f32 %v14515_v20, %v14204_v47 }
0x16bc   : > { %v19407_v13 = vpop.f32.mrf.mxu0  ;;  %v19575_v56 = vpop.f32.mrf.mxu1 }
0x16bd   : > { %v13730_v55 = vadd.f32 %v25461_v10, %v13414_v17  ;;  %v14361_v43 = vadd.f32 %v14354_v16, %v14045_v39  ;;  %v17719_v17 = vld [vmem:[%s25523_s24 + $0x6] sm:$0x3] }
0x16bf   : > { %v14046_v31 = vadd.f32 %v14041_v49, %v13730_v55 }
0x16c1   : > { %v14362_v25 = vadd.f32 %v14357_v33, %v14046_v31 }
0x16c6   : > { %v13485_v61 = vpop.f32.mrf.mxu0 }
0x16c7   : > { %v13492_v18 = vadd.f32 %v13485_v61, %v13172_v48 }
0x16c8   : > { %v19418_v5 = vpop.f32.mrf.mxu0 }
0x16ca   : > { %v13488_v28 = vpop.f32.mrf.mxu0 }
0x16cb   : > { %v13493_v9 = vadd.f32 %v13488_v28, %v13175_v27 }
0x16cc   : > { %v19419_v52 = vpop.f32.mrf.mxu0 }
0x16d6   : > { %v13643_v42 = vpop.f32.mrf.mxu0 }
0x16d7   : > { %v13650_v53 = vadd.f32 %v13643_v42, %v13334_v60 }
0x16d8   : > { %v19442_v6 = vpop.f32.mrf.mxu0 }
0x16da   : > { %v13646_v11 = vpop.f32.mrf.mxu0 }
0x16db   : > { %v13651_v3 = vadd.f32 %v13646_v11, %v13335_v35 }
0x16dc   : > { %v19443_v34 = vpop.f32.mrf.mxu0 }
0x16e6   : > { %v13801_v26 = vpop.f32.mrf.mxu0 }
0x16e7   : > { %v13808_v8 = vadd.f32 %v13801_v26, %v13492_v18 }
0x16e8   : > { %v19466_v63 = vpop.f32.mrf.mxu0 }
0x16ea   : > { %v13804_v15 = vpop.f32.mrf.mxu0 }
0x16eb   : > { %v13809_v54 = vadd.f32 %v13804_v15, %v13493_v9 }
0x16ec   : > { %v19467_v10 = vpop.f32.mrf.mxu0 }
0x16f6   : > { %v13959_v57 = vpop.f32.mrf.mxu0 }
0x16f7   : > { %v13966_v19 = vadd.f32 %v13959_v57, %v13650_v53 }
0x16f8   : > { %v19490_v49 = vpop.f32.mrf.mxu0 }
0x16fa   : > { %v13962_v12 = vpop.f32.mrf.mxu0 }
0x16fb   : > { %v13967_v58 = vadd.f32 %v13962_v12, %v13651_v3 }
0x16fc   : > { %v19491_v46 = vpop.f32.mrf.mxu0 }
0x1706   : > { %v14117_v48 = vpop.f32.mrf.mxu0 }
0x1707   : > { %v14124_v33 = vadd.f32 %v14117_v48, %v13808_v8 }
0x1708   : > { %v19514_v32 = vpop.f32.mrf.mxu0 }
0x170a   : > { %v14120_v36 = vpop.f32.mrf.mxu0 }
0x170b   : > { %v14125_v22 = vadd.f32 %v14120_v36, %v13809_v54 }
0x170c   : > { %v19515_v27 = vpop.f32.mrf.mxu0 }
0x1716   : > { %v14275_v14 = vpop.f32.mrf.mxu0 }
0x1717   : > { %v14282_v62 = vadd.f32 %v14275_v14, %v13966_v19 }
0x1718   : > { %v19538_v59 = vpop.f32.mrf.mxu0 }
0x1719   : > { %v14521_v47 = vadd.f32 %v14519_v50, %v14282_v62  ;;  %v17715_v50 = vld [vmem:[%s25523_s24 + $0x2] sm:$0x3] }
0x171a   : > { %v14278_v45 = vpop.f32.mrf.mxu0  ;;  %v14594_v39 = vsel %vm6472_vm5, %v17715_v50, 0 }
0x171b   : > { %v14283_v16 = vadd.f32 %v14278_v45, %v13967_v58  ;;  %v14523_v60 = vadd.f32 %v14521_v47, %v14361_v43 }
0x171c   : > { %v19539_v4 = vpop.f32.mrf.mxu0 }
0x171d   : > { %v14522_v41 = vadd.f32 %v14520_v51, %v14283_v16  ;;  %v14690_v51 = vsel %vm6472_vm5, %v17719_v17, 0 }
0x171f   : > { %v14524_v29 = vadd.f32 %v14522_v41, %v14362_v25 }
0x1726   : > { %v14433_v35 = vpop.f32.mrf.mxu0 }
0x1727   : > { %v14440_v23 = vadd.f32 %v14433_v35, %v14124_v33 }
0x1728   : > { %v19562_v7 = vpop.f32.mrf.mxu0 }
0x1729   : > { %v14525_v30 = vadd.f32 %v14523_v60, %v14440_v23 }
0x172a   : > { %v14436_v37 = vpop.f32.mrf.mxu0 }
0x172b   : > { %v14441_v40 = vadd.f32 %v14436_v37, %v14125_v22  ;;  %v14539_v44 = vadd.f32 %v14532_v0, %v14525_v30 }
0x172c   : > { %v19563_v1 = vpop.f32.mrf.mxu0 }
0x172d   : > { %v14526_v24 = vadd.f32 %v14524_v29, %v14441_v40 }
0x172f   : > { %v14540_v2 = vadd.f32 %v14537_v21, %v14526_v24 }
0x1731   : > { %v14542_v20 = vpack.c.bf16 %v14540_v2, %v14539_v44 }
0x1733   : > { %19579 = vmatmul.mubr.msk.bf16.vlgmr.msra.gmra.mxu0 %vm14543_vm10, %v14542_v20  ;;  %19591 = vmatmul.mubr.msk.bf16.vlgmr.msra.gmra.mxu1 %vm14543_vm10, %v14542_v20 }
0x1734   : > { %19583 = vmatpush3.bf16.msra.mxu0 %v14594_v39  ;;  %19584 = vmatprep.mubr.msk.bf16.mxu0 %vm20740_vm4, %v25663_v38 }
0x1735   : > { %19594 = vmatprep.subr.bf16.mxu0 %v25663_v38 }
0x173b   : > { %19585 = vmatmul.mubr.msk.bf16.vlgmr.msra.gmra.mxu0 %vm14543_vm10, %v14542_v20 }
0x173c   : > { %19595 = vmatpush3.bf16.msra.mxu0 %v14690_v51  ;;  %19596 = vmatprep.mubr.msk.bf16.mxu0 %vm20740_vm4, %v25663_v38 }
0x1743   : > { %19597 = vmatmul.mubr.msk.bf16.vlgmr.msra.gmra.mxu0 %vm14543_vm10, %v14542_v20 }
0x17f3   : > { %v14584_v13 = vpop.f32.mrf.mxu0  ;;  %v14678_v56 = vpop.f32.mrf.mxu1 }
0x17f5   : > { %v19580_v55 = vpop.f32.mrf.mxu0  ;;  %v19592_v43 = vpop.f32.mrf.mxu1 }
0x17f7   : > { %v14587_v31 = vpop.f32.mrf.mxu0  ;;  %v14681_v25 = vpop.f32.mrf.mxu1 }
0x17f9   : > { %v19581_v61 = vpop.f32.mrf.mxu0  ;;  %v19593_v18 = vpop.f32.mrf.mxu1 }
0x17fb   : > { %v14630_v5 = vpop.f32.mrf.mxu0 }
0x17fc   : > { %v14637_v9 = vmax.f32 %v14584_v13, %v14630_v5 }
0x17fd   : > { %v19586_v28 = vpop.f32.mrf.mxu0 }
0x17fe   : > { %v14685_v6 = vmax.f32 %v14637_v9, %v14678_v56 }
0x17ff   : > { %v14633_v52 = vpop.f32.mrf.mxu0 }
0x1800   : > { %v14638_v53 = vmax.f32 %v14587_v31, %v14633_v52 }
0x1801   : > { %v19587_v42 = vpop.f32.mrf.mxu0 }
0x1802   : > { %v14686_v34 = vmax.f32 %v14638_v53, %v14681_v25 }
0x1803   : > { %v14726_v11 = vpop.f32.mrf.mxu0 }
0x1804   : > { %v14733_v38 = vmax.f32 %v14685_v6, %v14726_v11 }
0x1805   : > { %v19598_v3 = vpop.f32.mrf.mxu0 }
0x1806   : > { %14740 = vrot.lane.b32.xlu1 %v14733_v38, %s20741_s9 }
0x1807   : > { %v14729_v26 = vpop.f32.mrf.mxu0 }
0x1808   : > { %v14734_v8 = vmax.f32 %v14686_v34, %v14729_v26 }
0x1809   : > { %v19599_v63 = vpop.f32.mrf.mxu0 }
0x180a   : > { %14742 = vrot.lane.b32.xlu1 %v14734_v8, %s20741_s9 }
0x1878   : > { %v14741_v15 = vpop.permute.xlu1 %14740 }
0x1879   : > { %14747 = vst.msk [vmem:[%s23118_s0] sm:$0xff] %vm14746_vm11, %v14741_v15 }
0x187c   : > { %v14743_v10 = vpop.permute.xlu1 %14742 }
0x187d   : > { %14748 = vst.msk [vmem:[%s23118_s0 + $0x8] sm:$0xff] %vm14746_vm11, %v14743_v10 }
0x187e PF: > { %s35_s29 = sadd.s32 1, %s20735_s29  }
0x187f   : > { %p32_p4 = scmp.ge.s32.totalorder %s35_s29, 4  }
0x1881   :  { %34 = sbr.rel (!%p32_p4) target bundleno = 11 (0xb), region = 228 }

</bundles_post_ra>
